<compile_context>
chip_gen: v7x
topology: tpu7x:2x2x1
jax: 0.10.0
libtpu: 0.0.40
codegen_flags: <defaults>
</compile_context>

<pallas_src>
import functools

import jax
import jax.numpy as jnp
from jax.experimental import pallas as pl
from jax.experimental.pallas import tpu as pltpu

LANE = 128
SUBLANE = 8


def _round_up(x, m):
    return ((x + m - 1) // m) * m


# ---------------------------------------------------------------------------
# Fused encoder + attention-decoder kernel (single pallas_call, grid=(1,)).
# ---------------------------------------------------------------------------
def seq2seq_attention_kernel(
        enc_emb_ref, dec_emb_ref,
        enc_wih_ref, enc_whh_ref, enc_b_ref,
        dec_wih_x_ref, dec_b_ref,
        att_wk_ref, att_b_ref, att_v_ref,
        h_fused_w_ref, ctx_fused_w_ref,
        p1_b_ref, out_w_ref, out_b_ref,
        enc_out_ref, logits_ref,
        xg_enc_sc, xg_dec_sc, kproj_sc):
    sl, bs, Ep = enc_emb_ref.shape
    dec_sl = dec_emb_ref.shape[0]
    G = 4 * Ep                                   # lane-aligned gate width
    Ap = att_wk_ref.shape[1]
    V = out_w_ref.shape[1]
    f32, bf16 = jnp.float32, jnp.bfloat16

    # cap the unroll once sequences get long (instruction memory / vreg pressure)
    unroll_enc = True if sl <= 16 else 4
    unroll_dec = True if dec_sl <= 16 else 4

    # ===================== encoder (single-layer LSTM) =====================
    # loop-invariant: x @ W_ih for every timestep as ONE MXU matmul (+ folded bias)
    xg_enc_sc[...] = (
        jnp.dot(enc_emb_ref[...].reshape(sl * bs, Ep).astype(bf16), enc_wih_ref[...],
                preferred_element_type=f32).reshape(sl, bs, G)
        + enc_b_ref[...])

    def enc_step(t, carry):
        h, c = carry                             # carried in vregs (no VMEM round trip)
        gates = xg_enc_sc[t] + jnp.dot(h.astype(bf16), enc_whh_ref[...],
                                       preferred_element_type=f32)     # [bs, 4Ep]
        i = jax.nn.sigmoid(gates[:, 0 * Ep:1 * Ep])
        f = jax.nn.sigmoid(gates[:, 1 * Ep:2 * Ep])
        g = jnp.tanh(gates[:, 2 * Ep:3 * Ep])
        o = jax.nn.sigmoid(gates[:, 3 * Ep:4 * Ep])
        c = f * c + i * g
        h = o * jnp.tanh(c)
        enc_out_ref[t] = h                       # resident output block == attention keys
        return h, c

    zst = jnp.zeros((bs, Ep), f32)
    jax.lax.fori_loop(0, sl, enc_step, (zst, zst), unroll=unroll_enc)

    # ===================== decoder loop-invariant hoists =====================
    # embedding half of the decoder LSTM input gates for ALL timesteps (+ folded bias)
    xg_dec_sc[...] = (
        jnp.dot(dec_emb_ref[...].reshape(dec_sl * bs, Ep).astype(bf16), dec_wih_x_ref[...],
                preferred_element_type=f32).reshape(dec_sl, bs, G)
        + dec_b_ref[...])

    # attention key projection (keys @ W_k + b) computed ONCE
    kproj_sc[...] = (
        jnp.dot(enc_out_ref[...].reshape(sl * bs, Ep).astype(bf16), att_wk_ref[...],
                preferred_element_type=f32).reshape(sl, bs, Ap)
        + att_b_ref[...])

    # bias broadcasts hoisted out of the unrolled loop (JAX does not CSE broadcast_in_dim)
    att_v = att_v_ref[...]                                   # [1, Ap] f32 (VPU operand)
    p1_bias = jnp.broadcast_to(p1_b_ref[...], (bs, Ep))
    out_bias = jnp.broadcast_to(out_b_ref[...], (bs, V))

    # ===================== teacher-forced attention decoder =====================
    def dec_step(t, carry):
        # h / ctx are carried as their pre-computed gate images (see fused matmuls
        # below); c is carried directly.  All carries live in vregs.
        c, h_gates, ctx_gates = carry
        gates = xg_dec_sc[t] + h_gates + ctx_gates           # [bs, 4Ep]
        i = jax.nn.sigmoid(gates[:, 0 * Ep:1 * Ep])
        f = jax.nn.sigmoid(gates[:, 1 * Ep:2 * Ep])
        g = jnp.tanh(gates[:, 2 * Ep:3 * Ep])
        o = jax.nn.sigmoid(gates[:, 3 * Ep:4 * Ep])
        c = f * c + i * g
        h = o * jnp.tanh(c)

        # ONE fused MXU matmul for everything consuming h:
        #   next-step recurrent gates | attention query proj | decoder-state proj half
        hmm = jnp.dot(h.astype(bf16), h_fused_w_ref[...], preferred_element_type=f32)
        h_gates_next = hmm[:, :G]
        q_proj = hmm[:, G:G + Ap]
        h_proj = hmm[:, G + Ap:]

        # MLP (Bahdanau) attention: score_s = v . tanh(Wq h + Wk k_s + b); softmax over
        # the source axis.  Score reduction = VPU multiply + cross-lane reduce (no 1-col
        # MXU matmul on the serial chain).
        hid = jnp.tanh(q_proj[None] + kproj_sc[...])                   # [sl, bs, Ap]
        scores = jnp.sum(hid * att_v, axis=-1, keepdims=True)          # [sl, bs, 1]
        m = jnp.max(scores, axis=0, keepdims=True)
        e = jnp.exp(scores - m)
        alpha = e * pl.reciprocal(jnp.sum(e, axis=0, keepdims=True), approx=True)
        ctx = jnp.sum(alpha * enc_out_ref[...], axis=0)                # [bs, Ep]

        # ONE fused MXU matmul for everything consuming ctx:
        #   context proj half | context half of the NEXT step's input gates
        cmm = jnp.dot(ctx.astype(bf16), ctx_fused_w_ref[...], preferred_element_type=f32)
        ctx_proj = cmm[:, :Ep]
        ctx_gates_next = cmm[:, Ep:]

        hidden = h_proj + ctx_proj + p1_bias                           # Linear(2E -> E)
        logits_ref[t] = (jnp.dot(hidden.astype(bf16), out_w_ref[...],
                                 preferred_element_type=f32) + out_bias)
        return c, h_gates_next, ctx_gates_next

    zg = jnp.zeros((bs, G), f32)
    # decoder hidden/context start at zero (matches decoder.reset(bs) in the reference)
    jax.lax.fori_loop(0, dec_sl, dec_step, (zst, zg, zg), unroll=unroll_dec)


def run_seq2seq(enc_emb, dec_emb, p):
    sl, bs, Ep = enc_emb.shape
    dec_sl = dec_emb.shape[0]
    Ap = p["att_wk"].shape[1]
    V = p["out_w"].shape[1]
    full3 = lambda shape: pl.BlockSpec(shape, lambda i: (0, 0, 0))
    full2 = lambda shape: pl.BlockSpec(shape, lambda i: (0, 0))

    return pl.pallas_call(
        seq2seq_attention_kernel,
        out_shape=(jax.ShapeDtypeStruct((sl, bs, Ep), jnp.float32),      # enc outputs / keys
                   jax.ShapeDtypeStruct((dec_sl, bs, V), jnp.float32)),  # decoder logits
        grid_spec=pltpu.PrefetchScalarGridSpec(
            num_scalar_prefetch=0,
            grid=(1,),
            in_specs=[
                full3((sl, bs, Ep)),               # encoder embeddings
                full3((dec_sl, bs, Ep)),           # decoder embeddings
                full2((Ep, 4 * Ep)),               # enc LSTM W_ih
                full2((Ep, 4 * Ep)),               # enc LSTM W_hh
                full2((1, 4 * Ep)),                # enc LSTM bias (b_ih + b_hh folded)
                full2((Ep, 4 * Ep)),               # dec LSTM W_ih (embedding half)
                full2((1, 4 * Ep)),                # dec LSTM bias
                full2((Ep, Ap)),                   # attn W_k
                full2((1, Ap)),                    # attn bias
                full2((1, Ap)),                    # attn score vector v (VPU operand)
                full2((Ep, 4 * Ep + Ap + Ep)),     # fused [W_hh | W_q | W_proj_h]
                full2((Ep, Ep + 4 * Ep)),          # fused [W_proj_c | W_ih_ctx]
                full2((1, Ep)),                    # projection bias
                full2((Ep, V)),                    # tied output weight
                full2((1, V)),                     # output bias
            ],
            out_specs=(full3((sl, bs, Ep)), full3((dec_sl, bs, V))),
            scratch_shapes=[
                pltpu.VMEM((sl, bs, 4 * Ep), jnp.float32),      # hoisted encoder x-gates
                pltpu.VMEM((dec_sl, bs, 4 * Ep), jnp.float32),  # hoisted decoder x-gates
                pltpu.VMEM((sl, bs, Ap), jnp.float32),          # hoisted key projection
            ],
        ),
        compiler_params=pltpu.CompilerParams(
            dimension_semantics=("arbitrary",),
            vmem_limit_bytes=32 * 1024 * 1024),
    )(enc_emb, dec_emb,
      p["enc_wih"], p["enc_whh"], p["enc_b"],
      p["dec_wih_x"], p["dec_b"],
      p["att_wk"], p["att_b"], p["att_v"],
      p["h_fused_w"], p["ctx_fused_w"],
      p["p1_b"], p["out_w"], p["out_b"])


# ---------------------------------------------------------------------------
# Parameter construction (lane-padded, gate-aligned, matmuls fused at init).
# ---------------------------------------------------------------------------
def init_params(key, ntoken, emb_sz, att_nhid):
    E, A, V = emb_sz, att_nhid, ntoken
    Ep = _round_up(E, LANE)
    Ap = _round_up(A, LANE)
    ks = jax.random.split(key, 16)
    u = lambda k, shape: jax.random.uniform(k, shape, jnp.float32, -0.1, 0.1)
    bf = lambda x: x.astype(jnp.bfloat16)

    def pad2(w, rows, cols):
        return jnp.pad(w, ((0, rows - w.shape[0]), (0, cols - w.shape[1])))

    def pad_gate_w(w):      # [e_in, 4E] -> [Ep, 4Ep], each gate block aligned at g*Ep
        out = jnp.zeros((Ep, 4 * Ep), jnp.float32)
        for g in range(4):
            out = out.at[:w.shape[0], g * Ep:g * Ep + E].set(w[:, g * E:(g + 1) * E])
        return out

    def pad_gate_b(b):      # [1, 4E] -> [1, 4Ep]
        out = jnp.zeros((1, 4 * Ep), jnp.float32)
        for g in range(4):
            out = out.at[:, g * Ep:g * Ep + E].set(b[:, g * E:(g + 1) * E])
        return out

    # raw (logical-size) weights; gate order i, f, g, o
    emb_enc = u(ks[0], (V, E))
    emb_dec = u(ks[1], (V, E))
    enc_wih = u(ks[2], (E, 4 * E))
    enc_whh = u(ks[3], (E, 4 * E))
    enc_b = u(ks[4], (1, 4 * E))
    dec_wih_x = u(ks[5], (E, 4 * E))    # W_ih half for the embedded token
    dec_wih_c = u(ks[6], (E, 4 * E))    # W_ih half for the previous attention context
    dec_whh = u(ks[7], (E, 4 * E))
    dec_b = u(ks[8], (1, 4 * E))
    att_wq = u(ks[9], (E, A))
    att_wk = u(ks[10], (E, A))
    att_v = u(ks[11], (A, 1))
    p1_wh = u(ks[12], (E, E))           # decoder-state half of Linear(2E -> E)
    p1_wc = u(ks[13], (E, E))           # context half

    # lane-padded pieces used in the fused matmul weights
    dec_whh_p = pad_gate_w(dec_whh)
    dec_wih_c_p = pad_gate_w(dec_wih_c)
    att_wq_p = pad2(att_wq, Ep, Ap)
    p1_wh_p = pad2(p1_wh, Ep, Ep)
    p1_wc_p = pad2(p1_wc, Ep, Ep)

    return dict(
        # embedding tables (f32 lookups in the wrapper), lane-padded to Ep
        emb_enc=pad2(emb_enc, V, Ep),
        emb_dec=pad2(emb_dec, V, Ep),
        # encoder LSTM
        enc_wih=bf(pad_gate_w(enc_wih)),
        enc_whh=bf(pad_gate_w(enc_whh)),
        enc_b=pad_gate_b(enc_b),
        # decoder LSTM: embedding half of W_ih (hoisted per-sequence matmul) + bias
        dec_wih_x=bf(pad_gate_w(dec_wih_x)),
        dec_b=pad_gate_b(dec_b),
        # MLP (Bahdanau) attention
        att_wk=bf(pad2(att_wk, Ep, Ap)),
        att_b=jnp.zeros((1, Ap), jnp.float32),
        att_v=pad2(att_v.T, 1, Ap),                       # [1, Ap] f32, VPU operand
        # fused same-operand matmul weights (built ONCE at init):
        #   h   @ [W_hh | W_q | W_proj_h]        (one MXU push per step for h)
        #   ctx @ [W_proj_c | W_ih_ctx]          (one MXU push per step for ctx)
        h_fused_w=bf(jnp.concatenate([dec_whh_p, att_wq_p, p1_wh_p], axis=1)),
        ctx_fused_w=bf(jnp.concatenate([p1_wc_p, dec_wih_c_p], axis=1)),
        p1_b=jnp.zeros((1, Ep), jnp.float32),
        # tied output weight (tie_decoder=True); built ONCE here, not per forward call
        out_w=bf(pad2(emb_dec.T, Ep, V)),
        out_b=jnp.zeros((1, V), jnp.float32),
    )


# ---------------------------------------------------------------------------
# Full forward (glue in plain JAX).
# ---------------------------------------------------------------------------
def _pad_batch(tokens, bs_pad):
    bs = tokens.shape[1]
    if bs == bs_pad:
        return tokens
    return jnp.pad(tokens, ((0, 0), (0, bs_pad - bs)))


@functools.partial(jax.jit, static_argnames=("emb_sz",))
def seq2seq_attention_forward(enc_tokens, dec_tokens, params, *, emb_sz):
    bs = enc_tokens.shape[1]
    bs_pad = _round_up(bs, SUBLANE)      # pad batch to an f32 sublane multiple
    enc_tok = _pad_batch(enc_tokens, bs_pad)
    dec_tok = _pad_batch(dec_tokens, bs_pad)

    # DropoutEmbeddings / WeightDrop / Dropout are identity in eval mode.
    enc_emb = params["emb_enc"][enc_tok]                    # [sl, bs_pad, Ep]
    dec_emb = params["emb_dec"][dec_tok]                    # [dec_sl, bs_pad, Ep]

    enc_out_pad, logits_pad = run_seq2seq(enc_emb, dec_emb, params)

    enc_out = enc_out_pad[:, :bs, :emb_sz]
    logits = logits_pad[:, :bs]
    predictions = logits[:dec_tokens.shape[0]]              # outputs_dec[:decoder_inputs.size(0)]
    return predictions, (enc_out, logits)


if __name__ == "__main__":
    NTOKEN = 128     # ntoken (shared encoder/decoder vocab)
    EMB_SZ = 32      # emb_sz == nhid (nlayers == 1)
    ATT_NHID = 16
    SRC_LEN, TGT_LEN, BS = 8, 8, 2

    key = jax.random.PRNGKey(0)
    k_par, k_enc, k_dec = jax.random.split(key, 3)
    params = init_params(k_par, NTOKEN, EMB_SZ, ATT_NHID)

    encoder_inputs = jax.random.randint(k_enc, (SRC_LEN, BS), 0, NTOKEN, jnp.int32)
    decoder_inputs = jax.random.randint(k_dec, (TGT_LEN, BS), 0, NTOKEN, jnp.int32)

    predictions, (enc_out, dec_logits) = seq2seq_attention_forward(
        encoder_inputs, decoder_inputs, params, emb_sz=EMB_SZ)
    jax.block_until_ready(predictions)

    assert predictions.shape == (TGT_LEN, BS, NTOKEN)
    assert enc_out.shape == (SRC_LEN, BS, EMB_SZ)
    assert dec_logits.shape == (TGT_LEN, BS, NTOKEN)
    assert bool(jnp.all(jnp.isfinite(predictions)))
    print("KERNEL_OK")
</pallas_src>

<mosaic_0001>
module attributes {stable_mosaic.version = 11 : i64} {
  func.func @seq2seq_attention_kernel(%arg0: i32, %arg1: memref<8x8x128xf32, #tpu.memory_space<vmem>>, %arg2: memref<8x8x128xf32, #tpu.memory_space<vmem>>, %arg3: memref<128x512xbf16, #tpu.memory_space<vmem>>, %arg4: memref<128x512xbf16, #tpu.memory_space<vmem>>, %arg5: memref<1x512xf32, #tpu.memory_space<vmem>>, %arg6: memref<128x512xbf16, #tpu.memory_space<vmem>>, %arg7: memref<1x512xf32, #tpu.memory_space<vmem>>, %arg8: memref<128x128xbf16, #tpu.memory_space<vmem>>, %arg9: memref<1x128xf32, #tpu.memory_space<vmem>>, %arg10: memref<1x128xf32, #tpu.memory_space<vmem>>, %arg11: memref<128x768xbf16, #tpu.memory_space<vmem>>, %arg12: memref<128x640xbf16, #tpu.memory_space<vmem>>, %arg13: memref<1x128xf32, #tpu.memory_space<vmem>>, %arg14: memref<128x128xbf16, #tpu.memory_space<vmem>>, %arg15: memref<1x128xf32, #tpu.memory_space<vmem>>, %arg16: memref<8x8x128xf32, #tpu.memory_space<vmem>>, %arg17: memref<8x8x128xf32, #tpu.memory_space<vmem>>, %arg18: memref<8x8x512xf32, #tpu.memory_space<vmem>>, %arg19: memref<8x8x512xf32, #tpu.memory_space<vmem>>, %arg20: memref<8x8x128xf32, #tpu.memory_space<vmem>>) attributes {dimension_semantics = [#tpu.dimension_semantics<arbitrary>], iteration_bounds = array<i64: 1>, scalar_prefetch = 0 : i64, scratch_operands = 3 : i64, tpu.core_type = #tpu.core_type<tc>, window_params = [{pipeline_mode = #tpu.pipeline_mode<synchronous>, transform_indices = @transform_0, window_bounds = array<i64: 8, 8, 128>}, {pipeline_mode = #tpu.pipeline_mode<synchronous>, transform_indices = @transform_1, window_bounds = array<i64: 8, 8, 128>}, {pipeline_mode = #tpu.pipeline_mode<synchronous>, transform_indices = @transform_2, window_bounds = array<i64: 128, 512>}, {pipeline_mode = #tpu.pipeline_mode<synchronous>, transform_indices = @transform_3, window_bounds = array<i64: 128, 512>}, {pipeline_mode = #tpu.pipeline_mode<synchronous>, transform_indices = @transform_4, window_bounds = array<i64: 1, 512>}, {pipeline_mode = #tpu.pipeline_mode<synchronous>, transform_indices = @transform_5, window_bounds = array<i64: 128, 512>}, {pipeline_mode = #tpu.pipeline_mode<synchronous>, transform_indices = @transform_6, window_bounds = array<i64: 1, 512>}, {pipeline_mode = #tpu.pipeline_mode<synchronous>, transform_indices = @transform_7, window_bounds = array<i64: 128, 128>}, {pipeline_mode = #tpu.pipeline_mode<synchronous>, transform_indices = @transform_8, window_bounds = array<i64: 1, 128>}, {pipeline_mode = #tpu.pipeline_mode<synchronous>, transform_indices = @transform_9, window_bounds = array<i64: 1, 128>}, {pipeline_mode = #tpu.pipeline_mode<synchronous>, transform_indices = @transform_10, window_bounds = array<i64: 128, 768>}, {pipeline_mode = #tpu.pipeline_mode<synchronous>, transform_indices = @transform_11, window_bounds = array<i64: 128, 640>}, {pipeline_mode = #tpu.pipeline_mode<synchronous>, transform_indices = @transform_12, window_bounds = array<i64: 1, 128>}, {pipeline_mode = #tpu.pipeline_mode<synchronous>, transform_indices = @transform_13, window_bounds = array<i64: 128, 128>}, {pipeline_mode = #tpu.pipeline_mode<synchronous>, transform_indices = @transform_14, window_bounds = array<i64: 1, 128>}, {pipeline_mode = #tpu.pipeline_mode<synchronous>, transform_indices = @transform_15, window_bounds = array<i64: 8, 8, 128>}, {pipeline_mode = #tpu.pipeline_mode<synchronous>, transform_indices = @transform_16, window_bounds = array<i64: 8, 8, 128>}]} {
    %c0 = arith.constant 0 : index
    %c0_0 = arith.constant 0 : index
    %c0_1 = arith.constant 0 : index
    %0 = vector.load %arg1[%c0, %c0_0, %c0_1] : memref<8x8x128xf32, #tpu.memory_space<vmem>>, vector<8x8x128xf32>
    %1 = vector.shape_cast %0 : vector<8x8x128xf32> to vector<64x128xf32>
    %2 = arith.truncf %1 : vector<64x128xf32> to vector<64x128xbf16>
    %c0_2 = arith.constant 0 : index
    %c0_3 = arith.constant 0 : index
    %3 = vector.load %arg3[%c0_2, %c0_3] : memref<128x512xbf16, #tpu.memory_space<vmem>>, vector<128x512xbf16>
    %cst = arith.constant dense<0.000000e+00> : vector<64x512xf32>
    %4 = tpu.matmul %2, %3, %cst {dimension_numbers = #tpu.dot_dimension_numbers<[1], [0], [0], [1], [0, 0, 1, 1], [], []>} : vector<64x128xbf16>, vector<128x512xbf16>, vector<64x512xf32> -> vector<64x512xf32>
    %5 = vector.shape_cast %4 : vector<64x512xf32> to vector<8x8x512xf32>
    %c0_4 = arith.constant 0 : index
    %c0_5 = arith.constant 0 : index
    %6 = vector.load %arg5[%c0_4, %c0_5] : memref<1x512xf32, #tpu.memory_space<vmem>>, vector<1x512xf32>
    %7 = vector.shape_cast %6 : vector<1x512xf32> to vector<1x1x512xf32>
    %8 = vector.broadcast %7 : vector<1x1x512xf32> to vector<8x8x512xf32>
    %9 = arith.addf %5, %8 : vector<8x8x512xf32>
    %c0_6 = arith.constant 0 : index
    %c0_7 = arith.constant 0 : index
    %c0_8 = arith.constant 0 : index
    %10 = vector.load %arg18[%c0_6, %c0_7, %c0_8] : memref<8x8x512xf32, #tpu.memory_space<vmem>>, vector<8x8x512xf32>
    tpu.vector_store %arg18[%c0_6, %c0_7, %c0_8], %9 {strides = array<i32>} : memref<8x8x512xf32, #tpu.memory_space<vmem>>, vector<8x8x512xf32>,
    %cst_9 = arith.constant 0.000000e+00 : f32
    %11 = vector.broadcast %cst_9 : f32 to vector<8x128xf32>
    %c0_i32 = arith.constant 0 : i32
    %12 = arith.index_cast %c0_i32 : i32 to index
    %c0_10 = arith.constant 0 : index
    %c0_11 = arith.constant 0 : index
    %13 = vector.load %arg18[%12, %c0_10, %c0_11] : memref<8x8x512xf32, #tpu.memory_space<vmem>>, vector<1x8x512xf32>
    %14 = vector.shape_cast %13 : vector<1x8x512xf32> to vector<8x512xf32>
    %15 = arith.truncf %11 : vector<8x128xf32> to vector<8x128xbf16>
    %c0_12 = arith.constant 0 : index
    %c0_13 = arith.constant 0 : index
    %16 = vector.load %arg4[%c0_12, %c0_13] : memref<128x512xbf16, #tpu.memory_space<vmem>>, vector<128x512xbf16>
    %cst_14 = arith.constant dense<0.000000e+00> : vector<8x512xf32>
    %17 = tpu.matmul %15, %16, %cst_14 {dimension_numbers = #tpu.dot_dimension_numbers<[1], [0], [0], [1], [0, 0, 1, 1], [], []>} : vector<8x128xbf16>, vector<128x512xbf16>, vector<8x512xf32> -> vector<8x512xf32>
    %18 = arith.addf %14, %17 : vector<8x512xf32>
    %19 = vector.extract_strided_slice %18 {offsets = [0, 0], sizes = [8, 128], strides = [1, 1]} : vector<8x512xf32> to vector<8x128xf32>
    %20 = arith.negf %19 : vector<8x128xf32>
    %21 = math.exp %20 : vector<8x128xf32>
    %cst_15 = arith.constant 1.000000e+00 : f32
    %22 = vector.broadcast %cst_15 : f32 to vector<8x128xf32>
    %23 = arith.addf %22, %21 : vector<8x128xf32>
    %24 = arith.divf %22, %23 : vector<8x128xf32>
    %25 = vector.extract_strided_slice %18 {offsets = [0, 128], sizes = [8, 128], strides = [1, 1]} : vector<8x512xf32> to vector<8x128xf32>
    %26 = arith.negf %25 : vector<8x128xf32>
    %27 = math.exp %26 : vector<8x128xf32>
    %cst_16 = arith.constant 1.000000e+00 : f32
    %28 = vector.broadcast %cst_16 : f32 to vector<8x128xf32>
    %29 = arith.addf %28, %27 : vector<8x128xf32>
    %30 = arith.divf %28, %29 : vector<8x128xf32>
    %31 = vector.extract_strided_slice %18 {offsets = [0, 256], sizes = [8, 128], strides = [1, 1]} : vector<8x512xf32> to vector<8x128xf32>
    %32 = math.tanh %31 : vector<8x128xf32>
    %33 = vector.extract_strided_slice %18 {offsets = [0, 384], sizes = [8, 128], strides = [1, 1]} : vector<8x512xf32> to vector<8x128xf32>
    %34 = arith.negf %33 : vector<8x128xf32>
    %35 = math.exp %34 : vector<8x128xf32>
    %cst_17 = arith.constant 1.000000e+00 : f32
    %36 = vector.broadcast %cst_17 : f32 to vector<8x128xf32>
    %37 = arith.addf %36, %35 : vector<8x128xf32>
    %38 = arith.divf %36, %37 : vector<8x128xf32>
    %39 = arith.mulf %30, %11 : vector<8x128xf32>
    %40 = arith.mulf %24, %32 : vector<8x128xf32>
    %41 = arith.addf %39, %40 : vector<8x128xf32>
    %42 = math.tanh %41 : vector<8x128xf32>
    %43 = arith.mulf %38, %42 : vector<8x128xf32>
    %44 = arith.index_cast %c0_i32 : i32 to index
    %c0_18 = arith.constant 0 : index
    %c0_19 = arith.constant 0 : index
    %45 = vector.load %arg16[%44, %c0_18, %c0_19] : memref<8x8x128xf32, #tpu.memory_space<vmem>>, vector<1x8x128xf32>
    %46 = vector.shape_cast %45 : vector<1x8x128xf32> to vector<8x128xf32>
    %47 = vector.shape_cast %43 : vector<8x128xf32> to vector<1x8x128xf32>
    tpu.vector_store %arg16[%44, %c0_18, %c0_19], %47 {strides = array<i32>} : memref<8x8x128xf32, #tpu.memory_space<vmem>>, vector<1x8x128xf32>,
    %c1_i32 = arith.constant 1 : i32
    %48 = arith.index_cast %c1_i32 : i32 to index
    %c0_20 = arith.constant 0 : index
    %c0_21 = arith.constant 0 : index
    %49 = vector.load %arg18[%48, %c0_20, %c0_21] : memref<8x8x512xf32, #tpu.memory_space<vmem>>, vector<1x8x512xf32>
    %50 = vector.shape_cast %49 : vector<1x8x512xf32> to vector<8x512xf32>
    %51 = arith.truncf %43 : vector<8x128xf32> to vector<8x128xbf16>
    %c0_22 = arith.constant 0 : index
    %c0_23 = arith.constant 0 : index
    %52 = vector.load %arg4[%c0_22, %c0_23] : memref<128x512xbf16, #tpu.memory_space<vmem>>, vector<128x512xbf16>
    %cst_24 = arith.constant dense<0.000000e+00> : vector<8x512xf32>
    %53 = tpu.matmul %51, %52, %cst_24 {dimension_numbers = #tpu.dot_dimension_numbers<[1], [0], [0], [1], [0, 0, 1, 1], [], []>} : vector<8x128xbf16>, vector<128x512xbf16>, vector<8x512xf32> -> vector<8x512xf32>
    %54 = arith.addf %50, %53 : vector<8x512xf32>
    %55 = vector.extract_strided_slice %54 {offsets = [0, 0], sizes = [8, 128], strides = [1, 1]} : vector<8x512xf32> to vector<8x128xf32>
    %56 = arith.negf %55 : vector<8x128xf32>
    %57 = math.exp %56 : vector<8x128xf32>
    %cst_25 = arith.constant 1.000000e+00 : f32
    %58 = vector.broadcast %cst_25 : f32 to vector<8x128xf32>
    %59 = arith.addf %58, %57 : vector<8x128xf32>
    %60 = arith.divf %58, %59 : vector<8x128xf32>
    %61 = vector.extract_strided_slice %54 {offsets = [0, 128], sizes = [8, 128], strides = [1, 1]} : vector<8x512xf32> to vector<8x128xf32>
    %62 = arith.negf %61 : vector<8x128xf32>
    %63 = math.exp %62 : vector<8x128xf32>
    %cst_26 = arith.constant 1.000000e+00 : f32
    %64 = vector.broadcast %cst_26 : f32 to vector<8x128xf32>
    %65 = arith.addf %64, %63 : vector<8x128xf32>
    %66 = arith.divf %64, %65 : vector<8x128xf32>
    %67 = vector.extract_strided_slice %54 {offsets = [0, 256], sizes = [8, 128], strides = [1, 1]} : vector<8x512xf32> to vector<8x128xf32>
    %68 = math.tanh %67 : vector<8x128xf32>
    %69 = vector.extract_strided_slice %54 {offsets = [0, 384], sizes = [8, 128], strides = [1, 1]} : vector<8x512xf32> to vector<8x128xf32>
    %70 = arith.negf %69 : vector<8x128xf32>
    %71 = math.exp %70 : vector<8x128xf32>
    %cst_27 = arith.constant 1.000000e+00 : f32
    %72 = vector.broadcast %cst_27 : f32 to vector<8x128xf32>
    %73 = arith.addf %72, %71 : vector<8x128xf32>
    %74 = arith.divf %72, %73 : vector<8x128xf32>
    %75 = arith.mulf %66, %41 : vector<8x128xf32>
    %76 = arith.mulf %60, %68 : vector<8x128xf32>
    %77 = arith.addf %75, %76 : vector<8x128xf32>
    %78 = math.tanh %77 : vector<8x128xf32>
    %79 = arith.mulf %74, %78 : vector<8x128xf32>
    %80 = arith.index_cast %c1_i32 : i32 to index
    %c0_28 = arith.constant 0 : index
    %c0_29 = arith.constant 0 : index
    %81 = vector.load %arg16[%80, %c0_28, %c0_29] : memref<8x8x128xf32, #tpu.memory_space<vmem>>, vector<1x8x128xf32>
    %82 = vector.shape_cast %81 : vector<1x8x128xf32> to vector<8x128xf32>
    %83 = vector.shape_cast %79 : vector<8x128xf32> to vector<1x8x128xf32>
    tpu.vector_store %arg16[%80, %c0_28, %c0_29], %83 {strides = array<i32>} : memref<8x8x128xf32, #tpu.memory_space<vmem>>, vector<1x8x128xf32>,
    %c2_i32 = arith.constant 2 : i32
    %84 = arith.index_cast %c2_i32 : i32 to index
    %c0_30 = arith.constant 0 : index
    %c0_31 = arith.constant 0 : index
    %85 = vector.load %arg18[%84, %c0_30, %c0_31] : memref<8x8x512xf32, #tpu.memory_space<vmem>>, vector<1x8x512xf32>
    %86 = vector.shape_cast %85 : vector<1x8x512xf32> to vector<8x512xf32>
    %87 = arith.truncf %79 : vector<8x128xf32> to vector<8x128xbf16>
    %c0_32 = arith.constant 0 : index
    %c0_33 = arith.constant 0 : index
    %88 = vector.load %arg4[%c0_32, %c0_33] : memref<128x512xbf16, #tpu.memory_space<vmem>>, vector<128x512xbf16>
    %cst_34 = arith.constant dense<0.000000e+00> : vector<8x512xf32>
    %89 = tpu.matmul %87, %88, %cst_34 {dimension_numbers = #tpu.dot_dimension_numbers<[1], [0], [0], [1], [0, 0, 1, 1], [], []>} : vector<8x128xbf16>, vector<128x512xbf16>, vector<8x512xf32> -> vector<8x512xf32>
    %90 = arith.addf %86, %89 : vector<8x512xf32>
    %91 = vector.extract_strided_slice %90 {offsets = [0, 0], sizes = [8, 128], strides = [1, 1]} : vector<8x512xf32> to vector<8x128xf32>
    %92 = arith.negf %91 : vector<8x128xf32>
    %93 = math.exp %92 : vector<8x128xf32>
    %cst_35 = arith.constant 1.000000e+00 : f32
    %94 = vector.broadcast %cst_35 : f32 to vector<8x128xf32>
    %95 = arith.addf %94, %93 : vector<8x128xf32>
    %96 = arith.divf %94, %95 : vector<8x128xf32>
    %97 = vector.extract_strided_slice %90 {offsets = [0, 128], sizes = [8, 128], strides = [1, 1]} : vector<8x512xf32> to vector<8x128xf32>
    %98 = arith.negf %97 : vector<8x128xf32>
    %99 = math.exp %98 : vector<8x128xf32>
    %cst_36 = arith.constant 1.000000e+00 : f32
    %100 = vector.broadcast %cst_36 : f32 to vector<8x128xf32>
    %101 = arith.addf %100, %99 : vector<8x128xf32>
    %102 = arith.divf %100, %101 : vector<8x128xf32>
    %103 = vector.extract_strided_slice %90 {offsets = [0, 256], sizes = [8, 128], strides = [1, 1]} : vector<8x512xf32> to vector<8x128xf32>
    %104 = math.tanh %103 : vector<8x128xf32>
    %105 = vector.extract_strided_slice %90 {offsets = [0, 384], sizes = [8, 128], strides = [1, 1]} : vector<8x512xf32> to vector<8x128xf32>
    %106 = arith.negf %105 : vector<8x128xf32>
    %107 = math.exp %106 : vector<8x128xf32>
    %cst_37 = arith.constant 1.000000e+00 : f32
    %108 = vector.broadcast %cst_37 : f32 to vector<8x128xf32>
    %109 = arith.addf %108, %107 : vector<8x128xf32>
    %110 = arith.divf %108, %109 : vector<8x128xf32>
    %111 = arith.mulf %102, %77 : vector<8x128xf32>
    %112 = arith.mulf %96, %104 : vector<8x128xf32>
    %113 = arith.addf %111, %112 : vector<8x128xf32>
    %114 = math.tanh %113 : vector<8x128xf32>
    %115 = arith.mulf %110, %114 : vector<8x128xf32>
    %116 = arith.index_cast %c2_i32 : i32 to index
    %c0_38 = arith.constant 0 : index
    %c0_39 = arith.constant 0 : index
    %117 = vector.load %arg16[%116, %c0_38, %c0_39] : memref<8x8x128xf32, #tpu.memory_space<vmem>>, vector<1x8x128xf32>
    %118 = vector.shape_cast %117 : vector<1x8x128xf32> to vector<8x128xf32>
    %119 = vector.shape_cast %115 : vector<8x128xf32> to vector<1x8x128xf32>
    tpu.vector_store %arg16[%116, %c0_38, %c0_39], %119 {strides = array<i32>} : memref<8x8x128xf32, #tpu.memory_space<vmem>>, vector<1x8x128xf32>,
    %c3_i32 = arith.constant 3 : i32
    %120 = arith.index_cast %c3_i32 : i32 to index
    %c0_40 = arith.constant 0 : index
    %c0_41 = arith.constant 0 : index
    %121 = vector.load %arg18[%120, %c0_40, %c0_41] : memref<8x8x512xf32, #tpu.memory_space<vmem>>, vector<1x8x512xf32>
    %122 = vector.shape_cast %121 : vector<1x8x512xf32> to vector<8x512xf32>
    %123 = arith.truncf %115 : vector<8x128xf32> to vector<8x128xbf16>
    %c0_42 = arith.constant 0 : index
    %c0_43 = arith.constant 0 : index
    %124 = vector.load %arg4[%c0_42, %c0_43] : memref<128x512xbf16, #tpu.memory_space<vmem>>, vector<128x512xbf16>
    %cst_44 = arith.constant dense<0.000000e+00> : vector<8x512xf32>
    %125 = tpu.matmul %123, %124, %cst_44 {dimension_numbers = #tpu.dot_dimension_numbers<[1], [0], [0], [1], [0, 0, 1, 1], [], []>} : vector<8x128xbf16>, vector<128x512xbf16>, vector<8x512xf32> -> vector<8x512xf32>
    %126 = arith.addf %122, %125 : vector<8x512xf32>
    %127 = vector.extract_strided_slice %126 {offsets = [0, 0], sizes = [8, 128], strides = [1, 1]} : vector<8x512xf32> to vector<8x128xf32>
    %128 = arith.negf %127 : vector<8x128xf32>
    %129 = math.exp %128 : vector<8x128xf32>
    %cst_45 = arith.constant 1.000000e+00 : f32
    %130 = vector.broadcast %cst_45 : f32 to vector<8x128xf32>
    %131 = arith.addf %130, %129 : vector<8x128xf32>
    %132 = arith.divf %130, %131 : vector<8x128xf32>
    %133 = vector.extract_strided_slice %126 {offsets = [0, 128], sizes = [8, 128], strides = [1, 1]} : vector<8x512xf32> to vector<8x128xf32>
    %134 = arith.negf %133 : vector<8x128xf32>
    %135 = math.exp %134 : vector<8x128xf32>
    %cst_46 = arith.constant 1.000000e+00 : f32
    %136 = vector.broadcast %cst_46 : f32 to vector<8x128xf32>
    %137 = arith.addf %136, %135 : vector<8x128xf32>
    %138 = arith.divf %136, %137 : vector<8x128xf32>
    %139 = vector.extract_strided_slice %126 {offsets = [0, 256], sizes = [8, 128], strides = [1, 1]} : vector<8x512xf32> to vector<8x128xf32>
    %140 = math.tanh %139 : vector<8x128xf32>
    %141 = vector.extract_strided_slice %126 {offsets = [0, 384], sizes = [8, 128], strides = [1, 1]} : vector<8x512xf32> to vector<8x128xf32>
    %142 = arith.negf %141 : vector<8x128xf32>
    %143 = math.exp %142 : vector<8x128xf32>
    %cst_47 = arith.constant 1.000000e+00 : f32
    %144 = vector.broadcast %cst_47 : f32 to vector<8x128xf32>
    %145 = arith.addf %144, %143 : vector<8x128xf32>
    %146 = arith.divf %144, %145 : vector<8x128xf32>
    %147 = arith.mulf %138, %113 : vector<8x128xf32>
    %148 = arith.mulf %132, %140 : vector<8x128xf32>
    %149 = arith.addf %147, %148 : vector<8x128xf32>
    %150 = math.tanh %149 : vector<8x128xf32>
    %151 = arith.mulf %146, %150 : vector<8x128xf32>
    %152 = arith.index_cast %c3_i32 : i32 to index
    %c0_48 = arith.constant 0 : index
    %c0_49 = arith.constant 0 : index
    %153 = vector.load %arg16[%152, %c0_48, %c0_49] : memref<8x8x128xf32, #tpu.memory_space<vmem>>, vector<1x8x128xf32>
    %154 = vector.shape_cast %153 : vector<1x8x128xf32> to vector<8x128xf32>
    %155 = vector.shape_cast %151 : vector<8x128xf32> to vector<1x8x128xf32>
    tpu.vector_store %arg16[%152, %c0_48, %c0_49], %155 {strides = array<i32>} : memref<8x8x128xf32, #tpu.memory_space<vmem>>, vector<1x8x128xf32>,
    %c4_i32 = arith.constant 4 : i32
    %156 = arith.index_cast %c4_i32 : i32 to index
    %c0_50 = arith.constant 0 : index
    %c0_51 = arith.constant 0 : index
    %157 = vector.load %arg18[%156, %c0_50, %c0_51] : memref<8x8x512xf32, #tpu.memory_space<vmem>>, vector<1x8x512xf32>
    %158 = vector.shape_cast %157 : vector<1x8x512xf32> to vector<8x512xf32>
    %159 = arith.truncf %151 : vector<8x128xf32> to vector<8x128xbf16>
    %c0_52 = arith.constant 0 : index
    %c0_53 = arith.constant 0 : index
    %160 = vector.load %arg4[%c0_52, %c0_53] : memref<128x512xbf16, #tpu.memory_space<vmem>>, vector<128x512xbf16>
    %cst_54 = arith.constant dense<0.000000e+00> : vector<8x512xf32>
    %161 = tpu.matmul %159, %160, %cst_54 {dimension_numbers = #tpu.dot_dimension_numbers<[1], [0], [0], [1], [0, 0, 1, 1], [], []>} : vector<8x128xbf16>, vector<128x512xbf16>, vector<8x512xf32> -> vector<8x512xf32>
    %162 = arith.addf %158, %161 : vector<8x512xf32>
    %163 = vector.extract_strided_slice %162 {offsets = [0, 0], sizes = [8, 128], strides = [1, 1]} : vector<8x512xf32> to vector<8x128xf32>
    %164 = arith.negf %163 : vector<8x128xf32>
    %165 = math.exp %164 : vector<8x128xf32>
    %cst_55 = arith.constant 1.000000e+00 : f32
    %166 = vector.broadcast %cst_55 : f32 to vector<8x128xf32>
    %167 = arith.addf %166, %165 : vector<8x128xf32>
    %168 = arith.divf %166, %167 : vector<8x128xf32>
    %169 = vector.extract_strided_slice %162 {offsets = [0, 128], sizes = [8, 128], strides = [1, 1]} : vector<8x512xf32> to vector<8x128xf32>
    %170 = arith.negf %169 : vector<8x128xf32>
    %171 = math.exp %170 : vector<8x128xf32>
    %cst_56 = arith.constant 1.000000e+00 : f32
    %172 = vector.broadcast %cst_56 : f32 to vector<8x128xf32>
    %173 = arith.addf %172, %171 : vector<8x128xf32>
    %174 = arith.divf %172, %173 : vector<8x128xf32>
    %175 = vector.extract_strided_slice %162 {offsets = [0, 256], sizes = [8, 128], strides = [1, 1]} : vector<8x512xf32> to vector<8x128xf32>
    %176 = math.tanh %175 : vector<8x128xf32>
    %177 = vector.extract_strided_slice %162 {offsets = [0, 384], sizes = [8, 128], strides = [1, 1]} : vector<8x512xf32> to vector<8x128xf32>
    %178 = arith.negf %177 : vector<8x128xf32>
    %179 = math.exp %178 : vector<8x128xf32>
    %cst_57 = arith.constant 1.000000e+00 : f32
    %180 = vector.broadcast %cst_57 : f32 to vector<8x128xf32>
    %181 = arith.addf %180, %179 : vector<8x128xf32>
    %182 = arith.divf %180, %181 : vector<8x128xf32>
    %183 = arith.mulf %174, %149 : vector<8x128xf32>
    %184 = arith.mulf %168, %176 : vector<8x128xf32>
    %185 = arith.addf %183, %184 : vector<8x128xf32>
    %186 = math.tanh %185 : vector<8x128xf32>
    %187 = arith.mulf %182, %186 : vector<8x128xf32>
    %188 = arith.index_cast %c4_i32 : i32 to index
    %c0_58 = arith.constant 0 : index
    %c0_59 = arith.constant 0 : index
    %189 = vector.load %arg16[%188, %c0_58, %c0_59] : memref<8x8x128xf32, #tpu.memory_space<vmem>>, vector<1x8x128xf32>
    %190 = vector.shape_cast %189 : vector<1x8x128xf32> to vector<8x128xf32>
    %191 = vector.shape_cast %187 : vector<8x128xf32> to vector<1x8x128xf32>
    tpu.vector_store %arg16[%188, %c0_58, %c0_59], %191 {strides = array<i32>} : memref<8x8x128xf32, #tpu.memory_space<vmem>>, vector<1x8x128xf32>,
    %c5_i32 = arith.constant 5 : i32
    %192 = arith.index_cast %c5_i32 : i32 to index
    %c0_60 = arith.constant 0 : index
    %c0_61 = arith.constant 0 : index
    %193 = vector.load %arg18[%192, %c0_60, %c0_61] : memref<8x8x512xf32, #tpu.memory_space<vmem>>, vector<1x8x512xf32>
    %194 = vector.shape_cast %193 : vector<1x8x512xf32> to vector<8x512xf32>
    %195 = arith.truncf %187 : vector<8x128xf32> to vector<8x128xbf16>
    %c0_62 = arith.constant 0 : index
    %c0_63 = arith.constant 0 : index
    %196 = vector.load %arg4[%c0_62, %c0_63] : memref<128x512xbf16, #tpu.memory_space<vmem>>, vector<128x512xbf16>
    %cst_64 = arith.constant dense<0.000000e+00> : vector<8x512xf32>
    %197 = tpu.matmul %195, %196, %cst_64 {dimension_numbers = #tpu.dot_dimension_numbers<[1], [0], [0], [1], [0, 0, 1, 1], [], []>} : vector<8x128xbf16>, vector<128x512xbf16>, vector<8x512xf32> -> vector<8x512xf32>
    %198 = arith.addf %194, %197 : vector<8x512xf32>
    %199 = vector.extract_strided_slice %198 {offsets = [0, 0], sizes = [8, 128], strides = [1, 1]} : vector<8x512xf32> to vector<8x128xf32>
    %200 = arith.negf %199 : vector<8x128xf32>
    %201 = math.exp %200 : vector<8x128xf32>
    %cst_65 = arith.constant 1.000000e+00 : f32
    %202 = vector.broadcast %cst_65 : f32 to vector<8x128xf32>
    %203 = arith.addf %202, %201 : vector<8x128xf32>
    %204 = arith.divf %202, %203 : vector<8x128xf32>
    %205 = vector.extract_strided_slice %198 {offsets = [0, 128], sizes = [8, 128], strides = [1, 1]} : vector<8x512xf32> to vector<8x128xf32>
    %206 = arith.negf %205 : vector<8x128xf32>
    %207 = math.exp %206 : vector<8x128xf32>
    %cst_66 = arith.constant 1.000000e+00 : f32
    %208 = vector.broadcast %cst_66 : f32 to vector<8x128xf32>
    %209 = arith.addf %208, %207 : vector<8x128xf32>
    %210 = arith.divf %208, %209 : vector<8x128xf32>
    %211 = vector.extract_strided_slice %198 {offsets = [0, 256], sizes = [8, 128], strides = [1, 1]} : vector<8x512xf32> to vector<8x128xf32>
    %212 = math.tanh %211 : vector<8x128xf32>
    %213 = vector.extract_strided_slice %198 {offsets = [0, 384], sizes = [8, 128], strides = [1, 1]} : vector<8x512xf32> to vector<8x128xf32>
    %214 = arith.negf %213 : vector<8x128xf32>
    %215 = math.exp %214 : vector<8x128xf32>
    %cst_67 = arith.constant 1.000000e+00 : f32
    %216 = vector.broadcast %cst_67 : f32 to vector<8x128xf32>
    %217 = arith.addf %216, %215 : vector<8x128xf32>
    %218 = arith.divf %216, %217 : vector<8x128xf32>
    %219 = arith.mulf %210, %185 : vector<8x128xf32>
    %220 = arith.mulf %204, %212 : vector<8x128xf32>
    %221 = arith.addf %219, %220 : vector<8x128xf32>
    %222 = math.tanh %221 : vector<8x128xf32>
    %223 = arith.mulf %218, %222 : vector<8x128xf32>
    %224 = arith.index_cast %c5_i32 : i32 to index
    %c0_68 = arith.constant 0 : index
    %c0_69 = arith.constant 0 : index
    %225 = vector.load %arg16[%224, %c0_68, %c0_69] : memref<8x8x128xf32, #tpu.memory_space<vmem>>, vector<1x8x128xf32>
    %226 = vector.shape_cast %225 : vector<1x8x128xf32> to vector<8x128xf32>
    %227 = vector.shape_cast %223 : vector<8x128xf32> to vector<1x8x128xf32>
    tpu.vector_store %arg16[%224, %c0_68, %c0_69], %227 {strides = array<i32>} : memref<8x8x128xf32, #tpu.memory_space<vmem>>, vector<1x8x128xf32>,
    %c6_i32 = arith.constant 6 : i32
    %228 = arith.index_cast %c6_i32 : i32 to index
    %c0_70 = arith.constant 0 : index
    %c0_71 = arith.constant 0 : index
    %229 = vector.load %arg18[%228, %c0_70, %c0_71] : memref<8x8x512xf32, #tpu.memory_space<vmem>>, vector<1x8x512xf32>
    %230 = vector.shape_cast %229 : vector<1x8x512xf32> to vector<8x512xf32>
    %231 = arith.truncf %223 : vector<8x128xf32> to vector<8x128xbf16>
    %c0_72 = arith.constant 0 : index
    %c0_73 = arith.constant 0 : index
    %232 = vector.load %arg4[%c0_72, %c0_73] : memref<128x512xbf16, #tpu.memory_space<vmem>>, vector<128x512xbf16>
    %cst_74 = arith.constant dense<0.000000e+00> : vector<8x512xf32>
    %233 = tpu.matmul %231, %232, %cst_74 {dimension_numbers = #tpu.dot_dimension_numbers<[1], [0], [0], [1], [0, 0, 1, 1], [], []>} : vector<8x128xbf16>, vector<128x512xbf16>, vector<8x512xf32> -> vector<8x512xf32>
    %234 = arith.addf %230, %233 : vector<8x512xf32>
    %235 = vector.extract_strided_slice %234 {offsets = [0, 0], sizes = [8, 128], strides = [1, 1]} : vector<8x512xf32> to vector<8x128xf32>
    %236 = arith.negf %235 : vector<8x128xf32>
    %237 = math.exp %236 : vector<8x128xf32>
    %cst_75 = arith.constant 1.000000e+00 : f32
    %238 = vector.broadcast %cst_75 : f32 to vector<8x128xf32>
    %239 = arith.addf %238, %237 : vector<8x128xf32>
    %240 = arith.divf %238, %239 : vector<8x128xf32>
    %241 = vector.extract_strided_slice %234 {offsets = [0, 128], sizes = [8, 128], strides = [1, 1]} : vector<8x512xf32> to vector<8x128xf32>
    %242 = arith.negf %241 : vector<8x128xf32>
    %243 = math.exp %242 : vector<8x128xf32>
    %cst_76 = arith.constant 1.000000e+00 : f32
    %244 = vector.broadcast %cst_76 : f32 to vector<8x128xf32>
    %245 = arith.addf %244, %243 : vector<8x128xf32>
    %246 = arith.divf %244, %245 : vector<8x128xf32>
    %247 = vector.extract_strided_slice %234 {offsets = [0, 256], sizes = [8, 128], strides = [1, 1]} : vector<8x512xf32> to vector<8x128xf32>
    %248 = math.tanh %247 : vector<8x128xf32>
    %249 = vector.extract_strided_slice %234 {offsets = [0, 384], sizes = [8, 128], strides = [1, 1]} : vector<8x512xf32> to vector<8x128xf32>
    %250 = arith.negf %249 : vector<8x128xf32>
    %251 = math.exp %250 : vector<8x128xf32>
    %cst_77 = arith.constant 1.000000e+00 : f32
    %252 = vector.broadcast %cst_77 : f32 to vector<8x128xf32>
    %253 = arith.addf %252, %251 : vector<8x128xf32>
    %254 = arith.divf %252, %253 : vector<8x128xf32>
    %255 = arith.mulf %246, %221 : vector<8x128xf32>
    %256 = arith.mulf %240, %248 : vector<8x128xf32>
    %257 = arith.addf %255, %256 : vector<8x128xf32>
    %258 = math.tanh %257 : vector<8x128xf32>
    %259 = arith.mulf %254, %258 : vector<8x128xf32>
    %260 = arith.index_cast %c6_i32 : i32 to index
    %c0_78 = arith.constant 0 : index
    %c0_79 = arith.constant 0 : index
    %261 = vector.load %arg16[%260, %c0_78, %c0_79] : memref<8x8x128xf32, #tpu.memory_space<vmem>>, vector<1x8x128xf32>
    %262 = vector.shape_cast %261 : vector<1x8x128xf32> to vector<8x128xf32>
    %263 = vector.shape_cast %259 : vector<8x128xf32> to vector<1x8x128xf32>
    tpu.vector_store %arg16[%260, %c0_78, %c0_79], %263 {strides = array<i32>} : memref<8x8x128xf32, #tpu.memory_space<vmem>>, vector<1x8x128xf32>,
    %c7_i32 = arith.constant 7 : i32
    %264 = arith.index_cast %c7_i32 : i32 to index
    %c0_80 = arith.constant 0 : index
    %c0_81 = arith.constant 0 : index
    %265 = vector.load %arg18[%264, %c0_80, %c0_81] : memref<8x8x512xf32, #tpu.memory_space<vmem>>, vector<1x8x512xf32>
    %266 = vector.shape_cast %265 : vector<1x8x512xf32> to vector<8x512xf32>
    %267 = arith.truncf %259 : vector<8x128xf32> to vector<8x128xbf16>
    %c0_82 = arith.constant 0 : index
    %c0_83 = arith.constant 0 : index
    %268 = vector.load %arg4[%c0_82, %c0_83] : memref<128x512xbf16, #tpu.memory_space<vmem>>, vector<128x512xbf16>
    %cst_84 = arith.constant dense<0.000000e+00> : vector<8x512xf32>
    %269 = tpu.matmul %267, %268, %cst_84 {dimension_numbers = #tpu.dot_dimension_numbers<[1], [0], [0], [1], [0, 0, 1, 1], [], []>} : vector<8x128xbf16>, vector<128x512xbf16>, vector<8x512xf32> -> vector<8x512xf32>
    %270 = arith.addf %266, %269 : vector<8x512xf32>
    %271 = vector.extract_strided_slice %270 {offsets = [0, 0], sizes = [8, 128], strides = [1, 1]} : vector<8x512xf32> to vector<8x128xf32>
    %272 = arith.negf %271 : vector<8x128xf32>
    %273 = math.exp %272 : vector<8x128xf32>
    %cst_85 = arith.constant 1.000000e+00 : f32
    %274 = vector.broadcast %cst_85 : f32 to vector<8x128xf32>
    %275 = arith.addf %274, %273 : vector<8x128xf32>
    %276 = arith.divf %274, %275 : vector<8x128xf32>
    %277 = vector.extract_strided_slice %270 {offsets = [0, 128], sizes = [8, 128], strides = [1, 1]} : vector<8x512xf32> to vector<8x128xf32>
    %278 = arith.negf %277 : vector<8x128xf32>
    %279 = math.exp %278 : vector<8x128xf32>
    %cst_86 = arith.constant 1.000000e+00 : f32
    %280 = vector.broadcast %cst_86 : f32 to vector<8x128xf32>
    %281 = arith.addf %280, %279 : vector<8x128xf32>
    %282 = arith.divf %280, %281 : vector<8x128xf32>
    %283 = vector.extract_strided_slice %270 {offsets = [0, 256], sizes = [8, 128], strides = [1, 1]} : vector<8x512xf32> to vector<8x128xf32>
    %284 = math.tanh %283 : vector<8x128xf32>
    %285 = vector.extract_strided_slice %270 {offsets = [0, 384], sizes = [8, 128], strides = [1, 1]} : vector<8x512xf32> to vector<8x128xf32>
    %286 = arith.negf %285 : vector<8x128xf32>
    %287 = math.exp %286 : vector<8x128xf32>
    %cst_87 = arith.constant 1.000000e+00 : f32
    %288 = vector.broadcast %cst_87 : f32 to vector<8x128xf32>
    %289 = arith.addf %288, %287 : vector<8x128xf32>
    %290 = arith.divf %288, %289 : vector<8x128xf32>
    %291 = arith.mulf %282, %257 : vector<8x128xf32>
    %292 = arith.mulf %276, %284 : vector<8x128xf32>
    %293 = arith.addf %291, %292 : vector<8x128xf32>
    %294 = math.tanh %293 : vector<8x128xf32>
    %295 = arith.mulf %290, %294 : vector<8x128xf32>
    %296 = arith.index_cast %c7_i32 : i32 to index
    %c0_88 = arith.constant 0 : index
    %c0_89 = arith.constant 0 : index
    %297 = vector.load %arg16[%296, %c0_88, %c0_89] : memref<8x8x128xf32, #tpu.memory_space<vmem>>, vector<1x8x128xf32>
    %298 = vector.shape_cast %297 : vector<1x8x128xf32> to vector<8x128xf32>
    %299 = vector.shape_cast %295 : vector<8x128xf32> to vector<1x8x128xf32>
    tpu.vector_store %arg16[%296, %c0_88, %c0_89], %299 {strides = array<i32>} : memref<8x8x128xf32, #tpu.memory_space<vmem>>, vector<1x8x128xf32>,
    %c8_i32 = arith.constant 8 : i32
    %c0_90 = arith.constant 0 : index
    %c0_91 = arith.constant 0 : index
    %c0_92 = arith.constant 0 : index
    %300 = vector.load %arg2[%c0_90, %c0_91, %c0_92] : memref<8x8x128xf32, #tpu.memory_space<vmem>>, vector<8x8x128xf32>
    %301 = vector.shape_cast %300 : vector<8x8x128xf32> to vector<64x128xf32>
    %302 = arith.truncf %301 : vector<64x128xf32> to vector<64x128xbf16>
    %c0_93 = arith.constant 0 : index
    %c0_94 = arith.constant 0 : index
    %303 = vector.load %arg6[%c0_93, %c0_94] : memref<128x512xbf16, #tpu.memory_space<vmem>>, vector<128x512xbf16>
    %cst_95 = arith.constant dense<0.000000e+00> : vector<64x512xf32>
    %304 = tpu.matmul %302, %303, %cst_95 {dimension_numbers = #tpu.dot_dimension_numbers<[1], [0], [0], [1], [0, 0, 1, 1], [], []>} : vector<64x128xbf16>, vector<128x512xbf16>, vector<64x512xf32> -> vector<64x512xf32>
    %305 = vector.shape_cast %304 : vector<64x512xf32> to vector<8x8x512xf32>
    %c0_96 = arith.constant 0 : index
    %c0_97 = arith.constant 0 : index
    %306 = vector.load %arg7[%c0_96, %c0_97] : memref<1x512xf32, #tpu.memory_space<vmem>>, vector<1x512xf32>
    %307 = vector.shape_cast %306 : vector<1x512xf32> to vector<1x1x512xf32>
    %308 = vector.broadcast %307 : vector<1x1x512xf32> to vector<8x8x512xf32>
    %309 = arith.addf %305, %308 : vector<8x8x512xf32>
    %c0_98 = arith.constant 0 : index
    %c0_99 = arith.constant 0 : index
    %c0_100 = arith.constant 0 : index
    %310 = vector.load %arg19[%c0_98, %c0_99, %c0_100] : memref<8x8x512xf32, #tpu.memory_space<vmem>>, vector<8x8x512xf32>
    tpu.vector_store %arg19[%c0_98, %c0_99, %c0_100], %309 {strides = array<i32>} : memref<8x8x512xf32, #tpu.memory_space<vmem>>, vector<8x8x512xf32>,
    %c0_101 = arith.constant 0 : index
    %c0_102 = arith.constant 0 : index
    %c0_103 = arith.constant 0 : index
    %311 = vector.load %arg16[%c0_101, %c0_102, %c0_103] : memref<8x8x128xf32, #tpu.memory_space<vmem>>, vector<8x8x128xf32>
    %312 = vector.shape_cast %311 : vector<8x8x128xf32> to vector<64x128xf32>
    %313 = arith.truncf %312 : vector<64x128xf32> to vector<64x128xbf16>
    %c0_104 = arith.constant 0 : index
    %c0_105 = arith.constant 0 : index
    %314 = vector.load %arg8[%c0_104, %c0_105] : memref<128x128xbf16, #tpu.memory_space<vmem>>, vector<128x128xbf16>
    %cst_106 = arith.constant dense<0.000000e+00> : vector<64x128xf32>
    %315 = tpu.matmul %313, %314, %cst_106 {dimension_numbers = #tpu.dot_dimension_numbers<[1], [0], [0], [1], [0, 0, 1, 1], [], []>} : vector<64x128xbf16>, vector<128x128xbf16>, vector<64x128xf32> -> vector<64x128xf32>
    %316 = vector.shape_cast %315 : vector<64x128xf32> to vector<8x8x128xf32>
    %c0_107 = arith.constant 0 : index
    %c0_108 = arith.constant 0 : index
    %317 = vector.load %arg9[%c0_107, %c0_108] : memref<1x128xf32, #tpu.memory_space<vmem>>, vector<1x128xf32>
    %318 = vector.shape_cast %317 : vector<1x128xf32> to vector<1x1x128xf32>
    %319 = vector.broadcast %318 : vector<1x1x128xf32> to vector<8x8x128xf32>
    %320 = arith.addf %316, %319 : vector<8x8x128xf32>
    %c0_109 = arith.constant 0 : index
    %c0_110 = arith.constant 0 : index
    %c0_111 = arith.constant 0 : index
    %321 = vector.load %arg20[%c0_109, %c0_110, %c0_111] : memref<8x8x128xf32, #tpu.memory_space<vmem>>, vector<8x8x128xf32>
    tpu.vector_store %arg20[%c0_109, %c0_110, %c0_111], %320 {strides = array<i32>} : memref<8x8x128xf32, #tpu.memory_space<vmem>>, vector<8x8x128xf32>,
    %c0_112 = arith.constant 0 : index
    %c0_113 = arith.constant 0 : index
    %322 = vector.load %arg10[%c0_112, %c0_113] : memref<1x128xf32, #tpu.memory_space<vmem>>, vector<1x128xf32>
    %c0_114 = arith.constant 0 : index
    %c0_115 = arith.constant 0 : index
    %323 = vector.load %arg13[%c0_114, %c0_115] : memref<1x128xf32, #tpu.memory_space<vmem>>, vector<1x128xf32>
    %324 = vector.shape_cast %323 : vector<1x128xf32> to vector<1x128xf32>
    %325 = vector.broadcast %324 : vector<1x128xf32> to vector<8x128xf32>
    %c0_116 = arith.constant 0 : index
    %c0_117 = arith.constant 0 : index
    %326 = vector.load %arg15[%c0_116, %c0_117] : memref<1x128xf32, #tpu.memory_space<vmem>>, vector<1x128xf32>
    %327 = vector.shape_cast %326 : vector<1x128xf32> to vector<1x128xf32>
    %328 = vector.broadcast %327 : vector<1x128xf32> to vector<8x128xf32>
    %cst_118 = arith.constant 0.000000e+00 : f32
    %329 = vector.broadcast %cst_118 : f32 to vector<8x512xf32>
    %c0_i32_119 = arith.constant 0 : i32
    %330 = arith.index_cast %c0_i32_119 : i32 to index
    %c0_120 = arith.constant 0 : index
    %c0_121 = arith.constant 0 : index
    %331 = vector.load %arg19[%330, %c0_120, %c0_121] : memref<8x8x512xf32, #tpu.memory_space<vmem>>, vector<1x8x512xf32>
    %332 = vector.shape_cast %331 : vector<1x8x512xf32> to vector<8x512xf32>
    %333 = arith.addf %332, %329 : vector<8x512xf32>
    %334 = arith.addf %333, %329 : vector<8x512xf32>
    %335 = vector.extract_strided_slice %334 {offsets = [0, 0], sizes = [8, 128], strides = [1, 1]} : vector<8x512xf32> to vector<8x128xf32>
    %336 = arith.negf %335 : vector<8x128xf32>
    %337 = math.exp %336 : vector<8x128xf32>
    %cst_122 = arith.constant 1.000000e+00 : f32
    %338 = vector.broadcast %cst_122 : f32 to vector<8x128xf32>
    %339 = arith.addf %338, %337 : vector<8x128xf32>
    %340 = arith.divf %338, %339 : vector<8x128xf32>
    %341 = vector.extract_strided_slice %334 {offsets = [0, 128], sizes = [8, 128], strides = [1, 1]} : vector<8x512xf32> to vector<8x128xf32>
    %342 = arith.negf %341 : vector<8x128xf32>
    %343 = math.exp %342 : vector<8x128xf32>
    %cst_123 = arith.constant 1.000000e+00 : f32
    %344 = vector.broadcast %cst_123 : f32 to vector<8x128xf32>
    %345 = arith.addf %344, %343 : vector<8x128xf32>
    %346 = arith.divf %344, %345 : vector<8x128xf32>
    %347 = vector.extract_strided_slice %334 {offsets = [0, 256], sizes = [8, 128], strides = [1, 1]} : vector<8x512xf32> to vector<8x128xf32>
    %348 = math.tanh %347 : vector<8x128xf32>
    %349 = vector.extract_strided_slice %334 {offsets = [0, 384], sizes = [8, 128], strides = [1, 1]} : vector<8x512xf32> to vector<8x128xf32>
    %350 = arith.negf %349 : vector<8x128xf32>
    %351 = math.exp %350 : vector<8x128xf32>
    %cst_124 = arith.constant 1.000000e+00 : f32
    %352 = vector.broadcast %cst_124 : f32 to vector<8x128xf32>
    %353 = arith.addf %352, %351 : vector<8x128xf32>
    %354 = arith.divf %352, %353 : vector<8x128xf32>
    %355 = arith.mulf %346, %11 : vector<8x128xf32>
    %356 = arith.mulf %340, %348 : vector<8x128xf32>
    %357 = arith.addf %355, %356 : vector<8x128xf32>
    %358 = math.tanh %357 : vector<8x128xf32>
    %359 = arith.mulf %354, %358 : vector<8x128xf32>
    %360 = arith.truncf %359 : vector<8x128xf32> to vector<8x128xbf16>
    %c0_125 = arith.constant 0 : index
    %c0_126 = arith.constant 0 : index
    %361 = vector.load %arg11[%c0_125, %c0_126] : memref<128x768xbf16, #tpu.memory_space<vmem>>, vector<128x768xbf16>
    %cst_127 = arith.constant dense<0.000000e+00> : vector<8x768xf32>
    %362 = tpu.matmul %360, %361, %cst_127 {dimension_numbers = #tpu.dot_dimension_numbers<[1], [0], [0], [1], [0, 0, 1, 1], [], []>} : vector<8x128xbf16>, vector<128x768xbf16>, vector<8x768xf32> -> vector<8x768xf32>
    %363 = vector.extract_strided_slice %362 {offsets = [0, 0], sizes = [8, 512], strides = [1, 1]} : vector<8x768xf32> to vector<8x512xf32>
    %364 = vector.extract_strided_slice %362 {offsets = [0, 512], sizes = [8, 128], strides = [1, 1]} : vector<8x768xf32> to vector<8x128xf32>
    %365 = vector.extract_strided_slice %362 {offsets = [0, 640], sizes = [8, 128], strides = [1, 1]} : vector<8x768xf32> to vector<8x128xf32>
    %366 = vector.shape_cast %364 : vector<8x128xf32> to vector<1x8x128xf32>
    %c0_128 = arith.constant 0 : index
    %c0_129 = arith.constant 0 : index
    %c0_130 = arith.constant 0 : index
    %367 = vector.load %arg20[%c0_128, %c0_129, %c0_130] : memref<8x8x128xf32, #tpu.memory_space<vmem>>, vector<8x8x128xf32>
    %368 = vector.broadcast %366 : vector<1x8x128xf32> to vector<8x8x128xf32>
    %369 = arith.addf %368, %367 : vector<8x8x128xf32>
    %370 = math.tanh %369 : vector<8x8x128xf32>
    %371 = vector.shape_cast %322 : vector<1x128xf32> to vector<1x1x128xf32>
    %372 = vector.broadcast %371 : vector<1x1x128xf32> to vector<8x8x128xf32>
    %373 = arith.mulf %370, %372 : vector<8x8x128xf32>
    %cst_131 = arith.constant dense<0.000000e+00> : vector<8x8xf32>
    %374 = vector.multi_reduction <add>, %373, %cst_131 [2] : vector<8x8x128xf32> to vector<8x8xf32>
    %375 = vector.shape_cast %374 : vector<8x8xf32> to vector<8x8x1xf32>
    %cst_132 = arith.constant dense<0xFF800000> : vector<8x1xf32>
    %376 = vector.multi_reduction <maximumf>, %375, %cst_132 [0] : vector<8x8x1xf32> to vector<8x1xf32>
    %377 = vector.shape_cast %376 : vector<8x1xf32> to vector<1x8x1xf32>
    %378 = vector.broadcast %377 : vector<1x8x1xf32> to vector<8x8x1xf32>
    %379 = arith.subf %375, %378 : vector<8x8x1xf32>
    %380 = math.exp %379 : vector<8x8x1xf32>
    %cst_133 = arith.constant dense<0.000000e+00> : vector<8x1xf32>
    %381 = vector.multi_reduction <add>, %380, %cst_133 [0] : vector<8x8x1xf32> to vector<8x1xf32>
    %382 = vector.shape_cast %381 : vector<8x1xf32> to vector<1x8x1xf32>
    %383 = tpu.reciprocal %382 {approx = true} : vector<1x8x1xf32> -> vector<1x8x1xf32>
    %384 = vector.broadcast %383 : vector<1x8x1xf32> to vector<8x8x1xf32>
    %385 = arith.mulf %380, %384 : vector<8x8x1xf32>
    %c0_134 = arith.constant 0 : index
    %c0_135 = arith.constant 0 : index
    %c0_136 = arith.constant 0 : index
    %386 = vector.load %arg16[%c0_134, %c0_135, %c0_136] : memref<8x8x128xf32, #tpu.memory_space<vmem>>, vector<8x8x128xf32>
    %387 = vector.broadcast %385 : vector<8x8x1xf32> to vector<8x8x128xf32>
    %388 = arith.mulf %387, %386 : vector<8x8x128xf32>
    %cst_137 = arith.constant dense<0.000000e+00> : vector<8x128xf32>
    %389 = vector.multi_reduction <add>, %388, %cst_137 [0] : vector<8x8x128xf32> to vector<8x128xf32>
    %390 = arith.truncf %389 : vector<8x128xf32> to vector<8x128xbf16>
    %c0_138 = arith.constant 0 : index
    %c0_139 = arith.constant 0 : index
    %391 = vector.load %arg12[%c0_138, %c0_139] : memref<128x640xbf16, #tpu.memory_space<vmem>>, vector<128x640xbf16>
    %cst_140 = arith.constant dense<0.000000e+00> : vector<8x640xf32>
    %392 = tpu.matmul %390, %391, %cst_140 {dimension_numbers = #tpu.dot_dimension_numbers<[1], [0], [0], [1], [0, 0, 1, 1], [], []>} : vector<8x128xbf16>, vector<128x640xbf16>, vector<8x640xf32> -> vector<8x640xf32>
    %393 = vector.extract_strided_slice %392 {offsets = [0, 0], sizes = [8, 128], strides = [1, 1]} : vector<8x640xf32> to vector<8x128xf32>
    %394 = vector.extract_strided_slice %392 {offsets = [0, 128], sizes = [8, 512], strides = [1, 1]} : vector<8x640xf32> to vector<8x512xf32>
    %395 = arith.addf %365, %393 : vector<8x128xf32>
    %396 = arith.addf %395, %325 : vector<8x128xf32>
    %397 = arith.truncf %396 : vector<8x128xf32> to vector<8x128xbf16>
    %c0_141 = arith.constant 0 : index
    %c0_142 = arith.constant 0 : index
    %398 = vector.load %arg14[%c0_141, %c0_142] : memref<128x128xbf16, #tpu.memory_space<vmem>>, vector<128x128xbf16>
    %cst_143 = arith.constant dense<0.000000e+00> : vector<8x128xf32>
    %399 = tpu.matmul %397, %398, %cst_143 {dimension_numbers = #tpu.dot_dimension_numbers<[1], [0], [0], [1], [0, 0, 1, 1], [], []>} : vector<8x128xbf16>, vector<128x128xbf16>, vector<8x128xf32> -> vector<8x128xf32>
    %400 = arith.addf %399, %328 : vector<8x128xf32>
    %401 = arith.index_cast %c0_i32_119 : i32 to index
    %c0_144 = arith.constant 0 : index
    %c0_145 = arith.constant 0 : index
    %402 = vector.load %arg17[%401, %c0_144, %c0_145] : memref<8x8x128xf32, #tpu.memory_space<vmem>>, vector<1x8x128xf32>
    %403 = vector.shape_cast %402 : vector<1x8x128xf32> to vector<8x128xf32>
    %404 = vector.shape_cast %400 : vector<8x128xf32> to vector<1x8x128xf32>
    tpu.vector_store %arg17[%401, %c0_144, %c0_145], %404 {strides = array<i32>} : memref<8x8x128xf32, #tpu.memory_space<vmem>>, vector<1x8x128xf32>,
    %c1_i32_146 = arith.constant 1 : i32
    %405 = arith.index_cast %c1_i32_146 : i32 to index
    %c0_147 = arith.constant 0 : index
    %c0_148 = arith.constant 0 : index
    %406 = vector.load %arg19[%405, %c0_147, %c0_148] : memref<8x8x512xf32, #tpu.memory_space<vmem>>, vector<1x8x512xf32>
    %407 = vector.shape_cast %406 : vector<1x8x512xf32> to vector<8x512xf32>
    %408 = arith.addf %407, %363 : vector<8x512xf32>
    %409 = arith.addf %408, %394 : vector<8x512xf32>
    %410 = vector.extract_strided_slice %409 {offsets = [0, 0], sizes = [8, 128], strides = [1, 1]} : vector<8x512xf32> to vector<8x128xf32>
    %411 = arith.negf %410 : vector<8x128xf32>
    %412 = math.exp %411 : vector<8x128xf32>
    %cst_149 = arith.constant 1.000000e+00 : f32
    %413 = vector.broadcast %cst_149 : f32 to vector<8x128xf32>
    %414 = arith.addf %413, %412 : vector<8x128xf32>
    %415 = arith.divf %413, %414 : vector<8x128xf32>
    %416 = vector.extract_strided_slice %409 {offsets = [0, 128], sizes = [8, 128], strides = [1, 1]} : vector<8x512xf32> to vector<8x128xf32>
    %417 = arith.negf %416 : vector<8x128xf32>
    %418 = math.exp %417 : vector<8x128xf32>
    %cst_150 = arith.constant 1.000000e+00 : f32
    %419 = vector.broadcast %cst_150 : f32 to vector<8x128xf32>
    %420 = arith.addf %419, %418 : vector<8x128xf32>
    %421 = arith.divf %419, %420 : vector<8x128xf32>
    %422 = vector.extract_strided_slice %409 {offsets = [0, 256], sizes = [8, 128], strides = [1, 1]} : vector<8x512xf32> to vector<8x128xf32>
    %423 = math.tanh %422 : vector<8x128xf32>
    %424 = vector.extract_strided_slice %409 {offsets = [0, 384], sizes = [8, 128], strides = [1, 1]} : vector<8x512xf32> to vector<8x128xf32>
    %425 = arith.negf %424 : vector<8x128xf32>
    %426 = math.exp %425 : vector<8x128xf32>
    %cst_151 = arith.constant 1.000000e+00 : f32
    %427 = vector.broadcast %cst_151 : f32 to vector<8x128xf32>
    %428 = arith.addf %427, %426 : vector<8x128xf32>
    %429 = arith.divf %427, %428 : vector<8x128xf32>
    %430 = arith.mulf %421, %357 : vector<8x128xf32>
    %431 = arith.mulf %415, %423 : vector<8x128xf32>
    %432 = arith.addf %430, %431 : vector<8x128xf32>
    %433 = math.tanh %432 : vector<8x128xf32>
    %434 = arith.mulf %429, %433 : vector<8x128xf32>
    %435 = arith.truncf %434 : vector<8x128xf32> to vector<8x128xbf16>
    %c0_152 = arith.constant 0 : index
    %c0_153 = arith.constant 0 : index
    %436 = vector.load %arg11[%c0_152, %c0_153] : memref<128x768xbf16, #tpu.memory_space<vmem>>, vector<128x768xbf16>
    %cst_154 = arith.constant dense<0.000000e+00> : vector<8x768xf32>
    %437 = tpu.matmul %435, %436, %cst_154 {dimension_numbers = #tpu.dot_dimension_numbers<[1], [0], [0], [1], [0, 0, 1, 1], [], []>} : vector<8x128xbf16>, vector<128x768xbf16>, vector<8x768xf32> -> vector<8x768xf32>
    %438 = vector.extract_strided_slice %437 {offsets = [0, 0], sizes = [8, 512], strides = [1, 1]} : vector<8x768xf32> to vector<8x512xf32>
    %439 = vector.extract_strided_slice %437 {offsets = [0, 512], sizes = [8, 128], strides = [1, 1]} : vector<8x768xf32> to vector<8x128xf32>
    %440 = vector.extract_strided_slice %437 {offsets = [0, 640], sizes = [8, 128], strides = [1, 1]} : vector<8x768xf32> to vector<8x128xf32>
    %441 = vector.shape_cast %439 : vector<8x128xf32> to vector<1x8x128xf32>
    %c0_155 = arith.constant 0 : index
    %c0_156 = arith.constant 0 : index
    %c0_157 = arith.constant 0 : index
    %442 = vector.load %arg20[%c0_155, %c0_156, %c0_157] : memref<8x8x128xf32, #tpu.memory_space<vmem>>, vector<8x8x128xf32>
    %443 = vector.broadcast %441 : vector<1x8x128xf32> to vector<8x8x128xf32>
    %444 = arith.addf %443, %442 : vector<8x8x128xf32>
    %445 = math.tanh %444 : vector<8x8x128xf32>
    %446 = vector.shape_cast %322 : vector<1x128xf32> to vector<1x1x128xf32>
    %447 = vector.broadcast %446 : vector<1x1x128xf32> to vector<8x8x128xf32>
    %448 = arith.mulf %445, %447 : vector<8x8x128xf32>
    %cst_158 = arith.constant dense<0.000000e+00> : vector<8x8xf32>
    %449 = vector.multi_reduction <add>, %448, %cst_158 [2] : vector<8x8x128xf32> to vector<8x8xf32>
    %450 = vector.shape_cast %449 : vector<8x8xf32> to vector<8x8x1xf32>
    %cst_159 = arith.constant dense<0xFF800000> : vector<8x1xf32>
    %451 = vector.multi_reduction <maximumf>, %450, %cst_159 [0] : vector<8x8x1xf32> to vector<8x1xf32>
    %452 = vector.shape_cast %451 : vector<8x1xf32> to vector<1x8x1xf32>
    %453 = vector.broadcast %452 : vector<1x8x1xf32> to vector<8x8x1xf32>
    %454 = arith.subf %450, %453 : vector<8x8x1xf32>
    %455 = math.exp %454 : vector<8x8x1xf32>
    %cst_160 = arith.constant dense<0.000000e+00> : vector<8x1xf32>
    %456 = vector.multi_reduction <add>, %455, %cst_160 [0] : vector<8x8x1xf32> to vector<8x1xf32>
    %457 = vector.shape_cast %456 : vector<8x1xf32> to vector<1x8x1xf32>
    %458 = tpu.reciprocal %457 {approx = true} : vector<1x8x1xf32> -> vector<1x8x1xf32>
    %459 = vector.broadcast %458 : vector<1x8x1xf32> to vector<8x8x1xf32>
    %460 = arith.mulf %455, %459 : vector<8x8x1xf32>
    %c0_161 = arith.constant 0 : index
    %c0_162 = arith.constant 0 : index
    %c0_163 = arith.constant 0 : index
    %461 = vector.load %arg16[%c0_161, %c0_162, %c0_163] : memref<8x8x128xf32, #tpu.memory_space<vmem>>, vector<8x8x128xf32>
    %462 = vector.broadcast %460 : vector<8x8x1xf32> to vector<8x8x128xf32>
    %463 = arith.mulf %462, %461 : vector<8x8x128xf32>
    %cst_164 = arith.constant dense<0.000000e+00> : vector<8x128xf32>
    %464 = vector.multi_reduction <add>, %463, %cst_164 [0] : vector<8x8x128xf32> to vector<8x128xf32>
    %465 = arith.truncf %464 : vector<8x128xf32> to vector<8x128xbf16>
    %c0_165 = arith.constant 0 : index
    %c0_166 = arith.constant 0 : index
    %466 = vector.load %arg12[%c0_165, %c0_166] : memref<128x640xbf16, #tpu.memory_space<vmem>>, vector<128x640xbf16>
    %cst_167 = arith.constant dense<0.000000e+00> : vector<8x640xf32>
    %467 = tpu.matmul %465, %466, %cst_167 {dimension_numbers = #tpu.dot_dimension_numbers<[1], [0], [0], [1], [0, 0, 1, 1], [], []>} : vector<8x128xbf16>, vector<128x640xbf16>, vector<8x640xf32> -> vector<8x640xf32>
    %468 = vector.extract_strided_slice %467 {offsets = [0, 0], sizes = [8, 128], strides = [1, 1]} : vector<8x640xf32> to vector<8x128xf32>
    %469 = vector.extract_strided_slice %467 {offsets = [0, 128], sizes = [8, 512], strides = [1, 1]} : vector<8x640xf32> to vector<8x512xf32>
    %470 = arith.addf %440, %468 : vector<8x128xf32>
    %471 = arith.addf %470, %325 : vector<8x128xf32>
    %472 = arith.truncf %471 : vector<8x128xf32> to vector<8x128xbf16>
    %c0_168 = arith.constant 0 : index
    %c0_169 = arith.constant 0 : index
    %473 = vector.load %arg14[%c0_168, %c0_169] : memref<128x128xbf16, #tpu.memory_space<vmem>>, vector<128x128xbf16>
    %cst_170 = arith.constant dense<0.000000e+00> : vector<8x128xf32>
    %474 = tpu.matmul %472, %473, %cst_170 {dimension_numbers = #tpu.dot_dimension_numbers<[1], [0], [0], [1], [0, 0, 1, 1], [], []>} : vector<8x128xbf16>, vector<128x128xbf16>, vector<8x128xf32> -> vector<8x128xf32>
    %475 = arith.addf %474, %328 : vector<8x128xf32>
    %476 = arith.index_cast %c1_i32_146 : i32 to index
    %c0_171 = arith.constant 0 : index
    %c0_172 = arith.constant 0 : index
    %477 = vector.load %arg17[%476, %c0_171, %c0_172] : memref<8x8x128xf32, #tpu.memory_space<vmem>>, vector<1x8x128xf32>
    %478 = vector.shape_cast %477 : vector<1x8x128xf32> to vector<8x128xf32>
    %479 = vector.shape_cast %475 : vector<8x128xf32> to vector<1x8x128xf32>
    tpu.vector_store %arg17[%476, %c0_171, %c0_172], %479 {strides = array<i32>} : memref<8x8x128xf32, #tpu.memory_space<vmem>>, vector<1x8x128xf32>,
    %c2_i32_173 = arith.constant 2 : i32
    %480 = arith.index_cast %c2_i32_173 : i32 to index
    %c0_174 = arith.constant 0 : index
    %c0_175 = arith.constant 0 : index
    %481 = vector.load %arg19[%480, %c0_174, %c0_175] : memref<8x8x512xf32, #tpu.memory_space<vmem>>, vector<1x8x512xf32>
    %482 = vector.shape_cast %481 : vector<1x8x512xf32> to vector<8x512xf32>
    %483 = arith.addf %482, %438 : vector<8x512xf32>
    %484 = arith.addf %483, %469 : vector<8x512xf32>
    %485 = vector.extract_strided_slice %484 {offsets = [0, 0], sizes = [8, 128], strides = [1, 1]} : vector<8x512xf32> to vector<8x128xf32>
    %486 = arith.negf %485 : vector<8x128xf32>
    %487 = math.exp %486 : vector<8x128xf32>
    %cst_176 = arith.constant 1.000000e+00 : f32
    %488 = vector.broadcast %cst_176 : f32 to vector<8x128xf32>
    %489 = arith.addf %488, %487 : vector<8x128xf32>
    %490 = arith.divf %488, %489 : vector<8x128xf32>
    %491 = vector.extract_strided_slice %484 {offsets = [0, 128], sizes = [8, 128], strides = [1, 1]} : vector<8x512xf32> to vector<8x128xf32>
    %492 = arith.negf %491 : vector<8x128xf32>
    %493 = math.exp %492 : vector<8x128xf32>
    %cst_177 = arith.constant 1.000000e+00 : f32
    %494 = vector.broadcast %cst_177 : f32 to vector<8x128xf32>
    %495 = arith.addf %494, %493 : vector<8x128xf32>
    %496 = arith.divf %494, %495 : vector<8x128xf32>
    %497 = vector.extract_strided_slice %484 {offsets = [0, 256], sizes = [8, 128], strides = [1, 1]} : vector<8x512xf32> to vector<8x128xf32>
    %498 = math.tanh %497 : vector<8x128xf32>
    %499 = vector.extract_strided_slice %484 {offsets = [0, 384], sizes = [8, 128], strides = [1, 1]} : vector<8x512xf32> to vector<8x128xf32>
    %500 = arith.negf %499 : vector<8x128xf32>
    %501 = math.exp %500 : vector<8x128xf32>
    %cst_178 = arith.constant 1.000000e+00 : f32
    %502 = vector.broadcast %cst_178 : f32 to vector<8x128xf32>
    %503 = arith.addf %502, %501 : vector<8x128xf32>
    %504 = arith.divf %502, %503 : vector<8x128xf32>
    %505 = arith.mulf %496, %432 : vector<8x128xf32>
    %506 = arith.mulf %490, %498 : vector<8x128xf32>
    %507 = arith.addf %505, %506 : vector<8x128xf32>
    %508 = math.tanh %507 : vector<8x128xf32>
    %509 = arith.mulf %504, %508 : vector<8x128xf32>
    %510 = arith.truncf %509 : vector<8x128xf32> to vector<8x128xbf16>
    %c0_179 = arith.constant 0 : index
    %c0_180 = arith.constant 0 : index
    %511 = vector.load %arg11[%c0_179, %c0_180] : memref<128x768xbf16, #tpu.memory_space<vmem>>, vector<128x768xbf16>
    %cst_181 = arith.constant dense<0.000000e+00> : vector<8x768xf32>
    %512 = tpu.matmul %510, %511, %cst_181 {dimension_numbers = #tpu.dot_dimension_numbers<[1], [0], [0], [1], [0, 0, 1, 1], [], []>} : vector<8x128xbf16>, vector<128x768xbf16>, vector<8x768xf32> -> vector<8x768xf32>
    %513 = vector.extract_strided_slice %512 {offsets = [0, 0], sizes = [8, 512], strides = [1, 1]} : vector<8x768xf32> to vector<8x512xf32>
    %514 = vector.extract_strided_slice %512 {offsets = [0, 512], sizes = [8, 128], strides = [1, 1]} : vector<8x768xf32> to vector<8x128xf32>
    %515 = vector.extract_strided_slice %512 {offsets = [0, 640], sizes = [8, 128], strides = [1, 1]} : vector<8x768xf32> to vector<8x128xf32>
    %516 = vector.shape_cast %514 : vector<8x128xf32> to vector<1x8x128xf32>
    %c0_182 = arith.constant 0 : index
    %c0_183 = arith.constant 0 : index
    %c0_184 = arith.constant 0 : index
    %517 = vector.load %arg20[%c0_182, %c0_183, %c0_184] : memref<8x8x128xf32, #tpu.memory_space<vmem>>, vector<8x8x128xf32>
    %518 = vector.broadcast %516 : vector<1x8x128xf32> to vector<8x8x128xf32>
    %519 = arith.addf %518, %517 : vector<8x8x128xf32>
    %520 = math.tanh %519 : vector<8x8x128xf32>
    %521 = vector.shape_cast %322 : vector<1x128xf32> to vector<1x1x128xf32>
    %522 = vector.broadcast %521 : vector<1x1x128xf32> to vector<8x8x128xf32>
    %523 = arith.mulf %520, %522 : vector<8x8x128xf32>
    %cst_185 = arith.constant dense<0.000000e+00> : vector<8x8xf32>
    %524 = vector.multi_reduction <add>, %523, %cst_185 [2] : vector<8x8x128xf32> to vector<8x8xf32>
    %525 = vector.shape_cast %524 : vector<8x8xf32> to vector<8x8x1xf32>
    %cst_186 = arith.constant dense<0xFF800000> : vector<8x1xf32>
    %526 = vector.multi_reduction <maximumf>, %525, %cst_186 [0] : vector<8x8x1xf32> to vector<8x1xf32>
    %527 = vector.shape_cast %526 : vector<8x1xf32> to vector<1x8x1xf32>
    %528 = vector.broadcast %527 : vector<1x8x1xf32> to vector<8x8x1xf32>
    %529 = arith.subf %525, %528 : vector<8x8x1xf32>
    %530 = math.exp %529 : vector<8x8x1xf32>
    %cst_187 = arith.constant dense<0.000000e+00> : vector<8x1xf32>
    %531 = vector.multi_reduction <add>, %530, %cst_187 [0] : vector<8x8x1xf32> to vector<8x1xf32>
    %532 = vector.shape_cast %531 : vector<8x1xf32> to vector<1x8x1xf32>
    %533 = tpu.reciprocal %532 {approx = true} : vector<1x8x1xf32> -> vector<1x8x1xf32>
    %534 = vector.broadcast %533 : vector<1x8x1xf32> to vector<8x8x1xf32>
    %535 = arith.mulf %530, %534 : vector<8x8x1xf32>
    %c0_188 = arith.constant 0 : index
    %c0_189 = arith.constant 0 : index
    %c0_190 = arith.constant 0 : index
    %536 = vector.load %arg16[%c0_188, %c0_189, %c0_190] : memref<8x8x128xf32, #tpu.memory_space<vmem>>, vector<8x8x128xf32>
    %537 = vector.broadcast %535 : vector<8x8x1xf32> to vector<8x8x128xf32>
    %538 = arith.mulf %537, %536 : vector<8x8x128xf32>
    %cst_191 = arith.constant dense<0.000000e+00> : vector<8x128xf32>
    %539 = vector.multi_reduction <add>, %538, %cst_191 [0] : vector<8x8x128xf32> to vector<8x128xf32>
    %540 = arith.truncf %539 : vector<8x128xf32> to vector<8x128xbf16>
    %c0_192 = arith.constant 0 : index
    %c0_193 = arith.constant 0 : index
    %541 = vector.load %arg12[%c0_192, %c0_193] : memref<128x640xbf16, #tpu.memory_space<vmem>>, vector<128x640xbf16>
    %cst_194 = arith.constant dense<0.000000e+00> : vector<8x640xf32>
    %542 = tpu.matmul %540, %541, %cst_194 {dimension_numbers = #tpu.dot_dimension_numbers<[1], [0], [0], [1], [0, 0, 1, 1], [], []>} : vector<8x128xbf16>, vector<128x640xbf16>, vector<8x640xf32> -> vector<8x640xf32>
    %543 = vector.extract_strided_slice %542 {offsets = [0, 0], sizes = [8, 128], strides = [1, 1]} : vector<8x640xf32> to vector<8x128xf32>
    %544 = vector.extract_strided_slice %542 {offsets = [0, 128], sizes = [8, 512], strides = [1, 1]} : vector<8x640xf32> to vector<8x512xf32>
    %545 = arith.addf %515, %543 : vector<8x128xf32>
    %546 = arith.addf %545, %325 : vector<8x128xf32>
    %547 = arith.truncf %546 : vector<8x128xf32> to vector<8x128xbf16>
    %c0_195 = arith.constant 0 : index
    %c0_196 = arith.constant 0 : index
    %548 = vector.load %arg14[%c0_195, %c0_196] : memref<128x128xbf16, #tpu.memory_space<vmem>>, vector<128x128xbf16>
    %cst_197 = arith.constant dense<0.000000e+00> : vector<8x128xf32>
    %549 = tpu.matmul %547, %548, %cst_197 {dimension_numbers = #tpu.dot_dimension_numbers<[1], [0], [0], [1], [0, 0, 1, 1], [], []>} : vector<8x128xbf16>, vector<128x128xbf16>, vector<8x128xf32> -> vector<8x128xf32>
    %550 = arith.addf %549, %328 : vector<8x128xf32>
    %551 = arith.index_cast %c2_i32_173 : i32 to index
    %c0_198 = arith.constant 0 : index
    %c0_199 = arith.constant 0 : index
    %552 = vector.load %arg17[%551, %c0_198, %c0_199] : memref<8x8x128xf32, #tpu.memory_space<vmem>>, vector<1x8x128xf32>
    %553 = vector.shape_cast %552 : vector<1x8x128xf32> to vector<8x128xf32>
    %554 = vector.shape_cast %550 : vector<8x128xf32> to vector<1x8x128xf32>
    tpu.vector_store %arg17[%551, %c0_198, %c0_199], %554 {strides = array<i32>} : memref<8x8x128xf32, #tpu.memory_space<vmem>>, vector<1x8x128xf32>,
    %c3_i32_200 = arith.constant 3 : i32
    %555 = arith.index_cast %c3_i32_200 : i32 to index
    %c0_201 = arith.constant 0 : index
    %c0_202 = arith.constant 0 : index
    %556 = vector.load %arg19[%555, %c0_201, %c0_202] : memref<8x8x512xf32, #tpu.memory_space<vmem>>, vector<1x8x512xf32>
    %557 = vector.shape_cast %556 : vector<1x8x512xf32> to vector<8x512xf32>
    %558 = arith.addf %557, %513 : vector<8x512xf32>
    %559 = arith.addf %558, %544 : vector<8x512xf32>
    %560 = vector.extract_strided_slice %559 {offsets = [0, 0], sizes = [8, 128], strides = [1, 1]} : vector<8x512xf32> to vector<8x128xf32>
    %561 = arith.negf %560 : vector<8x128xf32>
    %562 = math.exp %561 : vector<8x128xf32>
    %cst_203 = arith.constant 1.000000e+00 : f32
    %563 = vector.broadcast %cst_203 : f32 to vector<8x128xf32>
    %564 = arith.addf %563, %562 : vector<8x128xf32>
    %565 = arith.divf %563, %564 : vector<8x128xf32>
    %566 = vector.extract_strided_slice %559 {offsets = [0, 128], sizes = [8, 128], strides = [1, 1]} : vector<8x512xf32> to vector<8x128xf32>
    %567 = arith.negf %566 : vector<8x128xf32>
    %568 = math.exp %567 : vector<8x128xf32>
    %cst_204 = arith.constant 1.000000e+00 : f32
    %569 = vector.broadcast %cst_204 : f32 to vector<8x128xf32>
    %570 = arith.addf %569, %568 : vector<8x128xf32>
    %571 = arith.divf %569, %570 : vector<8x128xf32>
    %572 = vector.extract_strided_slice %559 {offsets = [0, 256], sizes = [8, 128], strides = [1, 1]} : vector<8x512xf32> to vector<8x128xf32>
    %573 = math.tanh %572 : vector<8x128xf32>
    %574 = vector.extract_strided_slice %559 {offsets = [0, 384], sizes = [8, 128], strides = [1, 1]} : vector<8x512xf32> to vector<8x128xf32>
    %575 = arith.negf %574 : vector<8x128xf32>
    %576 = math.exp %575 : vector<8x128xf32>
    %cst_205 = arith.constant 1.000000e+00 : f32
    %577 = vector.broadcast %cst_205 : f32 to vector<8x128xf32>
    %578 = arith.addf %577, %576 : vector<8x128xf32>
    %579 = arith.divf %577, %578 : vector<8x128xf32>
    %580 = arith.mulf %571, %507 : vector<8x128xf32>
    %581 = arith.mulf %565, %573 : vector<8x128xf32>
    %582 = arith.addf %580, %581 : vector<8x128xf32>
    %583 = math.tanh %582 : vector<8x128xf32>
    %584 = arith.mulf %579, %583 : vector<8x128xf32>
    %585 = arith.truncf %584 : vector<8x128xf32> to vector<8x128xbf16>
    %c0_206 = arith.constant 0 : index
    %c0_207 = arith.constant 0 : index
    %586 = vector.load %arg11[%c0_206, %c0_207] : memref<128x768xbf16, #tpu.memory_space<vmem>>, vector<128x768xbf16>
    %cst_208 = arith.constant dense<0.000000e+00> : vector<8x768xf32>
    %587 = tpu.matmul %585, %586, %cst_208 {dimension_numbers = #tpu.dot_dimension_numbers<[1], [0], [0], [1], [0, 0, 1, 1], [], []>} : vector<8x128xbf16>, vector<128x768xbf16>, vector<8x768xf32> -> vector<8x768xf32>
    %588 = vector.extract_strided_slice %587 {offsets = [0, 0], sizes = [8, 512], strides = [1, 1]} : vector<8x768xf32> to vector<8x512xf32>
    %589 = vector.extract_strided_slice %587 {offsets = [0, 512], sizes = [8, 128], strides = [1, 1]} : vector<8x768xf32> to vector<8x128xf32>
    %590 = vector.extract_strided_slice %587 {offsets = [0, 640], sizes = [8, 128], strides = [1, 1]} : vector<8x768xf32> to vector<8x128xf32>
    %591 = vector.shape_cast %589 : vector<8x128xf32> to vector<1x8x128xf32>
    %c0_209 = arith.constant 0 : index
    %c0_210 = arith.constant 0 : index
    %c0_211 = arith.constant 0 : index
    %592 = vector.load %arg20[%c0_209, %c0_210, %c0_211] : memref<8x8x128xf32, #tpu.memory_space<vmem>>, vector<8x8x128xf32>
    %593 = vector.broadcast %591 : vector<1x8x128xf32> to vector<8x8x128xf32>
    %594 = arith.addf %593, %592 : vector<8x8x128xf32>
    %595 = math.tanh %594 : vector<8x8x128xf32>
    %596 = vector.shape_cast %322 : vector<1x128xf32> to vector<1x1x128xf32>
    %597 = vector.broadcast %596 : vector<1x1x128xf32> to vector<8x8x128xf32>
    %598 = arith.mulf %595, %597 : vector<8x8x128xf32>
    %cst_212 = arith.constant dense<0.000000e+00> : vector<8x8xf32>
    %599 = vector.multi_reduction <add>, %598, %cst_212 [2] : vector<8x8x128xf32> to vector<8x8xf32>
    %600 = vector.shape_cast %599 : vector<8x8xf32> to vector<8x8x1xf32>
    %cst_213 = arith.constant dense<0xFF800000> : vector<8x1xf32>
    %601 = vector.multi_reduction <maximumf>, %600, %cst_213 [0] : vector<8x8x1xf32> to vector<8x1xf32>
    %602 = vector.shape_cast %601 : vector<8x1xf32> to vector<1x8x1xf32>
    %603 = vector.broadcast %602 : vector<1x8x1xf32> to vector<8x8x1xf32>
    %604 = arith.subf %600, %603 : vector<8x8x1xf32>
    %605 = math.exp %604 : vector<8x8x1xf32>
    %cst_214 = arith.constant dense<0.000000e+00> : vector<8x1xf32>
    %606 = vector.multi_reduction <add>, %605, %cst_214 [0] : vector<8x8x1xf32> to vector<8x1xf32>
    %607 = vector.shape_cast %606 : vector<8x1xf32> to vector<1x8x1xf32>
    %608 = tpu.reciprocal %607 {approx = true} : vector<1x8x1xf32> -> vector<1x8x1xf32>
    %609 = vector.broadcast %608 : vector<1x8x1xf32> to vector<8x8x1xf32>
    %610 = arith.mulf %605, %609 : vector<8x8x1xf32>
    %c0_215 = arith.constant 0 : index
    %c0_216 = arith.constant 0 : index
    %c0_217 = arith.constant 0 : index
    %611 = vector.load %arg16[%c0_215, %c0_216, %c0_217] : memref<8x8x128xf32, #tpu.memory_space<vmem>>, vector<8x8x128xf32>
    %612 = vector.broadcast %610 : vector<8x8x1xf32> to vector<8x8x128xf32>
    %613 = arith.mulf %612, %611 : vector<8x8x128xf32>
    %cst_218 = arith.constant dense<0.000000e+00> : vector<8x128xf32>
    %614 = vector.multi_reduction <add>, %613, %cst_218 [0] : vector<8x8x128xf32> to vector<8x128xf32>
    %615 = arith.truncf %614 : vector<8x128xf32> to vector<8x128xbf16>
    %c0_219 = arith.constant 0 : index
    %c0_220 = arith.constant 0 : index
    %616 = vector.load %arg12[%c0_219, %c0_220] : memref<128x640xbf16, #tpu.memory_space<vmem>>, vector<128x640xbf16>
    %cst_221 = arith.constant dense<0.000000e+00> : vector<8x640xf32>
    %617 = tpu.matmul %615, %616, %cst_221 {dimension_numbers = #tpu.dot_dimension_numbers<[1], [0], [0], [1], [0, 0, 1, 1], [], []>} : vector<8x128xbf16>, vector<128x640xbf16>, vector<8x640xf32> -> vector<8x640xf32>
    %618 = vector.extract_strided_slice %617 {offsets = [0, 0], sizes = [8, 128], strides = [1, 1]} : vector<8x640xf32> to vector<8x128xf32>
    %619 = vector.extract_strided_slice %617 {offsets = [0, 128], sizes = [8, 512], strides = [1, 1]} : vector<8x640xf32> to vector<8x512xf32>
    %620 = arith.addf %590, %618 : vector<8x128xf32>
    %621 = arith.addf %620, %325 : vector<8x128xf32>
    %622 = arith.truncf %621 : vector<8x128xf32> to vector<8x128xbf16>
    %c0_222 = arith.constant 0 : index
    %c0_223 = arith.constant 0 : index
    %623 = vector.load %arg14[%c0_222, %c0_223] : memref<128x128xbf16, #tpu.memory_space<vmem>>, vector<128x128xbf16>
    %cst_224 = arith.constant dense<0.000000e+00> : vector<8x128xf32>
    %624 = tpu.matmul %622, %623, %cst_224 {dimension_numbers = #tpu.dot_dimension_numbers<[1], [0], [0], [1], [0, 0, 1, 1], [], []>} : vector<8x128xbf16>, vector<128x128xbf16>, vector<8x128xf32> -> vector<8x128xf32>
    %625 = arith.addf %624, %328 : vector<8x128xf32>
    %626 = arith.index_cast %c3_i32_200 : i32 to index
    %c0_225 = arith.constant 0 : index
    %c0_226 = arith.constant 0 : index
    %627 = vector.load %arg17[%626, %c0_225, %c0_226] : memref<8x8x128xf32, #tpu.memory_space<vmem>>, vector<1x8x128xf32>
    %628 = vector.shape_cast %627 : vector<1x8x128xf32> to vector<8x128xf32>
    %629 = vector.shape_cast %625 : vector<8x128xf32> to vector<1x8x128xf32>
    tpu.vector_store %arg17[%626, %c0_225, %c0_226], %629 {strides = array<i32>} : memref<8x8x128xf32, #tpu.memory_space<vmem>>, vector<1x8x128xf32>,
    %c4_i32_227 = arith.constant 4 : i32
    %630 = arith.index_cast %c4_i32_227 : i32 to index
    %c0_228 = arith.constant 0 : index
    %c0_229 = arith.constant 0 : index
    %631 = vector.load %arg19[%630, %c0_228, %c0_229] : memref<8x8x512xf32, #tpu.memory_space<vmem>>, vector<1x8x512xf32>
    %632 = vector.shape_cast %631 : vector<1x8x512xf32> to vector<8x512xf32>
    %633 = arith.addf %632, %588 : vector<8x512xf32>
    %634 = arith.addf %633, %619 : vector<8x512xf32>
    %635 = vector.extract_strided_slice %634 {offsets = [0, 0], sizes = [8, 128], strides = [1, 1]} : vector<8x512xf32> to vector<8x128xf32>
    %636 = arith.negf %635 : vector<8x128xf32>
    %637 = math.exp %636 : vector<8x128xf32>
    %cst_230 = arith.constant 1.000000e+00 : f32
    %638 = vector.broadcast %cst_230 : f32 to vector<8x128xf32>
    %639 = arith.addf %638, %637 : vector<8x128xf32>
    %640 = arith.divf %638, %639 : vector<8x128xf32>
    %641 = vector.extract_strided_slice %634 {offsets = [0, 128], sizes = [8, 128], strides = [1, 1]} : vector<8x512xf32> to vector<8x128xf32>
    %642 = arith.negf %641 : vector<8x128xf32>
    %643 = math.exp %642 : vector<8x128xf32>
    %cst_231 = arith.constant 1.000000e+00 : f32
    %644 = vector.broadcast %cst_231 : f32 to vector<8x128xf32>
    %645 = arith.addf %644, %643 : vector<8x128xf32>
    %646 = arith.divf %644, %645 : vector<8x128xf32>
    %647 = vector.extract_strided_slice %634 {offsets = [0, 256], sizes = [8, 128], strides = [1, 1]} : vector<8x512xf32> to vector<8x128xf32>
    %648 = math.tanh %647 : vector<8x128xf32>
    %649 = vector.extract_strided_slice %634 {offsets = [0, 384], sizes = [8, 128], strides = [1, 1]} : vector<8x512xf32> to vector<8x128xf32>
    %650 = arith.negf %649 : vector<8x128xf32>
    %651 = math.exp %650 : vector<8x128xf32>
    %cst_232 = arith.constant 1.000000e+00 : f32
    %652 = vector.broadcast %cst_232 : f32 to vector<8x128xf32>
    %653 = arith.addf %652, %651 : vector<8x128xf32>
    %654 = arith.divf %652, %653 : vector<8x128xf32>
    %655 = arith.mulf %646, %582 : vector<8x128xf32>
    %656 = arith.mulf %640, %648 : vector<8x128xf32>
    %657 = arith.addf %655, %656 : vector<8x128xf32>
    %658 = math.tanh %657 : vector<8x128xf32>
    %659 = arith.mulf %654, %658 : vector<8x128xf32>
    %660 = arith.truncf %659 : vector<8x128xf32> to vector<8x128xbf16>
    %c0_233 = arith.constant 0 : index
    %c0_234 = arith.constant 0 : index
    %661 = vector.load %arg11[%c0_233, %c0_234] : memref<128x768xbf16, #tpu.memory_space<vmem>>, vector<128x768xbf16>
    %cst_235 = arith.constant dense<0.000000e+00> : vector<8x768xf32>
    %662 = tpu.matmul %660, %661, %cst_235 {dimension_numbers = #tpu.dot_dimension_numbers<[1], [0], [0], [1], [0, 0, 1, 1], [], []>} : vector<8x128xbf16>, vector<128x768xbf16>, vector<8x768xf32> -> vector<8x768xf32>
    %663 = vector.extract_strided_slice %662 {offsets = [0, 0], sizes = [8, 512], strides = [1, 1]} : vector<8x768xf32> to vector<8x512xf32>
    %664 = vector.extract_strided_slice %662 {offsets = [0, 512], sizes = [8, 128], strides = [1, 1]} : vector<8x768xf32> to vector<8x128xf32>
    %665 = vector.extract_strided_slice %662 {offsets = [0, 640], sizes = [8, 128], strides = [1, 1]} : vector<8x768xf32> to vector<8x128xf32>
    %666 = vector.shape_cast %664 : vector<8x128xf32> to vector<1x8x128xf32>
    %c0_236 = arith.constant 0 : index
    %c0_237 = arith.constant 0 : index
    %c0_238 = arith.constant 0 : index
    %667 = vector.load %arg20[%c0_236, %c0_237, %c0_238] : memref<8x8x128xf32, #tpu.memory_space<vmem>>, vector<8x8x128xf32>
    %668 = vector.broadcast %666 : vector<1x8x128xf32> to vector<8x8x128xf32>
    %669 = arith.addf %668, %667 : vector<8x8x128xf32>
    %670 = math.tanh %669 : vector<8x8x128xf32>
    %671 = vector.shape_cast %322 : vector<1x128xf32> to vector<1x1x128xf32>
    %672 = vector.broadcast %671 : vector<1x1x128xf32> to vector<8x8x128xf32>
    %673 = arith.mulf %670, %672 : vector<8x8x128xf32>
    %cst_239 = arith.constant dense<0.000000e+00> : vector<8x8xf32>
    %674 = vector.multi_reduction <add>, %673, %cst_239 [2] : vector<8x8x128xf32> to vector<8x8xf32>
    %675 = vector.shape_cast %674 : vector<8x8xf32> to vector<8x8x1xf32>
    %cst_240 = arith.constant dense<0xFF800000> : vector<8x1xf32>
    %676 = vector.multi_reduction <maximumf>, %675, %cst_240 [0] : vector<8x8x1xf32> to vector<8x1xf32>
    %677 = vector.shape_cast %676 : vector<8x1xf32> to vector<1x8x1xf32>
    %678 = vector.broadcast %677 : vector<1x8x1xf32> to vector<8x8x1xf32>
    %679 = arith.subf %675, %678 : vector<8x8x1xf32>
    %680 = math.exp %679 : vector<8x8x1xf32>
    %cst_241 = arith.constant dense<0.000000e+00> : vector<8x1xf32>
    %681 = vector.multi_reduction <add>, %680, %cst_241 [0] : vector<8x8x1xf32> to vector<8x1xf32>
    %682 = vector.shape_cast %681 : vector<8x1xf32> to vector<1x8x1xf32>
    %683 = tpu.reciprocal %682 {approx = true} : vector<1x8x1xf32> -> vector<1x8x1xf32>
    %684 = vector.broadcast %683 : vector<1x8x1xf32> to vector<8x8x1xf32>
    %685 = arith.mulf %680, %684 : vector<8x8x1xf32>
    %c0_242 = arith.constant 0 : index
    %c0_243 = arith.constant 0 : index
    %c0_244 = arith.constant 0 : index
    %686 = vector.load %arg16[%c0_242, %c0_243, %c0_244] : memref<8x8x128xf32, #tpu.memory_space<vmem>>, vector<8x8x128xf32>
    %687 = vector.broadcast %685 : vector<8x8x1xf32> to vector<8x8x128xf32>
    %688 = arith.mulf %687, %686 : vector<8x8x128xf32>
    %cst_245 = arith.constant dense<0.000000e+00> : vector<8x128xf32>
    %689 = vector.multi_reduction <add>, %688, %cst_245 [0] : vector<8x8x128xf32> to vector<8x128xf32>
    %690 = arith.truncf %689 : vector<8x128xf32> to vector<8x128xbf16>
    %c0_246 = arith.constant 0 : index
    %c0_247 = arith.constant 0 : index
    %691 = vector.load %arg12[%c0_246, %c0_247] : memref<128x640xbf16, #tpu.memory_space<vmem>>, vector<128x640xbf16>
    %cst_248 = arith.constant dense<0.000000e+00> : vector<8x640xf32>
    %692 = tpu.matmul %690, %691, %cst_248 {dimension_numbers = #tpu.dot_dimension_numbers<[1], [0], [0], [1], [0, 0, 1, 1], [], []>} : vector<8x128xbf16>, vector<128x640xbf16>, vector<8x640xf32> -> vector<8x640xf32>
    %693 = vector.extract_strided_slice %692 {offsets = [0, 0], sizes = [8, 128], strides = [1, 1]} : vector<8x640xf32> to vector<8x128xf32>
    %694 = vector.extract_strided_slice %692 {offsets = [0, 128], sizes = [8, 512], strides = [1, 1]} : vector<8x640xf32> to vector<8x512xf32>
    %695 = arith.addf %665, %693 : vector<8x128xf32>
    %696 = arith.addf %695, %325 : vector<8x128xf32>
    %697 = arith.truncf %696 : vector<8x128xf32> to vector<8x128xbf16>
    %c0_249 = arith.constant 0 : index
    %c0_250 = arith.constant 0 : index
    %698 = vector.load %arg14[%c0_249, %c0_250] : memref<128x128xbf16, #tpu.memory_space<vmem>>, vector<128x128xbf16>
    %cst_251 = arith.constant dense<0.000000e+00> : vector<8x128xf32>
    %699 = tpu.matmul %697, %698, %cst_251 {dimension_numbers = #tpu.dot_dimension_numbers<[1], [0], [0], [1], [0, 0, 1, 1], [], []>} : vector<8x128xbf16>, vector<128x128xbf16>, vector<8x128xf32> -> vector<8x128xf32>
    %700 = arith.addf %699, %328 : vector<8x128xf32>
    %701 = arith.index_cast %c4_i32_227 : i32 to index
    %c0_252 = arith.constant 0 : index
    %c0_253 = arith.constant 0 : index
    %702 = vector.load %arg17[%701, %c0_252, %c0_253] : memref<8x8x128xf32, #tpu.memory_space<vmem>>, vector<1x8x128xf32>
    %703 = vector.shape_cast %702 : vector<1x8x128xf32> to vector<8x128xf32>
    %704 = vector.shape_cast %700 : vector<8x128xf32> to vector<1x8x128xf32>
    tpu.vector_store %arg17[%701, %c0_252, %c0_253], %704 {strides = array<i32>} : memref<8x8x128xf32, #tpu.memory_space<vmem>>, vector<1x8x128xf32>,
    %c5_i32_254 = arith.constant 5 : i32
    %705 = arith.index_cast %c5_i32_254 : i32 to index
    %c0_255 = arith.constant 0 : index
    %c0_256 = arith.constant 0 : index
    %706 = vector.load %arg19[%705, %c0_255, %c0_256] : memref<8x8x512xf32, #tpu.memory_space<vmem>>, vector<1x8x512xf32>
    %707 = vector.shape_cast %706 : vector<1x8x512xf32> to vector<8x512xf32>
    %708 = arith.addf %707, %663 : vector<8x512xf32>
    %709 = arith.addf %708, %694 : vector<8x512xf32>
    %710 = vector.extract_strided_slice %709 {offsets = [0, 0], sizes = [8, 128], strides = [1, 1]} : vector<8x512xf32> to vector<8x128xf32>
    %711 = arith.negf %710 : vector<8x128xf32>
    %712 = math.exp %711 : vector<8x128xf32>
    %cst_257 = arith.constant 1.000000e+00 : f32
    %713 = vector.broadcast %cst_257 : f32 to vector<8x128xf32>
    %714 = arith.addf %713, %712 : vector<8x128xf32>
    %715 = arith.divf %713, %714 : vector<8x128xf32>
    %716 = vector.extract_strided_slice %709 {offsets = [0, 128], sizes = [8, 128], strides = [1, 1]} : vector<8x512xf32> to vector<8x128xf32>
    %717 = arith.negf %716 : vector<8x128xf32>
    %718 = math.exp %717 : vector<8x128xf32>
    %cst_258 = arith.constant 1.000000e+00 : f32
    %719 = vector.broadcast %cst_258 : f32 to vector<8x128xf32>
    %720 = arith.addf %719, %718 : vector<8x128xf32>
    %721 = arith.divf %719, %720 : vector<8x128xf32>
    %722 = vector.extract_strided_slice %709 {offsets = [0, 256], sizes = [8, 128], strides = [1, 1]} : vector<8x512xf32> to vector<8x128xf32>
    %723 = math.tanh %722 : vector<8x128xf32>
    %724 = vector.extract_strided_slice %709 {offsets = [0, 384], sizes = [8, 128], strides = [1, 1]} : vector<8x512xf32> to vector<8x128xf32>
    %725 = arith.negf %724 : vector<8x128xf32>
    %726 = math.exp %725 : vector<8x128xf32>
    %cst_259 = arith.constant 1.000000e+00 : f32
    %727 = vector.broadcast %cst_259 : f32 to vector<8x128xf32>
    %728 = arith.addf %727, %726 : vector<8x128xf32>
    %729 = arith.divf %727, %728 : vector<8x128xf32>
    %730 = arith.mulf %721, %657 : vector<8x128xf32>
    %731 = arith.mulf %715, %723 : vector<8x128xf32>
    %732 = arith.addf %730, %731 : vector<8x128xf32>
    %733 = math.tanh %732 : vector<8x128xf32>
    %734 = arith.mulf %729, %733 : vector<8x128xf32>
    %735 = arith.truncf %734 : vector<8x128xf32> to vector<8x128xbf16>
    %c0_260 = arith.constant 0 : index
    %c0_261 = arith.constant 0 : index
    %736 = vector.load %arg11[%c0_260, %c0_261] : memref<128x768xbf16, #tpu.memory_space<vmem>>, vector<128x768xbf16>
    %cst_262 = arith.constant dense<0.000000e+00> : vector<8x768xf32>
    %737 = tpu.matmul %735, %736, %cst_262 {dimension_numbers = #tpu.dot_dimension_numbers<[1], [0], [0], [1], [0, 0, 1, 1], [], []>} : vector<8x128xbf16>, vector<128x768xbf16>, vector<8x768xf32> -> vector<8x768xf32>
    %738 = vector.extract_strided_slice %737 {offsets = [0, 0], sizes = [8, 512], strides = [1, 1]} : vector<8x768xf32> to vector<8x512xf32>
    %739 = vector.extract_strided_slice %737 {offsets = [0, 512], sizes = [8, 128], strides = [1, 1]} : vector<8x768xf32> to vector<8x128xf32>
    %740 = vector.extract_strided_slice %737 {offsets = [0, 640], sizes = [8, 128], strides = [1, 1]} : vector<8x768xf32> to vector<8x128xf32>
    %741 = vector.shape_cast %739 : vector<8x128xf32> to vector<1x8x128xf32>
    %c0_263 = arith.constant 0 : index
    %c0_264 = arith.constant 0 : index
    %c0_265 = arith.constant 0 : index
    %742 = vector.load %arg20[%c0_263, %c0_264, %c0_265] : memref<8x8x128xf32, #tpu.memory_space<vmem>>, vector<8x8x128xf32>
    %743 = vector.broadcast %741 : vector<1x8x128xf32> to vector<8x8x128xf32>
    %744 = arith.addf %743, %742 : vector<8x8x128xf32>
    %745 = math.tanh %744 : vector<8x8x128xf32>
    %746 = vector.shape_cast %322 : vector<1x128xf32> to vector<1x1x128xf32>
    %747 = vector.broadcast %746 : vector<1x1x128xf32> to vector<8x8x128xf32>
    %748 = arith.mulf %745, %747 : vector<8x8x128xf32>
    %cst_266 = arith.constant dense<0.000000e+00> : vector<8x8xf32>
    %749 = vector.multi_reduction <add>, %748, %cst_266 [2] : vector<8x8x128xf32> to vector<8x8xf32>
    %750 = vector.shape_cast %749 : vector<8x8xf32> to vector<8x8x1xf32>
    %cst_267 = arith.constant dense<0xFF800000> : vector<8x1xf32>
    %751 = vector.multi_reduction <maximumf>, %750, %cst_267 [0] : vector<8x8x1xf32> to vector<8x1xf32>
    %752 = vector.shape_cast %751 : vector<8x1xf32> to vector<1x8x1xf32>
    %753 = vector.broadcast %752 : vector<1x8x1xf32> to vector<8x8x1xf32>
    %754 = arith.subf %750, %753 : vector<8x8x1xf32>
    %755 = math.exp %754 : vector<8x8x1xf32>
    %cst_268 = arith.constant dense<0.000000e+00> : vector<8x1xf32>
    %756 = vector.multi_reduction <add>, %755, %cst_268 [0] : vector<8x8x1xf32> to vector<8x1xf32>
    %757 = vector.shape_cast %756 : vector<8x1xf32> to vector<1x8x1xf32>
    %758 = tpu.reciprocal %757 {approx = true} : vector<1x8x1xf32> -> vector<1x8x1xf32>
    %759 = vector.broadcast %758 : vector<1x8x1xf32> to vector<8x8x1xf32>
    %760 = arith.mulf %755, %759 : vector<8x8x1xf32>
    %c0_269 = arith.constant 0 : index
    %c0_270 = arith.constant 0 : index
    %c0_271 = arith.constant 0 : index
    %761 = vector.load %arg16[%c0_269, %c0_270, %c0_271] : memref<8x8x128xf32, #tpu.memory_space<vmem>>, vector<8x8x128xf32>
    %762 = vector.broadcast %760 : vector<8x8x1xf32> to vector<8x8x128xf32>
    %763 = arith.mulf %762, %761 : vector<8x8x128xf32>
    %cst_272 = arith.constant dense<0.000000e+00> : vector<8x128xf32>
    %764 = vector.multi_reduction <add>, %763, %cst_272 [0] : vector<8x8x128xf32> to vector<8x128xf32>
    %765 = arith.truncf %764 : vector<8x128xf32> to vector<8x128xbf16>
    %c0_273 = arith.constant 0 : index
    %c0_274 = arith.constant 0 : index
    %766 = vector.load %arg12[%c0_273, %c0_274] : memref<128x640xbf16, #tpu.memory_space<vmem>>, vector<128x640xbf16>
    %cst_275 = arith.constant dense<0.000000e+00> : vector<8x640xf32>
    %767 = tpu.matmul %765, %766, %cst_275 {dimension_numbers = #tpu.dot_dimension_numbers<[1], [0], [0], [1], [0, 0, 1, 1], [], []>} : vector<8x128xbf16>, vector<128x640xbf16>, vector<8x640xf32> -> vector<8x640xf32>
    %768 = vector.extract_strided_slice %767 {offsets = [0, 0], sizes = [8, 128], strides = [1, 1]} : vector<8x640xf32> to vector<8x128xf32>
    %769 = vector.extract_strided_slice %767 {offsets = [0, 128], sizes = [8, 512], strides = [1, 1]} : vector<8x640xf32> to vector<8x512xf32>
    %770 = arith.addf %740, %768 : vector<8x128xf32>
    %771 = arith.addf %770, %325 : vector<8x128xf32>
    %772 = arith.truncf %771 : vector<8x128xf32> to vector<8x128xbf16>
    %c0_276 = arith.constant 0 : index
    %c0_277 = arith.constant 0 : index
    %773 = vector.load %arg14[%c0_276, %c0_277] : memref<128x128xbf16, #tpu.memory_space<vmem>>, vector<128x128xbf16>
    %cst_278 = arith.constant dense<0.000000e+00> : vector<8x128xf32>
    %774 = tpu.matmul %772, %773, %cst_278 {dimension_numbers = #tpu.dot_dimension_numbers<[1], [0], [0], [1], [0, 0, 1, 1], [], []>} : vector<8x128xbf16>, vector<128x128xbf16>, vector<8x128xf32> -> vector<8x128xf32>
    %775 = arith.addf %774, %328 : vector<8x128xf32>
    %776 = arith.index_cast %c5_i32_254 : i32 to index
    %c0_279 = arith.constant 0 : index
    %c0_280 = arith.constant 0 : index
    %777 = vector.load %arg17[%776, %c0_279, %c0_280] : memref<8x8x128xf32, #tpu.memory_space<vmem>>, vector<1x8x128xf32>
    %778 = vector.shape_cast %777 : vector<1x8x128xf32> to vector<8x128xf32>
    %779 = vector.shape_cast %775 : vector<8x128xf32> to vector<1x8x128xf32>
    tpu.vector_store %arg17[%776, %c0_279, %c0_280], %779 {strides = array<i32>} : memref<8x8x128xf32, #tpu.memory_space<vmem>>, vector<1x8x128xf32>,
    %c6_i32_281 = arith.constant 6 : i32
    %780 = arith.index_cast %c6_i32_281 : i32 to index
    %c0_282 = arith.constant 0 : index
    %c0_283 = arith.constant 0 : index
    %781 = vector.load %arg19[%780, %c0_282, %c0_283] : memref<8x8x512xf32, #tpu.memory_space<vmem>>, vector<1x8x512xf32>
    %782 = vector.shape_cast %781 : vector<1x8x512xf32> to vector<8x512xf32>
    %783 = arith.addf %782, %738 : vector<8x512xf32>
    %784 = arith.addf %783, %769 : vector<8x512xf32>
    %785 = vector.extract_strided_slice %784 {offsets = [0, 0], sizes = [8, 128], strides = [1, 1]} : vector<8x512xf32> to vector<8x128xf32>
    %786 = arith.negf %785 : vector<8x128xf32>
    %787 = math.exp %786 : vector<8x128xf32>
    %cst_284 = arith.constant 1.000000e+00 : f32
    %788 = vector.broadcast %cst_284 : f32 to vector<8x128xf32>
    %789 = arith.addf %788, %787 : vector<8x128xf32>
    %790 = arith.divf %788, %789 : vector<8x128xf32>
    %791 = vector.extract_strided_slice %784 {offsets = [0, 128], sizes = [8, 128], strides = [1, 1]} : vector<8x512xf32> to vector<8x128xf32>
    %792 = arith.negf %791 : vector<8x128xf32>
    %793 = math.exp %792 : vector<8x128xf32>
    %cst_285 = arith.constant 1.000000e+00 : f32
    %794 = vector.broadcast %cst_285 : f32 to vector<8x128xf32>
    %795 = arith.addf %794, %793 : vector<8x128xf32>
    %796 = arith.divf %794, %795 : vector<8x128xf32>
    %797 = vector.extract_strided_slice %784 {offsets = [0, 256], sizes = [8, 128], strides = [1, 1]} : vector<8x512xf32> to vector<8x128xf32>
    %798 = math.tanh %797 : vector<8x128xf32>
    %799 = vector.extract_strided_slice %784 {offsets = [0, 384], sizes = [8, 128], strides = [1, 1]} : vector<8x512xf32> to vector<8x128xf32>
    %800 = arith.negf %799 : vector<8x128xf32>
    %801 = math.exp %800 : vector<8x128xf32>
    %cst_286 = arith.constant 1.000000e+00 : f32
    %802 = vector.broadcast %cst_286 : f32 to vector<8x128xf32>
    %803 = arith.addf %802, %801 : vector<8x128xf32>
    %804 = arith.divf %802, %803 : vector<8x128xf32>
    %805 = arith.mulf %796, %732 : vector<8x128xf32>
    %806 = arith.mulf %790, %798 : vector<8x128xf32>
    %807 = arith.addf %805, %806 : vector<8x128xf32>
    %808 = math.tanh %807 : vector<8x128xf32>
    %809 = arith.mulf %804, %808 : vector<8x128xf32>
    %810 = arith.truncf %809 : vector<8x128xf32> to vector<8x128xbf16>
    %c0_287 = arith.constant 0 : index
    %c0_288 = arith.constant 0 : index
    %811 = vector.load %arg11[%c0_287, %c0_288] : memref<128x768xbf16, #tpu.memory_space<vmem>>, vector<128x768xbf16>
    %cst_289 = arith.constant dense<0.000000e+00> : vector<8x768xf32>
    %812 = tpu.matmul %810, %811, %cst_289 {dimension_numbers = #tpu.dot_dimension_numbers<[1], [0], [0], [1], [0, 0, 1, 1], [], []>} : vector<8x128xbf16>, vector<128x768xbf16>, vector<8x768xf32> -> vector<8x768xf32>
    %813 = vector.extract_strided_slice %812 {offsets = [0, 0], sizes = [8, 512], strides = [1, 1]} : vector<8x768xf32> to vector<8x512xf32>
    %814 = vector.extract_strided_slice %812 {offsets = [0, 512], sizes = [8, 128], strides = [1, 1]} : vector<8x768xf32> to vector<8x128xf32>
    %815 = vector.extract_strided_slice %812 {offsets = [0, 640], sizes = [8, 128], strides = [1, 1]} : vector<8x768xf32> to vector<8x128xf32>
    %816 = vector.shape_cast %814 : vector<8x128xf32> to vector<1x8x128xf32>
    %c0_290 = arith.constant 0 : index
    %c0_291 = arith.constant 0 : index
    %c0_292 = arith.constant 0 : index
    %817 = vector.load %arg20[%c0_290, %c0_291, %c0_292] : memref<8x8x128xf32, #tpu.memory_space<vmem>>, vector<8x8x128xf32>
    %818 = vector.broadcast %816 : vector<1x8x128xf32> to vector<8x8x128xf32>
    %819 = arith.addf %818, %817 : vector<8x8x128xf32>
    %820 = math.tanh %819 : vector<8x8x128xf32>
    %821 = vector.shape_cast %322 : vector<1x128xf32> to vector<1x1x128xf32>
    %822 = vector.broadcast %821 : vector<1x1x128xf32> to vector<8x8x128xf32>
    %823 = arith.mulf %820, %822 : vector<8x8x128xf32>
    %cst_293 = arith.constant dense<0.000000e+00> : vector<8x8xf32>
    %824 = vector.multi_reduction <add>, %823, %cst_293 [2] : vector<8x8x128xf32> to vector<8x8xf32>
    %825 = vector.shape_cast %824 : vector<8x8xf32> to vector<8x8x1xf32>
    %cst_294 = arith.constant dense<0xFF800000> : vector<8x1xf32>
    %826 = vector.multi_reduction <maximumf>, %825, %cst_294 [0] : vector<8x8x1xf32> to vector<8x1xf32>
    %827 = vector.shape_cast %826 : vector<8x1xf32> to vector<1x8x1xf32>
    %828 = vector.broadcast %827 : vector<1x8x1xf32> to vector<8x8x1xf32>
    %829 = arith.subf %825, %828 : vector<8x8x1xf32>
    %830 = math.exp %829 : vector<8x8x1xf32>
    %cst_295 = arith.constant dense<0.000000e+00> : vector<8x1xf32>
    %831 = vector.multi_reduction <add>, %830, %cst_295 [0] : vector<8x8x1xf32> to vector<8x1xf32>
    %832 = vector.shape_cast %831 : vector<8x1xf32> to vector<1x8x1xf32>
    %833 = tpu.reciprocal %832 {approx = true} : vector<1x8x1xf32> -> vector<1x8x1xf32>
    %834 = vector.broadcast %833 : vector<1x8x1xf32> to vector<8x8x1xf32>
    %835 = arith.mulf %830, %834 : vector<8x8x1xf32>
    %c0_296 = arith.constant 0 : index
    %c0_297 = arith.constant 0 : index
    %c0_298 = arith.constant 0 : index
    %836 = vector.load %arg16[%c0_296, %c0_297, %c0_298] : memref<8x8x128xf32, #tpu.memory_space<vmem>>, vector<8x8x128xf32>
    %837 = vector.broadcast %835 : vector<8x8x1xf32> to vector<8x8x128xf32>
    %838 = arith.mulf %837, %836 : vector<8x8x128xf32>
    %cst_299 = arith.constant dense<0.000000e+00> : vector<8x128xf32>
    %839 = vector.multi_reduction <add>, %838, %cst_299 [0] : vector<8x8x128xf32> to vector<8x128xf32>
    %840 = arith.truncf %839 : vector<8x128xf32> to vector<8x128xbf16>
    %c0_300 = arith.constant 0 : index
    %c0_301 = arith.constant 0 : index
    %841 = vector.load %arg12[%c0_300, %c0_301] : memref<128x640xbf16, #tpu.memory_space<vmem>>, vector<128x640xbf16>
    %cst_302 = arith.constant dense<0.000000e+00> : vector<8x640xf32>
    %842 = tpu.matmul %840, %841, %cst_302 {dimension_numbers = #tpu.dot_dimension_numbers<[1], [0], [0], [1], [0, 0, 1, 1], [], []>} : vector<8x128xbf16>, vector<128x640xbf16>, vector<8x640xf32> -> vector<8x640xf32>
    %843 = vector.extract_strided_slice %842 {offsets = [0, 0], sizes = [8, 128], strides = [1, 1]} : vector<8x640xf32> to vector<8x128xf32>
    %844 = vector.extract_strided_slice %842 {offsets = [0, 128], sizes = [8, 512], strides = [1, 1]} : vector<8x640xf32> to vector<8x512xf32>
    %845 = arith.addf %815, %843 : vector<8x128xf32>
    %846 = arith.addf %845, %325 : vector<8x128xf32>
    %847 = arith.truncf %846 : vector<8x128xf32> to vector<8x128xbf16>
    %c0_303 = arith.constant 0 : index
    %c0_304 = arith.constant 0 : index
    %848 = vector.load %arg14[%c0_303, %c0_304] : memref<128x128xbf16, #tpu.memory_space<vmem>>, vector<128x128xbf16>
    %cst_305 = arith.constant dense<0.000000e+00> : vector<8x128xf32>
    %849 = tpu.matmul %847, %848, %cst_305 {dimension_numbers = #tpu.dot_dimension_numbers<[1], [0], [0], [1], [0, 0, 1, 1], [], []>} : vector<8x128xbf16>, vector<128x128xbf16>, vector<8x128xf32> -> vector<8x128xf32>
    %850 = arith.addf %849, %328 : vector<8x128xf32>
    %851 = arith.index_cast %c6_i32_281 : i32 to index
    %c0_306 = arith.constant 0 : index
    %c0_307 = arith.constant 0 : index
    %852 = vector.load %arg17[%851, %c0_306, %c0_307] : memref<8x8x128xf32, #tpu.memory_space<vmem>>, vector<1x8x128xf32>
    %853 = vector.shape_cast %852 : vector<1x8x128xf32> to vector<8x128xf32>
    %854 = vector.shape_cast %850 : vector<8x128xf32> to vector<1x8x128xf32>
    tpu.vector_store %arg17[%851, %c0_306, %c0_307], %854 {strides = array<i32>} : memref<8x8x128xf32, #tpu.memory_space<vmem>>, vector<1x8x128xf32>,
    %c7_i32_308 = arith.constant 7 : i32
    %855 = arith.index_cast %c7_i32_308 : i32 to index
    %c0_309 = arith.constant 0 : index
    %c0_310 = arith.constant 0 : index
    %856 = vector.load %arg19[%855, %c0_309, %c0_310] : memref<8x8x512xf32, #tpu.memory_space<vmem>>, vector<1x8x512xf32>
    %857 = vector.shape_cast %856 : vector<1x8x512xf32> to vector<8x512xf32>
    %858 = arith.addf %857, %813 : vector<8x512xf32>
    %859 = arith.addf %858, %844 : vector<8x512xf32>
    %860 = vector.extract_strided_slice %859 {offsets = [0, 0], sizes = [8, 128], strides = [1, 1]} : vector<8x512xf32> to vector<8x128xf32>
    %861 = arith.negf %860 : vector<8x128xf32>
    %862 = math.exp %861 : vector<8x128xf32>
    %cst_311 = arith.constant 1.000000e+00 : f32
    %863 = vector.broadcast %cst_311 : f32 to vector<8x128xf32>
    %864 = arith.addf %863, %862 : vector<8x128xf32>
    %865 = arith.divf %863, %864 : vector<8x128xf32>
    %866 = vector.extract_strided_slice %859 {offsets = [0, 128], sizes = [8, 128], strides = [1, 1]} : vector<8x512xf32> to vector<8x128xf32>
    %867 = arith.negf %866 : vector<8x128xf32>
    %868 = math.exp %867 : vector<8x128xf32>
    %cst_312 = arith.constant 1.000000e+00 : f32
    %869 = vector.broadcast %cst_312 : f32 to vector<8x128xf32>
    %870 = arith.addf %869, %868 : vector<8x128xf32>
    %871 = arith.divf %869, %870 : vector<8x128xf32>
    %872 = vector.extract_strided_slice %859 {offsets = [0, 256], sizes = [8, 128], strides = [1, 1]} : vector<8x512xf32> to vector<8x128xf32>
    %873 = math.tanh %872 : vector<8x128xf32>
    %874 = vector.extract_strided_slice %859 {offsets = [0, 384], sizes = [8, 128], strides = [1, 1]} : vector<8x512xf32> to vector<8x128xf32>
    %875 = arith.negf %874 : vector<8x128xf32>
    %876 = math.exp %875 : vector<8x128xf32>
    %cst_313 = arith.constant 1.000000e+00 : f32
    %877 = vector.broadcast %cst_313 : f32 to vector<8x128xf32>
    %878 = arith.addf %877, %876 : vector<8x128xf32>
    %879 = arith.divf %877, %878 : vector<8x128xf32>
    %880 = arith.mulf %871, %807 : vector<8x128xf32>
    %881 = arith.mulf %865, %873 : vector<8x128xf32>
    %882 = arith.addf %880, %881 : vector<8x128xf32>
    %883 = math.tanh %882 : vector<8x128xf32>
    %884 = arith.mulf %879, %883 : vector<8x128xf32>
    %885 = arith.truncf %884 : vector<8x128xf32> to vector<8x128xbf16>
    %c0_314 = arith.constant 0 : index
    %c0_315 = arith.constant 0 : index
    %886 = vector.load %arg11[%c0_314, %c0_315] : memref<128x768xbf16, #tpu.memory_space<vmem>>, vector<128x768xbf16>
    %cst_316 = arith.constant dense<0.000000e+00> : vector<8x768xf32>
    %887 = tpu.matmul %885, %886, %cst_316 {dimension_numbers = #tpu.dot_dimension_numbers<[1], [0], [0], [1], [0, 0, 1, 1], [], []>} : vector<8x128xbf16>, vector<128x768xbf16>, vector<8x768xf32> -> vector<8x768xf32>
    %888 = vector.extract_strided_slice %887 {offsets = [0, 0], sizes = [8, 512], strides = [1, 1]} : vector<8x768xf32> to vector<8x512xf32>
    %889 = vector.extract_strided_slice %887 {offsets = [0, 512], sizes = [8, 128], strides = [1, 1]} : vector<8x768xf32> to vector<8x128xf32>
    %890 = vector.extract_strided_slice %887 {offsets = [0, 640], sizes = [8, 128], strides = [1, 1]} : vector<8x768xf32> to vector<8x128xf32>
    %891 = vector.shape_cast %889 : vector<8x128xf32> to vector<1x8x128xf32>
    %c0_317 = arith.constant 0 : index
    %c0_318 = arith.constant 0 : index
    %c0_319 = arith.constant 0 : index
    %892 = vector.load %arg20[%c0_317, %c0_318, %c0_319] : memref<8x8x128xf32, #tpu.memory_space<vmem>>, vector<8x8x128xf32>
    %893 = vector.broadcast %891 : vector<1x8x128xf32> to vector<8x8x128xf32>
    %894 = arith.addf %893, %892 : vector<8x8x128xf32>
    %895 = math.tanh %894 : vector<8x8x128xf32>
    %896 = vector.shape_cast %322 : vector<1x128xf32> to vector<1x1x128xf32>
    %897 = vector.broadcast %896 : vector<1x1x128xf32> to vector<8x8x128xf32>
    %898 = arith.mulf %895, %897 : vector<8x8x128xf32>
    %cst_320 = arith.constant dense<0.000000e+00> : vector<8x8xf32>
    %899 = vector.multi_reduction <add>, %898, %cst_320 [2] : vector<8x8x128xf32> to vector<8x8xf32>
    %900 = vector.shape_cast %899 : vector<8x8xf32> to vector<8x8x1xf32>
    %cst_321 = arith.constant dense<0xFF800000> : vector<8x1xf32>
    %901 = vector.multi_reduction <maximumf>, %900, %cst_321 [0] : vector<8x8x1xf32> to vector<8x1xf32>
    %902 = vector.shape_cast %901 : vector<8x1xf32> to vector<1x8x1xf32>
    %903 = vector.broadcast %902 : vector<1x8x1xf32> to vector<8x8x1xf32>
    %904 = arith.subf %900, %903 : vector<8x8x1xf32>
    %905 = math.exp %904 : vector<8x8x1xf32>
    %cst_322 = arith.constant dense<0.000000e+00> : vector<8x1xf32>
    %906 = vector.multi_reduction <add>, %905, %cst_322 [0] : vector<8x8x1xf32> to vector<8x1xf32>
    %907 = vector.shape_cast %906 : vector<8x1xf32> to vector<1x8x1xf32>
    %908 = tpu.reciprocal %907 {approx = true} : vector<1x8x1xf32> -> vector<1x8x1xf32>
    %909 = vector.broadcast %908 : vector<1x8x1xf32> to vector<8x8x1xf32>
    %910 = arith.mulf %905, %909 : vector<8x8x1xf32>
    %c0_323 = arith.constant 0 : index
    %c0_324 = arith.constant 0 : index
    %c0_325 = arith.constant 0 : index
    %911 = vector.load %arg16[%c0_323, %c0_324, %c0_325] : memref<8x8x128xf32, #tpu.memory_space<vmem>>, vector<8x8x128xf32>
    %912 = vector.broadcast %910 : vector<8x8x1xf32> to vector<8x8x128xf32>
    %913 = arith.mulf %912, %911 : vector<8x8x128xf32>
    %cst_326 = arith.constant dense<0.000000e+00> : vector<8x128xf32>
    %914 = vector.multi_reduction <add>, %913, %cst_326 [0] : vector<8x8x128xf32> to vector<8x128xf32>
    %915 = arith.truncf %914 : vector<8x128xf32> to vector<8x128xbf16>
    %c0_327 = arith.constant 0 : index
    %c0_328 = arith.constant 0 : index
    %916 = vector.load %arg12[%c0_327, %c0_328] : memref<128x640xbf16, #tpu.memory_space<vmem>>, vector<128x640xbf16>
    %cst_329 = arith.constant dense<0.000000e+00> : vector<8x640xf32>
    %917 = tpu.matmul %915, %916, %cst_329 {dimension_numbers = #tpu.dot_dimension_numbers<[1], [0], [0], [1], [0, 0, 1, 1], [], []>} : vector<8x128xbf16>, vector<128x640xbf16>, vector<8x640xf32> -> vector<8x640xf32>
    %918 = vector.extract_strided_slice %917 {offsets = [0, 0], sizes = [8, 128], strides = [1, 1]} : vector<8x640xf32> to vector<8x128xf32>
    %919 = vector.extract_strided_slice %917 {offsets = [0, 128], sizes = [8, 512], strides = [1, 1]} : vector<8x640xf32> to vector<8x512xf32>
    %920 = arith.addf %890, %918 : vector<8x128xf32>
    %921 = arith.addf %920, %325 : vector<8x128xf32>
    %922 = arith.truncf %921 : vector<8x128xf32> to vector<8x128xbf16>
    %c0_330 = arith.constant 0 : index
    %c0_331 = arith.constant 0 : index
    %923 = vector.load %arg14[%c0_330, %c0_331] : memref<128x128xbf16, #tpu.memory_space<vmem>>, vector<128x128xbf16>
    %cst_332 = arith.constant dense<0.000000e+00> : vector<8x128xf32>
    %924 = tpu.matmul %922, %923, %cst_332 {dimension_numbers = #tpu.dot_dimension_numbers<[1], [0], [0], [1], [0, 0, 1, 1], [], []>} : vector<8x128xbf16>, vector<128x128xbf16>, vector<8x128xf32> -> vector<8x128xf32>
    %925 = arith.addf %924, %328 : vector<8x128xf32>
    %926 = arith.index_cast %c7_i32_308 : i32 to index
    %c0_333 = arith.constant 0 : index
    %c0_334 = arith.constant 0 : index
    %927 = vector.load %arg17[%926, %c0_333, %c0_334] : memref<8x8x128xf32, #tpu.memory_space<vmem>>, vector<1x8x128xf32>
    %928 = vector.shape_cast %927 : vector<1x8x128xf32> to vector<8x128xf32>
    %929 = vector.shape_cast %925 : vector<8x128xf32> to vector<1x8x128xf32>
    tpu.vector_store %arg17[%926, %c0_333, %c0_334], %929 {strides = array<i32>} : memref<8x8x128xf32, #tpu.memory_space<vmem>>, vector<1x8x128xf32>,
    %c8_i32_335 = arith.constant 8 : i32
    return
  }
  func.func @transform_0(%arg0: i32) -> (i32, i32, i32) {
    %c0_i32 = arith.constant 0 : i32
    %c0_i32_0 = arith.constant 0 : i32
    %c0_i32_1 = arith.constant 0 : i32
    %c0_i32_2 = arith.constant 0 : i32
    return %c0_i32, %c0_i32_0, %c0_i32_1 : i32, i32, i32
  }
  func.func @transform_1(%arg0: i32) -> (i32, i32, i32) {
    %c0_i32 = arith.constant 0 : i32
    %c0_i32_0 = arith.constant 0 : i32
    %c0_i32_1 = arith.constant 0 : i32
    %c0_i32_2 = arith.constant 0 : i32
    return %c0_i32, %c0_i32_0, %c0_i32_1 : i32, i32, i32
  }
  func.func @transform_2(%arg0: i32) -> (i32, i32) {
    %c0_i32 = arith.constant 0 : i32
    %c0_i32_0 = arith.constant 0 : i32
    %c0_i32_1 = arith.constant 0 : i32
    return %c0_i32, %c0_i32_0 : i32, i32
  }
  func.func @transform_3(%arg0: i32) -> (i32, i32) {
    %c0_i32 = arith.constant 0 : i32
    %c0_i32_0 = arith.constant 0 : i32
    %c0_i32_1 = arith.constant 0 : i32
    return %c0_i32, %c0_i32_0 : i32, i32
  }
  func.func @transform_4(%arg0: i32) -> (i32, i32) {
    %c0_i32 = arith.constant 0 : i32
    %c0_i32_0 = arith.constant 0 : i32
    %c0_i32_1 = arith.constant 0 : i32
    return %c0_i32, %c0_i32_0 : i32, i32
  }
  func.func @transform_5(%arg0: i32) -> (i32, i32) {
    %c0_i32 = arith.constant 0 : i32
    %c0_i32_0 = arith.constant 0 : i32
    %c0_i32_1 = arith.constant 0 : i32
    return %c0_i32, %c0_i32_0 : i32, i32
  }
  func.func @transform_6(%arg0: i32) -> (i32, i32) {
    %c0_i32 = arith.constant 0 : i32
    %c0_i32_0 = arith.constant 0 : i32
    %c0_i32_1 = arith.constant 0 : i32
    return %c0_i32, %c0_i32_0 : i32, i32
  }
  func.func @transform_7(%arg0: i32) -> (i32, i32) {
    %c0_i32 = arith.constant 0 : i32
    %c0_i32_0 = arith.constant 0 : i32
    %c0_i32_1 = arith.constant 0 : i32
    return %c0_i32, %c0_i32_0 : i32, i32
  }
  func.func @transform_8(%arg0: i32) -> (i32, i32) {
    %c0_i32 = arith.constant 0 : i32
    %c0_i32_0 = arith.constant 0 : i32
    %c0_i32_1 = arith.constant 0 : i32
    return %c0_i32, %c0_i32_0 : i32, i32
  }
  func.func @transform_9(%arg0: i32) -> (i32, i32) {
    %c0_i32 = arith.constant 0 : i32
    %c0_i32_0 = arith.constant 0 : i32
    %c0_i32_1 = arith.constant 0 : i32
    return %c0_i32, %c0_i32_0 : i32, i32
  }
  func.func @transform_10(%arg0: i32) -> (i32, i32) {
    %c0_i32 = arith.constant 0 : i32
    %c0_i32_0 = arith.constant 0 : i32
    %c0_i32_1 = arith.constant 0 : i32
    return %c0_i32, %c0_i32_0 : i32, i32
  }
  func.func @transform_11(%arg0: i32) -> (i32, i32) {
    %c0_i32 = arith.constant 0 : i32
    %c0_i32_0 = arith.constant 0 : i32
    %c0_i32_1 = arith.constant 0 : i32
    return %c0_i32, %c0_i32_0 : i32, i32
  }
  func.func @transform_12(%arg0: i32) -> (i32, i32) {
    %c0_i32 = arith.constant 0 : i32
    %c0_i32_0 = arith.constant 0 : i32
    %c0_i32_1 = arith.constant 0 : i32
    return %c0_i32, %c0_i32_0 : i32, i32
  }
  func.func @transform_13(%arg0: i32) -> (i32, i32) {
    %c0_i32 = arith.constant 0 : i32
    %c0_i32_0 = arith.constant 0 : i32
    %c0_i32_1 = arith.constant 0 : i32
    return %c0_i32, %c0_i32_0 : i32, i32
  }
  func.func @transform_14(%arg0: i32) -> (i32, i32) {
    %c0_i32 = arith.constant 0 : i32
    %c0_i32_0 = arith.constant 0 : i32
    %c0_i32_1 = arith.constant 0 : i32
    return %c0_i32, %c0_i32_0 : i32, i32
  }
  func.func @transform_15(%arg0: i32) -> (i32, i32, i32) {
    %c0_i32 = arith.constant 0 : i32
    %c0_i32_0 = arith.constant 0 : i32
    %c0_i32_1 = arith.constant 0 : i32
    %c0_i32_2 = arith.constant 0 : i32
    return %c0_i32, %c0_i32_0, %c0_i32_1 : i32, i32, i32
  }
  func.func @transform_16(%arg0: i32) -> (i32, i32, i32) {
    %c0_i32 = arith.constant 0 : i32
    %c0_i32_0 = arith.constant 0 : i32
    %c0_i32_1 = arith.constant 0 : i32
    %c0_i32_2 = arith.constant 0 : i32
    return %c0_i32, %c0_i32_0, %c0_i32_1 : i32, i32, i32
  }
}

</mosaic_0001>

<bundles_post_ra>
// kernel: seq2seq_attention_forward.1
= control target key start
LH: loop header
LB: loop body
LE: loop exit
PB: predicated region body
PF: predicated region fallthrough
CT: control target
= control target key end

     0   :  { %s18835_s0 = inlined_call_operand.vmem [shape: f32[8,8,128], index: 0, kind: input, shape index: {}]   ;;  %s18836_s1 = inlined_call_operand.vmem [shape: f32[8,8,128], index: 1, kind: input, shape index: {}]   ;;  %s18837_s2 = inlined_call_operand.vmem [shape: bf16[128,512], index: 2, kind: input, shape index: {}]   ;;  %s18838_s3 = inlined_call_operand.hbm [shape: bf16[128,512], index: 3, kind: input, shape index: {}]   ;;  %s18839_s4 = inlined_call_operand.vmem [shape: f32[1,512], index: 4, kind: input, shape index: {}]   ;;  %s18840_s5 = inlined_call_operand.hbm [shape: bf16[128,512], index: 5, kind: input, shape index: {}]   ;;  %s18841_s6 = inlined_call_operand.vmem [shape: f32[1,512], index: 6, kind: input, shape index: {}]   ;;  %s18842_s7 = inlined_call_operand.vmem [shape: bf16[128,128], index: 7, kind: input, shape index: {}]   ;;  %s18843_s8 = inlined_call_operand.vmem [shape: f32[1,128], index: 8, kind: input, shape index: {}]   ;;  %s18844_s9 = inlined_call_operand.vmem [shape: f32[1,128], index: 9, kind: input, shape index: {}]   ;;  %s18845_s10 = inlined_call_operand.vmem [shape: bf16[128,768], index: 10, kind: input, shape index: {}]   ;;  %s18846_s11 = inlined_call_operand.vmem [shape: bf16[128,640], index: 11, kind: input, shape index: {}]   ;;  %s18847_s12 = inlined_call_operand.vmem [shape: f32[1,128], index: 12, kind: input, shape index: {}]   ;;  %s18848_s13 = inlined_call_operand.vmem [shape: bf16[128,128], index: 13, kind: input, shape index: {}]   ;;  %s18849_s14 = inlined_call_operand.vmem [shape: f32[1,128], index: 14, kind: input, shape index: {}]   ;;  %s18850_s15 = inlined_call_operand.vmem [shape: f32[8,8,128], index: 15, kind: output, shape index: {0}]   ;;  %s18851_s16 = inlined_call_operand.vmem [shape: f32[8,8,128], index: 16, kind: output, shape index: {1}]  }
   0x1   :  { %18990 = sst [smem:[#allocation78_spill]] %s18835_s0 }
   0x2   :  { %22 = vsyncpa [#allocation6], 0 }
   0x3   :  { %23 = vsyncpa [#allocation8], 0  ;;  %s14572_s21 = smov [#allocation5]   ;;  %s14524_s25 = scalar_lea.hbm %s18838_s3, 4096 }
   0x4   :  { %s35_s22 = sshll.u32 %s14572_s21, 4  ;;  %p14525_p0 = scmp.ne.s32.totalorder %s18838_s3, %s14524_s25  ;;  %s36_s22 = int_to_ptr.vmem [resolvable:$true] %s35_s22 }
   0x5   :  { %p14528_p1 = scmp.lt.u32.totalorder %s14524_s25, %s18838_s3 }
   0x7   :  { %p14530_p2 = pnand %p14528_p1, %p14525_p0 }
   0x9   :  { %14533 = shalt.err (!%p14530_p2)
}
   0xa   :  { %s14534_s30 = scalar_lea.vmem %s36_s22, 4096  ;;  %p14539_p4 = scmp.lt.s32.totalorder %s36_s22, %s36_s22 }
   0xb   :  { %p14535_p3 = scmp.ne.s32.totalorder %s36_s22, %s14534_s30  ;;  %p14540_p5 = scmp.lt.s32.totalorder %s14534_s30, %s14534_s30 }
   0xd   :  { %p14541_p6 = por %p14540_p5, %p14539_p4 }
   0xf   :  { %p14542_p7 = pnand %p14541_p6, %p14535_p3 }
  0x11   :  { %14545 = shalt.err (!%p14542_p7)
}
  0x12   :  { %s14573_s0 = smov 256   ;;  %s14574_s17 = smov 16  }
  0x13   :  { %41 = dma.hbm_to_vmem [thread:$0]  %s18838_s3, 4096, %s36_s22, [#allocation6], %s14573_s0, %s14573_s0, %s14574_s17  }
  0x14   :  { %s14575_s20 = smov [#allocation7]   ;;  %s14546_s25 = scalar_lea.hbm %s18840_s5, 4096 }
  0x15   :  { %s49_s21 = sshll.u32 %s14575_s20, 4  ;;  %p14547_p8 = scmp.ne.s32.totalorder %s18840_s5, %s14546_s25  ;;  %s50_s21 = int_to_ptr.vmem [resolvable:$true] %s49_s21 }
  0x16   :  { %p14550_p9 = scmp.lt.u32.totalorder %s14546_s25, %s18840_s5 }
  0x18   :  { %p14552_p10 = pnand %p14550_p9, %p14547_p8 }
  0x1a   :  { %14555 = shalt.err (!%p14552_p10)
}
  0x1b   :  { %s14556_s30 = scalar_lea.vmem %s50_s21, 4096  ;;  %p14561_p12 = scmp.lt.s32.totalorder %s50_s21, %s50_s21 }
  0x1c   :  { %p14557_p11 = scmp.ne.s32.totalorder %s50_s21, %s14556_s30  ;;  %p14562_p13 = scmp.lt.s32.totalorder %s14556_s30, %s14556_s30 }
  0x1e   :  { %p14563_p0 = por %p14562_p13, %p14561_p12 }
  0x20   :  { %p14564_p1 = pnand %p14563_p0, %p14557_p11 }
  0x22   :  { %14567 = shalt.err (!%p14564_p1)
}
  0x23   :  { %55 = dma.hbm_to_vmem [thread:$0]  %s18840_s5, 4096, %s50_s21, [#allocation8], %s14573_s0, %s14573_s0, %s14574_s17  }
  0x24   :  { %14568 = dma.done.wait [#allocation6], 4096  }
  0x25   :  { %14569 = vsyncadd [#allocation6], 4294963200 }
  0x26   :  { %14570 = dma.done.wait [#allocation8], 4096  }
  0x27   :  { %14571 = vsyncadd [#allocation8], 4294963200  ;;  %v18857_v0 = vmov 0   ;;  %v13131_v1 = vld [vmem:[%s18837_s2 + $0x4] ss:$16 sps:$4 sm:$0xff]   ;;  %s18991_s3 = sld [smem:[#allocation78_spill]] }
  0x28   :  { %317 = vmatprep.mubr.bf16.mxu0 %v18857_v0  ;;  %390 = vmatprep.mubr.bf16.mxu1 %v18857_v0  ;;  %v13133_v2 = vld [vmem:[%s18837_s2 + $0xc] ss:$16 sps:$4 sm:$0xff]   ;;  %v13135_v3 = vld [vmem:[%s18837_s2] ss:$16 sps:$4 sm:$0xff]   ;;  %v13136_v4 = vld [vmem:[%s18837_s2 + $0x8] ss:$16 sps:$4 sm:$0xff]  }
  0x29   :  { %285 = vmatprep.subr.bf16.mxu0 %v13131_v1  ;;  %358 = vmatprep.subr.bf16.mxu1 %v13133_v2  ;;  %v13137_v5 = vld [vmem:[%s18837_s2 + $0x24] ss:$16 sps:$4 sm:$0xff]   ;;  %v13139_v6 = vld [vmem:[%s18837_s2 + $0x2c] ss:$16 sps:$4 sm:$0xff]   ;;  %v13141_v7 = vld [vmem:[%s18837_s2 + $0x20] ss:$16 sps:$4 sm:$0xff]  }
  0x2a   :  { %286 = vmatpush1.bf16.msra.mxu0 %v13135_v3  ;;  %359 = vmatpush1.bf16.msra.mxu1 %v13136_v4  ;;  %v13142_v8 = vld [vmem:[%s18837_s2 + $0x28] ss:$16 sps:$4 sm:$0xff]   ;;  %v13143_v9 = vld [vmem:[%s18837_s2 + $0x44] ss:$16 sps:$4 sm:$0xff]   ;;  %v13145_v10 = vld [vmem:[%s18837_s2 + $0x4c] ss:$16 sps:$4 sm:$0xff]  }
  0x2b   :  { %287 = vmatprep.subr.bf16.mxu0 %v13137_v5  ;;  %360 = vmatprep.subr.bf16.mxu1 %v13139_v6  ;;  %v13147_v11 = vld [vmem:[%s18837_s2 + $0x40] ss:$16 sps:$4 sm:$0xff]   ;;  %v13148_v12 = vld [vmem:[%s18837_s2 + $0x48] ss:$16 sps:$4 sm:$0xff]   ;;  %v13149_v13 = vld [vmem:[%s18837_s2 + $0x64] ss:$16 sps:$4 sm:$0xff]  }
  0x2c   :  { %v13151_v14 = vld [vmem:[%s18837_s2 + $0x6c] ss:$16 sps:$4 sm:$0xff]   ;;  %v13153_v15 = vld [vmem:[%s18837_s2 + $0x60] ss:$16 sps:$4 sm:$0xff]   ;;  %v13154_v16 = vld [vmem:[%s18837_s2 + $0x68] ss:$16 sps:$4 sm:$0xff]  }
  0x2d   :  { %v13155_v17 = vld [vmem:[%s18837_s2 + $0x84] ss:$16 sps:$4 sm:$0xff]   ;;  %v13157_v18 = vld [vmem:[%s18837_s2 + $0x8c] ss:$16 sps:$4 sm:$0xff]   ;;  %v13159_v19 = vld [vmem:[%s18837_s2 + $0x80] ss:$16 sps:$4 sm:$0xff]  }
  0x2e   :  { %288 = vmatpush1.bf16.msra.mxu0 %v13141_v7  ;;  %361 = vmatpush1.bf16.msra.mxu1 %v13142_v8  ;;  %v13160_v20 = vld [vmem:[%s18837_s2 + $0x88] ss:$16 sps:$4 sm:$0xff]   ;;  %v13161_v21 = vld [vmem:[%s18837_s2 + $0xa4] ss:$16 sps:$4 sm:$0xff]   ;;  %v13163_v22 = vld [vmem:[%s18837_s2 + $0xac] ss:$16 sps:$4 sm:$0xff]  }
  0x2f   :  { %289 = vmatprep.subr.bf16.mxu0 %v13143_v9  ;;  %362 = vmatprep.subr.bf16.mxu1 %v13145_v10  ;;  %v13165_v23 = vld [vmem:[%s18837_s2 + $0xa0] ss:$16 sps:$4 sm:$0xff]   ;;  %v13166_v24 = vld [vmem:[%s18837_s2 + $0xa8] ss:$16 sps:$4 sm:$0xff]   ;;  %v13167_v25 = vld [vmem:[%s18837_s2 + $0xc4] ss:$16 sps:$4 sm:$0xff]  }
  0x30   :  { %v13169_v26 = vld [vmem:[%s18837_s2 + $0xcc] ss:$16 sps:$4 sm:$0xff]   ;;  %v13171_v27 = vld [vmem:[%s18837_s2 + $0xc0] ss:$16 sps:$4 sm:$0xff]   ;;  %v13172_v28 = vld [vmem:[%s18837_s2 + $0xc8] ss:$16 sps:$4 sm:$0xff]  }
  0x31   :  { %v13173_v29 = vld [vmem:[%s18837_s2 + $0xe4] ss:$16 sps:$4 sm:$0xff]   ;;  %v13175_v30 = vld [vmem:[%s18837_s2 + $0xec] ss:$16 sps:$4 sm:$0xff]   ;;  %v13177_v31 = vld [vmem:[%s18837_s2 + $0xe0] ss:$16 sps:$4 sm:$0xff]  }
  0x32   :  { %290 = vmatpush1.bf16.msra.mxu0 %v13147_v11  ;;  %363 = vmatpush1.bf16.msra.mxu1 %v13148_v12  ;;  %v13178_v32 = vld [vmem:[%s18837_s2 + $0xe8] ss:$16 sps:$4 sm:$0xff]   ;;  %v81_v33 = vld [vmem:[%s18991_s3] sm:$0xff]  ;;  %v14794_v36 = vld [vmem:[#allocation5 + $0xc] ss:$16 sps:$4 sm:$0xff]   ;;  %vm14578_vm0 = vmmov 0  }
  0x33   :  { %291 = vmatprep.subr.bf16.mxu0 %v13149_v13  ;;  %364 = vmatprep.subr.bf16.mxu1 %v13151_v14  ;;  %v82_v34 = vld [vmem:[%s18991_s3 + $0x8] sm:$0xff]  ;;  %v14792_v35 = vld [vmem:[#allocation5 + $0x4] ss:$16 sps:$4 sm:$0xff]   ;;  %v14796_v38 = vld [vmem:[#allocation5] ss:$16 sps:$4 sm:$0xff]   ;;  %v433_v14 = vlaneseq }
  0x34   :  { %v89_v37 = vpack.c.bf16 %v82_v34, %v81_v33  ;;  %v14798_v39 = vld [vmem:[#allocation5 + $0x8] ss:$16 sps:$4 sm:$0xff]   ;;  %v14802_v40 = vld [vmem:[#allocation5 + $0x24] ss:$16 sps:$4 sm:$0xff]   ;;  %v14804_v41 = vld [vmem:[#allocation5 + $0x2c] ss:$16 sps:$4 sm:$0xff]  }
  0x35   :  { %v14806_v42 = vld [vmem:[#allocation5 + $0x20] ss:$16 sps:$4 sm:$0xff]   ;;  %v14808_v43 = vld [vmem:[#allocation5 + $0x28] ss:$16 sps:$4 sm:$0xff]   ;;  %v14820_v46 = vld [vmem:[#allocation5 + $0x44] ss:$16 sps:$4 sm:$0xff]  }
  0x36   :  { %292 = vmatpush1.bf16.msra.mxu0 %v13153_v15  ;;  %365 = vmatpush1.bf16.msra.mxu1 %v13154_v16  ;;  %v83_v44 = vld [vmem:[%s18991_s3 + $0x10] sm:$0xff]  ;;  %v84_v45 = vld [vmem:[%s18991_s3 + $0x18] sm:$0xff]  ;;  %v85_v55 = vld [vmem:[%s18991_s3 + $0x20] sm:$0xff]  ;;  %v14912_v15 = vshrl.u32 %v433_v14, 7 }
  0x37   :  { %293 = vmatprep.subr.bf16.mxu0 %v13155_v17  ;;  %366 = vmatprep.subr.bf16.mxu1 %v13157_v18  ;;  %v14822_v47 = vld [vmem:[#allocation5 + $0x4c] ss:$16 sps:$4 sm:$0xff]   ;;  %v90_v48 = vpack.c.bf16 %v84_v45, %v83_v44  ;;  %v14826_v49 = vld [vmem:[#allocation5 + $0x40] ss:$16 sps:$4 sm:$0xff]   ;;  %v14828_v50 = vld [vmem:[#allocation5 + $0x48] ss:$16 sps:$4 sm:$0xff]  }
  0x38   :  { %v14832_v51 = vld [vmem:[#allocation5 + $0x64] ss:$16 sps:$4 sm:$0xff]   ;;  %v14836_v52 = vld [vmem:[#allocation5 + $0x6c] ss:$16 sps:$4 sm:$0xff]   ;;  %v14838_v53 = vld [vmem:[#allocation5 + $0x60] ss:$16 sps:$4 sm:$0xff]  }
  0x39   :  { %v14840_v54 = vld [vmem:[#allocation5 + $0x68] ss:$16 sps:$4 sm:$0xff]   ;;  %v14850_v57 = vld [vmem:[#allocation5 + $0x84] ss:$16 sps:$4 sm:$0xff]   ;;  %v14854_v58 = vld [vmem:[#allocation5 + $0x8c] ss:$16 sps:$4 sm:$0xff]  }
  0x3a   :  { %294 = vmatpush1.bf16.msra.mxu0 %v13159_v19  ;;  %367 = vmatpush1.bf16.msra.mxu1 %v13160_v20  ;;  %v86_v56 = vld [vmem:[%s18991_s3 + $0x28] sm:$0xff]  ;;  %v14858_v59 = vld [vmem:[#allocation5 + $0x80] ss:$16 sps:$4 sm:$0xff]   ;;  %v14862_v62 = vld [vmem:[#allocation5 + $0xa4] ss:$16 sps:$4 sm:$0xff]   ;;  %18992 = vst [vmem:[#allocation11_spill] sm:$0xff] %v14912_v15 }
  0x3b   :  { %295 = vmatprep.subr.bf16.mxu0 %v13161_v21  ;;  %368 = vmatprep.subr.bf16.mxu1 %v13163_v22  ;;  %v14860_v60 = vld [vmem:[#allocation5 + $0x88] ss:$16 sps:$4 sm:$0xff]   ;;  %v91_v61 = vpack.c.bf16 %v86_v56, %v85_v55  ;;  %v14864_v63 = vld [vmem:[#allocation5 + $0xac] ss:$16 sps:$4 sm:$0xff]   ;;  %v13209_v1 = vld [vmem:[#allocation5 + $0xa0] ss:$16 sps:$4 sm:$0xff]  }
  0x3c   :  { %v13212_v2 = vld [vmem:[#allocation5 + $0xa8] ss:$16 sps:$4 sm:$0xff]   ;;  %v87_v3 = vld [vmem:[%s18991_s3 + $0x30] sm:$0xff]  ;;  %v13220_v6 = vld [vmem:[#allocation5 + $0xcc] ss:$16 sps:$4 sm:$0xff]   ;;  %v18853_v16 = vsub.s32 2, %v14912_v15 }
  0x3d   :  { %v88_v4 = vld [vmem:[%s18991_s3 + $0x38] sm:$0xff]  ;;  %v13217_v5 = vld [vmem:[#allocation5 + $0xc4] ss:$16 sps:$4 sm:$0xff]   ;;  %v13215_v7 = vld [vmem:[#allocation5 + $0xc0] ss:$16 sps:$4 sm:$0xff]   ;;  %v18856_v18 = vsub.s32 0, %v14912_v15 }
  0x3e   :  { %296 = vmatpush1.bf16.msra.mxu0 %v13165_v23  ;;  %369 = vmatpush1.bf16.msra.mxu1 %v13166_v24  ;;  %v13218_v8 = vld [vmem:[#allocation5 + $0xc8] ss:$16 sps:$4 sm:$0xff]   ;;  %v92_v9 = vpack.c.bf16 %v88_v4, %v87_v3  ;;  %v13223_v10 = vld [vmem:[#allocation5 + $0xe4] ss:$16 sps:$4 sm:$0xff]   ;;  %v13226_v11 = vld [vmem:[#allocation5 + $0xec] ss:$16 sps:$4 sm:$0xff]  }
  0x3f   :  { %297 = vmatprep.subr.bf16.mxu0 %v13167_v25  ;;  %370 = vmatprep.subr.bf16.mxu1 %v13169_v26  ;;  %v13221_v12 = vld [vmem:[#allocation5 + $0xe0] ss:$16 sps:$4 sm:$0xff]   ;;  %v13224_v13 = vld [vmem:[#allocation5 + $0xe8] ss:$16 sps:$4 sm:$0xff]   ;;  %v18854_v19 = vsub.s32 3, %v14912_v15  ;;  %v18855_v20 = vsub.s32 1, %v14912_v15 }
  0x40   :  { %v431_v17 = vld [vmem:[%s18839_s4] sm:$0xf] }
  0x41   :  { %v14923_v21 = vrot.slane %v431_v17, %v18853_v16  ;;  %v14931_v24 = vrot.slane %v431_v17, %v18854_v19  ;;  %v436_v25 = vrot.slane %v431_v17, %v18856_v18  ;;  %v15106_v16 = vld [vmem:[#allocation5 + $0xe8] ss:$16 sps:$4 sm:$0xff]   ;;  %v14513_v19 = vld [vmem:[#allocation5 + $0x4] ss:$16 sps:$4 sm:$0xff]  }
  0x42   :  { %298 = vmatpush1.bf16.msra.mxu0 %v13171_v27  ;;  %371 = vmatpush1.bf16.msra.mxu1 %v13172_v28  ;;  %v440_v28 = vrot.slane %v431_v17, %v18855_v20  ;;  %v14514_v20 = vld [vmem:[#allocation5 + $0xc] ss:$16 sps:$4 sm:$0xff]  }
  0x43   :  { %299 = vmatprep.subr.bf16.mxu0 %v13173_v29  ;;  %372 = vmatprep.subr.bf16.mxu1 %v13175_v30 }
  0x46   :  { %300 = vmatpush1.bf16.msra.mxu0 %v13177_v31  ;;  %373 = vmatpush1.bf16.msra.mxu1 %v13178_v32 }
  0x47   :  { %713 = vmatprep.subr.bf16.mxu0 %v14792_v35  ;;  %754 = vmatprep.subr.bf16.mxu1 %v14794_v36 }
  0x49   :  { %318 = vmatmul.mubr.bf16.vlgmr.msra.gmra.mrb[0].mxu0 %v89_v37  ;;  %391 = vmatmul.mubr.bf16.vlgmr.msra.gmra.mrb[0].mxu1 %v89_v37 }
  0x4a   :  { %714 = vmatpush1.bf16.msra.mxu0 %v14796_v38  ;;  %755 = vmatpush1.bf16.msra.mxu1 %v14798_v39 }
  0x4b   :  { %715 = vmatprep.subr.bf16.mxu0 %v14802_v40  ;;  %756 = vmatprep.subr.bf16.mxu1 %v14804_v41 }
  0x4c   :  { %327 = vmatprep.mubr.bf16.mxu0 %v18857_v0  ;;  %400 = vmatprep.mubr.bf16.mxu1 %v18857_v0 }
  0x4e   :  { %716 = vmatpush1.bf16.msra.mxu0 %v14806_v42  ;;  %757 = vmatpush1.bf16.msra.mxu1 %v14808_v43 }
  0x4f   :  { %717 = vmatprep.subr.bf16.mxu0 %v14820_v46  ;;  %758 = vmatprep.subr.bf16.mxu1 %v14822_v47 }
  0x51   :  { %328 = vmatmul.mubr.bf16.gmra.mrb[4].mxu0 %v90_v48  ;;  %401 = vmatmul.mubr.bf16.gmra.mrb[4].mxu1 %v90_v48 }
  0x52   :  { %718 = vmatpush1.bf16.msra.mxu0 %v14826_v49  ;;  %759 = vmatpush1.bf16.msra.mxu1 %v14828_v50 }
  0x53   :  { %719 = vmatprep.subr.bf16.mxu0 %v14832_v51  ;;  %760 = vmatprep.subr.bf16.mxu1 %v14836_v52 }
  0x54   :  { %337 = vmatprep.mubr.bf16.mxu0 %v18857_v0  ;;  %410 = vmatprep.mubr.bf16.mxu1 %v18857_v0 }
  0x56   :  { %720 = vmatpush1.bf16.msra.mxu0 %v14838_v53  ;;  %761 = vmatpush1.bf16.msra.mxu1 %v14840_v54 }
  0x57   :  { %721 = vmatprep.subr.bf16.mxu0 %v14850_v57  ;;  %762 = vmatprep.subr.bf16.mxu1 %v14854_v58 }
  0x59   :  { %338 = vmatmul.mubr.bf16.gmra.mrb[8].mxu0 %v91_v61  ;;  %411 = vmatmul.mubr.bf16.gmra.mrb[8].mxu1 %v91_v61 }
  0x5a   :  { %722 = vmatpush1.bf16.msra.mxu0 %v14858_v59  ;;  %763 = vmatpush1.bf16.msra.mxu1 %v14860_v60 }
  0x5b   :  { %723 = vmatprep.subr.bf16.mxu0 %v14862_v62  ;;  %764 = vmatprep.subr.bf16.mxu1 %v14864_v63 }
  0x5c   :  { %347 = vmatprep.mubr.bf16.mxu0 %v18857_v0  ;;  %420 = vmatprep.mubr.bf16.mxu1 %v18857_v0 }
  0x5e   :  { %724 = vmatpush1.bf16.msra.mxu0 %v13209_v1  ;;  %765 = vmatpush1.bf16.msra.mxu1 %v13212_v2 }
  0x5f   :  { %725 = vmatprep.subr.bf16.mxu0 %v13217_v5  ;;  %766 = vmatprep.subr.bf16.mxu1 %v13220_v6 }
  0x61   :  { %348 = vmatmul.mubr.bf16.gmra.mrb[12].mxu0 %v92_v9  ;;  %421 = vmatmul.mubr.bf16.gmra.mrb[12].mxu1 %v92_v9 }
  0x62   :  { %726 = vmatpush1.bf16.msra.mxu0 %v13215_v7  ;;  %767 = vmatpush1.bf16.msra.mxu1 %v13218_v8 }
  0x63   :  { %727 = vmatprep.subr.bf16.mxu0 %v13223_v10  ;;  %768 = vmatprep.subr.bf16.mxu1 %v13226_v11 }
  0x64   :  { %745 = vmatprep.mubr.bf16.mxu0 %v18857_v0  ;;  %786 = vmatprep.mubr.bf16.mxu1 %v18857_v0 }
  0x66   :  { %728 = vmatpush1.bf16.msra.mxu0 %v13221_v12  ;;  %769 = vmatpush1.bf16.msra.mxu1 %v13224_v13 }
  0x67   :  { %1022 = vmatprep.subr.bf16.mxu0 %v14792_v35  ;;  %1063 = vmatprep.subr.bf16.mxu1 %v14794_v36 }
  0x69   :  { %746 = vmatmul.mubr.bf16.vlgmr.msra.gmra.mrb[16].mxu0 %v18857_v0  ;;  %787 = vmatmul.mubr.bf16.vlgmr.msra.gmra.mrb[16].mxu1 %v18857_v0 }
  0x6a   :  { %1023 = vmatpush1.bf16.msra.mxu0 %v14796_v38  ;;  %1064 = vmatpush1.bf16.msra.mxu1 %v14798_v39 }
  0x6b   :  { %1024 = vmatprep.subr.bf16.mxu0 %v14802_v40  ;;  %1065 = vmatprep.subr.bf16.mxu1 %v14804_v41 }
  0x6c   :  { %1054 = vmatprep.mubr.bf16.mxu0 %v18857_v0  ;;  %1095 = vmatprep.mubr.bf16.mxu1 %v18857_v0 }
  0x6e   :  { %1025 = vmatpush1.bf16.msra.mxu0 %v14806_v42  ;;  %1066 = vmatpush1.bf16.msra.mxu1 %v14808_v43 }
  0x6f   :  { %1026 = vmatprep.subr.bf16.mxu0 %v14820_v46  ;;  %1067 = vmatprep.subr.bf16.mxu1 %v14822_v47 }
  0x72   :  { %1027 = vmatpush1.bf16.msra.mxu0 %v14826_v49  ;;  %1068 = vmatpush1.bf16.msra.mxu1 %v14828_v50 }
  0x73   :  { %1028 = vmatprep.subr.bf16.mxu0 %v14832_v51  ;;  %1069 = vmatprep.subr.bf16.mxu1 %v14836_v52 }
  0x76   :  { %1029 = vmatpush1.bf16.msra.mxu0 %v14838_v53  ;;  %1070 = vmatpush1.bf16.msra.mxu1 %v14840_v54 }
  0x77   :  { %1030 = vmatprep.subr.bf16.mxu0 %v14850_v57  ;;  %1071 = vmatprep.subr.bf16.mxu1 %v14854_v58 }
  0x7a   :  { %1031 = vmatpush1.bf16.msra.mxu0 %v14858_v59  ;;  %1072 = vmatpush1.bf16.msra.mxu1 %v14860_v60 }
  0x7b   :  { %1032 = vmatprep.subr.bf16.mxu0 %v14862_v62  ;;  %1073 = vmatprep.subr.bf16.mxu1 %v14864_v63 }
  0x7e   :  { %1033 = vmatpush1.bf16.msra.mxu0 %v13209_v1  ;;  %1074 = vmatpush1.bf16.msra.mxu1 %v13212_v2 }
  0x7f   :  { %1034 = vmatprep.subr.bf16.mxu0 %v13217_v5  ;;  %1075 = vmatprep.subr.bf16.mxu1 %v13220_v6 }
  0x82   :  { %1035 = vmatpush1.bf16.msra.mxu0 %v13215_v7  ;;  %1076 = vmatpush1.bf16.msra.mxu1 %v13218_v8 }
  0x83   :  { %1036 = vmatprep.subr.bf16.mxu0 %v13223_v10  ;;  %1077 = vmatprep.subr.bf16.mxu1 %v13226_v11 }
  0x86   :  { %1037 = vmatpush1.bf16.msra.mxu0 %v13221_v12  ;;  %1078 = vmatpush1.bf16.msra.mxu1 %v13224_v13 }
  0x87   :  { %1332 = vmatprep.subr.bf16.mxu0 %v14792_v35  ;;  %1373 = vmatprep.subr.bf16.mxu1 %v14794_v36 }
 0x11c   :  { %v14925_v22 = vpop.f32.mrb[0].mxu0  ;;  %v14927_v23 = vpop.f32.mrb[0].mxu1 }
 0x11d   :  { %v321_v26 = vpop.f32.mrb[1].mxu0  ;;  %v394_v27 = vpop.f32.mrb[1].mxu1 }
 0x11e   :  { %v323_v29 = vpop.f32.mrb[2].mxu0  ;;  %v396_v30 = vpop.f32.mrb[2].mxu1 }
 0x11f   :  { %v14937_v31 = vadd.f32 %v436_v25, %v323_v29  ;;  %v325_v32 = vpop.f32.mrb[3].mxu0  ;;  %v14940_v33 = vadd.f32 %v14923_v21, %v396_v30  ;;  %v398_v34 = vpop.f32.mrb[3].mxu1 }
 0x120   :  { %v14942_v35 = vadd.f32 %v440_v28, %v325_v32  ;;  %v14945_v36 = vadd.f32 %v14931_v24, %v398_v34 }
 0x124   :  { %v329_v37 = vpop.f32.mrb[4].mxu0  ;;  %v402_v38 = vpop.f32.mrb[4].mxu1 }
 0x125   :  { %v14947_v39 = vadd.f32 %v436_v25, %v329_v37  ;;  %v331_v40 = vpop.f32.mrb[5].mxu0  ;;  %v14950_v41 = vadd.f32 %v14923_v21, %v402_v38  ;;  %v404_v42 = vpop.f32.mrb[5].mxu1 }
 0x126   :  { %v14952_v43 = vadd.f32 %v440_v28, %v331_v40  ;;  %v333_v44 = vpop.f32.mrb[6].mxu0  ;;  %v14955_v45 = vadd.f32 %v14931_v24, %v404_v42  ;;  %v406_v46 = vpop.f32.mrb[6].mxu1  ;;  %v453_v40 = vadd.f32 %v436_v25, %v14925_v22  ;;  %v455_v42 = vadd.f32 %v14923_v21, %v14927_v23 }
 0x127   :  { %v14957_v47 = vadd.f32 %v436_v25, %v333_v44  ;;  %v335_v48 = vpop.f32.mrb[7].mxu0  ;;  %v14960_v49 = vadd.f32 %v14923_v21, %v406_v46  ;;  %v408_v50 = vpop.f32.mrb[7].mxu1  ;;  %v454_v44 = vadd.f32 %v440_v28, %v321_v26  ;;  %v456_v46 = vadd.f32 %v14931_v24, %v394_v27 }
 0x128   :  { %v14962_v51 = vadd.f32 %v440_v28, %v335_v48  ;;  %v14965_v52 = vadd.f32 %v14931_v24, %v408_v50 }
 0x12c   :  { %v339_v53 = vpop.f32.mrb[8].mxu0  ;;  %v412_v54 = vpop.f32.mrb[8].mxu1 }
 0x12d   :  { %v14967_v55 = vadd.f32 %v436_v25, %v339_v53  ;;  %v341_v56 = vpop.f32.mrb[9].mxu0  ;;  %v14970_v57 = vadd.f32 %v14923_v21, %v412_v54  ;;  %v414_v58 = vpop.f32.mrb[9].mxu1 }
 0x12e   :  { %v14972_v59 = vadd.f32 %v440_v28, %v341_v56  ;;  %v343_v60 = vpop.f32.mrb[10].mxu0  ;;  %v14975_v61 = vadd.f32 %v14931_v24, %v414_v58  ;;  %v416_v62 = vpop.f32.mrb[10].mxu1 }
 0x12f   :  { %v14977_v63 = vadd.f32 %v436_v25, %v343_v60  ;;  %v345_v1 = vpop.f32.mrb[11].mxu0  ;;  %v14980_v2 = vadd.f32 %v14923_v21, %v416_v62  ;;  %v418_v3 = vpop.f32.mrb[11].mxu1 }
 0x130   :  { %v14982_v4 = vadd.f32 %v440_v28, %v345_v1  ;;  %v14985_v5 = vadd.f32 %v14931_v24, %v418_v3 }
 0x131   :  { %18993 = vst [vmem:[#allocation12_spill] sm:$0xff] %v14977_v63  ;;  %18994 = vst [vmem:[#allocation13_spill] sm:$0xff] %v14980_v2 }
 0x132   :  { %18995 = vst [vmem:[#allocation14_spill] sm:$0xff] %v14982_v4  ;;  %18996 = vst [vmem:[#allocation15_spill] sm:$0xff] %v14985_v5 }
 0x134   :  { %v349_v6 = vpop.f32.mrb[12].mxu0  ;;  %v422_v7 = vpop.f32.mrb[12].mxu1 }
 0x135   :  { %v14987_v8 = vadd.f32 %v436_v25, %v349_v6  ;;  %v351_v9 = vpop.f32.mrb[13].mxu0  ;;  %v14990_v10 = vadd.f32 %v14923_v21, %v422_v7  ;;  %v424_v11 = vpop.f32.mrb[13].mxu1 }
 0x136   :  { %v14992_v12 = vadd.f32 %v440_v28, %v351_v9  ;;  %v353_v13 = vpop.f32.mrb[14].mxu0  ;;  %v14995_v14 = vadd.f32 %v14931_v24, %v424_v11  ;;  %v426_v17 = vpop.f32.mrb[14].mxu1 }
 0x137   :  { %18997 = vst [vmem:[#allocation16_spill] sm:$0xff] %v14987_v8  ;;  %18998 = vst [vmem:[#allocation17_spill] sm:$0xff] %v14990_v10  ;;  %v14997_v29 = vadd.f32 %v436_v25, %v353_v13  ;;  %v355_v30 = vpop.f32.mrb[15].mxu0  ;;  %v15000_v32 = vadd.f32 %v14923_v21, %v426_v17  ;;  %v428_v34 = vpop.f32.mrb[15].mxu1 }
 0x138   :  { %18999 = vst [vmem:[#allocation18_spill] sm:$0xff] %v14992_v12  ;;  %19000 = vst [vmem:[#allocation19_spill] sm:$0xff] %v14995_v14  ;;  %v15002_v37 = vadd.f32 %v440_v28, %v355_v30  ;;  %v15005_v38 = vadd.f32 %v14931_v24, %v428_v34 }
 0x139   :  { %19001 = vst [vmem:[#allocation20_spill] sm:$0xff] %v14997_v29  ;;  %19002 = vst [vmem:[#allocation21_spill] sm:$0xff] %v15000_v32 }
 0x13a   :  { %19003 = vst [vmem:[#allocation22_spill] sm:$0xff] %v15002_v37  ;;  %19004 = vst [vmem:[#allocation23_spill] sm:$0xff] %v15005_v38 }
 0x13c   :  { %v747_v48 = vpop.f32.mrb[16].mxu0  ;;  %v788_v50 = vpop.f32.mrb[16].mxu1 }
 0x13d   :  { %v795_v53 = vadd.f32 %v747_v48, %v453_v40  ;;  %v797_v54 = vadd.f32 %v788_v50, %v455_v42  ;;  %v749_v56 = vpop.f32.mrb[17].mxu0  ;;  %v790_v58 = vpop.f32.mrb[17].mxu1  ;;  %v15017_v50 = vld [vmem:[#allocation5] ss:$16 sps:$4 sm:$0xff]  }
 0x13e   :  { %v796_v60 = vadd.f32 %v749_v56, %v454_v44  ;;  %v798_v62 = vadd.f32 %v790_v58, %v456_v46  ;;  %v751_v1 = vpop.f32.mrb[18].mxu0  ;;  %v792_v3 = vpop.f32.mrb[18].mxu1  ;;  %v15026_v56 = vld [vmem:[#allocation5 + $0x2c] ss:$16 sps:$4 sm:$0xff]   ;;  %v15031_v58 = vld [vmem:[#allocation5 + $0x20] ss:$16 sps:$4 sm:$0xff]  }
 0x13f   :  { %v11611_v6 = vmul.f32 -1.442695, %v795_v53  ;;  %v752_v7 = vpop.f32.mrb[19].mxu0  ;;  %v793_v9 = vpop.f32.mrb[19].mxu1  ;;  %v15020_v53 = vld [vmem:[#allocation5 + $0x8] ss:$16 sps:$4 sm:$0xff]  }
 0x140   :  { %v11612_v22 = vmul.f32 -1.442695, %v796_v60  ;;  %v11613_v21 = vmul.f32 -1.442695, %v798_v62  ;;  %v15034_v60 = vld [vmem:[#allocation5 + $0x28] ss:$16 sps:$4 sm:$0xff]  }
 0x141   :  { %13955 = vpow2.f32 %v11611_v6  ;;  %v15037_v62 = vld [vmem:[#allocation5 + $0x44] ss:$16 sps:$4 sm:$0xff]   ;;  %v15040_v1 = vld [vmem:[#allocation5 + $0x4c] ss:$16 sps:$4 sm:$0xff]   ;;  %v15043_v3 = vld [vmem:[#allocation5 + $0x40] ss:$16 sps:$4 sm:$0xff]  }
 0x142   :  { %13957 = vpow2.f32 %v11612_v22  ;;  %v15046_v6 = vld [vmem:[#allocation5 + $0x48] ss:$16 sps:$4 sm:$0xff]   ;;  %v15049_v7 = vld [vmem:[#allocation5 + $0x64] ss:$16 sps:$4 sm:$0xff]   ;;  %v15052_v9 = vld [vmem:[#allocation5 + $0x6c] ss:$16 sps:$4 sm:$0xff]  }
 0x143   :  { %13959 = vpow2.f32 %v11613_v21  ;;  %v15055_v22 = vld [vmem:[#allocation5 + $0x60] ss:$16 sps:$4 sm:$0xff]   ;;  %v15058_v21 = vld [vmem:[#allocation5 + $0x68] ss:$16 sps:$4 sm:$0xff]  }
 0x144   :  { %13961 = vtanh.f32 %v797_v54  ;;  %v15023_v54 = vld [vmem:[#allocation5 + $0x24] ss:$16 sps:$4 sm:$0xff]  }
 0x14b   :  { %v13956_v23 = vpop.eup %13955 }
 0x14c   :  { %v13958_v25 = vpop.eup %13957  ;;  %v802_v24 = vadd.f32 1.0, %v13956_v23  ;;  %v15061_v23 = vld [vmem:[#allocation5 + $0x84] ss:$16 sps:$4 sm:$0xff]  }
 0x14d   :  { %v808_v26 = vadd.f32 1.0, %v13958_v25  ;;  %v13960_v27 = vpop.eup %13959  ;;  %v15064_v25 = vld [vmem:[#allocation5 + $0x8c] ss:$16 sps:$4 sm:$0xff]  }
 0x14e   :  { %13963 = vrcp.f32 %v802_v24  ;;  %v13962_v28 = vpop.eup %13961  ;;  %v815_v30 = vadd.f32 1.0, %v13960_v27  ;;  %v15067_v24 = vld [vmem:[#allocation5 + $0x80] ss:$16 sps:$4 sm:$0xff]   ;;  %v15073_v27 = vld [vmem:[#allocation5 + $0xa4] ss:$16 sps:$4 sm:$0xff]  }
 0x14f   :  { %13965 = vrcp.f32 %v808_v26  ;;  %v15070_v26 = vld [vmem:[#allocation5 + $0x88] ss:$16 sps:$4 sm:$0xff]  }
 0x150   :  { %13967 = vrcp.f32 %v815_v30  ;;  %v15088_v30 = vld [vmem:[#allocation5 + $0xcc] ss:$16 sps:$4 sm:$0xff]  }
 0x158   :  { %v13964_v11 = vpop.eup %13963 }
 0x159   :  { %v13966_v13 = vpop.eup %13965  ;;  %v819_v17 = vmul.f32 %v13964_v11, %v13962_v28  ;;  %v15076_v28 = vld [vmem:[#allocation5 + $0xac] ss:$16 sps:$4 sm:$0xff]   ;;  %v15079_v11 = vld [vmem:[#allocation5 + $0xa0] ss:$16 sps:$4 sm:$0xff]  }
 0x15a   :  { %v818_v34 = vmul.f32 0.0, %v13966_v13  ;;  %v13968_v42 = vpop.eup %13967  ;;  %v15082_v13 = vld [vmem:[#allocation5 + $0xa8] ss:$16 sps:$4 sm:$0xff]  }
 0x15c   :  { %v15011_v40 = vadd.f32 %v819_v17, %v818_v34  ;;  %v15085_v17 = vld [vmem:[#allocation5 + $0xc4] ss:$16 sps:$4 sm:$0xff]   ;;  %v15091_v34 = vld [vmem:[#allocation5 + $0xc0] ss:$16 sps:$4 sm:$0xff]  }
 0x15e   :  { %13969 = vtanh.f32 %v15011_v40 }
 0x168   :  { %v13970_v44 = vpop.eup %13969 }
 0x169   :  { %v822_v46 = vmul.f32 %v13970_v44, %v13968_v42  ;;  %v15094_v42 = vld [vmem:[#allocation5 + $0xc8] ss:$16 sps:$4 sm:$0xff]   ;;  %v15097_v44 = vld [vmem:[#allocation5 + $0xe4] ss:$16 sps:$4 sm:$0xff]  }
 0x16b   :  { %823 = vst [vmem:[%s18850_s15] sm:$0xff] %v822_v46  ;;  %v829_v48 = vpack.c.bf16 %v822_v46, %v822_v46  ;;  %v15100_v46 = vld [vmem:[#allocation5 + $0xec] ss:$16 sps:$4 sm:$0xff]  }
 0x16d   :  { %1055 = vmatmul.mubr.bf16.vlgmr.msra.gmra.mrb[20].mxu0 %v829_v48  ;;  %1096 = vmatmul.mubr.bf16.vlgmr.msra.gmra.mrb[20].mxu1 %v829_v48  ;;  %v15103_v48 = vld [vmem:[#allocation5 + $0xe0] ss:$16 sps:$4 sm:$0xff]  }
 0x16e   :  { %1333 = vmatpush1.bf16.msra.mxu0 %v15017_v50  ;;  %1374 = vmatpush1.bf16.msra.mxu1 %v15020_v53 }
 0x16f   :  { %1334 = vmatprep.subr.bf16.mxu0 %v15023_v54  ;;  %1375 = vmatprep.subr.bf16.mxu1 %v15026_v56 }
 0x170   :  { %1364 = vmatprep.mubr.bf16.mxu0 %v18857_v0  ;;  %1405 = vmatprep.mubr.bf16.mxu1 %v18857_v0 }
 0x172   :  { %1335 = vmatpush1.bf16.msra.mxu0 %v15031_v58  ;;  %1376 = vmatpush1.bf16.msra.mxu1 %v15034_v60 }
 0x173   :  { %1336 = vmatprep.subr.bf16.mxu0 %v15037_v62  ;;  %1377 = vmatprep.subr.bf16.mxu1 %v15040_v1 }
 0x176   :  { %1337 = vmatpush1.bf16.msra.mxu0 %v15043_v3  ;;  %1378 = vmatpush1.bf16.msra.mxu1 %v15046_v6 }
 0x177   :  { %1338 = vmatprep.subr.bf16.mxu0 %v15049_v7  ;;  %1379 = vmatprep.subr.bf16.mxu1 %v15052_v9 }
 0x17a   :  { %1339 = vmatpush1.bf16.msra.mxu0 %v15055_v22  ;;  %1380 = vmatpush1.bf16.msra.mxu1 %v15058_v21 }
 0x17b   :  { %1340 = vmatprep.subr.bf16.mxu0 %v15061_v23  ;;  %1381 = vmatprep.subr.bf16.mxu1 %v15064_v25 }
 0x17e   :  { %1341 = vmatpush1.bf16.msra.mxu0 %v15067_v24  ;;  %1382 = vmatpush1.bf16.msra.mxu1 %v15070_v26 }
 0x17f   :  { %1342 = vmatprep.subr.bf16.mxu0 %v15073_v27  ;;  %1383 = vmatprep.subr.bf16.mxu1 %v15076_v28 }
 0x182   :  { %1343 = vmatpush1.bf16.msra.mxu0 %v15079_v11  ;;  %1384 = vmatpush1.bf16.msra.mxu1 %v15082_v13 }
 0x183   :  { %1344 = vmatprep.subr.bf16.mxu0 %v15085_v17  ;;  %1385 = vmatprep.subr.bf16.mxu1 %v15088_v30 }
 0x186   :  { %1345 = vmatpush1.bf16.msra.mxu0 %v15091_v34  ;;  %1386 = vmatpush1.bf16.msra.mxu1 %v15094_v42 }
 0x187   :  { %1346 = vmatprep.subr.bf16.mxu0 %v15097_v44  ;;  %1387 = vmatprep.subr.bf16.mxu1 %v15100_v46 }
 0x18a   :  { %1347 = vmatpush1.bf16.msra.mxu0 %v15103_v48  ;;  %1388 = vmatpush1.bf16.msra.mxu1 %v15106_v16 }
 0x18b   :  { %1642 = vmatprep.subr.bf16.mxu0 %v14513_v19  ;;  %1683 = vmatprep.subr.bf16.mxu1 %v14514_v20 }
 0x240   :  { %v1056_v18 = vpop.f32.mrb[20].mxu0  ;;  %v1097_v0 = vpop.f32.mrb[20].mxu1 }
 0x241   :  { %v1104_v15 = vadd.f32 %v1056_v18, %v14937_v31  ;;  %v1106_v38 = vadd.f32 %v1097_v0, %v14940_v33  ;;  %v1058_v37 = vpop.f32.mrb[21].mxu0  ;;  %v1099_v32 = vpop.f32.mrb[21].mxu1 }
 0x242   :  { %v1105_v29 = vadd.f32 %v1058_v37, %v14942_v35  ;;  %v1107_v14 = vadd.f32 %v1099_v32, %v14945_v36  ;;  %v1060_v12 = vpop.f32.mrb[22].mxu0  ;;  %v1101_v10 = vpop.f32.mrb[22].mxu1 }
 0x243   :  { %v11646_v8 = vmul.f32 -1.442695, %v1104_v15  ;;  %v1061_v5 = vpop.f32.mrb[23].mxu0  ;;  %v1102_v4 = vpop.f32.mrb[23].mxu1 }
 0x244   :  { %v11647_v19 = vmul.f32 -1.442695, %v1105_v29  ;;  %v11648_v20 = vmul.f32 -1.442695, %v1107_v14  ;;  %v19005_v14 = vmov 0  }
 0x245   :  { %13971 = vpow2.f32 %v11646_v8 }
 0x246   :  { %13973 = vpow2.f32 %v11647_v19  ;;  %v15189_v19 = vld [vmem:[#allocation5 + $0x44] ss:$16 sps:$4 sm:$0xff]  }
 0x247   :  { %13975 = vpow2.f32 %v11648_v20  ;;  %v15191_v20 = vld [vmem:[#allocation5 + $0x4c] ss:$16 sps:$4 sm:$0xff]  }
 0x248   :  { %13977 = vtanh.f32 %v1106_v38 }
 0x24f   :  { %v13972_v2 = vpop.eup %13971 }
 0x250   :  { %v13974_v63 = vpop.eup %13973  ;;  %v1111_v18 = vadd.f32 1.0, %v13972_v2 }
 0x251   :  { %v1117_v0 = vadd.f32 1.0, %v13974_v63  ;;  %v13976_v31 = vpop.eup %13975 }
 0x252   :  { %13979 = vrcp.f32 %v1111_v18  ;;  %v13978_v33 = vpop.eup %13977  ;;  %v1124_v15 = vadd.f32 1.0, %v13976_v31  ;;  %v15193_v18 = vld [vmem:[#allocation5 + $0x40] ss:$16 sps:$4 sm:$0xff]   ;;  %v15201_v31 = vld [vmem:[#allocation5 + $0x64] ss:$16 sps:$4 sm:$0xff]  }
 0x253   :  { %13981 = vrcp.f32 %v1117_v0  ;;  %v15195_v0 = vld [vmem:[#allocation5 + $0x48] ss:$16 sps:$4 sm:$0xff]  }
 0x254   :  { %13983 = vrcp.f32 %v1124_v15  ;;  %v15215_v15 = vld [vmem:[#allocation5 + $0x8c] ss:$16 sps:$4 sm:$0xff]  }
 0x25c   :  { %v13980_v35 = vpop.eup %13979 }
 0x25d   :  { %v13982_v36 = vpop.eup %13981  ;;  %v1128_v10 = vmul.f32 %v13980_v35, %v13978_v33  ;;  %v15203_v33 = vld [vmem:[#allocation5 + $0x6c] ss:$16 sps:$4 sm:$0xff]   ;;  %v15205_v35 = vld [vmem:[#allocation5 + $0x60] ss:$16 sps:$4 sm:$0xff]  }
 0x25e   :  { %v1127_v4 = vmul.f32 %v13982_v36, %v15011_v40  ;;  %v13984_v8 = vpop.eup %13983  ;;  %v15207_v36 = vld [vmem:[#allocation5 + $0x68] ss:$16 sps:$4 sm:$0xff]  }
 0x260   :  { %v15114_v5 = vadd.f32 %v1128_v10, %v1127_v4  ;;  %v15213_v10 = vld [vmem:[#allocation5 + $0x84] ss:$16 sps:$4 sm:$0xff]   ;;  %v15217_v4 = vld [vmem:[#allocation5 + $0x80] ss:$16 sps:$4 sm:$0xff]  }
 0x262   :  { %13985 = vtanh.f32 %v15114_v5 }
 0x26c   :  { %v13986_v2 = vpop.eup %13985 }
 0x26d   :  { %v1131_v12 = vmul.f32 %v13986_v2, %v13984_v8  ;;  %v15223_v8 = vld [vmem:[#allocation5 + $0xa4] ss:$16 sps:$4 sm:$0xff]   ;;  %v15227_v2 = vld [vmem:[#allocation5 + $0xa0] ss:$16 sps:$4 sm:$0xff]  }
 0x26f   :  { %11649 = vst [vmem:[%s18850_s15 + $0x8] sm:$0xff] %v1131_v12  ;;  %v1139_v63 = vpack.c.bf16 %v1131_v12, %v1131_v12  ;;  %v15229_v12 = vld [vmem:[#allocation5 + $0xa8] ss:$16 sps:$4 sm:$0xff]  }
 0x271   :  { %1365 = vmatmul.mubr.bf16.vlgmr.msra.gmra.mrb[24].mxu0 %v1139_v63  ;;  %1406 = vmatmul.mubr.bf16.vlgmr.msra.gmra.mrb[24].mxu1 %v1139_v63  ;;  %v15231_v63 = vld [vmem:[#allocation5 + $0xac] ss:$16 sps:$4 sm:$0xff]  }
 0x272   :  { %1643 = vmatpush1.bf16.msra.mxu0 %v15017_v50  ;;  %1684 = vmatpush1.bf16.msra.mxu1 %v15020_v53 }
 0x273   :  { %1644 = vmatprep.subr.bf16.mxu0 %v15023_v54  ;;  %1685 = vmatprep.subr.bf16.mxu1 %v15026_v56 }
 0x274   :  { %1674 = vmatprep.mubr.bf16.mxu0 %v19005_v14  ;;  %1715 = vmatprep.mubr.bf16.mxu1 %v19005_v14 }
 0x276   :  { %1645 = vmatpush1.bf16.msra.mxu0 %v15031_v58  ;;  %1686 = vmatpush1.bf16.msra.mxu1 %v15034_v60 }
 0x277   :  { %1646 = vmatprep.subr.bf16.mxu0 %v15037_v62  ;;  %1687 = vmatprep.subr.bf16.mxu1 %v15040_v1 }
 0x27a   :  { %1647 = vmatpush1.bf16.msra.mxu0 %v15043_v3  ;;  %1688 = vmatpush1.bf16.msra.mxu1 %v15046_v6 }
 0x27b   :  { %1648 = vmatprep.subr.bf16.mxu0 %v15049_v7  ;;  %1689 = vmatprep.subr.bf16.mxu1 %v15052_v9 }
 0x27e   :  { %1649 = vmatpush1.bf16.msra.mxu0 %v15055_v22  ;;  %1690 = vmatpush1.bf16.msra.mxu1 %v15058_v21 }
 0x27f   :  { %1650 = vmatprep.subr.bf16.mxu0 %v15061_v23  ;;  %1691 = vmatprep.subr.bf16.mxu1 %v15064_v25 }
 0x282   :  { %1651 = vmatpush1.bf16.msra.mxu0 %v15067_v24  ;;  %1692 = vmatpush1.bf16.msra.mxu1 %v15070_v26 }
 0x283   :  { %1652 = vmatprep.subr.bf16.mxu0 %v15073_v27  ;;  %1693 = vmatprep.subr.bf16.mxu1 %v15076_v28 }
 0x286   :  { %1653 = vmatpush1.bf16.msra.mxu0 %v15079_v11  ;;  %1694 = vmatpush1.bf16.msra.mxu1 %v15082_v13  ;;  %v15165_v13 = vld [vmem:[#allocation5 + $0x4] ss:$16 sps:$4 sm:$0xff]  }
 0x287   :  { %1654 = vmatprep.subr.bf16.mxu0 %v15085_v17  ;;  %1695 = vmatprep.subr.bf16.mxu1 %v15088_v30  ;;  %v15167_v17 = vld [vmem:[#allocation5 + $0xc] ss:$16 sps:$4 sm:$0xff]   ;;  %v15169_v30 = vld [vmem:[#allocation5] ss:$16 sps:$4 sm:$0xff]  }
 0x28a   :  { %1655 = vmatpush1.bf16.msra.mxu0 %v15091_v34  ;;  %1696 = vmatpush1.bf16.msra.mxu1 %v15094_v42  ;;  %v15171_v34 = vld [vmem:[#allocation5 + $0x8] ss:$16 sps:$4 sm:$0xff]   ;;  %v15177_v42 = vld [vmem:[#allocation5 + $0x24] ss:$16 sps:$4 sm:$0xff]  }
 0x28b   :  { %1656 = vmatprep.subr.bf16.mxu0 %v15097_v44  ;;  %1697 = vmatprep.subr.bf16.mxu1 %v15100_v46  ;;  %v15179_v44 = vld [vmem:[#allocation5 + $0x2c] ss:$16 sps:$4 sm:$0xff]   ;;  %v15181_v46 = vld [vmem:[#allocation5 + $0x20] ss:$16 sps:$4 sm:$0xff]  }
 0x28e   :  { %1657 = vmatpush1.bf16.msra.mxu0 %v15103_v48  ;;  %1698 = vmatpush1.bf16.msra.mxu1 %v15106_v16  ;;  %v15183_v48 = vld [vmem:[#allocation5 + $0x28] ss:$16 sps:$4 sm:$0xff]  }
 0x28f   :  { %1952 = vmatprep.subr.bf16.mxu0 %v15165_v13  ;;  %1993 = vmatprep.subr.bf16.mxu1 %v15167_v17 }
 0x344   :  { %v1366_v29 = vpop.f32.mrb[24].mxu0  ;;  %v1407_v32 = vpop.f32.mrb[24].mxu1 }
 0x345   :  { %v1414_v37 = vadd.f32 %v1366_v29, %v14947_v39  ;;  %v1416_v38 = vadd.f32 %v1407_v32, %v14950_v41  ;;  %v1368_v40 = vpop.f32.mrb[25].mxu0  ;;  %v1409_v50 = vpop.f32.mrb[25].mxu1  ;;  %v15234_v29 = vld [vmem:[#allocation5 + $0xc4] ss:$16 sps:$4 sm:$0xff]   ;;  %v15236_v32 = vld [vmem:[#allocation5 + $0xcc] ss:$16 sps:$4 sm:$0xff]  }
 0x346   :  { %v1415_v53 = vadd.f32 %v1368_v40, %v14952_v43  ;;  %v1417_v54 = vadd.f32 %v1409_v50, %v14955_v45  ;;  %v1370_v56 = vpop.f32.mrb[26].mxu0  ;;  %v1411_v58 = vpop.f32.mrb[26].mxu1  ;;  %v15247_v40 = vld [vmem:[#allocation5 + $0xe4] ss:$16 sps:$4 sm:$0xff]   ;;  %v15249_v50 = vld [vmem:[#allocation5 + $0xec] ss:$16 sps:$4 sm:$0xff]  }
 0x347   :  { %v11682_v60 = vmul.f32 -1.442695, %v1414_v37  ;;  %v1371_v62 = vpop.f32.mrb[27].mxu0  ;;  %v1412_v1 = vpop.f32.mrb[27].mxu1  ;;  %v15241_v37 = vld [vmem:[#allocation5 + $0xc0] ss:$16 sps:$4 sm:$0xff]  }
 0x348   :  { %v11683_v3 = vmul.f32 -1.442695, %v1415_v53  ;;  %v11684_v16 = vmul.f32 -1.442695, %v1417_v54  ;;  %v15253_v53 = vld [vmem:[#allocation5 + $0xe0] ss:$16 sps:$4 sm:$0xff]  }
 0x349   :  { %13987 = vpow2.f32 %v11682_v60  ;;  %v15255_v54 = vld [vmem:[#allocation5 + $0xe8] ss:$16 sps:$4 sm:$0xff]  }
 0x34a   :  { %13989 = vpow2.f32 %v11683_v3 }
 0x34b   :  { %13991 = vpow2.f32 %v11684_v16 }
 0x34c   :  { %13993 = vtanh.f32 %v1416_v38  ;;  %v15243_v38 = vld [vmem:[#allocation5 + $0xc8] ss:$16 sps:$4 sm:$0xff]  }
 0x353   :  { %v13988_v6 = vpop.eup %13987 }
 0x354   :  { %v13990_v7 = vpop.eup %13989  ;;  %v1421_v39 = vadd.f32 1.0, %v13988_v6 }
 0x355   :  { %v1427_v41 = vadd.f32 1.0, %v13990_v7  ;;  %v13992_v43 = vpop.eup %13991 }
 0x356   :  { %13995 = vrcp.f32 %v1421_v39  ;;  %v13994_v9 = vpop.eup %13993  ;;  %v1434_v23 = vadd.f32 1.0, %v13992_v43 }
 0x357   :  { %13997 = vrcp.f32 %v1427_v41 }
 0x358   :  { %13999 = vrcp.f32 %v1434_v23 }
 0x360   :  { %v13996_v45 = vpop.eup %13995 }
 0x361   :  { %v13998_v22 = vpop.eup %13997  ;;  %v1438_v21 = vmul.f32 %v13996_v45, %v13994_v9 }
 0x362   :  { %v1437_v25 = vmul.f32 %v13998_v22, %v15114_v5  ;;  %v14000_v26 = vpop.eup %13999  ;;  %v15219_v5 = vld [vmem:[#allocation5 + $0x88] ss:$16 sps:$4 sm:$0xff]  }
 0x364   :  { %v15157_v24 = vadd.f32 %v1438_v21, %v1437_v25 }
 0x366   :  { %14001 = vtanh.f32 %v15157_v24 }
 0x370   :  { %v14002_v27 = vpop.eup %14001 }
 0x371   :  { %v1441_v28 = vmul.f32 %v14002_v27, %v14000_v26 }
 0x373   :  { %11685 = vst [vmem:[%s18850_s15 + $0x10] sm:$0xff] %v1441_v28  ;;  %v1449_v11 = vpack.c.bf16 %v1441_v28, %v1441_v28 }
 0x375   :  { %1675 = vmatmul.mubr.bf16.vlgmr.msra.gmra.mrb[28].mxu0 %v1449_v11  ;;  %1716 = vmatmul.mubr.bf16.vlgmr.msra.gmra.mrb[28].mxu1 %v1449_v11 }
 0x376   :  { %1984 = vmatprep.mubr.bf16.mxu0 %v19005_v14  ;;  %2025 = vmatprep.mubr.bf16.mxu1 %v19005_v14 }
 0x377   :  { %1953 = vmatpush1.bf16.msra.mxu0 %v15169_v30  ;;  %1994 = vmatpush1.bf16.msra.mxu1 %v15171_v34 }
 0x378   :  { %1954 = vmatprep.subr.bf16.mxu0 %v15177_v42  ;;  %1995 = vmatprep.subr.bf16.mxu1 %v15179_v44 }
 0x37b   :  { %1955 = vmatpush1.bf16.msra.mxu0 %v15181_v46  ;;  %1996 = vmatpush1.bf16.msra.mxu1 %v15183_v48 }
 0x37c   :  { %1956 = vmatprep.subr.bf16.mxu0 %v15189_v19  ;;  %1997 = vmatprep.subr.bf16.mxu1 %v15191_v20 }
 0x37f   :  { %1957 = vmatpush1.bf16.msra.mxu0 %v15193_v18  ;;  %1998 = vmatpush1.bf16.msra.mxu1 %v15195_v0 }
 0x380   :  { %1958 = vmatprep.subr.bf16.mxu0 %v15201_v31  ;;  %1999 = vmatprep.subr.bf16.mxu1 %v15203_v33 }
 0x383   :  { %1959 = vmatpush1.bf16.msra.mxu0 %v15205_v35  ;;  %2000 = vmatpush1.bf16.msra.mxu1 %v15207_v36 }
 0x384   :  { %1960 = vmatprep.subr.bf16.mxu0 %v15213_v10  ;;  %2001 = vmatprep.subr.bf16.mxu1 %v15215_v15 }
 0x387   :  { %1961 = vmatpush1.bf16.msra.mxu0 %v15217_v4  ;;  %2002 = vmatpush1.bf16.msra.mxu1 %v15219_v5 }
 0x388   :  { %1962 = vmatprep.subr.bf16.mxu0 %v15223_v8  ;;  %2003 = vmatprep.subr.bf16.mxu1 %v15231_v63 }
 0x38b   :  { %1963 = vmatpush1.bf16.msra.mxu0 %v15227_v2  ;;  %2004 = vmatpush1.bf16.msra.mxu1 %v15229_v12 }
 0x38c   :  { %1964 = vmatprep.subr.bf16.mxu0 %v15234_v29  ;;  %2005 = vmatprep.subr.bf16.mxu1 %v15236_v32 }
 0x38f   :  { %1965 = vmatpush1.bf16.msra.mxu0 %v15241_v37  ;;  %2006 = vmatpush1.bf16.msra.mxu1 %v15243_v38 }
 0x390   :  { %1966 = vmatprep.subr.bf16.mxu0 %v15247_v40  ;;  %2007 = vmatprep.subr.bf16.mxu1 %v15249_v50 }
 0x393   :  { %1967 = vmatpush1.bf16.msra.mxu0 %v15253_v53  ;;  %2008 = vmatpush1.bf16.msra.mxu1 %v15255_v54 }
 0x394   :  { %2262 = vmatprep.subr.bf16.mxu0 %v15165_v13  ;;  %2303 = vmatprep.subr.bf16.mxu1 %v15167_v17 }
 0x448   :  { %v1676_v56 = vpop.f32.mrb[28].mxu0  ;;  %v1717_v58 = vpop.f32.mrb[28].mxu1 }
 0x449   :  { %v1724_v60 = vadd.f32 %v1676_v56, %v14957_v47  ;;  %v1726_v62 = vadd.f32 %v1717_v58, %v14960_v49  ;;  %v1678_v1 = vpop.f32.mrb[29].mxu0  ;;  %v1719_v3 = vpop.f32.mrb[29].mxu1 }
 0x44a   :  { %v1725_v16 = vadd.f32 %v1678_v1, %v14962_v51  ;;  %v1727_v6 = vadd.f32 %v1719_v3, %v14965_v52  ;;  %v1680_v7 = vpop.f32.mrb[30].mxu0  ;;  %v1721_v39 = vpop.f32.mrb[30].mxu1 }
 0x44b   :  { %v11718_v41 = vmul.f32 -1.442695, %v1724_v60  ;;  %v1681_v43 = vpop.f32.mrb[31].mxu0  ;;  %v1722_v9 = vpop.f32.mrb[31].mxu1 }
 0x44c   :  { %v11719_v45 = vmul.f32 -1.442695, %v1725_v16  ;;  %v11720_v22 = vmul.f32 -1.442695, %v1727_v6 }
 0x44d   :  { %14003 = vpow2.f32 %v11718_v41 }
 0x44e   :  { %14005 = vpow2.f32 %v11719_v45 }
 0x44f   :  { %14007 = vpow2.f32 %v11720_v22 }
 0x450   :  { %14009 = vtanh.f32 %v1726_v62 }
 0x457   :  { %v14004_v21 = vpop.eup %14003 }
 0x458   :  { %v14006_v23 = vpop.eup %14005  ;;  %v1731_v47 = vadd.f32 1.0, %v14004_v21 }
 0x459   :  { %v1737_v49 = vadd.f32 1.0, %v14006_v23  ;;  %v14008_v51 = vpop.eup %14007 }
 0x45a   :  { %14011 = vrcp.f32 %v1731_v47  ;;  %v14010_v25 = vpop.eup %14009  ;;  %v1744_v28 = vadd.f32 1.0, %v14008_v51 }
 0x45b   :  { %14013 = vrcp.f32 %v1737_v49 }
 0x45c   :  { %14015 = vrcp.f32 %v1744_v28 }
 0x464   :  { %v14012_v52 = vpop.eup %14011 }
 0x465   :  { %v14014_v26 = vpop.eup %14013  ;;  %v1748_v27 = vmul.f32 %v14012_v52, %v14010_v25 }
 0x466   :  { %v1747_v11 = vmul.f32 %v14014_v26, %v15157_v24  ;;  %v14016_v58 = vpop.eup %14015 }
 0x468   :  { %v15268_v56 = vadd.f32 %v1748_v27, %v1747_v11 }
 0x46a   :  { %14017 = vtanh.f32 %v15268_v56 }
 0x474   :  { %v14018_v60 = vpop.eup %14017 }
 0x475   :  { %v1751_v1 = vmul.f32 %v14018_v60, %v14016_v58 }
 0x477   :  { %11721 = vst [vmem:[%s18850_s15 + $0x18] sm:$0xff] %v1751_v1  ;;  %v1759_v62 = vpack.c.bf16 %v1751_v1, %v1751_v1 }
 0x479   :  { %1985 = vmatmul.mubr.bf16.vlgmr.msra.gmra.mrb[32].mxu0 %v1759_v62  ;;  %2026 = vmatmul.mubr.bf16.vlgmr.msra.gmra.mrb[32].mxu1 %v1759_v62 }
 0x47a   :  { %2263 = vmatpush1.bf16.msra.mxu0 %v15169_v30  ;;  %2304 = vmatpush1.bf16.msra.mxu1 %v15171_v34 }
 0x47b   :  { %2264 = vmatprep.subr.bf16.mxu0 %v15177_v42  ;;  %2305 = vmatprep.subr.bf16.mxu1 %v15179_v44 }
 0x47c   :  { %2294 = vmatprep.mubr.bf16.mxu0 %v19005_v14  ;;  %2335 = vmatprep.mubr.bf16.mxu1 %v19005_v14 }
 0x47e   :  { %2265 = vmatpush1.bf16.msra.mxu0 %v15181_v46  ;;  %2306 = vmatpush1.bf16.msra.mxu1 %v15183_v48 }
 0x47f   :  { %2266 = vmatprep.subr.bf16.mxu0 %v15189_v19  ;;  %2307 = vmatprep.subr.bf16.mxu1 %v15191_v20 }
 0x482   :  { %2267 = vmatpush1.bf16.msra.mxu0 %v15193_v18  ;;  %2308 = vmatpush1.bf16.msra.mxu1 %v15195_v0 }
 0x483   :  { %2268 = vmatprep.subr.bf16.mxu0 %v15201_v31  ;;  %2309 = vmatprep.subr.bf16.mxu1 %v15203_v33 }
 0x486   :  { %2269 = vmatpush1.bf16.msra.mxu0 %v15205_v35  ;;  %2310 = vmatpush1.bf16.msra.mxu1 %v15207_v36 }
 0x487   :  { %2270 = vmatprep.subr.bf16.mxu0 %v15213_v10  ;;  %2311 = vmatprep.subr.bf16.mxu1 %v15215_v15 }
 0x48a   :  { %2271 = vmatpush1.bf16.msra.mxu0 %v15217_v4  ;;  %2312 = vmatpush1.bf16.msra.mxu1 %v15219_v5 }
 0x48b   :  { %2272 = vmatprep.subr.bf16.mxu0 %v15223_v8  ;;  %2313 = vmatprep.subr.bf16.mxu1 %v15231_v63 }
 0x48e   :  { %2273 = vmatpush1.bf16.msra.mxu0 %v15227_v2  ;;  %2314 = vmatpush1.bf16.msra.mxu1 %v15229_v12 }
 0x48f   :  { %2274 = vmatprep.subr.bf16.mxu0 %v15234_v29  ;;  %2315 = vmatprep.subr.bf16.mxu1 %v15236_v32 }
 0x492   :  { %2275 = vmatpush1.bf16.msra.mxu0 %v15241_v37  ;;  %2316 = vmatpush1.bf16.msra.mxu1 %v15243_v38 }
 0x493   :  { %2276 = vmatprep.subr.bf16.mxu0 %v15247_v40  ;;  %2317 = vmatprep.subr.bf16.mxu1 %v15249_v50 }
 0x496   :  { %2277 = vmatpush1.bf16.msra.mxu0 %v15253_v53  ;;  %2318 = vmatpush1.bf16.msra.mxu1 %v15255_v54 }
 0x497   :  { %2572 = vmatprep.subr.bf16.mxu0 %v15165_v13  ;;  %2613 = vmatprep.subr.bf16.mxu1 %v15167_v17 }
 0x54c   :  { %v1986_v24 = vpop.f32.mrb[32].mxu0  ;;  %v2027_v3 = vpop.f32.mrb[32].mxu1 }
 0x54d   :  { %v2034_v16 = vadd.f32 %v1986_v24, %v14967_v55  ;;  %v2036_v6 = vadd.f32 %v2027_v3, %v14970_v57  ;;  %v1988_v7 = vpop.f32.mrb[33].mxu0  ;;  %v2029_v39 = vpop.f32.mrb[33].mxu1 }
 0x54e   :  { %v2035_v41 = vadd.f32 %v1988_v7, %v14972_v59  ;;  %v2037_v43 = vadd.f32 %v2029_v39, %v14975_v61  ;;  %v1990_v9 = vpop.f32.mrb[34].mxu0  ;;  %v2031_v45 = vpop.f32.mrb[34].mxu1  ;;  %v19007_v7 = vld [vmem:[#allocation13_spill] sm:$0xff] }
 0x54f   :  { %v11754_v22 = vmul.f32 -1.442695, %v2034_v16  ;;  %v1991_v21 = vpop.f32.mrb[35].mxu0  ;;  %v2032_v23 = vpop.f32.mrb[35].mxu1  ;;  %v19006_v16 = vld [vmem:[#allocation12_spill] sm:$0xff]  ;;  %v19008_v9 = vld [vmem:[#allocation14_spill] sm:$0xff] }
 0x550   :  { %v11755_v47 = vmul.f32 -1.442695, %v2035_v41  ;;  %v11756_v49 = vmul.f32 -1.442695, %v2037_v43 }
 0x551   :  { %14019 = vpow2.f32 %v11754_v22  ;;  %v19009_v22 = vld [vmem:[#allocation15_spill] sm:$0xff] }
 0x552   :  { %14021 = vpow2.f32 %v11755_v47 }
 0x553   :  { %14023 = vpow2.f32 %v11756_v49 }
 0x554   :  { %14025 = vtanh.f32 %v2036_v6 }
 0x55b   :  { %v14020_v51 = vpop.eup %14019 }
 0x55c   :  { %v14022_v25 = vpop.eup %14021  ;;  %v2041_v55 = vadd.f32 1.0, %v14020_v51 }
 0x55d   :  { %v2047_v57 = vadd.f32 1.0, %v14022_v25  ;;  %v14024_v59 = vpop.eup %14023 }
 0x55e   :  { %14027 = vrcp.f32 %v2041_v55  ;;  %v14026_v52 = vpop.eup %14025  ;;  %v2054_v28 = vadd.f32 1.0, %v14024_v59 }
 0x55f   :  { %14029 = vrcp.f32 %v2047_v57 }
 0x560   :  { %14031 = vrcp.f32 %v2054_v28 }
 0x568   :  { %v14028_v61 = vpop.eup %14027 }
 0x569   :  { %v14030_v26 = vpop.eup %14029  ;;  %v2058_v27 = vmul.f32 %v14028_v61, %v14026_v52 }
 0x56a   :  { %v2057_v11 = vmul.f32 %v14030_v26, %v15268_v56  ;;  %v14032_v60 = vpop.eup %14031 }
 0x56c   :  { %v15313_v58 = vadd.f32 %v2058_v27, %v2057_v11 }
 0x56e   :  { %14033 = vtanh.f32 %v15313_v58 }
 0x578   :  { %v14034_v1 = vpop.eup %14033 }
 0x579   :  { %v15316_v62 = vmul.f32 %v14034_v1, %v14032_v60 }
 0x57b   :  { %11757 = vst [vmem:[%s18850_s15 + $0x20] sm:$0xff] %v15316_v62  ;;  %v2069_v24 = vpack.c.bf16 %v15316_v62, %v15316_v62 }
 0x57d   :  { %2295 = vmatmul.mubr.bf16.vlgmr.msra.gmra.mrb[36].mxu0 %v2069_v24  ;;  %2336 = vmatmul.mubr.bf16.vlgmr.msra.gmra.mrb[36].mxu1 %v2069_v24 }
 0x57e   :  { %2573 = vmatpush1.bf16.msra.mxu0 %v15169_v30  ;;  %2614 = vmatpush1.bf16.msra.mxu1 %v15171_v34 }
 0x57f   :  { %2574 = vmatprep.subr.bf16.mxu0 %v15177_v42  ;;  %2615 = vmatprep.subr.bf16.mxu1 %v15179_v44 }
 0x580   :  { %2604 = vmatprep.mubr.bf16.mxu0 %v19005_v14  ;;  %2645 = vmatprep.mubr.bf16.mxu1 %v19005_v14 }
 0x582   :  { %2575 = vmatpush1.bf16.msra.mxu0 %v15181_v46  ;;  %2616 = vmatpush1.bf16.msra.mxu1 %v15183_v48 }
 0x583   :  { %2576 = vmatprep.subr.bf16.mxu0 %v15189_v19  ;;  %2617 = vmatprep.subr.bf16.mxu1 %v15191_v20 }
 0x586   :  { %2577 = vmatpush1.bf16.msra.mxu0 %v15193_v18  ;;  %2618 = vmatpush1.bf16.msra.mxu1 %v15195_v0 }
 0x587   :  { %2578 = vmatprep.subr.bf16.mxu0 %v15201_v31  ;;  %2619 = vmatprep.subr.bf16.mxu1 %v15203_v33 }
 0x58a   :  { %2579 = vmatpush1.bf16.msra.mxu0 %v15205_v35  ;;  %2620 = vmatpush1.bf16.msra.mxu1 %v15207_v36 }
 0x58b   :  { %2580 = vmatprep.subr.bf16.mxu0 %v15213_v10  ;;  %2621 = vmatprep.subr.bf16.mxu1 %v15215_v15 }
 0x58e   :  { %2581 = vmatpush1.bf16.msra.mxu0 %v15217_v4  ;;  %2622 = vmatpush1.bf16.msra.mxu1 %v15219_v5 }
 0x58f   :  { %2582 = vmatprep.subr.bf16.mxu0 %v15223_v8  ;;  %2623 = vmatprep.subr.bf16.mxu1 %v15231_v63 }
 0x592   :  { %2583 = vmatpush1.bf16.msra.mxu0 %v15227_v2  ;;  %2624 = vmatpush1.bf16.msra.mxu1 %v15229_v12 }
 0x593   :  { %2584 = vmatprep.subr.bf16.mxu0 %v15234_v29  ;;  %2625 = vmatprep.subr.bf16.mxu1 %v15236_v32 }
 0x596   :  { %2585 = vmatpush1.bf16.msra.mxu0 %v15241_v37  ;;  %2626 = vmatpush1.bf16.msra.mxu1 %v15243_v38 }
 0x597   :  { %2586 = vmatprep.subr.bf16.mxu0 %v15247_v40  ;;  %2627 = vmatprep.subr.bf16.mxu1 %v15249_v50 }
 0x59a   :  { %2587 = vmatpush1.bf16.msra.mxu0 %v15253_v53  ;;  %2628 = vmatpush1.bf16.msra.mxu1 %v15255_v54 }
 0x59b   :  { %2882 = vmatprep.subr.bf16.mxu0 %v15165_v13  ;;  %2923 = vmatprep.subr.bf16.mxu1 %v15167_v17 }
 0x650   :  { %v2296_v56 = vpop.f32.mrb[36].mxu0  ;;  %v2337_v3 = vpop.f32.mrb[36].mxu1 }
 0x651   :  { %v2344_v6 = vadd.f32 %v2296_v56, %v19006_v16  ;;  %v2346_v39 = vadd.f32 %v2337_v3, %v19007_v7  ;;  %v2298_v41 = vpop.f32.mrb[37].mxu0  ;;  %v2339_v43 = vpop.f32.mrb[37].mxu1 }
 0x652   :  { %v2345_v45 = vadd.f32 %v2298_v41, %v19008_v9  ;;  %v2347_v21 = vadd.f32 %v2339_v43, %v19009_v22  ;;  %v2300_v23 = vpop.f32.mrb[38].mxu0  ;;  %v2341_v47 = vpop.f32.mrb[38].mxu1  ;;  %v13287_v22 = vld [vmem:[#allocation7 + $0x8] ss:$16 sps:$4 sm:$0xff]  }
 0x653   :  { %v11790_v49 = vmul.f32 -1.442695, %v2344_v6  ;;  %v2301_v51 = vpop.f32.mrb[39].mxu0  ;;  %v2342_v25 = vpop.f32.mrb[39].mxu1  ;;  %v13280_v23 = vld [vmem:[#allocation7 + $0x24] ss:$16 sps:$4 sm:$0xff]  }
 0x654   :  { %v11791_v13 = vmul.f32 -1.442695, %v2345_v45  ;;  %v11792_v17 = vmul.f32 -1.442695, %v2347_v21  ;;  %v13275_v45 = vld [vmem:[#allocation7] ss:$16 sps:$4 sm:$0xff]  }
 0x655   :  { %14035 = vpow2.f32 %v11790_v49  ;;  %v13295_v47 = vld [vmem:[#allocation7 + $0x2c] ss:$16 sps:$4 sm:$0xff]   ;;  %v13278_v49 = vld [vmem:[#allocation7 + $0x20] ss:$16 sps:$4 sm:$0xff]   ;;  %v13293_v51 = vld [vmem:[#allocation7 + $0x28] ss:$16 sps:$4 sm:$0xff]  }
 0x656   :  { %14037 = vpow2.f32 %v11791_v13  ;;  %v13283_v25 = vld [vmem:[#allocation7 + $0x44] ss:$16 sps:$4 sm:$0xff]   ;;  %v13301_v13 = vld [vmem:[#allocation7 + $0x4c] ss:$16 sps:$4 sm:$0xff]  }
 0x657   :  { %14039 = vpow2.f32 %v11792_v17  ;;  %v13281_v17 = vld [vmem:[#allocation7 + $0x40] ss:$16 sps:$4 sm:$0xff]  }
 0x658   :  { %14041 = vtanh.f32 %v2346_v39 }
 0x65f   :  { %v14036_v55 = vpop.eup %14035 }
 0x660   :  { %v14038_v57 = vpop.eup %14037  ;;  %v2351_v59 = vadd.f32 1.0, %v14036_v55  ;;  %v13299_v55 = vld [vmem:[#allocation7 + $0x48] ss:$16 sps:$4 sm:$0xff]  }
 0x661   :  { %v2357_v52 = vadd.f32 1.0, %v14038_v57  ;;  %v14040_v61 = vpop.eup %14039  ;;  %v13286_v57 = vld [vmem:[#allocation7 + $0x64] ss:$16 sps:$4 sm:$0xff]  }
 0x662   :  { %14043 = vrcp.f32 %v2351_v59  ;;  %v14042_v26 = vpop.eup %14041  ;;  %v2364_v60 = vadd.f32 1.0, %v14040_v61  ;;  %v13307_v59 = vld [vmem:[#allocation7 + $0x6c] ss:$16 sps:$4 sm:$0xff]   ;;  %v13305_v61 = vld [vmem:[#allocation7 + $0x68] ss:$16 sps:$4 sm:$0xff]  }
 0x663   :  { %14045 = vrcp.f32 %v2357_v52  ;;  %v13284_v52 = vld [vmem:[#allocation7 + $0x60] ss:$16 sps:$4 sm:$0xff]  }
 0x664   :  { %14047 = vrcp.f32 %v2364_v60  ;;  %v13298_v60 = vld [vmem:[#allocation7 + $0xa4] ss:$16 sps:$4 sm:$0xff]  }
 0x66c   :  { %v14044_v27 = vpop.eup %14043 }
 0x66d   :  { %v14046_v28 = vpop.eup %14045  ;;  %v2368_v11 = vmul.f32 %v14044_v27, %v14042_v26  ;;  %v13292_v26 = vld [vmem:[#allocation7 + $0x84] ss:$16 sps:$4 sm:$0xff]   ;;  %v13313_v27 = vld [vmem:[#allocation7 + $0x8c] ss:$16 sps:$4 sm:$0xff]  }
 0x66e   :  { %v2367_v1 = vmul.f32 %v14046_v28, %v15313_v58  ;;  %v14048_v56 = vpop.eup %14047  ;;  %v13290_v28 = vld [vmem:[#allocation7 + $0x80] ss:$16 sps:$4 sm:$0xff]  }
 0x670   :  { %v15363_v24 = vadd.f32 %v2368_v11, %v2367_v1  ;;  %v13311_v11 = vld [vmem:[#allocation7 + $0x88] ss:$16 sps:$4 sm:$0xff]   ;;  %v13317_v1 = vld [vmem:[#allocation7 + $0xac] ss:$16 sps:$4 sm:$0xff]  }
 0x672   :  { %14049 = vtanh.f32 %v15363_v24 }
 0x67c   :  { %v14050_v3 = vpop.eup %14049 }
 0x67d   :  { %v15366_v16 = vmul.f32 %v14050_v3, %v14048_v56  ;;  %v13315_v56 = vld [vmem:[#allocation7 + $0xa8] ss:$16 sps:$4 sm:$0xff]   ;;  %v13304_v3 = vld [vmem:[#allocation7 + $0xc4] ss:$16 sps:$4 sm:$0xff]  }
 0x67f   :  { %11793 = vst [vmem:[%s18850_s15 + $0x28] sm:$0xff] %v15366_v16  ;;  %v2379_v6 = vpack.c.bf16 %v15366_v16, %v15366_v16 }
 0x681   :  { %2605 = vmatmul.mubr.bf16.vlgmr.msra.gmra.mrb[40].mxu0 %v2379_v6  ;;  %2646 = vmatmul.mubr.bf16.vlgmr.msra.gmra.mrb[40].mxu1 %v2379_v6  ;;  %v13321_v6 = vld [vmem:[#allocation7 + $0xcc] ss:$16 sps:$4 sm:$0xff]  }
 0x682   :  { %2883 = vmatpush1.bf16.msra.mxu0 %v15169_v30  ;;  %2924 = vmatpush1.bf16.msra.mxu1 %v15171_v34  ;;  %v13277_v30 = vld [vmem:[#allocation7 + $0x4] ss:$16 sps:$4 sm:$0xff]   ;;  %v13289_v34 = vld [vmem:[#allocation7 + $0xc] ss:$16 sps:$4 sm:$0xff]  }
 0x683   :  { %2884 = vmatprep.subr.bf16.mxu0 %v15177_v42  ;;  %2925 = vmatprep.subr.bf16.mxu1 %v15179_v44 }
 0x684   :  { %2914 = vmatprep.mubr.bf16.mxu0 %v19005_v14  ;;  %2955 = vmatprep.mubr.bf16.mxu1 %v19005_v14 }
 0x686   :  { %2885 = vmatpush1.bf16.msra.mxu0 %v15181_v46  ;;  %2926 = vmatpush1.bf16.msra.mxu1 %v15183_v48  ;;  %v19010_v46 = vld [vmem:[#allocation16_spill] sm:$0xff] }
 0x687   :  { %2886 = vmatprep.subr.bf16.mxu0 %v15189_v19  ;;  %2927 = vmatprep.subr.bf16.mxu1 %v15191_v20  ;;  %v19011_v19 = vld [vmem:[#allocation17_spill] sm:$0xff] }
 0x68a   :  { %2887 = vmatpush1.bf16.msra.mxu0 %v15193_v18  ;;  %2928 = vmatpush1.bf16.msra.mxu1 %v15195_v0 }
 0x68b   :  { %2888 = vmatprep.subr.bf16.mxu0 %v15201_v31  ;;  %2929 = vmatprep.subr.bf16.mxu1 %v15203_v33  ;;  %v19012_v31 = vld [vmem:[#allocation18_spill] sm:$0xff] }
 0x68e   :  { %2889 = vmatpush1.bf16.msra.mxu0 %v15205_v35  ;;  %2930 = vmatpush1.bf16.msra.mxu1 %v15207_v36  ;;  %v19013_v35 = vld [vmem:[#allocation19_spill] sm:$0xff] }
 0x68f   :  { %2890 = vmatprep.subr.bf16.mxu0 %v15213_v10  ;;  %2931 = vmatprep.subr.bf16.mxu1 %v15215_v15 }
 0x692   :  { %2891 = vmatpush1.bf16.msra.mxu0 %v15217_v4  ;;  %2932 = vmatpush1.bf16.msra.mxu1 %v15219_v5 }
 0x693   :  { %2892 = vmatprep.subr.bf16.mxu0 %v15223_v8  ;;  %2933 = vmatprep.subr.bf16.mxu1 %v15231_v63 }
 0x696   :  { %2893 = vmatpush1.bf16.msra.mxu0 %v15227_v2  ;;  %2934 = vmatpush1.bf16.msra.mxu1 %v15229_v12 }
 0x697   :  { %2894 = vmatprep.subr.bf16.mxu0 %v15234_v29  ;;  %2935 = vmatprep.subr.bf16.mxu1 %v15236_v32 }
 0x69a   :  { %2895 = vmatpush1.bf16.msra.mxu0 %v15241_v37  ;;  %2936 = vmatpush1.bf16.msra.mxu1 %v15243_v38 }
 0x69b   :  { %2896 = vmatprep.subr.bf16.mxu0 %v15247_v40  ;;  %2937 = vmatprep.subr.bf16.mxu1 %v15249_v50 }
 0x69e   :  { %2897 = vmatpush1.bf16.msra.mxu0 %v15253_v53  ;;  %2938 = vmatpush1.bf16.msra.mxu1 %v15255_v54 }
 0x69f   :  { %3198 = vmatprep.subr.bf16.mxu0 %v13277_v30  ;;  %3271 = vmatprep.subr.bf16.mxu1 %v13289_v34  ;;  %v13302_v30 = vld [vmem:[#allocation7 + $0xc0] ss:$16 sps:$4 sm:$0xff]   ;;  %v13319_v34 = vld [vmem:[#allocation7 + $0xc8] ss:$16 sps:$4 sm:$0xff]  }
 0x754   :  { %v2606_v42 = vpop.f32.mrb[40].mxu0  ;;  %v2647_v44 = vpop.f32.mrb[40].mxu1 }
 0x755   :  { %v2654_v48 = vadd.f32 %v2606_v42, %v19010_v46  ;;  %v2656_v20 = vadd.f32 %v2647_v44, %v19011_v19  ;;  %v2608_v18 = vpop.f32.mrb[41].mxu0  ;;  %v2649_v0 = vpop.f32.mrb[41].mxu1  ;;  %v13310_v42 = vld [vmem:[#allocation7 + $0xe4] ss:$16 sps:$4 sm:$0xff]   ;;  %v13325_v44 = vld [vmem:[#allocation7 + $0xec] ss:$16 sps:$4 sm:$0xff]  }
 0x756   :  { %v2655_v33 = vadd.f32 %v2608_v18, %v19012_v31  ;;  %v2657_v36 = vadd.f32 %v2649_v0, %v19013_v35  ;;  %v2610_v10 = vpop.f32.mrb[42].mxu0  ;;  %v2651_v15 = vpop.f32.mrb[42].mxu1  ;;  %v13308_v46 = vld [vmem:[#allocation7 + $0xe0] ss:$16 sps:$4 sm:$0xff]   ;;  %v2995_v19 = vld [vmem:[%s18836_s1 + $0x8] sm:$0xff]  ;;  %v2997_v35 = vld [vmem:[%s18836_s1 + $0x18] sm:$0xff] }
 0x757   :  { %v11826_v4 = vmul.f32 -1.442695, %v2654_v48  ;;  %v2611_v5 = vpop.f32.mrb[43].mxu0  ;;  %v2652_v8 = vpop.f32.mrb[43].mxu1  ;;  %v2994_v48 = vld [vmem:[%s18836_s1] sm:$0xff]  ;;  %v13318_v31 = vld [vmem:[%s18842_s7 + $0x8] sm:$0xff]  }
 0x758   :  { %v11827_v2 = vmul.f32 -1.442695, %v2655_v33  ;;  %v11828_v12 = vmul.f32 -1.442695, %v2657_v36  ;;  %v13314_v18 = vld [vmem:[%s18842_s7] sm:$0xff]   ;;  %v3002_v0 = vpack.c.bf16 %v2995_v19, %v2994_v48  ;;  %v2996_v33 = vld [vmem:[%s18836_s1 + $0x10] sm:$0xff] }
 0x759   :  { %14051 = vpow2.f32 %v11826_v4  ;;  %v13322_v36 = vld [vmem:[%s18842_s7 + $0x10] sm:$0xff]   ;;  %v3003_v10 = vpack.c.bf16 %v2997_v35, %v2996_v33  ;;  %v13326_v15 = vld [vmem:[%s18842_s7 + $0x18] sm:$0xff]   ;;  %v2998_v4 = vld [vmem:[%s18836_s1 + $0x20] sm:$0xff] }
 0x75a   :  { %14053 = vpow2.f32 %v11827_v2  ;;  %v2999_v5 = vld [vmem:[%s18836_s1 + $0x28] sm:$0xff]  ;;  %v13327_v8 = vld [vmem:[%s18842_s7 + $0x20] sm:$0xff]  }
 0x75b   :  { %14055 = vpow2.f32 %v11828_v12  ;;  %v3004_v2 = vpack.c.bf16 %v2999_v5, %v2998_v4  ;;  %v13328_v12 = vld [vmem:[%s18842_s7 + $0x28] sm:$0xff]  }
 0x75c   :  { %14057 = vtanh.f32 %v2656_v20  ;;  %v13323_v20 = vld [vmem:[#allocation7 + $0xe8] ss:$16 sps:$4 sm:$0xff]  }
 0x763   :  { %v14052_v63 = vpop.eup %14051 }
 0x764   :  { %v14054_v29 = vpop.eup %14053  ;;  %v2661_v32 = vadd.f32 1.0, %v14052_v63  ;;  %v3000_v63 = vld [vmem:[%s18836_s1 + $0x30] sm:$0xff] }
 0x765   :  { %v2667_v37 = vadd.f32 1.0, %v14054_v29  ;;  %v14056_v38 = vpop.eup %14055  ;;  %v3001_v29 = vld [vmem:[%s18836_s1 + $0x38] sm:$0xff] }
 0x766   :  { %14059 = vrcp.f32 %v2661_v32  ;;  %v14058_v40 = vpop.eup %14057  ;;  %v2674_v58 = vadd.f32 1.0, %v14056_v38  ;;  %v13329_v32 = vld [vmem:[%s18842_s7 + $0x30] sm:$0xff]   ;;  %v3431_v38 = vld [vmem:[%s18850_s15 + $0x8] sm:$0xff] }
 0x767   :  { %14061 = vrcp.f32 %v2667_v37  ;;  %v3005_v37 = vpack.c.bf16 %v3001_v29, %v3000_v63 }
 0x768   :  { %14063 = vrcp.f32 %v2674_v58  ;;  %v15493_v58 = vld [vmem:[%s18850_s15 + $0x10] sm:$0xff] }
 0x770   :  { %v14060_v50 = vpop.eup %14059 }
 0x771   :  { %v14062_v53 = vpop.eup %14061  ;;  %v2678_v54 = vmul.f32 %v14060_v50, %v14058_v40  ;;  %v3430_v40 = vld [vmem:[%s18850_s15] sm:$0xff]  ;;  %v13330_v50 = vld [vmem:[%s18842_s7 + $0x38] sm:$0xff]  }
 0x772   :  { %v2677_v7 = vmul.f32 %v14062_v53, %v15363_v24  ;;  %v14064_v41 = vpop.eup %14063  ;;  %v13296_v24 = vld [vmem:[#allocation7 + $0xa0] ss:$16 sps:$4 sm:$0xff]   ;;  %v3438_v53 = vpack.c.bf16 %v3431_v38, %v3430_v40 }
 0x774   :  { %v15411_v39 = vadd.f32 %v2678_v54, %v2677_v7  ;;  %v15488_v54 = vld [vmem:[%s18850_s15 + $0x18] sm:$0xff] }
 0x775   :  { %v3439_v7 = vpack.c.bf16 %v15488_v54, %v15493_v58 }
 0x776   :  { %14065 = vtanh.f32 %v15411_v39 }
 0x780   :  { %v14066_v43 = vpop.eup %14065 }
 0x781   :  { %v15414_v9 = vmul.f32 %v14066_v43, %v14064_v41  ;;  %v3440_v41 = vpack.c.bf16 %v15366_v16, %v15316_v62  ;;  %v13333_v43 = vld [vmem:[%s18845_s10 + $0x4] ss:$24 sps:$4 sm:$0xff]   ;;  %v13339_v62 = vld [vmem:[%s18845_s10 + $0x34] ss:$24 sps:$4 sm:$0xff]   ;;  %v13337_v16 = vld [vmem:[%s18845_s10 + $0x30] ss:$24 sps:$4 sm:$0xff]  }
 0x783   :  { %11829 = vst [vmem:[%s18850_s15 + $0x30] sm:$0xff] %v15414_v9  ;;  %v2689_v21 = vpack.c.bf16 %v15414_v9, %v15414_v9 }
 0x785   :  { %2915 = vmatmul.mubr.bf16.vlgmr.msra.gmra.mrb[44].mxu0 %v2689_v21  ;;  %2956 = vmatmul.mubr.bf16.vlgmr.msra.gmra.mrb[44].mxu1 %v2689_v21  ;;  %v13334_v21 = vld [vmem:[%s18845_s10 + $0x8] ss:$24 sps:$4 sm:$0xff]  }
 0x786   :  { %3199 = vmatpush1.bf16.msra.mxu0 %v13275_v45  ;;  %3272 = vmatpush1.bf16.msra.mxu1 %v13287_v22  ;;  %v13331_v45 = vld [vmem:[%s18845_s10] ss:$24 sps:$4 sm:$0xff]   ;;  %v13336_v22 = vld [vmem:[%s18845_s10 + $0xc] ss:$24 sps:$4 sm:$0xff]  }
 0x787   :  { %3200 = vmatprep.subr.bf16.mxu0 %v13280_v23  ;;  %3273 = vmatprep.subr.bf16.mxu1 %v13295_v47  ;;  %v13342_v23 = vld [vmem:[%s18845_s10 + $0x3c] ss:$24 sps:$4 sm:$0xff]   ;;  %v13340_v47 = vld [vmem:[%s18845_s10 + $0x38] ss:$24 sps:$4 sm:$0xff]  }
 0x788   :  { %3230 = vmatprep.mubr.bf16.mxu0 %v19005_v14  ;;  %3303 = vmatprep.mubr.bf16.mxu1 %v19005_v14 }
 0x78a   :  { %3201 = vmatpush1.bf16.msra.mxu0 %v13278_v49  ;;  %3274 = vmatpush1.bf16.msra.mxu1 %v13293_v51  ;;  %v13345_v49 = vld [vmem:[%s18845_s10 + $0x64] ss:$24 sps:$4 sm:$0xff]   ;;  %v13343_v51 = vld [vmem:[%s18845_s10 + $0x60] ss:$24 sps:$4 sm:$0xff]  }
 0x78b   :  { %3202 = vmatprep.subr.bf16.mxu0 %v13283_v25  ;;  %3275 = vmatprep.subr.bf16.mxu1 %v13301_v13  ;;  %v13348_v25 = vld [vmem:[%s18845_s10 + $0x6c] ss:$24 sps:$4 sm:$0xff]   ;;  %v13346_v13 = vld [vmem:[%s18845_s10 + $0x68] ss:$24 sps:$4 sm:$0xff]  }
 0x78e   :  { %3203 = vmatpush1.bf16.msra.mxu0 %v13281_v17  ;;  %3276 = vmatpush1.bf16.msra.mxu1 %v13299_v55  ;;  %v13351_v17 = vld [vmem:[%s18845_s10 + $0x94] ss:$24 sps:$4 sm:$0xff]   ;;  %v13349_v55 = vld [vmem:[%s18845_s10 + $0x90] ss:$24 sps:$4 sm:$0xff]  }
 0x78f   :  { %3204 = vmatprep.subr.bf16.mxu0 %v13286_v57  ;;  %3277 = vmatprep.subr.bf16.mxu1 %v13307_v59  ;;  %v13354_v57 = vld [vmem:[%s18845_s10 + $0x9c] ss:$24 sps:$4 sm:$0xff]   ;;  %v13352_v59 = vld [vmem:[%s18845_s10 + $0x98] ss:$24 sps:$4 sm:$0xff]  }
 0x792   :  { %3205 = vmatpush1.bf16.msra.mxu0 %v13284_v52  ;;  %3278 = vmatpush1.bf16.msra.mxu1 %v13305_v61  ;;  %v13357_v52 = vld [vmem:[%s18845_s10 + $0xc4] ss:$24 sps:$4 sm:$0xff]   ;;  %v13355_v61 = vld [vmem:[%s18845_s10 + $0xc0] ss:$24 sps:$4 sm:$0xff]  }
 0x793   :  { %3206 = vmatprep.subr.bf16.mxu0 %v13292_v26  ;;  %3279 = vmatprep.subr.bf16.mxu1 %v13313_v27  ;;  %v13360_v26 = vld [vmem:[%s18845_s10 + $0xcc] ss:$24 sps:$4 sm:$0xff]   ;;  %v13358_v27 = vld [vmem:[%s18845_s10 + $0xc8] ss:$24 sps:$4 sm:$0xff]  }
 0x796   :  { %3207 = vmatpush1.bf16.msra.mxu0 %v13290_v28  ;;  %3280 = vmatpush1.bf16.msra.mxu1 %v13311_v11  ;;  %v13363_v28 = vld [vmem:[%s18845_s10 + $0xf4] ss:$24 sps:$4 sm:$0xff]   ;;  %v13361_v11 = vld [vmem:[%s18845_s10 + $0xf0] ss:$24 sps:$4 sm:$0xff]  }
 0x797   :  { %3208 = vmatprep.subr.bf16.mxu0 %v13298_v60  ;;  %3281 = vmatprep.subr.bf16.mxu1 %v13317_v1  ;;  %v13366_v60 = vld [vmem:[%s18845_s10 + $0xfc] ss:$24 sps:$4 sm:$0xff]   ;;  %v13364_v1 = vld [vmem:[%s18845_s10 + $0xf8] ss:$24 sps:$4 sm:$0xff]  }
 0x79a   :  { %3209 = vmatpush1.bf16.msra.mxu0 %v13296_v24  ;;  %3282 = vmatpush1.bf16.msra.mxu1 %v13315_v56  ;;  %v13369_v24 = vld [vmem:[%s18845_s10 + $0x124] ss:$24 sps:$4 sm:$0xff]   ;;  %v13367_v56 = vld [vmem:[%s18845_s10 + $0x120] ss:$24 sps:$4 sm:$0xff]  }
 0x79b   :  { %3210 = vmatprep.subr.bf16.mxu0 %v13304_v3  ;;  %3283 = vmatprep.subr.bf16.mxu1 %v13321_v6  ;;  %v13372_v3 = vld [vmem:[%s18845_s10 + $0x12c] ss:$24 sps:$4 sm:$0xff]   ;;  %v13370_v6 = vld [vmem:[%s18845_s10 + $0x128] ss:$24 sps:$4 sm:$0xff]  }
 0x79e   :  { %3211 = vmatpush1.bf16.msra.mxu0 %v13302_v30  ;;  %3284 = vmatpush1.bf16.msra.mxu1 %v13319_v34  ;;  %v13375_v30 = vld [vmem:[%s18845_s10 + $0x154] ss:$24 sps:$4 sm:$0xff]  }
 0x79f   :  { %3212 = vmatprep.subr.bf16.mxu0 %v13310_v42  ;;  %3285 = vmatprep.subr.bf16.mxu1 %v13325_v44  ;;  %v13378_v34 = vld [vmem:[%s18845_s10 + $0x15c] ss:$24 sps:$4 sm:$0xff]   ;;  %v13373_v42 = vld [vmem:[%s18845_s10 + $0x150] ss:$24 sps:$4 sm:$0xff]  }
 0x7a0   :  { %v13376_v44 = vld [vmem:[%s18845_s10 + $0x158] ss:$24 sps:$4 sm:$0xff]  }
 0x7a2   :  { %3213 = vmatpush1.bf16.msra.mxu0 %v13308_v46  ;;  %3286 = vmatpush1.bf16.msra.mxu1 %v13323_v20  ;;  %v13381_v46 = vld [vmem:[%s18845_s10 + $0x14] ss:$24 sps:$4 sm:$0xff]  }
 0x7a3   :  { %12800 = vmatprep.subr.bf16.mxu0 %v13314_v18  ;;  %3934 = vmatprep.subr.bf16.mxu1 %v13333_v43  ;;  %v19014_v20 = vld [vmem:[#allocation20_spill] sm:$0xff] }
 0x7a5   :  { %3231 = vmatmul.mubr.bf16.vlgmr.msra.gmra.mrb[48].mxu0 %v3002_v0  ;;  %3304 = vmatmul.mubr.bf16.vlgmr.msra.gmra.mrb[48].mxu1 %v3002_v0  ;;  %v19015_v0 = vld [vmem:[#allocation21_spill] sm:$0xff] }
 0x7a6   :  { %12801 = vmatpush3.bf16.msra.mxu0 %v13314_v18  ;;  %3240 = vmatprep.mubr.bf16.mxu0 %v19005_v14 }
 0x7a7   :  { %12802 = vmatprep.subr.bf16.mxu0 %v13318_v31  ;;  %3313 = vmatprep.mubr.bf16.mxu1 %v19005_v14 }
 0x7a8   :  { %3935 = vmatpush1.bf16.msra.mxu1 %v13331_v45 }
 0x7a9   :  { %3936 = vmatprep.subr.bf16.mxu1 %v13339_v62  ;;  %v19018_v62 = vld [vmem:[#allocation11_spill] sm:$0xff] }
 0x7aa   :  { %12803 = vmatpush3.bf16.msra.mxu0 %v13318_v31 }
 0x7ab   :  { %12804 = vmatprep.subr.bf16.mxu0 %v13322_v36 }
 0x7ac   :  { %3937 = vmatpush1.bf16.msra.mxu1 %v13337_v16  ;;  %v19019_v16 = vsub.s32 0, %v19018_v62 }
 0x7ad   :  { %3241 = vmatmul.mubr.bf16.gmra.mrb[52].mxu0 %v3003_v10  ;;  %3314 = vmatmul.mubr.bf16.gmra.mrb[52].mxu1 %v3003_v10 }
 0x7ae   :  { %12805 = vmatpush3.bf16.msra.mxu0 %v13322_v36  ;;  %3250 = vmatprep.mubr.bf16.mxu0 %v19005_v14  ;;  %v19016_v36 = vld [vmem:[#allocation22_spill] sm:$0xff] }
 0x7af   :  { %12806 = vmatprep.subr.bf16.mxu0 %v13326_v15  ;;  %3323 = vmatprep.mubr.bf16.mxu1 %v19005_v14 }
 0x7b0   :  { %3938 = vmatprep.subr.bf16.mxu1 %v13345_v49  ;;  %v19020_v49 = vsub.s32 1, %v19018_v62 }
 0x7b1   :  { %3939 = vmatpush1.bf16.msra.mxu1 %v13343_v51 }
 0x7b2   :  { %12807 = vmatpush3.bf16.msra.mxu0 %v13326_v15  ;;  %3940 = vmatprep.subr.bf16.mxu1 %v13351_v17  ;;  %v19017_v15 = vld [vmem:[#allocation23_spill] sm:$0xff] }
 0x7b3   :  { %12808 = vmatprep.subr.bf16.mxu0 %v13327_v8 }
 0x7b5   :  { %3251 = vmatmul.mubr.bf16.gmra.mrb[56].mxu0 %v3004_v2  ;;  %3324 = vmatmul.mubr.bf16.gmra.mrb[56].mxu1 %v3004_v2 }
 0x7b6   :  { %12809 = vmatpush3.bf16.msra.mxu0 %v13327_v8  ;;  %3260 = vmatprep.mubr.bf16.mxu0 %v19005_v14 }
 0x7b7   :  { %12810 = vmatprep.subr.bf16.mxu0 %v13328_v12  ;;  %3333 = vmatprep.mubr.bf16.mxu1 %v19005_v14 }
 0x7b8   :  { %3941 = vmatpush1.bf16.msra.mxu1 %v13349_v55 }
 0x7b9   :  { %3942 = vmatprep.subr.bf16.mxu1 %v13357_v52 }
 0x7ba   :  { %12811 = vmatpush3.bf16.msra.mxu0 %v13328_v12 }
 0x7bb   :  { %12812 = vmatprep.subr.bf16.mxu0 %v13329_v32 }
 0x7bc   :  { %3943 = vmatpush1.bf16.msra.mxu1 %v13355_v61 }
 0x7bd   :  { %3261 = vmatmul.mubr.bf16.gmra.mrb[60].mxu0 %v3005_v37  ;;  %3334 = vmatmul.mubr.bf16.gmra.mrb[60].mxu1 %v3005_v37 }
 0x7be   :  { %12813 = vmatpush3.bf16.msra.mxu0 %v13329_v32  ;;  %12816 = vmatprep.mubr.bf16.mxu0 %v3438_v53 }
 0x7bf   :  { %12814 = vmatprep.subr.bf16.mxu0 %v13330_v50  ;;  %3966 = vmatprep.mubr.bf16.mxu1 %v19005_v14 }
 0x7c0   :  { %3944 = vmatprep.subr.bf16.mxu1 %v13363_v28 }
 0x7c1   :  { %3945 = vmatpush1.bf16.msra.mxu1 %v13361_v11  ;;  %v19021_v11 = vsub.s32 3, %v19018_v62 }
 0x7c2   :  { %12815 = vmatpush3.bf16.msra.mxu0 %v13330_v50  ;;  %3946 = vmatprep.subr.bf16.mxu1 %v13369_v24 }
 0x7c3   :  { %3975 = vmatprep.subr.bf16.mxu0 %v13336_v22 }
 0x7c5   :  { %12817 = vmatmul.mubr.bf16.vlgmr.msra.gmra.mrb[64].mxu0 %v3439_v7  ;;  %3947 = vmatpush1.bf16.msra.mxu1 %v13367_v56  ;;  %v3344_v7 = vld [vmem:[%s18841_s6] sm:$0xf] }
 0x7c6   :  { %12820 = vmatprep.mubr.bf16.mxu0 %v3440_v41  ;;  %3976 = vmatpush1.bf16.msra.mxu0 %v13334_v21  ;;  %v15612_v51 = vrot.slane %v3344_v7, %v19020_v49 }
 0x7c7   :  { %3977 = vmatprep.subr.bf16.mxu0 %v13342_v23  ;;  %3948 = vmatprep.subr.bf16.mxu1 %v13375_v30  ;;  %v15607_v23 = vrot.slane %v3344_v7, %v19019_v16 }
 0x7c9   :  { %3949 = vmatpush1.bf16.msra.mxu1 %v13373_v42 }
 0x7ca   :  { %3978 = vmatpush1.bf16.msra.mxu0 %v13340_v47  ;;  %4016 = vmatprep.subr.bf16.mxu1 %v13381_v46 }
 0x7cb   :  { %3979 = vmatprep.subr.bf16.mxu0 %v13348_v25 }
 0x7ce   :  { %3980 = vmatpush1.bf16.msra.mxu0 %v13346_v13 }
 0x7cf   :  { %3981 = vmatprep.subr.bf16.mxu0 %v13354_v57 }
 0x7d2   :  { %3982 = vmatpush1.bf16.msra.mxu0 %v13352_v59 }
 0x7d3   :  { %3983 = vmatprep.subr.bf16.mxu0 %v13360_v26 }
 0x7d6   :  { %3984 = vmatpush1.bf16.msra.mxu0 %v13358_v27 }
 0x7d7   :  { %3985 = vmatprep.subr.bf16.mxu0 %v13366_v60  ;;  %v15623_v60 = vrot.slane %v3344_v7, %v19021_v11 }
 0x7d9   :  { %19022 = vst [vmem:[#allocation12_spill] sm:$0xff] %v15623_v60 }
 0x7da   :  { %3986 = vmatpush1.bf16.msra.mxu0 %v13364_v1 }
 0x7db   :  { %3987 = vmatprep.subr.bf16.mxu0 %v13372_v3 }
 0x7de   :  { %3988 = vmatpush1.bf16.msra.mxu0 %v13370_v6  ;;  %v19023_v6 = vsub.s32 2, %v19018_v62 }
 0x7df   :  { %3989 = vmatprep.subr.bf16.mxu0 %v13378_v34 }
 0x7e0   :  { %v15633_v30 = vrot.slane %v3344_v7, %v19023_v6 }
 0x7e2   :  { %3990 = vmatpush1.bf16.msra.mxu0 %v13376_v44  ;;  %19024 = vst [vmem:[#allocation13_spill] sm:$0xff] %v15633_v30 }
 0x858   :  { %v2916_v48 = vpop.f32.mrb[44].mxu0  ;;  %v2957_v19 = vpop.f32.mrb[44].mxu1 }
 0x859   :  { %v2964_v18 = vadd.f32 %v2916_v48, %v19014_v20  ;;  %v2966_v31 = vadd.f32 %v2957_v19, %v19015_v0  ;;  %v2918_v33 = vpop.f32.mrb[45].mxu0  ;;  %v2959_v35 = vpop.f32.mrb[45].mxu1 }
 0x85a   :  { %v2965_v10 = vadd.f32 %v2918_v33, %v19016_v36  ;;  %v2967_v4 = vadd.f32 %v2959_v35, %v19017_v15  ;;  %v2920_v5 = vpop.f32.mrb[46].mxu0  ;;  %v2961_v8 = vpop.f32.mrb[46].mxu1 }
 0x85b   :  { %v11862_v2 = vmul.f32 -1.442695, %v2964_v18  ;;  %v2921_v12 = vpop.f32.mrb[47].mxu0  ;;  %v2962_v63 = vpop.f32.mrb[47].mxu1 }
 0x85c   :  { %v11863_v29 = vmul.f32 -1.442695, %v2965_v10  ;;  %v11864_v32 = vmul.f32 -1.442695, %v2967_v4 }
 0x85d   :  { %14067 = vpow2.f32 %v11862_v2 }
 0x85e   :  { %14069 = vpow2.f32 %v11863_v29 }
 0x85f   :  { %14071 = vpow2.f32 %v11864_v32 }
 0x860   :  { %14073 = vtanh.f32 %v2966_v31 }
 0x867   :  { %v14068_v37 = vpop.eup %14067 }
 0x868   :  { %v14070_v38 = vpop.eup %14069  ;;  %v2971_v40 = vadd.f32 1.0, %v14068_v37 }
 0x869   :  { %v2977_v50 = vadd.f32 1.0, %v14070_v38  ;;  %v14072_v53 = vpop.eup %14071 }
 0x86a   :  { %14075 = vrcp.f32 %v2971_v40  ;;  %v14074_v41 = vpop.eup %14073  ;;  %v2984_v21 = vadd.f32 1.0, %v14072_v53 }
 0x86b   :  { %14077 = vrcp.f32 %v2977_v50 }
 0x86c   :  { %14079 = vrcp.f32 %v2984_v21 }
 0x874   :  { %v14076_v43 = vpop.eup %14075 }
 0x875   :  { %v14078_v45 = vpop.eup %14077  ;;  %v2988_v22 = vmul.f32 %v14076_v43, %v14074_v41 }
 0x876   :  { %v2987_v47 = vmul.f32 %v14078_v45, %v15411_v39  ;;  %v14080_v0 = vpop.eup %14079 }
 0x878   :  { %v2989_v25 = vadd.f32 %v2988_v22, %v2987_v47  ;;  %v3232_v13 = vpop.f32.mrb[48].mxu0  ;;  %v3305_v17 = vpop.f32.mrb[48].mxu1 }
 0x879   :  { %v3366_v55 = vadd.f32 %v15607_v23, %v3232_v13  ;;  %v3234_v57 = vpop.f32.mrb[49].mxu0  ;;  %v3307_v59 = vpop.f32.mrb[49].mxu1  ;;  %v3368_v15 = vadd.f32 %v15633_v30, %v3305_v17 }
 0x87a   :  { %14081 = vtanh.f32 %v2989_v25  ;;  %v3367_v52 = vadd.f32 %v15612_v51, %v3234_v57  ;;  %v3236_v61 = vpop.f32.mrb[50].mxu0  ;;  %v15616_v26 = vpop.f32.mrb[50].mxu1  ;;  %v3369_v3 = vadd.f32 %v15623_v60, %v3307_v59 }
 0x87b   :  { %v11909_v27 = vmul.f32 -1.442695, %v3366_v55  ;;  %v15619_v39 = vadd.f32 %v15607_v23, %v3236_v61  ;;  %v3238_v28 = vpop.f32.mrb[51].mxu0  ;;  %v15625_v1 = vpop.f32.mrb[51].mxu1 }
 0x87c   :  { %v11910_v24 = vmul.f32 -1.442695, %v3367_v52  ;;  %v15628_v56 = vadd.f32 %v15612_v51, %v3238_v28  ;;  %v11911_v31 = vmul.f32 -1.442695, %v3369_v3  ;;  %v13379_v3 = vld [vmem:[%s18845_s10 + $0x10] ss:$24 sps:$4 sm:$0xff]  }
 0x87d   :  { %14083 = vpow2.f32 %v11909_v27 }
 0x87e   :  { %14085 = vpow2.f32 %v11910_v24 }
 0x87f   :  { %14087 = vpow2.f32 %v11911_v31  ;;  %v13390_v31 = vld [vmem:[%s18845_s10 + $0xa4] ss:$24 sps:$4 sm:$0xff]  }
 0x880   :  { %v3242_v34 = vpop.f32.mrb[52].mxu0  ;;  %v15635_v42 = vpop.f32.mrb[52].mxu1  ;;  %14089 = vtanh.f32 %v3368_v15  ;;  %v13391_v15 = vld [vmem:[%s18845_s10 + $0xd0] ss:$24 sps:$4 sm:$0xff]  }
 0x881   :  { %19025 = vst [vmem:[#allocation14_spill] sm:$0xff] %v15635_v42  ;;  %v15638_v44 = vadd.f32 %v15607_v23, %v3242_v34  ;;  %v3244_v46 = vpop.f32.mrb[53].mxu0  ;;  %v15640_v48 = vpop.f32.mrb[53].mxu1  ;;  %v13384_v34 = vld [vmem:[%s18845_s10 + $0x44] ss:$24 sps:$4 sm:$0xff]  }
 0x882   :  { %19027 = vst [vmem:[#allocation16_spill] sm:$0xff] %v15640_v48  ;;  %v15643_v19 = vadd.f32 %v15612_v51, %v3244_v46  ;;  %v3246_v20 = vpop.f32.mrb[54].mxu0  ;;  %v15645_v18 = vpop.f32.mrb[54].mxu1  ;;  %v13382_v46 = vld [vmem:[%s18845_s10 + $0x40] ss:$24 sps:$4 sm:$0xff]  }
 0x883   :  { %19026 = vst [vmem:[#allocation15_spill] sm:$0xff] %v15638_v44  ;;  %19029 = vst [vmem:[#allocation18_spill] sm:$0xff] %v15645_v18  ;;  %v15648_v33 = vadd.f32 %v15607_v23, %v3246_v20  ;;  %v3248_v35 = vpop.f32.mrb[55].mxu0  ;;  %v15650_v36 = vpop.f32.mrb[55].mxu1  ;;  %v13387_v20 = vld [vmem:[%s18845_s10 + $0x74] ss:$24 sps:$4 sm:$0xff]  }
 0x884   :  { %19028 = vst [vmem:[#allocation17_spill] sm:$0xff] %v15643_v19  ;;  %19031 = vst [vmem:[#allocation20_spill] sm:$0xff] %v15650_v36  ;;  %v14082_v10 = vpop.eup %14081  ;;  %v15654_v4 = vadd.f32 %v15612_v51, %v3248_v35  ;;  %v13388_v35 = vld [vmem:[%s18845_s10 + $0xa0] ss:$24 sps:$4 sm:$0xff]  }
 0x885   :  { %19030 = vst [vmem:[#allocation19_spill] sm:$0xff] %v15648_v33  ;;  %v15656_v5 = vmul.f32 %v14082_v10, %v14080_v0  ;;  %v13385_v0 = vld [vmem:[%s18845_s10 + $0x70] ss:$24 sps:$4 sm:$0xff]   ;;  %v13393_v10 = vld [vmem:[%s18845_s10 + $0xd4] ss:$24 sps:$4 sm:$0xff]  }
 0x886   :  { %19032 = vst [vmem:[#allocation21_spill] sm:$0xff] %v15654_v4 }
 0x887   :  { %v14084_v8 = vpop.eup %14083  ;;  %11865 = vst [vmem:[%s18850_s15 + $0x38] sm:$0xff] %v15656_v5  ;;  %v3441_v2 = vpack.c.bf16 %v15656_v5, %v15414_v9 }
 0x888   :  { %v14086_v12 = vpop.eup %14085  ;;  %v3624_v63 = vadd.f32 1.0, %v14084_v8  ;;  %v3252_v29 = vpop.f32.mrb[56].mxu0  ;;  %v13396_v8 = vld [vmem:[%s18845_s10 + $0x104] ss:$24 sps:$4 sm:$0xff]  }
 0x889   :  { %v3630_v32 = vadd.f32 1.0, %v14086_v12  ;;  %v15665_v37 = vadd.f32 %v15607_v23, %v3252_v29  ;;  %v3254_v38 = vpop.f32.mrb[57].mxu0  ;;  %12821 = vmatmul.mubr.bf16.gmra.mrb[68].mxu0 %v3441_v2  ;;  %v14088_v43 = vpop.eup %14087  ;;  %v13394_v2 = vld [vmem:[%s18845_s10 + $0x100] ss:$24 sps:$4 sm:$0xff]   ;;  %v13399_v12 = vld [vmem:[%s18845_s10 + $0x134] ss:$24 sps:$4 sm:$0xff]  }
 0x88a   :  { %14091 = vrcp.f32 %v3624_v63  ;;  %v15668_v40 = vadd.f32 %v15612_v51, %v3254_v38  ;;  %v3256_v50 = vpop.f32.mrb[58].mxu0  ;;  %4007 = vmatprep.mubr.bf16.mxu0 %v19005_v14  ;;  %v14090_v21 = vpop.eup %14089  ;;  %v3637_v13 = vadd.f32 1.0, %v14088_v43  ;;  %v13397_v63 = vld [vmem:[%s18845_s10 + $0x130] ss:$24 sps:$4 sm:$0xff]   ;;  %v13402_v29 = vld [vmem:[%s18845_s10 + $0x164] ss:$24 sps:$4 sm:$0xff]  }
 0x88b   :  { %19033 = vst [vmem:[#allocation22_spill] sm:$0xff] %v15665_v37  ;;  %14093 = vrcp.f32 %v3630_v32  ;;  %v15672_v9 = vadd.f32 %v15607_v23, %v3256_v50  ;;  %v3258_v53 = vpop.f32.mrb[59].mxu0  ;;  %v13400_v32 = vld [vmem:[%s18845_s10 + $0x160] ss:$24 sps:$4 sm:$0xff]   ;;  %v15748_v38 = vpop.f32.mrb[56].mxu1  ;;  %v18881_v37 = vmov 0.0  }
 0x88c   :  { %19034 = vst [vmem:[#allocation23_spill] sm:$0xff] %v15668_v40  ;;  %v15675_v7 = vadd.f32 %v15612_v51, %v3258_v53  ;;  %14095 = vrcp.f32 %v3637_v13  ;;  %19041 = vst [vmem:[#allocation29_spill] sm:$0xff] %v15748_v38  ;;  %v15750_v50 = vpop.f32.mrb[57].mxu1  ;;  %v16011_v40 = vld [vmem:[%s18846_s11 + $0x120] ss:$20 sps:$4 sm:$0xff]  }
 0x88d   :  { %19035 = vst [vmem:[#allocation11_spill] sm:$0xff] %v15672_v9  ;;  %19042 = vst [vmem:[#allocation30_spill] sm:$0xff] %v15750_v50  ;;  %v15752_v53 = vpop.f32.mrb[58].mxu1  ;;  %v15992_v9 = vld [vmem:[%s18846_s11 + $0x11c] ss:$20 sps:$4 sm:$0xff]  }
 0x88e   :  { %19036 = vst [vmem:[#allocation24_spill] sm:$0xff] %v15675_v7  ;;  %19043 = vst [vmem:[#allocation31_spill] sm:$0xff] %v15752_v53  ;;  %v15987_v7 = vld [vmem:[%s18846_s11 + $0xf8] ss:$20 sps:$4 sm:$0xff]  }
 0x88f   :  { %19061 = vst [vmem:[#allocation49_spill] sm:$0xff] %v15987_v7  ;;  %v16004_v53 = vld [vmem:[%s18846_s11 + $0x118] ss:$20 sps:$4 sm:$0xff]   ;;  %19063 = vst [vmem:[#allocation51_spill] sm:$0xff] %v16011_v40 }
 0x890   :  { %v3262_v41 = vpop.f32.mrb[60].mxu0 }
 0x891   :  { %v15678_v45 = vadd.f32 %v15607_v23, %v3262_v41  ;;  %v3264_v22 = vpop.f32.mrb[61].mxu0  ;;  %v15754_v41 = vpop.f32.mrb[59].mxu1 }
 0x892   :  { %v15681_v62 = vadd.f32 %v15612_v51, %v3264_v22  ;;  %v3266_v16 = vpop.f32.mrb[62].mxu0  ;;  %19044 = vst [vmem:[#allocation32_spill] sm:$0xff] %v15754_v41  ;;  %v15756_v43 = vpop.f32.mrb[60].mxu1  ;;  %v15998_v41 = vld [vmem:[%s18846_s11 + $0x124] ss:$20 sps:$4 sm:$0xff]  }
 0x893   :  { %19037 = vst [vmem:[#allocation25_spill] sm:$0xff] %v15678_v45  ;;  %v15684_v47 = vadd.f32 %v15607_v23, %v3266_v16  ;;  %v3268_v49 = vpop.f32.mrb[63].mxu0  ;;  %19045 = vst [vmem:[#allocation33_spill] sm:$0xff] %v15756_v43  ;;  %v15758_v22 = vpop.f32.mrb[61].mxu1  ;;  %v15968_v45 = vld [vmem:[%s18846_s11 + $0xf4] ss:$20 sps:$4 sm:$0xff]  }
 0x894   :  { %19038 = vst [vmem:[#allocation26_spill] sm:$0xff] %v15681_v62  ;;  %v14092_v25 = vpop.eup %14091  ;;  %v15687_v17 = vadd.f32 %v15612_v51, %v3268_v49  ;;  %19046 = vst [vmem:[#allocation34_spill] sm:$0xff] %v15758_v22  ;;  %v15963_v62 = vld [vmem:[%s18846_s11 + $0xd0] ss:$20 sps:$4 sm:$0xff]  }
 0x895   :  { %19039 = vst [vmem:[#allocation27_spill] sm:$0xff] %v15684_v47  ;;  %v14094_v55 = vpop.eup %14093  ;;  %v3641_v57 = vmul.f32 %v14092_v25, %v14090_v21  ;;  %v15760_v21 = vpop.f32.mrb[62].mxu1  ;;  %v15944_v47 = vld [vmem:[%s18846_s11 + $0xcc] ss:$20 sps:$4 sm:$0xff]   ;;  %19059 = vst [vmem:[#allocation47_spill] sm:$0xff] %v15963_v62 }
 0x896   :  { %19040 = vst [vmem:[#allocation28_spill] sm:$0xff] %v15687_v17  ;;  %v3640_v59 = vmul.f32 0.0, %v14094_v55  ;;  %v14096_v11 = vpop.eup %14095  ;;  %19047 = vst [vmem:[#allocation35_spill] sm:$0xff] %v15760_v21  ;;  %v15762_v16 = vpop.f32.mrb[63].mxu1  ;;  %v15939_v17 = vld [vmem:[%s18846_s11 + $0xa8] ss:$20 sps:$4 sm:$0xff]  }
 0x897   :  { %19048 = vst [vmem:[#allocation36_spill] sm:$0xff] %v15762_v16  ;;  %v15950_v16 = vld [vmem:[%s18846_s11 + $0xd4] ss:$20 sps:$4 sm:$0xff]   ;;  %v15974_v22 = vld [vmem:[%s18846_s11 + $0xfc] ss:$20 sps:$4 sm:$0xff]   ;;  %19062 = vst [vmem:[#allocation50_spill] sm:$0xff] %v15998_v41 }
 0x898   :  { %v15689_v52 = vadd.f32 %v3641_v57, %v3640_v59  ;;  %v15691_v61 = vpop.f32.mrb[64].mxu0  ;;  %v3372_v57 = vadd.f32 %v15633_v30, %v15616_v26  ;;  %v3373_v59 = vadd.f32 %v15623_v60, %v15625_v1  ;;  %v11906_v1 = vld [vmem:[%s18843_s8] ss:$0 sm:$0xff]  ;;  %19058 = vst [vmem:[#allocation46_spill] sm:$0xff] %v15950_v16  ;;  %v15956_v21 = vld [vmem:[%s18846_s11 + $0xc8] ss:$20 sps:$4 sm:$0xff]  }
 0x899   :  { %v15693_v27 = vpop.f32.mrb[65].mxu0  ;;  %19060 = vst [vmem:[#allocation48_spill] sm:$0xff] %v15974_v22  ;;  %v15980_v43 = vld [vmem:[%s18846_s11 + $0xf0] ss:$20 sps:$4 sm:$0xff]  }
 0x89a   :  { %14097 = vtanh.f32 %v15689_v52  ;;  %v15696_v23 = vpop.f32.mrb[66].mxu0 }
 0x89b   :  { %v15698_v28 = vpop.f32.mrb[67].mxu0 }
 0x8a4   :  { %v14098_v24 = vpop.eup %14097 }
 0x8a5   :  { %v3644_v51 = vmul.f32 %v14098_v24, %v14096_v11 }
 0x8a7   :  { %v3645_v6 = vpack.c.bf16 %v3644_v51, %v3644_v51 }
 0x8a9   :  { %3967 = vmatmul.mubr.bf16.vlgmr.msra.gmra.mrb[64].mxu1 %v3645_v6  ;;  %4008 = vmatmul.mubr.bf16.vlgmr.msra.gmra.mrb[72].mxu0 %v3645_v6 }
 0x8aa   :  { %4017 = vmatpush1.bf16.msra.mxu1 %v13379_v3  ;;  %4048 = vmatprep.mubr.bf16.mxu1 %v19005_v14 }
 0x8ab   :  { %4018 = vmatprep.subr.bf16.mxu1 %v13384_v34  ;;  %4470 = vmatprep.mubr.bf16.mxu0 %v19005_v14 }
 0x8ae   :  { %4019 = vmatpush1.bf16.msra.mxu1 %v13382_v46 }
 0x8af   :  { %4020 = vmatprep.subr.bf16.mxu1 %v13387_v20 }
 0x8b2   :  { %4021 = vmatpush1.bf16.msra.mxu1 %v13385_v0 }
 0x8b3   :  { %4022 = vmatprep.subr.bf16.mxu1 %v13390_v31 }
 0x8b6   :  { %4023 = vmatpush1.bf16.msra.mxu1 %v13388_v35 }
 0x8b7   :  { %4024 = vmatprep.subr.bf16.mxu1 %v13393_v10  ;;  %v15785_v10 = vadd.f32 %v11906_v1, %v15693_v27 }
 0x8b9   :  { %19050 = vst [vmem:[#allocation38_spill] sm:$0xff] %v15785_v10 }
 0x8ba   :  { %4025 = vmatpush1.bf16.msra.mxu1 %v13391_v15  ;;  %v15788_v15 = vadd.f32 %v15696_v23, %v11906_v1 }
 0x8bb   :  { %4026 = vmatprep.subr.bf16.mxu1 %v13396_v8 }
 0x8bc   :  { %19051 = vst [vmem:[#allocation39_spill] sm:$0xff] %v15788_v15 }
 0x8be   :  { %4027 = vmatpush1.bf16.msra.mxu1 %v13394_v2 }
 0x8bf   :  { %4028 = vmatprep.subr.bf16.mxu1 %v13399_v12 }
 0x8c2   :  { %4029 = vmatpush1.bf16.msra.mxu1 %v13397_v63 }
 0x8c3   :  { %4030 = vmatprep.subr.bf16.mxu1 %v13402_v29 }
 0x8c6   :  { %4031 = vmatpush1.bf16.msra.mxu1 %v13400_v32 }
 0x8c9   :  { %4049 = vmatmul.mubr.bf16.vlgmr.msra.gmra.mrb[68].mxu1 %v3645_v6 }
 0x8ca   :  { %4511 = vmatprep.mubr.bf16.mxu1 %v19005_v14 }
 0x95c   :  { %v12822_v49 = vpop.f32.mrb[68].mxu0 }
 0x95d   :  { %v3556_v25 = vpop.f32.mrb[69].mxu0 }
 0x95e   :  { %v12823_v13 = vpop.f32.mrb[70].mxu0  ;;  %v15801_v23 = vadd.f32 %v11906_v1, %v3556_v25  ;;  %v15814_v25 = vld [vmem:[%s18844_s9] ss:$0 sm:$0xff] }
 0x95f   :  { %v3559_v55 = vpop.f32.mrb[71].mxu0  ;;  %19057 = vst [vmem:[#allocation45_spill] sm:$0xff] %v15814_v25 }
 0x960   :  { %v15799_v27 = vadd.f32 %v11906_v1, %v3559_v55  ;;  %19054 = vst [vmem:[#allocation42_spill] sm:$0xff] %v15801_v23 }
 0x962   :  { %19053 = vst [vmem:[#allocation41_spill] sm:$0xff] %v15799_v27 }
 0x97c   :  { %v3968_v11 = vpop.f32.mrb[64].mxu1  ;;  %v4009_v24 = vpop.f32.mrb[72].mxu0 }
 0x97d   :  { %v15769_v51 = vadd.f32 %v3968_v11, %v15619_v39  ;;  %v15771_v3 = vadd.f32 %v4009_v24, %v3372_v57  ;;  %v3970_v6 = vpop.f32.mrb[65].mxu1  ;;  %v4011_v34 = vpop.f32.mrb[73].mxu0  ;;  %v15782_v39 = vadd.f32 %v15691_v61, %v11906_v1  ;;  %v15805_v11 = vadd.f32 %v12823_v13, %v11906_v1 }
 0x97e   :  { %v15774_v46 = vadd.f32 %v3970_v6, %v15628_v56  ;;  %v15776_v20 = vadd.f32 %v4011_v34, %v3373_v59  ;;  %v3972_v0 = vpop.f32.mrb[66].mxu1  ;;  %v4013_v31 = vpop.f32.mrb[74].mxu0  ;;  %v15791_v56 = vadd.f32 %v11906_v1, %v15698_v28  ;;  %v15807_v24 = vadd.f32 %v12822_v49, %v11906_v1 }
 0x97f   :  { %v3973_v26 = vpop.f32.mrb[67].mxu1  ;;  %v4014_v35 = vpop.f32.mrb[75].mxu0  ;;  %19049 = vst [vmem:[#allocation37_spill] sm:$0xff] %v15782_v39  ;;  %19055 = vst [vmem:[#allocation43_spill] sm:$0xff] %v15805_v11 }
 0x980   :  { %19052 = vst [vmem:[#allocation40_spill] sm:$0xff] %v15791_v56  ;;  %19056 = vst [vmem:[#allocation44_spill] sm:$0xff] %v15807_v24 }
 0x99c   :  { %v4050_v8 = vpop.f32.mrb[68].mxu1 }
 0x99d   :  { %v15793_v2 = vpop.f32.mrb[69].mxu1  ;;  %v4067_v12 = vadd.f32 %v4050_v8, %v15782_v39  ;;  %v4065_v63 = vadd.f32 %v4050_v8, %v15785_v10  ;;  %v4068_v29 = vadd.f32 %v4050_v8, %v15788_v15  ;;  %v4066_v32 = vadd.f32 %v4050_v8, %v15791_v56 }
 0x99e   :  { %v4054_v61 = vpop.f32.mrb[70].mxu1  ;;  %v4070_v28 = vadd.f32 %v4050_v8, %v15799_v27  ;;  %v4069_v59 = vadd.f32 %v4050_v8, %v15801_v23  ;;  %v4072_v6 = vadd.f32 %v4050_v8, %v15805_v11  ;;  %v4071_v55 = vadd.f32 %v4050_v8, %v15807_v24 }
 0x99f   :  { %v4055_v57 = vpop.f32.mrb[71].mxu1  ;;  %14099 = vtanh.f32 %v4067_v12 }
 0x9a0   :  { %14101 = vtanh.f32 %v4065_v63 }
 0x9a1   :  { %14103 = vtanh.f32 %v4068_v29 }
 0x9a2   :  { %14105 = vtanh.f32 %v4066_v32 }
 0x9a3   :  { %14107 = vtanh.f32 %v4070_v28 }
 0x9a4   :  { %14109 = vtanh.f32 %v4069_v59  ;;  %v15827_v59 = vld [vmem:[%s18846_s11] ss:$20 sps:$4 sm:$0xff]  }
 0x9a5   :  { %14111 = vtanh.f32 %v4072_v6  ;;  %v15832_v6 = vld [vmem:[%s18846_s11 + $0x4] ss:$20 sps:$4 sm:$0xff]  }
 0x9a6   :  { %14113 = vtanh.f32 %v4071_v55  ;;  %v15837_v55 = vld [vmem:[%s18846_s11 + $0x8] ss:$20 sps:$4 sm:$0xff]   ;;  %4438 = vmatprep.subr.bf16.mxu0 %v15832_v6 }
 0x9a7   :  { %4439 = vmatpush1.bf16.msra.mxu0 %v15827_v59 }
 0x9a9   :  { %v14100_v34 = vpop.eup %14099 }
 0x9aa   :  { %v14102_v0 = vpop.eup %14101  ;;  %v4089_v31 = vmul.f32 %v14100_v34, %v15814_v25  ;;  %v15842_v34 = vld [vmem:[%s18846_s11 + $0xc] ss:$20 sps:$4 sm:$0xff]  }
 0x9ab   :  { %v14104_v13 = vpop.eup %14103  ;;  %v4087_v49 = vmul.f32 %v14102_v0, %v15814_v25  ;;  %v15847_v0 = vld [vmem:[%s18846_s11 + $0x2c] ss:$20 sps:$4 sm:$0xff]   ;;  %4479 = vmatprep.subr.bf16.mxu1 %v15842_v34 }
 0x9ac   :  { %v14106_v26 = vpop.eup %14105  ;;  %4099 = vadd.xlane.f32.xlu1 %v4089_v31  ;;  %v4090_v35 = vmul.f32 %v14104_v13, %v15814_v25  ;;  %v15853_v31 = vld [vmem:[%s18846_s11 + $0x34] ss:$20 sps:$4 sm:$0xff]   ;;  %4480 = vmatpush1.bf16.msra.mxu1 %v15837_v55 }
 0x9ad   :  { %4095 = vadd.xlane.f32.xlu0 %v4087_v49  ;;  %v14108_v1 = vpop.eup %14107  ;;  %v4088_v8 = vmul.f32 %v14106_v26, %v15814_v25  ;;  %v15860_v13 = vld [vmem:[%s18846_s11 + $0x28] ss:$20 sps:$4 sm:$0xff]   ;;  %4440 = vmatprep.subr.bf16.mxu0 %v15847_v0  ;;  %v15867_v49 = vld [vmem:[%s18846_s11 + $0x30] ss:$20 sps:$4 sm:$0xff]  }
 0x9ae   :  { %v14110_v12 = vpop.eup %14109  ;;  %v4092_v63 = vmul.f32 %v14108_v1, %v15814_v25  ;;  %v15872_v26 = vld [vmem:[%s18846_s11 + $0x54] ss:$20 sps:$4 sm:$0xff]   ;;  %4481 = vmatprep.subr.bf16.mxu1 %v15853_v31  ;;  %4441 = vmatpush1.bf16.msra.mxu0 %v15860_v13  ;;  %v15884_v1 = vld [vmem:[%s18846_s11 + $0x50] ss:$20 sps:$4 sm:$0xff]  }
 0x9af   :  { %v14112_v29 = vpop.eup %14111  ;;  %v4091_v61 = vmul.f32 %v14110_v12, %v15814_v25  ;;  %4442 = vmatprep.subr.bf16.mxu0 %v15872_v26  ;;  %v15896_v12 = vld [vmem:[%s18846_s11 + $0x7c] ss:$20 sps:$4 sm:$0xff]  }
 0x9b0   :  { %4101 = vadd.xlane.f32.xlu1 %v4090_v35  ;;  %v14114_v32 = vpop.eup %14113  ;;  %v4094_v57 = vmul.f32 %v14112_v29, %v15814_v25  ;;  %v15878_v35 = vld [vmem:[%s18846_s11 + $0x5c] ss:$20 sps:$4 sm:$0xff]   ;;  %4482 = vmatpush1.bf16.msra.mxu1 %v15867_v49  ;;  %v15908_v29 = vld [vmem:[%s18846_s11 + $0x78] ss:$20 sps:$4 sm:$0xff]  }
 0x9b1   :  { %4097 = vadd.xlane.f32.xlu0 %v4088_v8  ;;  %v4093_v28 = vmul.f32 %v14114_v32, %v15814_v25  ;;  %v15891_v8 = vld [vmem:[%s18846_s11 + $0x58] ss:$20 sps:$4 sm:$0xff]   ;;  %4483 = vmatprep.subr.bf16.mxu1 %v15878_v35 }
 0x9b2   :  { %4443 = vmatpush1.bf16.msra.mxu0 %v15884_v1  ;;  %v15920_v32 = vld [vmem:[%s18846_s11 + $0xa4] ss:$20 sps:$4 sm:$0xff]  }
 0x9b3   :  { %4444 = vmatprep.subr.bf16.mxu0 %v15896_v12 }
 0x9b4   :  { %4105 = vadd.xlane.f32.xlu1 %v4092_v63  ;;  %v15902_v63 = vld [vmem:[%s18846_s11 + $0x84] ss:$20 sps:$4 sm:$0xff]   ;;  %4484 = vmatpush1.bf16.msra.mxu1 %v15891_v8 }
 0x9b5   :  { %4103 = vadd.xlane.f32.xlu0 %v4091_v61  ;;  %v15915_v61 = vld [vmem:[%s18846_s11 + $0x80] ss:$20 sps:$4 sm:$0xff]   ;;  %4485 = vmatprep.subr.bf16.mxu1 %v15902_v63 }
 0x9b6   :  { %4445 = vmatpush1.bf16.msra.mxu0 %v15908_v29 }
 0x9b7   :  { %4446 = vmatprep.subr.bf16.mxu0 %v15920_v32 }
 0x9b8   :  { %4109 = vadd.xlane.f32.xlu1 %v4094_v57  ;;  %v15926_v57 = vld [vmem:[%s18846_s11 + $0xac] ss:$20 sps:$4 sm:$0xff]   ;;  %4486 = vmatpush1.bf16.msra.mxu1 %v15915_v61 }
 0x9b9   :  { %4107 = vadd.xlane.f32.xlu0 %v4093_v28  ;;  %v15932_v28 = vld [vmem:[%s18846_s11 + $0xa0] ss:$20 sps:$4 sm:$0xff]   ;;  %4487 = vmatprep.subr.bf16.mxu1 %v15926_v57 }
 0x9ba   :  { %4447 = vmatpush1.bf16.msra.mxu0 %v15932_v28 }
 0x9bb   :  { %4448 = vmatprep.subr.bf16.mxu0 %v15944_v47 }
 0x9bc   :  { %4488 = vmatpush1.bf16.msra.mxu1 %v15939_v17 }
 0x9bd   :  { %4489 = vmatprep.subr.bf16.mxu1 %v15950_v16 }
 0x9be   :  { %4449 = vmatpush1.bf16.msra.mxu0 %v15956_v21 }
 0x9bf   :  { %4450 = vmatprep.subr.bf16.mxu0 %v15968_v45 }
 0x9c0   :  { %4490 = vmatpush1.bf16.msra.mxu1 %v15963_v62 }
 0x9c1   :  { %4491 = vmatprep.subr.bf16.mxu1 %v15974_v22 }
 0x9c2   :  { %4451 = vmatpush1.bf16.msra.mxu0 %v15980_v43 }
 0x9c3   :  { %4452 = vmatprep.subr.bf16.mxu0 %v15992_v9 }
 0x9c4   :  { %4492 = vmatpush1.bf16.msra.mxu1 %v15987_v7 }
 0x9c5   :  { %4493 = vmatprep.subr.bf16.mxu1 %v15998_v41 }
 0x9c6   :  { %4453 = vmatpush1.bf16.msra.mxu0 %v16004_v53 }
 0x9c7   :  { %12824 = vmatprep.subr.bf16.mxu0 %v18881_v37 }
 0x9c8   :  { %4494 = vmatpush1.bf16.msra.mxu1 %v16011_v40 }
 0x9c9   :  { %12844 = vmatprep.subr.bf16.mxu1 %v18881_v37 }
 0xa39   :  { %v4100_v50 = vpop.xlane.xlu1 %4099 }
 0xa3a   :  { %v4096_v38 = vpop.xlane.xlu0 %4095 }
 0xa3d   :  { %v4102_v4 = vpop.xlane.xlu1 %4101 }
 0xa3e   :  { %v4098_v33 = vpop.xlane.xlu0 %4097 }
 0xa41   :  { %v4106_v36 = vpop.xlane.xlu1 %4105 }
 0xa42   :  { %v4104_v18 = vpop.xlane.xlu0 %4103  ;;  %v4112_v24 = vmax.f32 %v4098_v33, %v4106_v36 }
 0xa43   :  { %v4111_v25 = vmax.f32 %v4096_v38, %v4104_v18 }
 0xa45   :  { %v4110_v11 = vpop.xlane.xlu1 %4109  ;;  %v4115_v15 = vmax.f32 %v4111_v25, %v4112_v24 }
 0xa46   :  { %v4108_v23 = vpop.xlane.xlu0 %4107  ;;  %v4114_v27 = vmax.f32 %v4102_v4, %v4110_v11 }
 0xa47   :  { %v4113_v39 = vmax.f32 %v4100_v50, %v4108_v23 }
 0xa49   :  { %v4116_v10 = vmax.f32 %v4113_v39, %v4114_v27 }
 0xa4b   :  { %v4117_v56 = vmax.f32 %v4115_v15, %v4116_v10  ;;  %v16021_v15 = vld [vmem:[%s18850_s15] sm:$0xff] }
 0xa4d   :  { %v4118_v19 = vsub.f32 %v4096_v38, %v4117_v56  ;;  %v4119_v44 = vsub.f32 %v4098_v33, %v4117_v56  ;;  %v4120_v60 = vsub.f32 %v4100_v50, %v4117_v56  ;;  %v4121_v48 = vsub.f32 %v4102_v4, %v4117_v56 }
 0xa4e   :  { %v4122_v42 = vsub.f32 %v4104_v18, %v4117_v56  ;;  %v4123_v41 = vsub.f32 %v4106_v36, %v4117_v56  ;;  %v4124_v22 = vsub.f32 %v4108_v23, %v4117_v56  ;;  %v4125_v16 = vsub.f32 %v4110_v11, %v4117_v56  ;;  %v16026_v56 = vld [vmem:[%s18850_s15 + $0x8] sm:$0xff] }
 0xa4f   :  { %v4126_v37 = vmul.f32 1.442695, %v4118_v19  ;;  %v4128_v30 = vmul.f32 1.442695, %v4119_v44  ;;  %v4130_v40 = vmul.f32 1.442695, %v4120_v60 }
 0xa50   :  { %v4132_v7 = vmul.f32 1.442695, %v4121_v48  ;;  %v4134_v62 = vmul.f32 1.442695, %v4122_v42  ;;  %v4136_v24 = vmul.f32 1.442695, %v4123_v41 }
 0xa51   :  { %14115 = vpow2.f32 %v4126_v37  ;;  %v4138_v39 = vmul.f32 1.442695, %v4124_v22  ;;  %v4140_v33 = vmul.f32 1.442695, %v4125_v16 }
 0xa52   :  { %14117 = vpow2.f32 %v4128_v30 }
 0xa53   :  { %14119 = vpow2.f32 %v4130_v40 }
 0xa54   :  { %14121 = vpow2.f32 %v4132_v7 }
 0xa55   :  { %14123 = vpow2.f32 %v4134_v62 }
 0xa56   :  { %14125 = vpow2.f32 %v4136_v24 }
 0xa57   :  { %14127 = vpow2.f32 %v4138_v39 }
 0xa58   :  { %14129 = vpow2.f32 %v4140_v33 }
 0xa5b   :  { %v14116_v38 = vpop.eup %14115 }
 0xa5c   :  { %v14118_v4 = vpop.eup %14117 }
 0xa5d   :  { %v4142_v44 = vadd.f32 %v14118_v4, %v14116_v38  ;;  %v14120_v19 = vpop.eup %14119 }
 0xa5e   :  { %v14122_v18 = vpop.eup %14121 }
 0xa5f   :  { %v4143_v60 = vadd.f32 %v14120_v19, %v4142_v44  ;;  %v14124_v48 = vpop.eup %14123  ;;  %v16035_v44 = vld [vmem:[%s18850_s15 + $0x20] sm:$0xff] }
 0xa60   :  { %v14126_v37 = vpop.eup %14125 }
 0xa61   :  { %v4144_v30 = vadd.f32 %v14122_v18, %v4143_v60  ;;  %v14128_v40 = vpop.eup %14127 }
 0xa62   :  { %v14130_v50 = vpop.eup %14129 }
 0xa63   :  { %v4145_v36 = vadd.f32 %v14124_v48, %v4144_v30  ;;  %v16041_v30 = vld [vmem:[%s18850_s15 + $0x28] sm:$0xff] }
 0xa65   :  { %v4146_v42 = vadd.f32 %v14126_v37, %v4145_v36 }
 0xa67   :  { %v4147_v7 = vadd.f32 %v14128_v40, %v4146_v42 }
 0xa69   :  { %v4148_v62 = vadd.f32 %v14130_v50, %v4147_v7 }
 0xa6b   :  { %14131 = vrcp.f32 %v4148_v62 }
 0xa75   :  { %v14132_v41 = vpop.eup %14131 }
 0xa76   :  { %v4150_v22 = vmul.f32 %v14132_v41, %v14116_v38  ;;  %v4151_v16 = vmul.f32 %v14132_v41, %v14118_v4  ;;  %v4152_v10 = vmul.f32 %v14132_v41, %v14120_v19  ;;  %v4153_v27 = vmul.f32 %v14132_v41, %v14122_v18 }
 0xa77   :  { %v4154_v25 = vmul.f32 %v14132_v41, %v14124_v48  ;;  %v4155_v33 = vmul.f32 %v14132_v41, %v14126_v37  ;;  %v4156_v19 = vmul.f32 %v14132_v41, %v14128_v40 }
 0xa78   :  { %v4166_v23 = vmul.f32 %v16021_v15, %v4150_v22  ;;  %v4167_v11 = vmul.f32 %v16026_v56, %v4151_v16  ;;  %v4168_v24 = vmul.f32 %v4152_v10, %v15493_v58  ;;  %v4169_v38 = vmul.f32 %v4153_v27, %v15488_v54  ;;  %v16047_v54 = vld [vmem:[%s18850_s15 + $0x30] sm:$0xff]  ;;  %v13452_v16 = vld [vmem:[%s18846_s11 + $0x38] ss:$20 sps:$4 sm:$0xff]  }
 0xa79   :  { %v4170_v60 = vmul.f32 %v16035_v44, %v4154_v25  ;;  %v4157_v58 = vmul.f32 %v14132_v41, %v14130_v50  ;;  %v4171_v48 = vmul.f32 %v16041_v30, %v4155_v33  ;;  %v4172_v37 = vmul.f32 %v16047_v54, %v4156_v19  ;;  %v13451_v22 = vld [vmem:[%s18846_s11 + $0x10] ss:$20 sps:$4 sm:$0xff]   ;;  %v13460_v10 = vld [vmem:[%s18848_s13 + $0x8] sm:$0xff]   ;;  %v13453_v27 = vld [vmem:[%s18846_s11 + $0x60] ss:$20 sps:$4 sm:$0xff]  }
 0xa7a   :  { %v4174_v39 = vadd.f32 %v4167_v11, %v4166_v23  ;;  %v13459_v41 = vld [vmem:[%s18848_s13] sm:$0xff]   ;;  %v13461_v23 = vld [vmem:[%s18848_s13 + $0x10] sm:$0xff]   ;;  %v13454_v11 = vld [vmem:[%s18846_s11 + $0x88] ss:$20 sps:$4 sm:$0xff]  }
 0xa7b   :  { %v4173_v40 = vmul.f32 %v4157_v58, %v15656_v5  ;;  %v19064_v5 = vmov 0.0   ;;  %v13462_v25 = vld [vmem:[%s18848_s13 + $0x18] sm:$0xff]  }
 0xa7c   :  { %v4175_v4 = vadd.f32 %v4174_v39, %v4168_v24  ;;  %v13455_v24 = vld [vmem:[%s18846_s11 + $0xb0] ss:$20 sps:$4 sm:$0xff]   ;;  %v13456_v33 = vld [vmem:[%s18846_s11 + $0xd8] ss:$20 sps:$4 sm:$0xff]   ;;  %v13458_v19 = vld [vmem:[%s18846_s11 + $0x128] ss:$20 sps:$4 sm:$0xff]  }
 0xa7d   :  { %v13463_v39 = vld [vmem:[%s18848_s13 + $0x20] sm:$0xff]  }
 0xa7e   :  { %v4176_v18 = vadd.f32 %v4175_v4, %v4169_v38  ;;  %v13464_v38 = vld [vmem:[%s18848_s13 + $0x28] sm:$0xff]   ;;  %v13457_v4 = vld [vmem:[%s18846_s11 + $0x100] ss:$20 sps:$4 sm:$0xff]   ;;  %v16121_v58 = vld [vmem:[%s18845_s10 + $0x4] ss:$24 sps:$4 sm:$0xff]  }
 0xa80   :  { %v4177_v36 = vadd.f32 %v4176_v18, %v4170_v60  ;;  %v13465_v60 = vld [vmem:[%s18848_s13 + $0x30] sm:$0xff]   ;;  %v13466_v18 = vld [vmem:[%s18848_s13 + $0x38] sm:$0xff]  }
 0xa82   :  { %v4178_v42 = vadd.f32 %v4177_v36, %v4171_v48  ;;  %v16126_v48 = vld [vmem:[%s18845_s10] ss:$24 sps:$4 sm:$0xff]   ;;  %v16131_v36 = vld [vmem:[%s18845_s10 + $0xc] ss:$24 sps:$4 sm:$0xff]  }
 0xa83   :  { %19065 = vst [vmem:[#allocation52_spill] sm:$0xff] %v16131_v36 }
 0xa84   :  { %v4179_v7 = vadd.f32 %v4178_v42, %v4172_v37  ;;  %v16139_v37 = vld [vmem:[%s18845_s10 + $0x34] ss:$24 sps:$4 sm:$0xff]   ;;  %v16144_v42 = vld [vmem:[%s18845_s10 + $0x30] ss:$24 sps:$4 sm:$0xff]  }
 0xa86   :  { %v4180_v62 = vadd.f32 %v4179_v7, %v4173_v40  ;;  %v16151_v40 = vld [vmem:[%s18845_s10 + $0x64] ss:$24 sps:$4 sm:$0xff]   ;;  %v16156_v7 = vld [vmem:[%s18845_s10 + $0x60] ss:$24 sps:$4 sm:$0xff]  }
 0xa88   :  { %v4181_v50 = vpack.c.bf16 %v4180_v62, %v4180_v62  ;;  %v16163_v62 = vld [vmem:[%s18845_s10 + $0x94] ss:$24 sps:$4 sm:$0xff]  }
 0xa8a   :  { %4471 = vmatmul.mubr.bf16.vlgmr.msra.gmra.mrb[76].mxu0 %v4181_v50  ;;  %4512 = vmatmul.mubr.bf16.vlgmr.msra.gmra.mrb[72].mxu1 %v4181_v50 }
 0xa8b   :  { %12825 = vmatpush3.bf16.msra.mxu0 %v13451_v22  ;;  %12840 = vmatprep.mubr.msk.bf16.mxu0 %vm14578_vm0, %v19064_v5  ;;  %v16168_v22 = vld [vmem:[%s18845_s10 + $0x90] ss:$24 sps:$4 sm:$0xff]  }
 0xa8c   :  { %12826 = vmatprep.subr.bf16.mxu0 %v19064_v5  ;;  %12845 = vmatpush3.bf16.msra.mxu1 %v13459_v41  ;;  %v16180_v41 = vld [vmem:[%s18845_s10 + $0xc4] ss:$24 sps:$4 sm:$0xff]  }
 0xa8d   :  { %12846 = vmatprep.subr.bf16.mxu1 %v19064_v5  ;;  %12860 = vmatprep.mubr.msk.bf16.mxu1 %vm14578_vm0, %v19064_v5 }
 0xa8f   :  { %12827 = vmatpush3.bf16.msra.mxu0 %v13452_v16  ;;  %v16185_v16 = vld [vmem:[%s18845_s10 + $0xf4] ss:$24 sps:$4 sm:$0xff]  }
 0xa90   :  { %12828 = vmatprep.subr.bf16.mxu0 %v19064_v5  ;;  %12847 = vmatpush3.bf16.msra.mxu1 %v13460_v10  ;;  %19067 = vst [vmem:[#allocation54_spill] sm:$0xff] %v16185_v16  ;;  %v16192_v10 = vld [vmem:[%s18845_s10 + $0xf0] ss:$24 sps:$4 sm:$0xff]  }
 0xa91   :  { %12848 = vmatprep.subr.bf16.mxu1 %v19064_v5  ;;  %19068 = vst [vmem:[#allocation55_spill] sm:$0xff] %v16192_v10 }
 0xa93   :  { %12829 = vmatpush3.bf16.msra.mxu0 %v13453_v27  ;;  %v16198_v27 = vld [vmem:[%s18845_s10 + $0x124] ss:$24 sps:$4 sm:$0xff]  }
 0xa94   :  { %12830 = vmatprep.subr.bf16.mxu0 %v19064_v5  ;;  %12849 = vmatpush3.bf16.msra.mxu1 %v13461_v23  ;;  %19069 = vst [vmem:[#allocation56_spill] sm:$0xff] %v16198_v27  ;;  %v16204_v23 = vld [vmem:[%s18845_s10 + $0x120] ss:$24 sps:$4 sm:$0xff]  }
 0xa95   :  { %12850 = vmatprep.subr.bf16.mxu1 %v19064_v5  ;;  %19070 = vst [vmem:[#allocation57_spill] sm:$0xff] %v16204_v23 }
 0xa97   :  { %12831 = vmatpush3.bf16.msra.mxu0 %v13454_v11  ;;  %v16210_v11 = vld [vmem:[%s18845_s10 + $0x154] ss:$24 sps:$4 sm:$0xff]  }
 0xa98   :  { %12832 = vmatprep.subr.bf16.mxu0 %v19064_v5  ;;  %12851 = vmatpush3.bf16.msra.mxu1 %v13462_v25  ;;  %19071 = vst [vmem:[#allocation58_spill] sm:$0xff] %v16210_v11  ;;  %v16216_v25 = vld [vmem:[%s18845_s10 + $0x150] ss:$24 sps:$4 sm:$0xff]  }
 0xa99   :  { %12852 = vmatprep.subr.bf16.mxu1 %v19064_v5  ;;  %19072 = vst [vmem:[#allocation59_spill] sm:$0xff] %v16216_v25 }
 0xa9b   :  { %12833 = vmatpush3.bf16.msra.mxu0 %v13455_v24  ;;  %v16222_v24 = vld [vmem:[%s18845_s10 + $0x14] ss:$24 sps:$4 sm:$0xff]  }
 0xa9c   :  { %12834 = vmatprep.subr.bf16.mxu0 %v19064_v5  ;;  %12853 = vmatpush3.bf16.msra.mxu1 %v13463_v39  ;;  %19073 = vst [vmem:[#allocation60_spill] sm:$0xff] %v16222_v24  ;;  %v16229_v39 = vld [vmem:[%s18847_s12] ss:$0 sm:$0xff] }
 0xa9d   :  { %12854 = vmatprep.subr.bf16.mxu1 %v19064_v5 }
 0xa9f   :  { %12835 = vmatpush3.bf16.msra.mxu0 %v13456_v33 }
 0xaa0   :  { %12836 = vmatprep.subr.bf16.mxu0 %v19064_v5  ;;  %12855 = vmatpush3.bf16.msra.mxu1 %v13464_v38 }
 0xaa1   :  { %12856 = vmatprep.subr.bf16.mxu1 %v19064_v5 }
 0xaa3   :  { %12837 = vmatpush3.bf16.msra.mxu0 %v13457_v4 }
 0xaa4   :  { %12838 = vmatprep.subr.bf16.mxu0 %v19064_v5  ;;  %12857 = vmatpush3.bf16.msra.mxu1 %v13465_v60 }
 0xaa5   :  { %12858 = vmatprep.subr.bf16.mxu1 %v19064_v5 }
 0xaa7   :  { %12839 = vmatpush3.bf16.msra.mxu0 %v13458_v19 }
 0xaa8   :  { %12859 = vmatpush3.bf16.msra.mxu1 %v13466_v18  ;;  %4994 = vmatprep.subr.bf16.mxu0 %v16121_v58 }
 0xaa9   :  { %5035 = vmatprep.subr.bf16.mxu1 %v16131_v36 }
 0xaaa   :  { %12841 = vmatmul.mubr.bf16.vlgmr.msra.gmra.mrb[80].mxu0 %v4181_v50  ;;  %v16175_v50 = vld [vmem:[%s18845_s10 + $0xc0] ss:$24 sps:$4 sm:$0xff]  }
 0xaab   :  { %5026 = vmatprep.mubr.bf16.mxu0 %v19005_v14  ;;  %4995 = vmatpush1.bf16.msra.mxu0 %v16126_v48  ;;  %19066 = vst [vmem:[#allocation53_spill] sm:$0xff] %v16175_v50 }
 0xaac   :  { %4996 = vmatprep.subr.bf16.mxu0 %v16139_v37 }
 0xaaf   :  { %4997 = vmatpush1.bf16.msra.mxu0 %v16144_v42 }
 0xab0   :  { %4998 = vmatprep.subr.bf16.mxu0 %v16151_v40 }
 0xab3   :  { %4999 = vmatpush1.bf16.msra.mxu0 %v16156_v7 }
 0xab4   :  { %5000 = vmatprep.subr.bf16.mxu0 %v16163_v62 }
 0xab7   :  { %5001 = vmatpush1.bf16.msra.mxu0 %v16168_v22 }
 0xab8   :  { %5002 = vmatprep.subr.bf16.mxu0 %v16180_v41 }
 0xabb   :  { %5003 = vmatpush1.bf16.msra.mxu0 %v16175_v50 }
 0xabc   :  { %5004 = vmatprep.subr.bf16.mxu0 %v16185_v16 }
 0xabf   :  { %5005 = vmatpush1.bf16.msra.mxu0 %v16192_v10 }
 0xac0   :  { %5006 = vmatprep.subr.bf16.mxu0 %v16198_v27 }
 0xac3   :  { %5007 = vmatpush1.bf16.msra.mxu0 %v16204_v23 }
 0xac4   :  { %5008 = vmatprep.subr.bf16.mxu0 %v16210_v11 }
 0xac7   :  { %5009 = vmatpush1.bf16.msra.mxu0 %v16216_v25 }
 0xac8   :  { %5076 = vmatprep.subr.bf16.mxu0 %v16222_v24 }
 0xb5d   :  { %v4472_v33 = vpop.f32.mrb[76].mxu0  ;;  %v4513_v38 = vpop.f32.mrb[72].mxu1 }
 0xb5e   :  { %v4560_v4 = vadd.f32 %v4472_v33, %v15793_v2  ;;  %v4678_v19 = vadd.f32 %v15774_v46, %v4513_v38  ;;  %v4474_v60 = vpop.f32.mrb[77].mxu0  ;;  %v4515_v18 = vpop.f32.mrb[73].mxu1  ;;  %v16239_v2 = vld [vmem:[%s18845_s10 + $0x8] ss:$24 sps:$4 sm:$0xff]   ;;  %v16281_v33 = vld [vmem:[%s18845_s10 + $0xcc] ss:$24 sps:$4 sm:$0xff]  }
 0xb5f   :  { %v4677_v36 = vadd.f32 %v15769_v51, %v4474_v60  ;;  %v4679_v11 = vadd.f32 %v15771_v3, %v4515_v18  ;;  %v4476_v25 = vpop.f32.mrb[78].mxu0  ;;  %v4517_v23 = vpop.f32.mrb[74].mxu1  ;;  %v16244_v51 = vld [vmem:[%s18845_s10 + $0x3c] ss:$24 sps:$4 sm:$0xff]   ;;  %v16250_v3 = vld [vmem:[%s18845_s10 + $0x38] ss:$24 sps:$4 sm:$0xff]  }
 0xb60   :  { %v4561_v24 = vadd.f32 %v16229_v39, %v4560_v4  ;;  %v12010_v27 = vmul.f32 -1.442695, %v4678_v19  ;;  %v4477_v10 = vpop.f32.mrb[79].mxu0  ;;  %v4518_v16 = vpop.f32.mrb[75].mxu1  ;;  %v16275_v25 = vld [vmem:[%s18845_s10 + $0x98] ss:$24 sps:$4 sm:$0xff]  }
 0xb61   :  { %v12009_v50 = vmul.f32 -1.442695, %v4677_v36  ;;  %v16257_v36 = vld [vmem:[%s18845_s10 + $0x6c] ss:$24 sps:$4 sm:$0xff]   ;;  %v16269_v16 = vld [vmem:[%s18845_s10 + $0x9c] ss:$24 sps:$4 sm:$0xff]  }
 0xb62   :  { %v4562_v46 = vpack.c.bf16 %v4561_v24, %v4561_v24  ;;  %14133 = vpow2.f32 %v12010_v27  ;;  %19074 = vst [vmem:[#allocation61_spill] sm:$0xff] %v16275_v25  ;;  %19075 = vst [vmem:[#allocation62_spill] sm:$0xff] %v16281_v33  ;;  %v16287_v38 = vld [vmem:[%s18845_s10 + $0xc8] ss:$24 sps:$4 sm:$0xff]   ;;  %v16299_v4 = vld [vmem:[%s18845_s10 + $0xf8] ss:$24 sps:$4 sm:$0xff]  }
 0xb63   :  { %14135 = vpow2.f32 %v12009_v50  ;;  %v16263_v50 = vld [vmem:[%s18845_s10 + $0x68] ss:$24 sps:$4 sm:$0xff]   ;;  %19076 = vst [vmem:[#allocation63_spill] sm:$0xff] %v16287_v38  ;;  %19078 = vst [vmem:[#allocation65_spill] sm:$0xff] %v16299_v4  ;;  %v16305_v19 = vld [vmem:[%s18845_s10 + $0x12c] ss:$24 sps:$4 sm:$0xff]  }
 0xb64   :  { %12861 = vmatmul.mubr.bf16.vlgmr.msra.gmra.mrb[76].mxu1 %v4562_v46  ;;  %14137 = vtanh.f32 %v4679_v11  ;;  %v16293_v11 = vld [vmem:[%s18845_s10 + $0xfc] ss:$24 sps:$4 sm:$0xff]   ;;  %19079 = vst [vmem:[#allocation66_spill] sm:$0xff] %v16305_v19  ;;  %v16311_v46 = vld [vmem:[%s18845_s10 + $0x128] ss:$24 sps:$4 sm:$0xff]  }
 0xb65   :  { %5036 = vmatpush1.bf16.msra.mxu1 %v16239_v2  ;;  %5067 = vmatprep.mubr.bf16.mxu1 %v19005_v14  ;;  %19077 = vst [vmem:[#allocation64_spill] sm:$0xff] %v16293_v11  ;;  %19080 = vst [vmem:[#allocation67_spill] sm:$0xff] %v16311_v46 }
 0xb66   :  { %5037 = vmatprep.subr.bf16.mxu1 %v16244_v51 }
 0xb69   :  { %5038 = vmatpush1.bf16.msra.mxu1 %v16250_v3 }
 0xb6a   :  { %5039 = vmatprep.subr.bf16.mxu1 %v16257_v36 }
 0xb6c   :  { %v14134_v10 = vpop.eup %14133 }
 0xb6d   :  { %v14136_v27 = vpop.eup %14135  ;;  %v4690_v23 = vadd.f32 1.0, %v14134_v10  ;;  %5040 = vmatpush1.bf16.msra.mxu1 %v16263_v50 }
 0xb6e   :  { %v4684_v24 = vadd.f32 1.0, %v14136_v27  ;;  %5041 = vmatprep.subr.bf16.mxu1 %v16269_v16  ;;  %v14138_v60 = vpop.eup %14137 }
 0xb6f   :  { %14139 = vrcp.f32 %v4690_v23  ;;  %v16318_v23 = vld [vmem:[%s18845_s10 + $0x15c] ss:$24 sps:$4 sm:$0xff]  }
 0xb70   :  { %14141 = vrcp.f32 %v4684_v24 }
 0xb71   :  { %5042 = vmatpush1.bf16.msra.mxu1 %v16275_v25 }
 0xb72   :  { %5043 = vmatprep.subr.bf16.mxu1 %v16281_v33 }
 0xb75   :  { %5044 = vmatpush1.bf16.msra.mxu1 %v16287_v38 }
 0xb76   :  { %5045 = vmatprep.subr.bf16.mxu1 %v16293_v11 }
 0xb79   :  { %v14140_v18 = vpop.eup %14139  ;;  %5046 = vmatpush1.bf16.msra.mxu1 %v16299_v4  ;;  %v16326_v4 = vld [vmem:[%s18845_s10 + $0x158] ss:$24 sps:$4 sm:$0xff]  }
 0xb7a   :  { %v14142_v10 = vpop.eup %14141  ;;  %v4700_v27 = vmul.f32 %v14140_v18, %v15689_v52  ;;  %5047 = vmatprep.subr.bf16.mxu1 %v16305_v19 }
 0xb7b   :  { %v4701_v24 = vmul.f32 %v14142_v10, %v14138_v60 }
 0xb7d   :  { %v16320_v11 = vadd.f32 %v4701_v24, %v4700_v27  ;;  %v4554_v38 = vpop.f32.mrb[80].mxu0  ;;  %5048 = vmatpush1.bf16.msra.mxu1 %v16311_v46 }
 0xb7e   :  { %v4680_v52 = vadd.f32 %v15776_v20, %v4554_v38  ;;  %v12842_v18 = vpop.f32.mrb[81].mxu0  ;;  %5049 = vmatprep.subr.bf16.mxu1 %v16318_v23  ;;  %v16336_v20 = vld [vmem:[%s18845_s10 + $0x10] ss:$24 sps:$4 sm:$0xff]  }
 0xb7f   :  { %v4557_v19 = vpop.f32.mrb[82].mxu0 }
 0xb80   :  { %v12011_v33 = vmul.f32 -1.442695, %v4680_v52  ;;  %v12843_v25 = vpop.f32.mrb[83].mxu0  ;;  %v16363_v19 = vld [vmem:[%s18845_s10 + $0x70] ss:$24 sps:$4 sm:$0xff]  }
 0xb81   :  { %5050 = vmatpush1.bf16.msra.mxu1 %v16326_v4  ;;  %v16341_v25 = vld [vmem:[%s18845_s10 + $0x44] ss:$24 sps:$4 sm:$0xff]   ;;  %v19101_v52 = vld [vmem:[#allocation12_spill] sm:$0xff] }
 0xb82   :  { %14143 = vpow2.f32 %v12011_v33  ;;  %5492 = vmatprep.subr.bf16.mxu1 %v15832_v6  ;;  %v16347_v6 = vld [vmem:[%s18845_s10 + $0x40] ss:$24 sps:$4 sm:$0xff]   ;;  %v16354_v33 = vld [vmem:[%s18845_s10 + $0x74] ss:$24 sps:$4 sm:$0xff]  }
 0xb83   :  { %14145 = vtanh.f32 %v16320_v11 }
 0xb8c   :  { %v14144_v60 = vpop.eup %14143 }
 0xb8d   :  { %v4697_v10 = vadd.f32 1.0, %v14144_v60  ;;  %v14146_v27 = vpop.eup %14145 }
 0xb8f   :  { %14147 = vrcp.f32 %v4697_v10 }
 0xb99   :  { %v14148_v24 = vpop.eup %14147 }
 0xb9a   :  { %v4704_v46 = vmul.f32 %v14148_v24, %v14146_v27  ;;  %v19102_v27 = vld [vmem:[#allocation15_spill] sm:$0xff] }
 0xb9c   :  { %v4705_v38 = vpack.c.bf16 %v4704_v46, %v4704_v46  ;;  %v16369_v46 = vld [vmem:[%s18845_s10 + $0xa4] ss:$24 sps:$4 sm:$0xff]  }
 0xb9d   :  { %19081 = vst [vmem:[#allocation68_spill] sm:$0xff] %v16369_v46 }
 0xb9e   :  { %5027 = vmatmul.mubr.bf16.vlgmr.msra.gmra.mrb[84].mxu0 %v4705_v38  ;;  %5068 = vmatmul.mubr.bf16.vlgmr.msra.gmra.mrb[80].mxu1 %v4705_v38 }
 0xb9f   :  { %5077 = vmatpush1.bf16.msra.mxu0 %v16336_v20  ;;  %5108 = vmatprep.mubr.bf16.mxu0 %v19005_v14 }
 0xba0   :  { %5078 = vmatprep.subr.bf16.mxu0 %v16341_v25  ;;  %5493 = vmatpush1.bf16.msra.mxu1 %v15827_v59  ;;  %v16377_v59 = vld [vmem:[%s18845_s10 + $0xa0] ss:$24 sps:$4 sm:$0xff]  }
 0xba1   :  { %5494 = vmatprep.subr.bf16.mxu1 %v15847_v0  ;;  %5524 = vmatprep.mubr.bf16.mxu1 %v19005_v14  ;;  %19082 = vst [vmem:[#allocation69_spill] sm:$0xff] %v16377_v59  ;;  %v16383_v0 = vld [vmem:[%s18845_s10 + $0xd4] ss:$24 sps:$4 sm:$0xff]  }
 0xba2   :  { %19083 = vst [vmem:[#allocation70_spill] sm:$0xff] %v16383_v0 }
 0xba3   :  { %5079 = vmatpush1.bf16.msra.mxu0 %v16347_v6 }
 0xba4   :  { %5080 = vmatprep.subr.bf16.mxu0 %v16354_v33  ;;  %5495 = vmatpush1.bf16.msra.mxu1 %v15860_v13  ;;  %v16391_v13 = vld [vmem:[%s18845_s10 + $0xd0] ss:$24 sps:$4 sm:$0xff]  }
 0xba5   :  { %5496 = vmatprep.subr.bf16.mxu1 %v15872_v26  ;;  %19084 = vst [vmem:[#allocation71_spill] sm:$0xff] %v16391_v13  ;;  %v16397_v26 = vld [vmem:[%s18845_s10 + $0x104] ss:$24 sps:$4 sm:$0xff]  }
 0xba6   :  { %19085 = vst [vmem:[#allocation72_spill] sm:$0xff] %v16397_v26 }
 0xba7   :  { %5081 = vmatpush1.bf16.msra.mxu0 %v16363_v19 }
 0xba8   :  { %5082 = vmatprep.subr.bf16.mxu0 %v16369_v46  ;;  %5497 = vmatpush1.bf16.msra.mxu1 %v15884_v1  ;;  %v16405_v1 = vld [vmem:[%s18845_s10 + $0x100] ss:$24 sps:$4 sm:$0xff]  }
 0xba9   :  { %5498 = vmatprep.subr.bf16.mxu1 %v15896_v12  ;;  %19086 = vst [vmem:[#allocation73_spill] sm:$0xff] %v16405_v1  ;;  %v16411_v12 = vld [vmem:[%s18845_s10 + $0x134] ss:$24 sps:$4 sm:$0xff]  }
 0xbaa   :  { %19087 = vst [vmem:[#allocation74_spill] sm:$0xff] %v16411_v12 }
 0xbab   :  { %5083 = vmatpush1.bf16.msra.mxu0 %v16377_v59 }
 0xbac   :  { %5084 = vmatprep.subr.bf16.mxu0 %v16383_v0  ;;  %5499 = vmatpush1.bf16.msra.mxu1 %v15908_v29  ;;  %v16419_v29 = vld [vmem:[%s18845_s10 + $0x130] ss:$24 sps:$4 sm:$0xff]  }
 0xbad   :  { %5500 = vmatprep.subr.bf16.mxu1 %v15920_v32  ;;  %19088 = vst [vmem:[#allocation75_spill] sm:$0xff] %v16419_v29  ;;  %v16425_v32 = vld [vmem:[%s18845_s10 + $0x164] ss:$24 sps:$4 sm:$0xff]  }
 0xbae   :  { %19089 = vst [vmem:[#allocation76_spill] sm:$0xff] %v16425_v32 }
 0xbaf   :  { %5085 = vmatpush1.bf16.msra.mxu0 %v16391_v13 }
 0xbb0   :  { %5086 = vmatprep.subr.bf16.mxu0 %v16397_v26  ;;  %5501 = vmatpush1.bf16.msra.mxu1 %v15932_v28  ;;  %v19100_v28 = vld [vmem:[#allocation16_spill] sm:$0xff] }
 0xbb1   :  { %5502 = vmatprep.subr.bf16.mxu1 %v15944_v47  ;;  %v16433_v47 = vld [vmem:[%s18845_s10 + $0x160] ss:$24 sps:$4 sm:$0xff]   ;;  %v3377_v18 = vadd.f32 %v19101_v52, %v19100_v28 }
 0xbb2   :  { %19090 = vst [vmem:[#allocation77_spill] sm:$0xff] %v16433_v47 }
 0xbb3   :  { %5087 = vmatpush1.bf16.msra.mxu0 %v16405_v1 }
 0xbb4   :  { %5088 = vmatprep.subr.bf16.mxu0 %v16411_v12  ;;  %5503 = vmatpush1.bf16.msra.mxu1 %v15956_v21  ;;  %v19095_v21 = vld [vmem:[#allocation50_spill] sm:$0xff] }
 0xbb5   :  { %5504 = vmatprep.subr.bf16.mxu1 %v15968_v45  ;;  %v19092_v45 = vld [vmem:[#allocation47_spill] sm:$0xff] }
 0xbb7   :  { %5089 = vmatpush1.bf16.msra.mxu0 %v16419_v29 }
 0xbb8   :  { %5090 = vmatprep.subr.bf16.mxu0 %v16425_v32  ;;  %5505 = vmatpush1.bf16.msra.mxu1 %v15980_v43  ;;  %v19094_v43 = vld [vmem:[#allocation49_spill] sm:$0xff] }
 0xbb9   :  { %5506 = vmatprep.subr.bf16.mxu1 %v15992_v9  ;;  %v19091_v9 = vld [vmem:[#allocation46_spill] sm:$0xff] }
 0xbbb   :  { %5091 = vmatpush1.bf16.msra.mxu0 %v16433_v47 }
 0xbbc   :  { %5533 = vmatprep.subr.bf16.mxu0 %v15842_v34  ;;  %5507 = vmatpush1.bf16.msra.mxu1 %v16004_v53  ;;  %v19093_v53 = vld [vmem:[#allocation48_spill] sm:$0xff]  ;;  %v16462_v34 = vld [vmem:[%s18849_s14] ss:$0 sm:$0xff] }
 0xbbd   :  { %12864 = vmatprep.subr.bf16.mxu1 %v19064_v5  ;;  %19097 = vst [vmem:[#allocation46_spill] sm:$0xff] %v16462_v34 }
 0xbbe   :  { %5109 = vmatmul.mubr.bf16.vlgmr.msra.gmra.mrb[88].mxu0 %v4705_v38 }
 0xbbf   :  { %5534 = vmatpush1.bf16.msra.mxu0 %v15837_v55  ;;  %5565 = vmatprep.mubr.bf16.mxu0 %v19005_v14  ;;  %v19096_v55 = vld [vmem:[#allocation51_spill] sm:$0xff] }
 0xbc0   :  { %5535 = vmatprep.subr.bf16.mxu0 %v15853_v31 }
 0xbc3   :  { %5536 = vmatpush1.bf16.msra.mxu0 %v15867_v49 }
 0xbc4   :  { %5537 = vmatprep.subr.bf16.mxu0 %v15878_v35 }
 0xbc7   :  { %5538 = vmatpush1.bf16.msra.mxu0 %v15891_v8 }
 0xbc8   :  { %5539 = vmatprep.subr.bf16.mxu0 %v15902_v63  ;;  %v19098_v63 = vld [vmem:[#allocation14_spill] sm:$0xff] }
 0xbcb   :  { %5540 = vmatpush1.bf16.msra.mxu0 %v15915_v61  ;;  %v19099_v61 = vld [vmem:[#allocation13_spill] sm:$0xff] }
 0xbcc   :  { %5541 = vmatprep.subr.bf16.mxu0 %v15926_v57  ;;  %v3376_v57 = vadd.f32 %v19099_v61, %v19098_v63  ;;  %v19104_v63 = vld [vmem:[#allocation40_spill] sm:$0xff]  ;;  %v19107_v61 = vld [vmem:[#allocation37_spill] sm:$0xff] }
 0xbcf   :  { %5542 = vmatpush1.bf16.msra.mxu0 %v15939_v17 }
 0xbd0   :  { %5543 = vmatprep.subr.bf16.mxu0 %v19091_v9 }
 0xbd3   :  { %5544 = vmatpush1.bf16.msra.mxu0 %v19092_v45 }
 0xbd4   :  { %5545 = vmatprep.subr.bf16.mxu0 %v19093_v53  ;;  %v19103_v53 = vld [vmem:[#allocation17_spill] sm:$0xff] }
 0xbd7   :  { %5546 = vmatpush1.bf16.msra.mxu0 %v19094_v43 }
 0xbd8   :  { %5547 = vmatprep.subr.bf16.mxu0 %v19095_v21 }
 0xbdb   :  { %5548 = vmatpush1.bf16.msra.mxu0 %v19096_v55 }
 0xbdc   :  { %12884 = vmatprep.subr.bf16.mxu0 %v19064_v5 }
 0xc37   :  { %v4661_v17 = vpop.f32.mrb[76].mxu1 }
 0xc38   :  { %v4662_v31 = vadd.f32 %v16462_v34, %v4661_v17  ;;  %v12862_v49 = vpop.f32.mrb[77].mxu1 }
 0xc39   :  { %v4664_v35 = vpop.f32.mrb[78].mxu1 }
 0xc3a   :  { %4667 = vst [vmem:[%s18851_s16] sm:$0xff] %v4662_v31  ;;  %v12863_v8 = vpop.f32.mrb[79].mxu1 }
 0xc71   :  { %v5028_v60 = vpop.f32.mrb[84].mxu0  ;;  %v5069_v10 = vpop.f32.mrb[80].mxu1 }
 0xc72   :  { %v16473_v24 = vadd.f32 %v5028_v60, %v19102_v27  ;;  %v16475_v38 = vadd.f32 %v5069_v10, %v3376_v57  ;;  %v5030_v9 = vpop.f32.mrb[85].mxu0  ;;  %v5071_v45 = vpop.f32.mrb[81].mxu1  ;;  %v19105_v60 = vld [vmem:[#allocation38_spill] sm:$0xff]  ;;  %v19106_v57 = vld [vmem:[#allocation39_spill] sm:$0xff] }
 0xc73   :  { %v16478_v43 = vadd.f32 %v5030_v9, %v19103_v53  ;;  %v16480_v21 = vadd.f32 %v5071_v45, %v3377_v18  ;;  %v5032_v55 = vpop.f32.mrb[86].mxu0  ;;  %v5073_v17 = vpop.f32.mrb[82].mxu1  ;;  %v19108_v18 = vld [vmem:[#allocation41_spill] sm:$0xff]  ;;  %v19109_v53 = vld [vmem:[#allocation42_spill] sm:$0xff] }
 0xc74   :  { %v5033_v31 = vpop.f32.mrb[87].mxu0  ;;  %v5074_v49 = vpop.f32.mrb[83].mxu1  ;;  %v19110_v17 = vld [vmem:[#allocation43_spill] sm:$0xff] }
 0xc75   :  { %v19111_v49 = vld [vmem:[#allocation44_spill] sm:$0xff] }
 0xc91   :  { %v5110_v35 = vpop.f32.mrb[88].mxu0 }
 0xc92   :  { %v16482_v8 = vpop.f32.mrb[89].mxu0  ;;  %v5126_v28 = vadd.f32 %v5110_v35, %v19104_v63  ;;  %v5125_v27 = vadd.f32 %v5110_v35, %v19105_v60  ;;  %v5128_v10 = vadd.f32 %v5110_v35, %v19106_v57  ;;  %v5127_v34 = vadd.f32 %v5110_v35, %v19107_v61  ;;  %v19112_v57 = vld [vmem:[#allocation45_spill] sm:$0xff] }
 0xc93   :  { %v5114_v52 = vpop.f32.mrb[90].mxu0  ;;  %v5130_v45 = vadd.f32 %v5110_v35, %v19108_v18  ;;  %v5129_v55 = vadd.f32 %v5110_v35, %v19109_v53  ;;  %v5132_v31 = vadd.f32 %v5110_v35, %v19110_v17  ;;  %v5131_v60 = vadd.f32 %v5110_v35, %v19111_v49 }
 0xc94   :  { %v5115_v9 = vpop.f32.mrb[91].mxu0  ;;  %14149 = vtanh.f32 %v5126_v28 }
 0xc95   :  { %14151 = vtanh.f32 %v5125_v27 }
 0xc96   :  { %14153 = vtanh.f32 %v5128_v10 }
 0xc97   :  { %14155 = vtanh.f32 %v5127_v34 }
 0xc98   :  { %14157 = vtanh.f32 %v5130_v45 }
 0xc99   :  { %14159 = vtanh.f32 %v5129_v55 }
 0xc9a   :  { %14161 = vtanh.f32 %v5132_v31 }
 0xc9b   :  { %14163 = vtanh.f32 %v5131_v60 }
 0xc9e   :  { %v14150_v63 = vpop.eup %14149 }
 0xc9f   :  { %v14152_v52 = vpop.eup %14151  ;;  %v5142_v61 = vmul.f32 %v14150_v63, %v19112_v57 }
 0xca0   :  { %v14154_v28 = vpop.eup %14153  ;;  %v5141_v27 = vmul.f32 %v14152_v52, %v19112_v57 }
 0xca1   :  { %v14156_v10 = vpop.eup %14155  ;;  %5151 = vadd.xlane.f32.xlu1 %v5142_v61  ;;  %v5144_v34 = vmul.f32 %v14154_v28, %v19112_v57 }
 0xca2   :  { %5149 = vadd.xlane.f32.xlu0 %v5141_v27  ;;  %v14158_v9 = vpop.eup %14157  ;;  %v5143_v45 = vmul.f32 %v14156_v10, %v19112_v57 }
 0xca3   :  { %v14160_v55 = vpop.eup %14159  ;;  %v5146_v35 = vmul.f32 %v14158_v9, %v19112_v57 }
 0xca4   :  { %v14162_v31 = vpop.eup %14161  ;;  %v5145_v63 = vmul.f32 %v14160_v55, %v19112_v57 }
 0xca5   :  { %5155 = vadd.xlane.f32.xlu1 %v5144_v34  ;;  %v14164_v60 = vpop.eup %14163  ;;  %v5148_v52 = vmul.f32 %v14162_v31, %v19112_v57 }
 0xca6   :  { %5153 = vadd.xlane.f32.xlu0 %v5143_v45  ;;  %v5147_v61 = vmul.f32 %v14164_v60, %v19112_v57 }
 0xca9   :  { %5159 = vadd.xlane.f32.xlu1 %v5146_v35 }
 0xcaa   :  { %5157 = vadd.xlane.f32.xlu0 %v5145_v63 }
 0xcad   :  { %5163 = vadd.xlane.f32.xlu1 %v5148_v52 }
 0xcae   :  { %5161 = vadd.xlane.f32.xlu0 %v5147_v61 }
 0xd2e   :  { %v5152_v28 = vpop.xlane.xlu1 %5151 }
 0xd2f   :  { %v5150_v27 = vpop.xlane.xlu0 %5149 }
 0xd32   :  { %v5156_v10 = vpop.xlane.xlu1 %5155 }
 0xd33   :  { %v5154_v49 = vpop.xlane.xlu0 %5153 }
 0xd36   :  { %v5160_v34 = vpop.xlane.xlu1 %5159 }
 0xd37   :  { %v5158_v45 = vpop.xlane.xlu0 %5157  ;;  %v5166_v17 = vmax.f32 %v5152_v28, %v5160_v34 }
 0xd38   :  { %v5165_v9 = vmax.f32 %v5150_v27, %v5158_v45 }
 0xd3a   :  { %v5164_v53 = vpop.xlane.xlu1 %5163  ;;  %v5169_v35 = vmax.f32 %v5165_v9, %v5166_v17 }
 0xd3b   :  { %v5168_v18 = vmax.f32 %v5156_v10, %v5164_v53  ;;  %v5162_v55 = vpop.xlane.xlu0 %5161 }
 0xd3c   :  { %v5167_v47 = vmax.f32 %v5154_v49, %v5162_v55 }
 0xd3e   :  { %v5170_v63 = vmax.f32 %v5167_v47, %v5168_v18 }
 0xd40   :  { %v5171_v32 = vmax.f32 %v5169_v35, %v5170_v63 }
 0xd42   :  { %v5172_v31 = vsub.f32 %v5150_v27, %v5171_v32  ;;  %v5173_v29 = vsub.f32 %v5152_v28, %v5171_v32  ;;  %v5174_v57 = vsub.f32 %v5154_v49, %v5171_v32  ;;  %v5175_v60 = vsub.f32 %v5156_v10, %v5171_v32 }
 0xd43   :  { %v5176_v12 = vsub.f32 %v5158_v45, %v5171_v32  ;;  %v5177_v26 = vsub.f32 %v5160_v34, %v5171_v32  ;;  %v5178_v0 = vsub.f32 %v5162_v55, %v5171_v32  ;;  %v5179_v46 = vsub.f32 %v5164_v53, %v5171_v32 }
 0xd44   :  { %v5180_v52 = vmul.f32 1.442695, %v5172_v31  ;;  %v5182_v61 = vmul.f32 1.442695, %v5173_v29  ;;  %v5184_v1 = vmul.f32 1.442695, %v5174_v57 }
 0xd45   :  { %v5186_v13 = vmul.f32 1.442695, %v5175_v60  ;;  %v5188_v59 = vmul.f32 1.442695, %v5176_v12  ;;  %v5190_v17 = vmul.f32 1.442695, %v5177_v26 }
 0xd46   :  { %14165 = vpow2.f32 %v5180_v52  ;;  %v5192_v47 = vmul.f32 1.442695, %v5178_v0  ;;  %v5194_v18 = vmul.f32 1.442695, %v5179_v46  ;;  %v16505_v60 = vld [vmem:[%s18850_s15 + $0x10] sm:$0xff] }
 0xd47   :  { %14167 = vpow2.f32 %v5182_v61 }
 0xd48   :  { %14169 = vpow2.f32 %v5184_v1 }
 0xd49   :  { %14171 = vpow2.f32 %v5186_v13 }
 0xd4a   :  { %14173 = vpow2.f32 %v5188_v59 }
 0xd4b   :  { %14175 = vpow2.f32 %v5190_v17 }
 0xd4c   :  { %14177 = vpow2.f32 %v5192_v47  ;;  %v16511_v47 = vld [vmem:[%s18850_s15 + $0x18] sm:$0xff] }
 0xd4d   :  { %14179 = vpow2.f32 %v5194_v18 }
 0xd50   :  { %v14166_v49 = vpop.eup %14165 }
 0xd51   :  { %v14168_v28 = vpop.eup %14167 }
 0xd52   :  { %v5196_v29 = vadd.f32 %v14168_v28, %v14166_v49  ;;  %v14170_v27 = vpop.eup %14169 }
 0xd53   :  { %v14172_v34 = vpop.eup %14171 }
 0xd54   :  { %v5197_v10 = vadd.f32 %v14170_v27, %v5196_v29  ;;  %v14174_v9 = vpop.eup %14173 }
 0xd55   :  { %v14176_v1 = vpop.eup %14175 }
 0xd56   :  { %v5198_v45 = vadd.f32 %v14172_v34, %v5197_v10  ;;  %v14178_v32 = vpop.eup %14177 }
 0xd57   :  { %v14180_v26 = vpop.eup %14179 }
 0xd58   :  { %v5199_v55 = vadd.f32 %v14174_v9, %v5198_v45 }
 0xd5a   :  { %v5200_v12 = vadd.f32 %v14176_v1, %v5199_v55  ;;  %v16520_v55 = vld [vmem:[%s18850_s15 + $0x38] sm:$0xff] }
 0xd5c   :  { %v5201_v13 = vadd.f32 %v14178_v32, %v5200_v12 }
 0xd5e   :  { %v5202_v59 = vadd.f32 %v14180_v26, %v5201_v13 }
 0xd60   :  { %14181 = vrcp.f32 %v5202_v59  ;;  %v13541_v59 = vld [vmem:[%s18846_s11 + $0x60] ss:$20 sps:$4 sm:$0xff]  }
 0xd6a   :  { %v14182_v0 = vpop.eup %14181 }
 0xd6b   :  { %v5204_v46 = vmul.f32 %v14182_v0, %v14166_v49  ;;  %v5205_v53 = vmul.f32 %v14182_v0, %v14168_v28  ;;  %v5206_v35 = vmul.f32 %v14182_v0, %v14170_v27  ;;  %v5207_v63 = vmul.f32 %v14182_v0, %v14172_v34 }
 0xd6c   :  { %v5208_v52 = vmul.f32 %v14182_v0, %v14174_v9  ;;  %v5209_v18 = vmul.f32 %v14182_v0, %v14176_v1  ;;  %v5210_v28 = vmul.f32 %v14182_v0, %v14178_v32  ;;  %v5211_v27 = vmul.f32 %v14182_v0, %v14180_v26  ;;  %v13548_v26 = vld [vmem:[%s18848_s13 + $0x8] sm:$0xff]   ;;  %v13549_v0 = vld [vmem:[%s18848_s13 + $0x10] sm:$0xff]  }
 0xd6d   :  { %v5220_v31 = vmul.f32 %v5204_v46, %v16021_v15  ;;  %v5221_v57 = vmul.f32 %v5205_v53, %v16026_v56  ;;  %v5222_v61 = vmul.f32 %v16505_v60, %v5206_v35  ;;  %v5223_v49 = vmul.f32 %v16511_v47, %v5207_v63  ;;  %v13542_v46 = vld [vmem:[%s18846_s11 + $0x88] ss:$20 sps:$4 sm:$0xff]   ;;  %v13543_v35 = vld [vmem:[%s18846_s11 + $0xb0] ss:$20 sps:$4 sm:$0xff]  }
 0xd6e   :  { %v5224_v56 = vmul.f32 %v5208_v52, %v16035_v44  ;;  %v5225_v10 = vmul.f32 %v5209_v18, %v16041_v30  ;;  %v5226_v45 = vmul.f32 %v5210_v28, %v16047_v54  ;;  %v5227_v1 = vmul.f32 %v16520_v55, %v5211_v27  ;;  %v13539_v44 = vld [vmem:[%s18846_s11 + $0x10] ss:$20 sps:$4 sm:$0xff]   ;;  %v13540_v54 = vld [vmem:[%s18846_s11 + $0x38] ss:$20 sps:$4 sm:$0xff]   ;;  %v13545_v52 = vld [vmem:[%s18846_s11 + $0x100] ss:$20 sps:$4 sm:$0xff]  }
 0xd6f   :  { %v5228_v17 = vadd.f32 %v5221_v57, %v5220_v31  ;;  %v13547_v30 = vld [vmem:[%s18848_s13] sm:$0xff]   ;;  %v13550_v53 = vld [vmem:[%s18848_s13 + $0x18] sm:$0xff]   ;;  %v13552_v57 = vld [vmem:[%s18848_s13 + $0x28] sm:$0xff]  }
 0xd70   :  { %v13551_v63 = vld [vmem:[%s18848_s13 + $0x20] sm:$0xff]   ;;  %v13544_v31 = vld [vmem:[%s18846_s11 + $0xd8] ss:$20 sps:$4 sm:$0xff]  }
 0xd71   :  { %v5229_v15 = vadd.f32 %v5228_v17, %v5222_v61  ;;  %v13546_v61 = vld [vmem:[%s18846_s11 + $0x128] ss:$20 sps:$4 sm:$0xff]  }
 0xd72   :  { %v19114_v17 = vld [vmem:[#allocation54_spill] sm:$0xff]  ;;  %v19116_v18 = vld [vmem:[#allocation56_spill] sm:$0xff] }
 0xd73   :  { %v5230_v29 = vadd.f32 %v5229_v15, %v5223_v49 }
 0xd75   :  { %v5231_v34 = vadd.f32 %v5230_v29, %v5224_v56 }
 0xd77   :  { %v5232_v9 = vadd.f32 %v5231_v34, %v5225_v10 }
 0xd79   :  { %v5233_v12 = vadd.f32 %v5232_v9, %v5226_v45 }
 0xd7b   :  { %v5234_v13 = vadd.f32 %v5233_v12, %v5227_v1 }
 0xd7d   :  { %v5235_v32 = vpack.c.bf16 %v5234_v13, %v5234_v13 }
 0xd7f   :  { %5525 = vmatmul.mubr.bf16.vlgmr.msra.gmra.mrb[84].mxu1 %v5235_v32  ;;  %5566 = vmatmul.mubr.bf16.vlgmr.msra.gmra.mrb[92].mxu0 %v5235_v32 }
 0xd80   :  { %12865 = vmatpush3.bf16.msra.mxu1 %v13539_v44  ;;  %12880 = vmatprep.mubr.msk.bf16.mxu1 %vm14578_vm0, %v19064_v5 }
 0xd81   :  { %12866 = vmatprep.subr.bf16.mxu1 %v19064_v5  ;;  %12885 = vmatpush3.bf16.msra.mxu0 %v13547_v30 }
 0xd82   :  { %12886 = vmatprep.subr.bf16.mxu0 %v19064_v5  ;;  %12900 = vmatprep.mubr.msk.bf16.mxu0 %vm14578_vm0, %v19064_v5 }
 0xd84   :  { %12867 = vmatpush3.bf16.msra.mxu1 %v13540_v54 }
 0xd85   :  { %12868 = vmatprep.subr.bf16.mxu1 %v19064_v5  ;;  %12887 = vmatpush3.bf16.msra.mxu0 %v13548_v26  ;;  %v19126_v26 = vld [vmem:[#allocation65_spill] sm:$0xff] }
 0xd86   :  { %12888 = vmatprep.subr.bf16.mxu0 %v19064_v5 }
 0xd88   :  { %12869 = vmatpush3.bf16.msra.mxu1 %v13541_v59 }
 0xd89   :  { %12870 = vmatprep.subr.bf16.mxu1 %v19064_v5  ;;  %12889 = vmatpush3.bf16.msra.mxu0 %v13549_v0  ;;  %v19127_v0 = vld [vmem:[#allocation66_spill] sm:$0xff] }
 0xd8a   :  { %12890 = vmatprep.subr.bf16.mxu0 %v19064_v5 }
 0xd8c   :  { %12871 = vmatpush3.bf16.msra.mxu1 %v13542_v46 }
 0xd8d   :  { %12872 = vmatprep.subr.bf16.mxu1 %v19064_v5  ;;  %12891 = vmatpush3.bf16.msra.mxu0 %v13550_v53 }
 0xd8e   :  { %12892 = vmatprep.subr.bf16.mxu0 %v19064_v5 }
 0xd90   :  { %12873 = vmatpush3.bf16.msra.mxu1 %v13543_v35  ;;  %v19128_v35 = vld [vmem:[#allocation67_spill] sm:$0xff] }
 0xd91   :  { %12874 = vmatprep.subr.bf16.mxu1 %v19064_v5  ;;  %12893 = vmatpush3.bf16.msra.mxu0 %v13551_v63 }
 0xd92   :  { %12894 = vmatprep.subr.bf16.mxu0 %v19064_v5 }
 0xd94   :  { %12875 = vmatpush3.bf16.msra.mxu1 %v13544_v31 }
 0xd95   :  { %12876 = vmatprep.subr.bf16.mxu1 %v19064_v5  ;;  %12895 = vmatpush3.bf16.msra.mxu0 %v13552_v57 }
 0xd96   :  { %12896 = vmatprep.subr.bf16.mxu0 %v19064_v5 }
 0xd98   :  { %12877 = vmatpush3.bf16.msra.mxu1 %v13545_v52 }
 0xd99   :  { %12878 = vmatprep.subr.bf16.mxu1 %v19064_v5 }
 0xd9c   :  { %12879 = vmatpush3.bf16.msra.mxu1 %v13546_v61 }
 0xd9d   :  { %6049 = vmatprep.subr.bf16.mxu1 %v16121_v58  ;;  %v19113_v58 = vld [vmem:[#allocation53_spill] sm:$0xff] }
 0xd9f   :  { %12881 = vmatmul.mubr.bf16.vlgmr.msra.gmra.mrb[88].mxu1 %v5235_v32 }
 0xda0   :  { %6050 = vmatpush1.bf16.msra.mxu1 %v16126_v48  ;;  %6081 = vmatprep.mubr.bf16.mxu1 %v19005_v14  ;;  %v19115_v48 = vld [vmem:[#allocation55_spill] sm:$0xff] }
 0xda1   :  { %6051 = vmatprep.subr.bf16.mxu1 %v16139_v37  ;;  %v19117_v37 = vld [vmem:[#allocation57_spill] sm:$0xff] }
 0xda4   :  { %6052 = vmatpush1.bf16.msra.mxu1 %v16144_v42  ;;  %v19118_v42 = vld [vmem:[#allocation58_spill] sm:$0xff] }
 0xda5   :  { %6053 = vmatprep.subr.bf16.mxu1 %v16151_v40  ;;  %v19119_v40 = vld [vmem:[#allocation59_spill] sm:$0xff] }
 0xda8   :  { %6054 = vmatpush1.bf16.msra.mxu1 %v16156_v7  ;;  %v19120_v7 = vld [vmem:[#allocation60_spill] sm:$0xff] }
 0xda9   :  { %6055 = vmatprep.subr.bf16.mxu1 %v16163_v62  ;;  %v13553_v62 = vld [vmem:[%s18848_s13 + $0x30] sm:$0xff]  }
 0xdaa   :  { %12897 = vmatpush3.bf16.msra.mxu0 %v13553_v62  ;;  %v19139_v62 = vld [vmem:[#allocation46_spill] sm:$0xff] }
 0xdab   :  { %12898 = vmatprep.subr.bf16.mxu0 %v19064_v5 }
 0xdac   :  { %6056 = vmatpush1.bf16.msra.mxu1 %v16168_v22  ;;  %v13554_v22 = vld [vmem:[%s18848_s13 + $0x38] sm:$0xff]  }
 0xdad   :  { %6057 = vmatprep.subr.bf16.mxu1 %v16180_v41  ;;  %v19121_v41 = vld [vmem:[#allocation52_spill] sm:$0xff] }
 0xdae   :  { %12899 = vmatpush3.bf16.msra.mxu0 %v13554_v22 }
 0xdaf   :  { %6090 = vmatprep.subr.bf16.mxu0 %v19121_v41 }
 0xdb0   :  { %6058 = vmatpush1.bf16.msra.mxu1 %v19113_v58 }
 0xdb1   :  { %6059 = vmatprep.subr.bf16.mxu1 %v19114_v17 }
 0xdb4   :  { %6060 = vmatpush1.bf16.msra.mxu1 %v19115_v48 }
 0xdb5   :  { %6061 = vmatprep.subr.bf16.mxu1 %v19116_v18 }
 0xdb8   :  { %6062 = vmatpush1.bf16.msra.mxu1 %v19117_v37 }
 0xdb9   :  { %6063 = vmatprep.subr.bf16.mxu1 %v19118_v42  ;;  %v19132_v42 = vld [vmem:[#allocation71_spill] sm:$0xff] }
 0xdbc   :  { %6064 = vmatpush1.bf16.msra.mxu1 %v19119_v40  ;;  %v19134_v40 = vld [vmem:[#allocation73_spill] sm:$0xff] }
 0xdbd   :  { %6131 = vmatprep.subr.bf16.mxu1 %v19120_v7  ;;  %v19136_v7 = vld [vmem:[#allocation75_spill] sm:$0xff] }
 0xe52   :  { %v5526_v49 = vpop.f32.mrb[84].mxu1  ;;  %v5567_v15 = vpop.f32.mrb[92].mxu0 }
 0xe53   :  { %v5614_v28 = vadd.f32 %v5526_v49, %v16482_v8  ;;  %v5733_v56 = vadd.f32 %v16478_v43, %v5567_v15  ;;  %v5528_v29 = vpop.f32.mrb[85].mxu1  ;;  %v5569_v27 = vpop.f32.mrb[93].mxu0  ;;  %v19123_v8 = vld [vmem:[#allocation62_spill] sm:$0xff] }
 0xe54   :  { %v5732_v10 = vadd.f32 %v16473_v24, %v5528_v29  ;;  %v5734_v34 = vadd.f32 %v16475_v38, %v5569_v27  ;;  %v5530_v45 = vpop.f32.mrb[86].mxu1  ;;  %v5571_v9 = vpop.f32.mrb[94].mxu0  ;;  %v19142_v27 = vld [vmem:[#allocation20_spill] sm:$0xff] }
 0xe55   :  { %v5615_v1 = vadd.f32 %v16229_v39, %v5614_v28  ;;  %v12110_v12 = vmul.f32 -1.442695, %v5733_v56  ;;  %v5531_v13 = vpop.f32.mrb[87].mxu1  ;;  %v5572_v44 = vpop.f32.mrb[95].mxu0  ;;  %v19140_v28 = vld [vmem:[#allocation18_spill] sm:$0xff]  ;;  %v19141_v56 = vld [vmem:[#allocation13_spill] sm:$0xff] }
 0xe56   :  { %v12109_v32 = vmul.f32 -1.442695, %v5732_v10  ;;  %v3380_v29 = vadd.f32 %v19141_v56, %v19140_v28  ;;  %v19143_v10 = vld [vmem:[#allocation12_spill] sm:$0xff]  ;;  %v16701_v28 = vld [vmem:[%s18846_s11] ss:$20 sps:$4 sm:$0xff]  }
 0xe57   :  { %v5616_v30 = vpack.c.bf16 %v5615_v1, %v5615_v1  ;;  %14183 = vpow2.f32 %v12110_v12  ;;  %v19144_v1 = vld [vmem:[#allocation19_spill] sm:$0xff] }
 0xe58   :  { %14185 = vpow2.f32 %v12109_v32 }
 0xe59   :  { %12901 = vmatmul.mubr.bf16.vlgmr.msra.gmra.mrb[96].mxu0 %v5616_v30  ;;  %14187 = vtanh.f32 %v5734_v34  ;;  %v3381_v34 = vadd.f32 %v19143_v10, %v19142_v27  ;;  %v19145_v30 = vld [vmem:[#allocation21_spill] sm:$0xff]  ;;  %v16712_v27 = vld [vmem:[%s18846_s11 + $0x8] ss:$20 sps:$4 sm:$0xff]  }
 0xe5a   :  { %6091 = vmatpush1.bf16.msra.mxu0 %v16239_v2  ;;  %6122 = vmatprep.mubr.bf16.mxu0 %v19005_v14  ;;  %v19122_v2 = vld [vmem:[#allocation61_spill] sm:$0xff] }
 0xe5b   :  { %6092 = vmatprep.subr.bf16.mxu0 %v16244_v51  ;;  %v19124_v51 = vld [vmem:[#allocation63_spill] sm:$0xff] }
 0xe5e   :  { %6093 = vmatpush1.bf16.msra.mxu0 %v16250_v3  ;;  %v19125_v3 = vld [vmem:[#allocation64_spill] sm:$0xff] }
 0xe5f   :  { %6094 = vmatprep.subr.bf16.mxu0 %v16257_v36 }
 0xe61   :  { %v14184_v24 = vpop.eup %14183 }
 0xe62   :  { %v14186_v39 = vpop.eup %14185  ;;  %v5745_v38 = vadd.f32 1.0, %v14184_v24  ;;  %6095 = vmatpush1.bf16.msra.mxu0 %v16263_v50 }
 0xe63   :  { %v5739_v43 = vadd.f32 1.0, %v14186_v39  ;;  %6096 = vmatprep.subr.bf16.mxu0 %v16269_v16  ;;  %v14188_v36 = vpop.eup %14187 }
 0xe64   :  { %14189 = vrcp.f32 %v5745_v38 }
 0xe65   :  { %14191 = vrcp.f32 %v5739_v43 }
 0xe66   :  { %6097 = vmatpush1.bf16.msra.mxu0 %v19122_v2 }
 0xe67   :  { %6098 = vmatprep.subr.bf16.mxu0 %v19123_v8 }
 0xe6a   :  { %6099 = vmatpush1.bf16.msra.mxu0 %v19124_v51 }
 0xe6b   :  { %6100 = vmatprep.subr.bf16.mxu0 %v19125_v3 }
 0xe6e   :  { %v14190_v54 = vpop.eup %14189  ;;  %6101 = vmatpush1.bf16.msra.mxu0 %v19126_v26  ;;  %v19147_v26 = vld [vmem:[#allocation38_spill] sm:$0xff] }
 0xe6f   :  { %v14192_v59 = vpop.eup %14191  ;;  %v5755_v50 = vmul.f32 %v14190_v54, %v16320_v11  ;;  %6102 = vmatprep.subr.bf16.mxu0 %v19127_v0 }
 0xe70   :  { %v5756_v16 = vmul.f32 %v14192_v59, %v14188_v36  ;;  %v19146_v36 = vld [vmem:[#allocation40_spill] sm:$0xff] }
 0xe72   :  { %v16627_v46 = vadd.f32 %v5756_v16, %v5755_v50  ;;  %v5608_v53 = vpop.f32.mrb[88].mxu1  ;;  %6103 = vmatpush1.bf16.msra.mxu0 %v19128_v35  ;;  %v19148_v50 = vld [vmem:[#allocation39_spill] sm:$0xff] }
 0xe73   :  { %v5735_v63 = vadd.f32 %v16480_v21, %v5608_v53  ;;  %v12882_v31 = vpop.f32.mrb[89].mxu1  ;;  %6104 = vmatprep.subr.bf16.mxu0 %v16318_v23  ;;  %v19130_v23 = vld [vmem:[#allocation69_spill] sm:$0xff]  ;;  %v19131_v21 = vld [vmem:[#allocation70_spill] sm:$0xff] }
 0xe74   :  { %v5611_v57 = vpop.f32.mrb[90].mxu1  ;;  %v19149_v53 = vld [vmem:[#allocation37_spill] sm:$0xff] }
 0xe75   :  { %v12111_v52 = vmul.f32 -1.442695, %v5735_v63  ;;  %v12883_v61 = vpop.f32.mrb[91].mxu1  ;;  %v19150_v31 = vld [vmem:[#allocation41_spill] sm:$0xff] }
 0xe76   :  { %6105 = vmatpush1.bf16.msra.mxu0 %v16326_v4  ;;  %v19129_v4 = vld [vmem:[#allocation68_spill] sm:$0xff] }
 0xe77   :  { %14193 = vpow2.f32 %v12111_v52  ;;  %v19151_v52 = vld [vmem:[#allocation42_spill] sm:$0xff] }
 0xe78   :  { %14195 = vtanh.f32 %v16627_v46 }
 0xe81   :  { %v14194_v11 = vpop.eup %14193 }
 0xe82   :  { %v5752_v58 = vadd.f32 1.0, %v14194_v11  ;;  %v14196_v17 = vpop.eup %14195  ;;  %v19152_v11 = vld [vmem:[#allocation43_spill] sm:$0xff] }
 0xe84   :  { %14197 = vrcp.f32 %v5752_v58 }
 0xe8e   :  { %v14198_v48 = vpop.eup %14197 }
 0xe8f   :  { %v5759_v18 = vmul.f32 %v14198_v48, %v14196_v17  ;;  %v19153_v17 = vld [vmem:[#allocation44_spill] sm:$0xff] }
 0xe91   :  { %v5760_v37 = vpack.c.bf16 %v5759_v18, %v5759_v18 }
 0xe93   :  { %6082 = vmatmul.mubr.bf16.vlgmr.msra.gmra.mrb[92].mxu1 %v5760_v37  ;;  %6123 = vmatmul.mubr.bf16.vlgmr.msra.gmra.mrb[100].mxu0 %v5760_v37 }
 0xe94   :  { %6132 = vmatpush1.bf16.msra.mxu1 %v16336_v20  ;;  %6163 = vmatprep.mubr.bf16.mxu1 %v19005_v14  ;;  %v19133_v20 = vld [vmem:[#allocation72_spill] sm:$0xff] }
 0xe95   :  { %6133 = vmatprep.subr.bf16.mxu1 %v16341_v25  ;;  %6579 = vmatprep.mubr.bf16.mxu0 %v19005_v14  ;;  %v19135_v25 = vld [vmem:[#allocation74_spill] sm:$0xff] }
 0xe98   :  { %6134 = vmatpush1.bf16.msra.mxu1 %v16347_v6  ;;  %v19137_v6 = vld [vmem:[#allocation76_spill] sm:$0xff] }
 0xe99   :  { %6135 = vmatprep.subr.bf16.mxu1 %v16354_v33  ;;  %v19138_v33 = vld [vmem:[#allocation77_spill] sm:$0xff] }
 0xe9c   :  { %6136 = vmatpush1.bf16.msra.mxu1 %v16363_v19 }
 0xe9d   :  { %6137 = vmatprep.subr.bf16.mxu1 %v19129_v4  ;;  %v16683_v4 = vld [vmem:[%s18844_s9] ss:$0 sm:$0xff] }
 0xe9e   :  { %19154 = vst [vmem:[#allocation47_spill] sm:$0xff] %v16683_v4 }
 0xea0   :  { %6138 = vmatpush1.bf16.msra.mxu1 %v19130_v23 }
 0xea1   :  { %6139 = vmatprep.subr.bf16.mxu1 %v19131_v21 }
 0xea4   :  { %6140 = vmatpush1.bf16.msra.mxu1 %v19132_v42 }
 0xea5   :  { %6141 = vmatprep.subr.bf16.mxu1 %v19133_v20 }
 0xea8   :  { %6142 = vmatpush1.bf16.msra.mxu1 %v19134_v40 }
 0xea9   :  { %6143 = vmatprep.subr.bf16.mxu1 %v19135_v25 }
 0xeac   :  { %6144 = vmatpush1.bf16.msra.mxu1 %v19136_v7 }
 0xead   :  { %6145 = vmatprep.subr.bf16.mxu1 %v19137_v6 }
 0xeb0   :  { %6146 = vmatpush1.bf16.msra.mxu1 %v19138_v33 }
 0xeb3   :  { %6164 = vmatmul.mubr.bf16.vlgmr.msra.gmra.mrb[96].mxu1 %v5760_v37 }
 0xeb4   :  { %6620 = vmatprep.mubr.bf16.mxu1 %v19005_v14 }
 0xf2c   :  { %v5715_v19 = vpop.f32.mrb[96].mxu0 }
 0xf2d   :  { %v5716_v22 = vadd.f32 %v19139_v62, %v5715_v19  ;;  %v12902_v41 = vpop.f32.mrb[97].mxu0 }
 0xf2e   :  { %v5718_v49 = vpop.f32.mrb[98].mxu0 }
 0xf2f   :  { %12108 = vst [vmem:[%s18851_s16 + $0x8] sm:$0xff] %v5716_v22  ;;  %v12903_v15 = vpop.f32.mrb[99].mxu0 }
 0xf30   :  { %v16696_v15 = vld [vmem:[%s18846_s11 + $0x4] ss:$20 sps:$4 sm:$0xff]  }
 0xf31   :  { %6547 = vmatprep.subr.bf16.mxu0 %v16696_v15 }
 0xf32   :  { %6548 = vmatpush1.bf16.msra.mxu0 %v16701_v28 }
 0xf66   :  { %v6083_v45 = vpop.f32.mrb[92].mxu1  ;;  %v6124_v9 = vpop.f32.mrb[100].mxu0 }
 0xf67   :  { %v16661_v12 = vadd.f32 %v6083_v45, %v19144_v1  ;;  %v16663_v13 = vadd.f32 %v6124_v9, %v3380_v29  ;;  %v6085_v44 = vpop.f32.mrb[93].mxu1  ;;  %v6126_v32 = vpop.f32.mrb[101].mxu0  ;;  %v16706_v29 = vld [vmem:[%s18846_s11 + $0xc] ss:$20 sps:$4 sm:$0xff]   ;;  %v16725_v45 = vld [vmem:[%s18846_s11 + $0x28] ss:$20 sps:$4 sm:$0xff]  }
 0xf68   :  { %v16666_v24 = vadd.f32 %v6085_v44, %v19145_v30  ;;  %v16668_v39 = vadd.f32 %v6126_v32, %v3381_v34  ;;  %v6087_v38 = vpop.f32.mrb[94].mxu1  ;;  %v6128_v43 = vpop.f32.mrb[102].mxu0  ;;  %6588 = vmatprep.subr.bf16.mxu1 %v16706_v29  ;;  %v16720_v34 = vld [vmem:[%s18846_s11 + $0x2c] ss:$20 sps:$4 sm:$0xff]   ;;  %v16730_v9 = vld [vmem:[%s18846_s11 + $0x34] ss:$20 sps:$4 sm:$0xff]  }
 0xf69   :  { %v6088_v2 = vpop.f32.mrb[95].mxu1  ;;  %v6129_v8 = vpop.f32.mrb[103].mxu0  ;;  %6589 = vmatpush1.bf16.msra.mxu1 %v16712_v27  ;;  %6549 = vmatprep.subr.bf16.mxu0 %v16720_v34  ;;  %v16736_v1 = vld [vmem:[%s18846_s11 + $0x30] ss:$20 sps:$4 sm:$0xff]   ;;  %v16744_v44 = vld [vmem:[%s18846_s11 + $0x54] ss:$20 sps:$4 sm:$0xff]  }
 0xf6a   :  { %6550 = vmatpush1.bf16.msra.mxu0 %v16725_v45  ;;  %6590 = vmatprep.subr.bf16.mxu1 %v16730_v9  ;;  %v16749_v32 = vld [vmem:[%s18846_s11 + $0x50] ss:$20 sps:$4 sm:$0xff]   ;;  %v16754_v30 = vld [vmem:[%s18846_s11 + $0x58] ss:$20 sps:$4 sm:$0xff]  }
 0xf6b   :  { %v16759_v38 = vld [vmem:[%s18846_s11 + $0x5c] ss:$20 sps:$4 sm:$0xff]   ;;  %6551 = vmatprep.subr.bf16.mxu0 %v16744_v44  ;;  %v16772_v2 = vld [vmem:[%s18846_s11 + $0x78] ss:$20 sps:$4 sm:$0xff]  }
 0xf6c   :  { %v16765_v43 = vld [vmem:[%s18846_s11 + $0x7c] ss:$20 sps:$4 sm:$0xff]   ;;  %v16777_v8 = vld [vmem:[%s18846_s11 + $0x84] ss:$20 sps:$4 sm:$0xff]  }
 0xf6d   :  { %6591 = vmatpush1.bf16.msra.mxu1 %v16736_v1 }
 0xf6e   :  { %6552 = vmatpush1.bf16.msra.mxu0 %v16749_v32  ;;  %6592 = vmatprep.subr.bf16.mxu1 %v16759_v38 }
 0xf6f   :  { %6553 = vmatprep.subr.bf16.mxu0 %v16765_v43 }
 0xf71   :  { %6593 = vmatpush1.bf16.msra.mxu1 %v16754_v30 }
 0xf72   :  { %6594 = vmatprep.subr.bf16.mxu1 %v16777_v8  ;;  %6554 = vmatpush1.bf16.msra.mxu0 %v16772_v2 }
 0xf86   :  { %v6165_v51 = vpop.f32.mrb[96].mxu1 }
 0xf87   :  { %v16670_v3 = vpop.f32.mrb[97].mxu1  ;;  %v6181_v54 = vadd.f32 %v6165_v51, %v19146_v36  ;;  %v6180_v59 = vadd.f32 %v6165_v51, %v19147_v26  ;;  %v6183_v0 = vadd.f32 %v6165_v51, %v19148_v50  ;;  %v6182_v35 = vadd.f32 %v6165_v51, %v19149_v53 }
 0xf88   :  { %v6169_v16 = vpop.f32.mrb[98].mxu1  ;;  %v6185_v57 = vadd.f32 %v6165_v51, %v19150_v31  ;;  %v6184_v61 = vadd.f32 %v6165_v51, %v19151_v52  ;;  %v6187_v58 = vadd.f32 %v6165_v51, %v19152_v11  ;;  %v6186_v48 = vadd.f32 %v6165_v51, %v19153_v17  ;;  %v16784_v51 = vld [vmem:[%s18846_s11 + $0x80] ss:$20 sps:$4 sm:$0xff]  }
 0xf89   :  { %v6170_v63 = vpop.f32.mrb[99].mxu1  ;;  %14199 = vtanh.f32 %v6181_v54  ;;  %v16789_v54 = vld [vmem:[%s18846_s11 + $0xa4] ss:$20 sps:$4 sm:$0xff]   ;;  %6595 = vmatpush1.bf16.msra.mxu1 %v16784_v51  ;;  %v16808_v16 = vld [vmem:[%s18846_s11 + $0xa8] ss:$20 sps:$4 sm:$0xff]  }
 0xf8a   :  { %14201 = vtanh.f32 %v6180_v59  ;;  %v16795_v59 = vld [vmem:[%s18846_s11 + $0xac] ss:$20 sps:$4 sm:$0xff]   ;;  %6555 = vmatprep.subr.bf16.mxu0 %v16789_v54  ;;  %19155 = vst [vmem:[#allocation48_spill] sm:$0xff] %v16808_v16  ;;  %v16819_v63 = vld [vmem:[%s18846_s11 + $0xd4] ss:$20 sps:$4 sm:$0xff]  }
 0xf8b   :  { %14203 = vtanh.f32 %v6183_v0  ;;  %v16801_v0 = vld [vmem:[%s18846_s11 + $0xa0] ss:$20 sps:$4 sm:$0xff]   ;;  %6596 = vmatprep.subr.bf16.mxu1 %v16795_v59  ;;  %19156 = vst [vmem:[#allocation49_spill] sm:$0xff] %v16819_v63 }
 0xf8c   :  { %14205 = vtanh.f32 %v6182_v35  ;;  %v16813_v35 = vld [vmem:[%s18846_s11 + $0xcc] ss:$20 sps:$4 sm:$0xff]   ;;  %6556 = vmatpush1.bf16.msra.mxu0 %v16801_v0 }
 0xf8d   :  { %14207 = vtanh.f32 %v6185_v57  ;;  %v16825_v57 = vld [vmem:[%s18846_s11 + $0xc8] ss:$20 sps:$4 sm:$0xff]   ;;  %6597 = vmatpush1.bf16.msra.mxu1 %v16808_v16  ;;  %6557 = vmatprep.subr.bf16.mxu0 %v16813_v35 }
 0xf8e   :  { %14209 = vtanh.f32 %v6184_v61  ;;  %v16832_v61 = vld [vmem:[%s18846_s11 + $0xd0] ss:$20 sps:$4 sm:$0xff]   ;;  %6598 = vmatprep.subr.bf16.mxu1 %v16819_v63 }
 0xf8f   :  { %14211 = vtanh.f32 %v6187_v58  ;;  %19157 = vst [vmem:[#allocation50_spill] sm:$0xff] %v16832_v61  ;;  %v16837_v58 = vld [vmem:[%s18846_s11 + $0xf4] ss:$20 sps:$4 sm:$0xff]  }
 0xf90   :  { %14213 = vtanh.f32 %v6186_v48  ;;  %v16843_v48 = vld [vmem:[%s18846_s11 + $0xfc] ss:$20 sps:$4 sm:$0xff]   ;;  %6558 = vmatpush1.bf16.msra.mxu0 %v16825_v57 }
 0xf91   :  { %19158 = vst [vmem:[#allocation51_spill] sm:$0xff] %v16843_v48  ;;  %6599 = vmatpush1.bf16.msra.mxu1 %v16832_v61  ;;  %6559 = vmatprep.subr.bf16.mxu0 %v16837_v58 }
 0xf92   :  { %6600 = vmatprep.subr.bf16.mxu1 %v16843_v48 }
 0xf93   :  { %v14200_v18 = vpop.eup %14199 }
 0xf94   :  { %v14202_v37 = vpop.eup %14201  ;;  %v6197_v23 = vmul.f32 %v16683_v4, %v14200_v18  ;;  %v16849_v18 = vld [vmem:[%s18846_s11 + $0xf0] ss:$20 sps:$4 sm:$0xff]  }
 0xf95   :  { %v14204_v21 = vpop.eup %14203  ;;  %v6196_v42 = vmul.f32 %v16683_v4, %v14202_v37  ;;  %v16856_v37 = vld [vmem:[%s18846_s11 + $0xf8] ss:$20 sps:$4 sm:$0xff]   ;;  %6560 = vmatpush1.bf16.msra.mxu0 %v16849_v18 }
 0xf96   :  { %v14206_v20 = vpop.eup %14205  ;;  %6206 = vadd.xlane.f32.xlu1 %v6197_v23  ;;  %v6199_v40 = vmul.f32 %v16683_v4, %v14204_v21  ;;  %19159 = vst [vmem:[#allocation14_spill] sm:$0xff] %v16856_v37  ;;  %v16861_v23 = vld [vmem:[%s18846_s11 + $0x11c] ss:$20 sps:$4 sm:$0xff]   ;;  %v16867_v21 = vld [vmem:[%s18846_s11 + $0x124] ss:$20 sps:$4 sm:$0xff]   ;;  %6601 = vmatpush1.bf16.msra.mxu1 %v16856_v37 }
 0xf97   :  { %6204 = vadd.xlane.f32.xlu0 %v6196_v42  ;;  %v14208_v25 = vpop.eup %14207  ;;  %v6198_v7 = vmul.f32 %v16683_v4, %v14206_v20  ;;  %19160 = vst [vmem:[#allocation16_spill] sm:$0xff] %v16867_v21  ;;  %v16873_v42 = vld [vmem:[%s18846_s11 + $0x118] ss:$20 sps:$4 sm:$0xff]   ;;  %6561 = vmatprep.subr.bf16.mxu0 %v16861_v23  ;;  %v16880_v20 = vld [vmem:[%s18846_s11 + $0x120] ss:$20 sps:$4 sm:$0xff]  }
 0xf98   :  { %v14210_v6 = vpop.eup %14209  ;;  %v6201_v33 = vmul.f32 %v16683_v4, %v14208_v25  ;;  %19161 = vst [vmem:[#allocation15_spill] sm:$0xff] %v16880_v20  ;;  %6602 = vmatprep.subr.bf16.mxu1 %v16867_v21 }
 0xf99   :  { %v14212_v19 = vpop.eup %14211  ;;  %v6200_v62 = vmul.f32 %v16683_v4, %v14210_v6  ;;  %6562 = vmatpush1.bf16.msra.mxu0 %v16873_v42 }
 0xf9a   :  { %6210 = vadd.xlane.f32.xlu1 %v6199_v40  ;;  %v14214_v22 = vpop.eup %14213  ;;  %v6203_v41 = vmul.f32 %v16683_v4, %v14212_v19  ;;  %6603 = vmatpush1.bf16.msra.mxu1 %v16880_v20 }
 0xf9b   :  { %6208 = vadd.xlane.f32.xlu0 %v6198_v7  ;;  %v6202_v49 = vmul.f32 %v16683_v4, %v14214_v22  ;;  %12904 = vmatprep.subr.bf16.mxu0 %v19064_v5 }
 0xf9c   :  { %12924 = vmatprep.subr.bf16.mxu1 %v19064_v5 }
 0xf9e   :  { %6214 = vadd.xlane.f32.xlu1 %v6201_v33 }
 0xf9f   :  { %6212 = vadd.xlane.f32.xlu0 %v6200_v62 }
 0xfa2   :  { %6218 = vadd.xlane.f32.xlu1 %v6203_v41 }
 0xfa3   :  { %6216 = vadd.xlane.f32.xlu0 %v6202_v49 }
0x1023   :  { %v6207_v40 = vpop.xlane.xlu1 %6206 }
0x1024   :  { %v6205_v25 = vpop.xlane.xlu0 %6204 }
0x1027   :  { %v6211_v7 = vpop.xlane.xlu1 %6210 }
0x1028   :  { %v6209_v6 = vpop.xlane.xlu0 %6208 }
0x102b   :  { %v6215_v33 = vpop.xlane.xlu1 %6214 }
0x102c   :  { %v6213_v19 = vpop.xlane.xlu0 %6212  ;;  %v6221_v62 = vmax.f32 %v6207_v40, %v6215_v33 }
0x102d   :  { %v6220_v22 = vmax.f32 %v6205_v25, %v6213_v19 }
0x102f   :  { %v6219_v41 = vpop.xlane.xlu1 %6218  ;;  %v6224_v11 = vmax.f32 %v6220_v22, %v6221_v62 }
0x1030   :  { %v6223_v49 = vmax.f32 %v6211_v7, %v6219_v41  ;;  %v6217_v4 = vpop.xlane.xlu0 %6216 }
0x1031   :  { %v6222_v17 = vmax.f32 %v6209_v6, %v6217_v4 }
0x1033   :  { %v6225_v52 = vmax.f32 %v6222_v17, %v6223_v49 }
0x1035   :  { %v6226_v31 = vmax.f32 %v6224_v11, %v6225_v52 }
0x1037   :  { %v6227_v53 = vsub.f32 %v6205_v25, %v6226_v31  ;;  %v6228_v50 = vsub.f32 %v6207_v40, %v6226_v31  ;;  %v6229_v26 = vsub.f32 %v6209_v6, %v6226_v31  ;;  %v6230_v36 = vsub.f32 %v6211_v7, %v6226_v31  ;;  %v16890_v6 = vld [vmem:[%s18850_s15] sm:$0xff] }
0x1038   :  { %v6231_v20 = vsub.f32 %v6213_v19, %v6226_v31  ;;  %v6232_v37 = vsub.f32 %v6215_v33, %v6226_v31  ;;  %v6233_v61 = vsub.f32 %v6217_v4, %v6226_v31  ;;  %v6234_v16 = vsub.f32 %v6219_v41, %v6226_v31  ;;  %v16895_v33 = vld [vmem:[%s18850_s15 + $0x8] sm:$0xff] }
0x1039   :  { %v6235_v10 = vmul.f32 1.442695, %v6227_v53  ;;  %v6237_v56 = vmul.f32 1.442695, %v6228_v50  ;;  %v6239_v21 = vmul.f32 1.442695, %v6229_v26 }
0x103a   :  { %v6241_v48 = vmul.f32 1.442695, %v6230_v36  ;;  %v6243_v63 = vmul.f32 1.442695, %v6231_v20  ;;  %v6245_v62 = vmul.f32 1.442695, %v6232_v37 }
0x103b   :  { %14215 = vpow2.f32 %v6235_v10  ;;  %v6247_v52 = vmul.f32 1.442695, %v6233_v61  ;;  %v6249_v11 = vmul.f32 1.442695, %v6234_v16 }
0x103c   :  { %14217 = vpow2.f32 %v6237_v56 }
0x103d   :  { %14219 = vpow2.f32 %v6239_v21 }
0x103e   :  { %14221 = vpow2.f32 %v6241_v48 }
0x103f   :  { %14223 = vpow2.f32 %v6243_v63 }
0x1040   :  { %14225 = vpow2.f32 %v6245_v62 }
0x1041   :  { %14227 = vpow2.f32 %v6247_v52 }
0x1042   :  { %14229 = vpow2.f32 %v6249_v11 }
0x1045   :  { %v14216_v17 = vpop.eup %14215 }
0x1046   :  { %v14218_v40 = vpop.eup %14217 }
0x1047   :  { %v6251_v50 = vadd.f32 %v14218_v40, %v14216_v17  ;;  %v14220_v53 = vpop.eup %14219 }
0x1048   :  { %v14222_v26 = vpop.eup %14221 }
0x1049   :  { %v6252_v10 = vadd.f32 %v14220_v53, %v6251_v50  ;;  %v14224_v36 = vpop.eup %14223  ;;  %v16904_v50 = vld [vmem:[%s18850_s15 + $0x20] sm:$0xff] }
0x104a   :  { %v14226_v21 = vpop.eup %14225 }
0x104b   :  { %v6253_v56 = vadd.f32 %v14222_v26, %v6252_v10  ;;  %v14228_v31 = vpop.eup %14227 }
0x104c   :  { %v14230_v37 = vpop.eup %14229 }
0x104d   :  { %v6254_v4 = vadd.f32 %v14224_v36, %v6253_v56  ;;  %v16910_v56 = vld [vmem:[%s18850_s15 + $0x28] sm:$0xff] }
0x104f   :  { %v6255_v20 = vadd.f32 %v14226_v21, %v6254_v4 }
0x1051   :  { %v6256_v48 = vadd.f32 %v14228_v31, %v6255_v20 }
0x1053   :  { %v6257_v63 = vadd.f32 %v14230_v37, %v6256_v48 }
0x1055   :  { %14231 = vrcp.f32 %v6257_v63 }
0x105f   :  { %v14232_v61 = vpop.eup %14231 }
0x1060   :  { %v6259_v16 = vmul.f32 %v14232_v61, %v14216_v17  ;;  %v6260_v25 = vmul.f32 %v14232_v61, %v14218_v40  ;;  %v6261_v7 = vmul.f32 %v14232_v61, %v14220_v53  ;;  %v6262_v19 = vmul.f32 %v14232_v61, %v14222_v26 }
0x1061   :  { %v6263_v49 = vmul.f32 %v14232_v61, %v14224_v36  ;;  %v6264_v11 = vmul.f32 %v14232_v61, %v14226_v21  ;;  %v6265_v53 = vmul.f32 %v14232_v61, %v14228_v31 }
0x1062   :  { %v6275_v22 = vmul.f32 %v16890_v6, %v6259_v16  ;;  %v6276_v41 = vmul.f32 %v16895_v33, %v6260_v25  ;;  %v6277_v62 = vmul.f32 %v6261_v7, %v16505_v60  ;;  %v6278_v17 = vmul.f32 %v6262_v19, %v16511_v47  ;;  %v16916_v47 = vld [vmem:[%s18850_s15 + $0x30] sm:$0xff]  ;;  %v13604_v25 = vld [vmem:[%s18846_s11 + $0x38] ss:$20 sps:$4 sm:$0xff]  }
0x1063   :  { %v6279_v10 = vmul.f32 %v16904_v50, %v6263_v49  ;;  %v6266_v60 = vmul.f32 %v14232_v61, %v14230_v37  ;;  %v6280_v36 = vmul.f32 %v16910_v56, %v6264_v11  ;;  %v6281_v21 = vmul.f32 %v16916_v47, %v6265_v53  ;;  %v13603_v16 = vld [vmem:[%s18846_s11 + $0x10] ss:$20 sps:$4 sm:$0xff]   ;;  %v13605_v7 = vld [vmem:[%s18846_s11 + $0x60] ss:$20 sps:$4 sm:$0xff]   ;;  %v13616_v11 = vld [vmem:[%s18848_s13 + $0x28] sm:$0xff]  }
0x1064   :  { %v6283_v52 = vadd.f32 %v6276_v41, %v6275_v22  ;;  %v13611_v61 = vld [vmem:[%s18848_s13] sm:$0xff]   ;;  %v13613_v19 = vld [vmem:[%s18848_s13 + $0x10] sm:$0xff]   ;;  %v13606_v22 = vld [vmem:[%s18846_s11 + $0x88] ss:$20 sps:$4 sm:$0xff]  }
0x1065   :  { %v6282_v31 = vmul.f32 %v6266_v60, %v16520_v55  ;;  %v13612_v55 = vld [vmem:[%s18848_s13 + $0x8] sm:$0xff]   ;;  %v13614_v41 = vld [vmem:[%s18848_s13 + $0x18] sm:$0xff]   ;;  %v13607_v49 = vld [vmem:[%s18846_s11 + $0xb0] ss:$20 sps:$4 sm:$0xff]  }
0x1066   :  { %v6284_v40 = vadd.f32 %v6283_v52, %v6277_v62  ;;  %v13615_v62 = vld [vmem:[%s18848_s13 + $0x20] sm:$0xff]   ;;  %v13608_v52 = vld [vmem:[%s18846_s11 + $0xd8] ss:$20 sps:$4 sm:$0xff]   ;;  %v13617_v53 = vld [vmem:[%s18848_s13 + $0x30] sm:$0xff]  }
0x1067   :  { %v16995_v60 = vld [vmem:[%s18845_s10] ss:$24 sps:$4 sm:$0xff]  }
0x1068   :  { %v6285_v26 = vadd.f32 %v6284_v40, %v6278_v17  ;;  %v13609_v17 = vld [vmem:[%s18846_s11 + $0x100] ss:$20 sps:$4 sm:$0xff]   ;;  %v13610_v40 = vld [vmem:[%s18846_s11 + $0x128] ss:$20 sps:$4 sm:$0xff]  }
0x106a   :  { %v6286_v4 = vadd.f32 %v6285_v26, %v6279_v10  ;;  %v13618_v10 = vld [vmem:[%s18848_s13 + $0x38] sm:$0xff]  }
0x106b   :  { %v16990_v26 = vld [vmem:[%s18845_s10 + $0x4] ss:$24 sps:$4 sm:$0xff]  }
0x106c   :  { %v6287_v20 = vadd.f32 %v6286_v4, %v6280_v36  ;;  %v17000_v36 = vld [vmem:[%s18845_s10 + $0xc] ss:$24 sps:$4 sm:$0xff]  }
0x106d   :  { %19162 = vst [vmem:[#allocation17_spill] sm:$0xff] %v17000_v36  ;;  %v17008_v4 = vld [vmem:[%s18845_s10 + $0x34] ss:$24 sps:$4 sm:$0xff]  }
0x106e   :  { %v6288_v48 = vadd.f32 %v6287_v20, %v6281_v21  ;;  %v17013_v21 = vld [vmem:[%s18845_s10 + $0x30] ss:$24 sps:$4 sm:$0xff]   ;;  %v17020_v20 = vld [vmem:[%s18845_s10 + $0x64] ss:$24 sps:$4 sm:$0xff]  }
0x1070   :  { %v6289_v63 = vadd.f32 %v6288_v48, %v6282_v31  ;;  %v17025_v31 = vld [vmem:[%s18845_s10 + $0x60] ss:$24 sps:$4 sm:$0xff]   ;;  %v17032_v48 = vld [vmem:[%s18845_s10 + $0x94] ss:$24 sps:$4 sm:$0xff]  }
0x1072   :  { %v6290_v37 = vpack.c.bf16 %v6289_v63, %v6289_v63  ;;  %v17037_v63 = vld [vmem:[%s18845_s10 + $0x90] ss:$24 sps:$4 sm:$0xff]  }
0x1074   :  { %6580 = vmatmul.mubr.bf16.vlgmr.msra.gmra.mrb[104].mxu0 %v6290_v37  ;;  %6621 = vmatmul.mubr.bf16.vlgmr.msra.gmra.mrb[100].mxu1 %v6290_v37 }
0x1075   :  { %12905 = vmatpush3.bf16.msra.mxu0 %v13603_v16  ;;  %12920 = vmatprep.mubr.msk.bf16.mxu0 %vm14578_vm0, %v19064_v5  ;;  %v17044_v16 = vld [vmem:[%s18845_s10 + $0xc0] ss:$24 sps:$4 sm:$0xff]  }
0x1076   :  { %12906 = vmatprep.subr.bf16.mxu0 %v19064_v5  ;;  %12925 = vmatpush3.bf16.msra.mxu1 %v13611_v61  ;;  %v17054_v61 = vld [vmem:[%s18845_s10 + $0xf4] ss:$24 sps:$4 sm:$0xff]  }
0x1077   :  { %12926 = vmatprep.subr.bf16.mxu1 %v19064_v5  ;;  %12940 = vmatprep.mubr.msk.bf16.mxu1 %vm14578_vm0, %v19064_v5 }
0x1079   :  { %12907 = vmatpush3.bf16.msra.mxu0 %v13604_v25  ;;  %v17061_v25 = vld [vmem:[%s18845_s10 + $0xf0] ss:$24 sps:$4 sm:$0xff]  }
0x107a   :  { %12908 = vmatprep.subr.bf16.mxu0 %v19064_v5  ;;  %12927 = vmatpush3.bf16.msra.mxu1 %v13612_v55  ;;  %v17067_v55 = vld [vmem:[%s18845_s10 + $0x124] ss:$24 sps:$4 sm:$0xff]  }
0x107b   :  { %12928 = vmatprep.subr.bf16.mxu1 %v19064_v5  ;;  %19163 = vst [vmem:[#allocation45_spill] sm:$0xff] %v17067_v55 }
0x107d   :  { %12909 = vmatpush3.bf16.msra.mxu0 %v13605_v7  ;;  %v17073_v7 = vld [vmem:[%s18845_s10 + $0x120] ss:$24 sps:$4 sm:$0xff]  }
0x107e   :  { %12910 = vmatprep.subr.bf16.mxu0 %v19064_v5  ;;  %12929 = vmatpush3.bf16.msra.mxu1 %v13613_v19  ;;  %19164 = vst [vmem:[#allocation53_spill] sm:$0xff] %v17073_v7  ;;  %v17079_v19 = vld [vmem:[%s18845_s10 + $0x154] ss:$24 sps:$4 sm:$0xff]  }
0x107f   :  { %12930 = vmatprep.subr.bf16.mxu1 %v19064_v5  ;;  %19165 = vst [vmem:[#allocation54_spill] sm:$0xff] %v17079_v19 }
0x1081   :  { %12911 = vmatpush3.bf16.msra.mxu0 %v13606_v22  ;;  %v17085_v22 = vld [vmem:[%s18845_s10 + $0x150] ss:$24 sps:$4 sm:$0xff]  }
0x1082   :  { %12912 = vmatprep.subr.bf16.mxu0 %v19064_v5  ;;  %12931 = vmatpush3.bf16.msra.mxu1 %v13614_v41  ;;  %19166 = vst [vmem:[#allocation55_spill] sm:$0xff] %v17085_v22  ;;  %v17091_v41 = vld [vmem:[%s18845_s10 + $0x14] ss:$24 sps:$4 sm:$0xff]  }
0x1083   :  { %12932 = vmatprep.subr.bf16.mxu1 %v19064_v5  ;;  %19167 = vst [vmem:[#allocation56_spill] sm:$0xff] %v17091_v41 }
0x1085   :  { %12913 = vmatpush3.bf16.msra.mxu0 %v13607_v49 }
0x1086   :  { %12914 = vmatprep.subr.bf16.mxu0 %v19064_v5  ;;  %12933 = vmatpush3.bf16.msra.mxu1 %v13615_v62 }
0x1087   :  { %12934 = vmatprep.subr.bf16.mxu1 %v19064_v5 }
0x1089   :  { %12915 = vmatpush3.bf16.msra.mxu0 %v13608_v52 }
0x108a   :  { %12916 = vmatprep.subr.bf16.mxu0 %v19064_v5  ;;  %12935 = vmatpush3.bf16.msra.mxu1 %v13616_v11 }
0x108b   :  { %12936 = vmatprep.subr.bf16.mxu1 %v19064_v5 }
0x108d   :  { %12917 = vmatpush3.bf16.msra.mxu0 %v13609_v17 }
0x108e   :  { %12918 = vmatprep.subr.bf16.mxu0 %v19064_v5  ;;  %12937 = vmatpush3.bf16.msra.mxu1 %v13617_v53 }
0x108f   :  { %12938 = vmatprep.subr.bf16.mxu1 %v19064_v5 }
0x1091   :  { %12919 = vmatpush3.bf16.msra.mxu0 %v13610_v40 }
0x1092   :  { %12939 = vmatpush3.bf16.msra.mxu1 %v13618_v10  ;;  %7104 = vmatprep.subr.bf16.mxu0 %v16990_v26 }
0x1093   :  { %7145 = vmatprep.subr.bf16.mxu1 %v17000_v36 }
0x1094   :  { %12921 = vmatmul.mubr.bf16.vlgmr.msra.gmra.mrb[108].mxu0 %v6290_v37  ;;  %v17049_v37 = vld [vmem:[%s18845_s10 + $0xc4] ss:$24 sps:$4 sm:$0xff]  }
0x1095   :  { %7136 = vmatprep.mubr.bf16.mxu0 %v19005_v14  ;;  %7105 = vmatpush1.bf16.msra.mxu0 %v16995_v60 }
0x1096   :  { %7106 = vmatprep.subr.bf16.mxu0 %v17008_v4 }
0x1099   :  { %7107 = vmatpush1.bf16.msra.mxu0 %v17013_v21 }
0x109a   :  { %7108 = vmatprep.subr.bf16.mxu0 %v17020_v20 }
0x109d   :  { %7109 = vmatpush1.bf16.msra.mxu0 %v17025_v31 }
0x109e   :  { %7110 = vmatprep.subr.bf16.mxu0 %v17032_v48 }
0x10a1   :  { %7111 = vmatpush1.bf16.msra.mxu0 %v17037_v63 }
0x10a2   :  { %7112 = vmatprep.subr.bf16.mxu0 %v17049_v37 }
0x10a5   :  { %7113 = vmatpush1.bf16.msra.mxu0 %v17044_v16 }
0x10a6   :  { %7114 = vmatprep.subr.bf16.mxu0 %v17054_v61 }
0x10a9   :  { %7115 = vmatpush1.bf16.msra.mxu0 %v17061_v25 }
0x10aa   :  { %7116 = vmatprep.subr.bf16.mxu0 %v17067_v55 }
0x10ad   :  { %7117 = vmatpush1.bf16.msra.mxu0 %v17073_v7 }
0x10ae   :  { %7118 = vmatprep.subr.bf16.mxu0 %v17079_v19 }
0x10b1   :  { %7119 = vmatpush1.bf16.msra.mxu0 %v17085_v22  ;;  %v17102_v22 = vld [vmem:[%s18847_s12] ss:$0 sm:$0xff] }
0x10b2   :  { %7186 = vmatprep.subr.bf16.mxu0 %v17091_v41 }
0x1147   :  { %v6581_v49 = vpop.f32.mrb[104].mxu0  ;;  %v6622_v62 = vpop.f32.mrb[100].mxu1 }
0x1148   :  { %v6669_v52 = vadd.f32 %v6581_v49, %v16670_v3  ;;  %v6788_v11 = vadd.f32 %v16666_v24, %v6622_v62  ;;  %v6583_v17 = vpop.f32.mrb[105].mxu0  ;;  %v6624_v40 = vpop.f32.mrb[101].mxu1  ;;  %v17108_v24 = vld [vmem:[%s18845_s10 + $0x8] ss:$24 sps:$4 sm:$0xff]  }
0x1149   :  { %v6787_v53 = vadd.f32 %v16661_v12, %v6583_v17  ;;  %v6789_v10 = vadd.f32 %v16663_v13, %v6624_v40  ;;  %v6585_v36 = vpop.f32.mrb[106].mxu0  ;;  %v6626_v19 = vpop.f32.mrb[102].mxu1  ;;  %v17113_v13 = vld [vmem:[%s18845_s10 + $0x3c] ss:$24 sps:$4 sm:$0xff]   ;;  %v17150_v40 = vld [vmem:[%s18845_s10 + $0xcc] ss:$24 sps:$4 sm:$0xff]  }
0x114a   :  { %v6670_v41 = vadd.f32 %v17102_v22, %v6669_v52  ;;  %v12210_v7 = vmul.f32 -1.442695, %v6788_v11  ;;  %v6586_v55 = vpop.f32.mrb[107].mxu0  ;;  %v6627_v3 = vpop.f32.mrb[103].mxu1  ;;  %v17119_v36 = vld [vmem:[%s18845_s10 + $0x38] ss:$24 sps:$4 sm:$0xff]  }
0x114b   :  { %v12209_v49 = vmul.f32 -1.442695, %v6787_v53  ;;  %v17126_v55 = vld [vmem:[%s18845_s10 + $0x6c] ss:$24 sps:$4 sm:$0xff]   ;;  %v17138_v19 = vld [vmem:[%s18845_s10 + $0x9c] ss:$24 sps:$4 sm:$0xff]  }
0x114c   :  { %v6671_v12 = vpack.c.bf16 %v6670_v41, %v6670_v41  ;;  %14233 = vpow2.f32 %v12210_v7  ;;  %v17132_v7 = vld [vmem:[%s18845_s10 + $0x68] ss:$24 sps:$4 sm:$0xff]   ;;  %19169 = vst [vmem:[#allocation58_spill] sm:$0xff] %v17138_v19  ;;  %v17144_v11 = vld [vmem:[%s18845_s10 + $0x98] ss:$24 sps:$4 sm:$0xff]   ;;  %19171 = vst [vmem:[#allocation60_spill] sm:$0xff] %v17150_v40 }
0x114d   :  { %14235 = vpow2.f32 %v12209_v49  ;;  %19168 = vst [vmem:[#allocation57_spill] sm:$0xff] %v17132_v7  ;;  %19170 = vst [vmem:[#allocation59_spill] sm:$0xff] %v17144_v11  ;;  %v17156_v53 = vld [vmem:[%s18845_s10 + $0xc8] ss:$24 sps:$4 sm:$0xff]   ;;  %v17168_v3 = vld [vmem:[%s18845_s10 + $0xf8] ss:$24 sps:$4 sm:$0xff]  }
0x114e   :  { %12941 = vmatmul.mubr.bf16.vlgmr.msra.gmra.mrb[104].mxu1 %v6671_v12  ;;  %14237 = vtanh.f32 %v6789_v10  ;;  %19172 = vst [vmem:[#allocation52_spill] sm:$0xff] %v17156_v53  ;;  %v17162_v10 = vld [vmem:[%s18845_s10 + $0xfc] ss:$24 sps:$4 sm:$0xff]   ;;  %19174 = vst [vmem:[#allocation62_spill] sm:$0xff] %v17168_v3  ;;  %v17174_v49 = vld [vmem:[%s18845_s10 + $0x12c] ss:$24 sps:$4 sm:$0xff]  }
0x114f   :  { %7146 = vmatpush1.bf16.msra.mxu1 %v17108_v24  ;;  %7177 = vmatprep.mubr.bf16.mxu1 %v19005_v14  ;;  %19173 = vst [vmem:[#allocation61_spill] sm:$0xff] %v17162_v10  ;;  %19175 = vst [vmem:[#allocation63_spill] sm:$0xff] %v17174_v49 }
0x1150   :  { %7147 = vmatprep.subr.bf16.mxu1 %v17113_v13 }
0x1153   :  { %7148 = vmatpush1.bf16.msra.mxu1 %v17119_v36 }
0x1154   :  { %7149 = vmatprep.subr.bf16.mxu1 %v17126_v55 }
0x1156   :  { %v14234_v41 = vpop.eup %14233 }
0x1157   :  { %v14236_v62 = vpop.eup %14235  ;;  %v6800_v52 = vadd.f32 1.0, %v14234_v41  ;;  %7150 = vmatpush1.bf16.msra.mxu1 %v17132_v7 }
0x1158   :  { %v6794_v17 = vadd.f32 1.0, %v14236_v62  ;;  %7151 = vmatprep.subr.bf16.mxu1 %v17138_v19  ;;  %v14238_v12 = vpop.eup %14237  ;;  %v17180_v62 = vld [vmem:[%s18845_s10 + $0x128] ss:$24 sps:$4 sm:$0xff]  }
0x1159   :  { %14239 = vrcp.f32 %v6800_v52  ;;  %19176 = vst [vmem:[#allocation64_spill] sm:$0xff] %v17180_v62 }
0x115a   :  { %14241 = vrcp.f32 %v6794_v17 }
0x115b   :  { %7152 = vmatpush1.bf16.msra.mxu1 %v17144_v11 }
0x115c   :  { %7153 = vmatprep.subr.bf16.mxu1 %v17150_v40 }
0x115f   :  { %7154 = vmatpush1.bf16.msra.mxu1 %v17156_v53 }
0x1160   :  { %7155 = vmatprep.subr.bf16.mxu1 %v17162_v10  ;;  %v17187_v10 = vld [vmem:[%s18845_s10 + $0x15c] ss:$24 sps:$4 sm:$0xff]  }
0x1163   :  { %v14240_v41 = vpop.eup %14239  ;;  %7156 = vmatpush1.bf16.msra.mxu1 %v17168_v3  ;;  %v17195_v3 = vld [vmem:[%s18845_s10 + $0x158] ss:$24 sps:$4 sm:$0xff]  }
0x1164   :  { %v14242_v52 = vpop.eup %14241  ;;  %v6810_v17 = vmul.f32 %v14240_v41, %v16627_v46  ;;  %7157 = vmatprep.subr.bf16.mxu1 %v17174_v49 }
0x1165   :  { %v6811_v53 = vmul.f32 %v14242_v52, %v14238_v12 }
0x1167   :  { %v17189_v40 = vadd.f32 %v6811_v53, %v6810_v17  ;;  %v6663_v11 = vpop.f32.mrb[108].mxu0  ;;  %7158 = vmatpush1.bf16.msra.mxu1 %v17180_v62 }
0x1168   :  { %v6790_v46 = vadd.f32 %v16668_v39, %v6663_v11  ;;  %v12922_v41 = vpop.f32.mrb[109].mxu0  ;;  %7159 = vmatprep.subr.bf16.mxu1 %v17187_v10  ;;  %v17205_v39 = vld [vmem:[%s18845_s10 + $0x10] ss:$24 sps:$4 sm:$0xff]  }
0x1169   :  { %v6666_v49 = vpop.f32.mrb[110].mxu0  ;;  %v19198_v41 = vld [vmem:[#allocation30_spill] sm:$0xff] }
0x116a   :  { %v12211_v19 = vmul.f32 -1.442695, %v6790_v46  ;;  %v12923_v7 = vpop.f32.mrb[111].mxu0  ;;  %v17232_v49 = vld [vmem:[%s18845_s10 + $0x70] ss:$24 sps:$4 sm:$0xff]  }
0x116b   :  { %7160 = vmatpush1.bf16.msra.mxu1 %v17195_v3  ;;  %v17210_v7 = vld [vmem:[%s18845_s10 + $0x44] ss:$24 sps:$4 sm:$0xff]   ;;  %19177 = vst [vmem:[#allocation65_spill] sm:$0xff] %v17232_v49 }
0x116c   :  { %14243 = vpow2.f32 %v12211_v19  ;;  %7602 = vmatprep.subr.bf16.mxu1 %v16696_v15  ;;  %v17216_v15 = vld [vmem:[%s18845_s10 + $0x40] ss:$24 sps:$4 sm:$0xff]   ;;  %v17223_v19 = vld [vmem:[%s18845_s10 + $0x74] ss:$24 sps:$4 sm:$0xff]  }
0x116d   :  { %14245 = vtanh.f32 %v17189_v40 }
0x1176   :  { %v14244_v53 = vpop.eup %14243 }
0x1177   :  { %v6807_v12 = vadd.f32 1.0, %v14244_v53  ;;  %v14246_v52 = vpop.eup %14245  ;;  %v19199_v53 = vld [vmem:[#allocation12_spill] sm:$0xff] }
0x1179   :  { %14247 = vrcp.f32 %v6807_v12  ;;  %v3385_v12 = vadd.f32 %v19199_v53, %v19198_v41  ;;  %v19202_v41 = vld [vmem:[#allocation40_spill] sm:$0xff] }
0x1183   :  { %v14248_v17 = vpop.eup %14247 }
0x1184   :  { %v6814_v62 = vmul.f32 %v14248_v17, %v14246_v52 }
0x1186   :  { %v6815_v11 = vpack.c.bf16 %v6814_v62, %v6814_v62  ;;  %v17238_v62 = vld [vmem:[%s18845_s10 + $0xa4] ss:$24 sps:$4 sm:$0xff]  }
0x1187   :  { %19178 = vst [vmem:[#allocation66_spill] sm:$0xff] %v17238_v62 }
0x1188   :  { %7137 = vmatmul.mubr.bf16.vlgmr.msra.gmra.mrb[112].mxu0 %v6815_v11  ;;  %7178 = vmatmul.mubr.bf16.vlgmr.msra.gmra.mrb[108].mxu1 %v6815_v11 }
0x1189   :  { %7187 = vmatpush1.bf16.msra.mxu0 %v17205_v39  ;;  %7218 = vmatprep.mubr.bf16.mxu0 %v19005_v14 }
0x118a   :  { %7188 = vmatprep.subr.bf16.mxu0 %v17210_v7  ;;  %7603 = vmatpush1.bf16.msra.mxu1 %v16701_v28  ;;  %v17246_v28 = vld [vmem:[%s18845_s10 + $0xa0] ss:$24 sps:$4 sm:$0xff]  }
0x118b   :  { %7604 = vmatprep.subr.bf16.mxu1 %v16720_v34  ;;  %7634 = vmatprep.mubr.bf16.mxu1 %v19005_v14  ;;  %19179 = vst [vmem:[#allocation67_spill] sm:$0xff] %v17246_v28  ;;  %v17252_v34 = vld [vmem:[%s18845_s10 + $0xd4] ss:$24 sps:$4 sm:$0xff]  }
0x118c   :  { %19180 = vst [vmem:[#allocation68_spill] sm:$0xff] %v17252_v34 }
0x118d   :  { %7189 = vmatpush1.bf16.msra.mxu0 %v17216_v15 }
0x118e   :  { %7190 = vmatprep.subr.bf16.mxu0 %v17223_v19  ;;  %7605 = vmatpush1.bf16.msra.mxu1 %v16725_v45  ;;  %v17260_v45 = vld [vmem:[%s18845_s10 + $0xd0] ss:$24 sps:$4 sm:$0xff]  }
0x118f   :  { %7606 = vmatprep.subr.bf16.mxu1 %v16744_v44  ;;  %19181 = vst [vmem:[#allocation69_spill] sm:$0xff] %v17260_v45  ;;  %v17266_v44 = vld [vmem:[%s18845_s10 + $0x104] ss:$24 sps:$4 sm:$0xff]  }
0x1190   :  { %19182 = vst [vmem:[#allocation70_spill] sm:$0xff] %v17266_v44 }
0x1191   :  { %7191 = vmatpush1.bf16.msra.mxu0 %v17232_v49 }
0x1192   :  { %7192 = vmatprep.subr.bf16.mxu0 %v17238_v62  ;;  %7607 = vmatpush1.bf16.msra.mxu1 %v16749_v32  ;;  %v17274_v32 = vld [vmem:[%s18845_s10 + $0x100] ss:$24 sps:$4 sm:$0xff]  }
0x1193   :  { %7608 = vmatprep.subr.bf16.mxu1 %v16765_v43  ;;  %19183 = vst [vmem:[#allocation71_spill] sm:$0xff] %v17274_v32  ;;  %v17280_v43 = vld [vmem:[%s18845_s10 + $0x134] ss:$24 sps:$4 sm:$0xff]  }
0x1194   :  { %19184 = vst [vmem:[#allocation72_spill] sm:$0xff] %v17280_v43 }
0x1195   :  { %7193 = vmatpush1.bf16.msra.mxu0 %v17246_v28 }
0x1196   :  { %7194 = vmatprep.subr.bf16.mxu0 %v17252_v34  ;;  %7609 = vmatpush1.bf16.msra.mxu1 %v16772_v2  ;;  %v17288_v2 = vld [vmem:[%s18845_s10 + $0x130] ss:$24 sps:$4 sm:$0xff]  }
0x1197   :  { %7610 = vmatprep.subr.bf16.mxu1 %v16789_v54  ;;  %19185 = vst [vmem:[#allocation73_spill] sm:$0xff] %v17288_v2  ;;  %v17294_v54 = vld [vmem:[%s18845_s10 + $0x164] ss:$24 sps:$4 sm:$0xff]  }
0x1198   :  { %19186 = vst [vmem:[#allocation74_spill] sm:$0xff] %v17294_v54 }
0x1199   :  { %7195 = vmatpush1.bf16.msra.mxu0 %v17260_v45 }
0x119a   :  { %7196 = vmatprep.subr.bf16.mxu0 %v17266_v44  ;;  %7611 = vmatpush1.bf16.msra.mxu1 %v16801_v0  ;;  %v17302_v0 = vld [vmem:[%s18845_s10 + $0x160] ss:$24 sps:$4 sm:$0xff]  }
0x119b   :  { %7612 = vmatprep.subr.bf16.mxu1 %v16813_v35  ;;  %19187 = vst [vmem:[#allocation75_spill] sm:$0xff] %v17302_v0  ;;  %v19189_v35 = vld [vmem:[#allocation49_spill] sm:$0xff] }
0x119d   :  { %7197 = vmatpush1.bf16.msra.mxu0 %v17274_v32 }
0x119e   :  { %7198 = vmatprep.subr.bf16.mxu0 %v17280_v43  ;;  %7613 = vmatpush1.bf16.msra.mxu1 %v16825_v57  ;;  %v19191_v57 = vld [vmem:[#allocation51_spill] sm:$0xff] }
0x119f   :  { %7614 = vmatprep.subr.bf16.mxu1 %v16837_v58 }
0x11a1   :  { %7199 = vmatpush1.bf16.msra.mxu0 %v17288_v2 }
0x11a2   :  { %7200 = vmatprep.subr.bf16.mxu0 %v17294_v54  ;;  %7615 = vmatpush1.bf16.msra.mxu1 %v16849_v18 }
0x11a3   :  { %7616 = vmatprep.subr.bf16.mxu1 %v16861_v23  ;;  %v19196_v23 = vld [vmem:[#allocation29_spill] sm:$0xff] }
0x11a5   :  { %7201 = vmatpush1.bf16.msra.mxu0 %v17302_v0 }
0x11a6   :  { %7643 = vmatprep.subr.bf16.mxu0 %v16706_v29  ;;  %7617 = vmatpush1.bf16.msra.mxu1 %v16873_v42  ;;  %v19188_v29 = vld [vmem:[#allocation48_spill] sm:$0xff]  ;;  %v19197_v42 = vld [vmem:[#allocation13_spill] sm:$0xff] }
0x11a7   :  { %12944 = vmatprep.subr.bf16.mxu1 %v19064_v5  ;;  %v3384_v46 = vadd.f32 %v19197_v42, %v19196_v23 }
0x11a8   :  { %7219 = vmatmul.mubr.bf16.vlgmr.msra.gmra.mrb[116].mxu0 %v6815_v11  ;;  %v19200_v11 = vld [vmem:[#allocation22_spill] sm:$0xff] }
0x11a9   :  { %7644 = vmatpush1.bf16.msra.mxu0 %v16712_v27  ;;  %7675 = vmatprep.mubr.bf16.mxu0 %v19005_v14  ;;  %v19190_v27 = vld [vmem:[#allocation50_spill] sm:$0xff] }
0x11aa   :  { %7645 = vmatprep.subr.bf16.mxu0 %v16730_v9  ;;  %v19192_v9 = vld [vmem:[#allocation14_spill] sm:$0xff] }
0x11ad   :  { %7646 = vmatpush1.bf16.msra.mxu0 %v16736_v1  ;;  %v19193_v1 = vld [vmem:[#allocation16_spill] sm:$0xff] }
0x11ae   :  { %7647 = vmatprep.subr.bf16.mxu0 %v16759_v38  ;;  %v19194_v38 = vld [vmem:[#allocation15_spill] sm:$0xff] }
0x11b1   :  { %7648 = vmatpush1.bf16.msra.mxu0 %v16754_v30 }
0x11b2   :  { %7649 = vmatprep.subr.bf16.mxu0 %v16777_v8  ;;  %v17331_v8 = vld [vmem:[%s18849_s14] ss:$0 sm:$0xff] }
0x11b3   :  { %19195 = vst [vmem:[#allocation76_spill] sm:$0xff] %v17331_v8 }
0x11b5   :  { %7650 = vmatpush1.bf16.msra.mxu0 %v16784_v51 }
0x11b6   :  { %7651 = vmatprep.subr.bf16.mxu0 %v16795_v59 }
0x11b9   :  { %7652 = vmatpush1.bf16.msra.mxu0 %v19188_v29 }
0x11ba   :  { %7653 = vmatprep.subr.bf16.mxu0 %v19189_v35 }
0x11bd   :  { %7654 = vmatpush1.bf16.msra.mxu0 %v19190_v27 }
0x11be   :  { %7655 = vmatprep.subr.bf16.mxu0 %v19191_v57 }
0x11c1   :  { %7656 = vmatpush1.bf16.msra.mxu0 %v19192_v9  ;;  %v19201_v9 = vld [vmem:[#allocation23_spill] sm:$0xff] }
0x11c2   :  { %7657 = vmatprep.subr.bf16.mxu0 %v19193_v1 }
0x11c5   :  { %7658 = vmatpush1.bf16.msra.mxu0 %v19194_v38 }
0x11c6   :  { %12964 = vmatprep.subr.bf16.mxu0 %v19064_v5 }
0x1221   :  { %v6770_v30 = vpop.f32.mrb[104].mxu1 }
0x1222   :  { %v6771_v51 = vadd.f32 %v17331_v8, %v6770_v30  ;;  %v12942_v59 = vpop.f32.mrb[105].mxu1  ;;  %v19205_v8 = vld [vmem:[#allocation37_spill] sm:$0xff] }
0x1223   :  { %v6773_v58 = vpop.f32.mrb[106].mxu1 }
0x1224   :  { %12208 = vst [vmem:[%s18851_s16 + $0x10] sm:$0xff] %v6771_v51  ;;  %v12943_v18 = vpop.f32.mrb[107].mxu1 }
0x125b   :  { %v7138_v52 = vpop.f32.mrb[112].mxu0  ;;  %v7179_v17 = vpop.f32.mrb[108].mxu1 }
0x125c   :  { %v17342_v29 = vadd.f32 %v7138_v52, %v19200_v11  ;;  %v17344_v35 = vadd.f32 %v7179_v17, %v3384_v46  ;;  %v7140_v27 = vpop.f32.mrb[113].mxu0  ;;  %v7181_v57 = vpop.f32.mrb[109].mxu1  ;;  %v19203_v52 = vld [vmem:[#allocation38_spill] sm:$0xff]  ;;  %v19204_v46 = vld [vmem:[#allocation39_spill] sm:$0xff] }
0x125d   :  { %v17347_v1 = vadd.f32 %v7140_v27, %v19201_v9  ;;  %v17349_v38 = vadd.f32 %v7181_v57, %v3385_v12  ;;  %v7142_v30 = vpop.f32.mrb[114].mxu0  ;;  %v7183_v51 = vpop.f32.mrb[110].mxu1  ;;  %v19206_v12 = vld [vmem:[#allocation41_spill] sm:$0xff]  ;;  %v19207_v9 = vld [vmem:[#allocation42_spill] sm:$0xff] }
0x125e   :  { %v7143_v59 = vpop.f32.mrb[115].mxu0  ;;  %v7184_v58 = vpop.f32.mrb[111].mxu1  ;;  %v19208_v51 = vld [vmem:[#allocation43_spill] sm:$0xff] }
0x125f   :  { %v19209_v58 = vld [vmem:[#allocation44_spill] sm:$0xff] }
0x127b   :  { %v7220_v18 = vpop.f32.mrb[116].mxu0 }
0x127c   :  { %v17351_v23 = vpop.f32.mrb[117].mxu0  ;;  %v7236_v53 = vadd.f32 %v7220_v18, %v19202_v41  ;;  %v7235_v11 = vadd.f32 %v7220_v18, %v19203_v52  ;;  %v7238_v17 = vadd.f32 %v7220_v18, %v19204_v46  ;;  %v7237_v0 = vadd.f32 %v7220_v18, %v19205_v8  ;;  %v19210_v46 = vld [vmem:[#allocation47_spill] sm:$0xff] }
0x127d   :  { %v7224_v42 = vpop.f32.mrb[118].mxu0  ;;  %v7240_v57 = vadd.f32 %v7220_v18, %v19206_v12  ;;  %v7239_v30 = vadd.f32 %v7220_v18, %v19207_v9  ;;  %v7242_v59 = vadd.f32 %v7220_v18, %v19208_v51  ;;  %v7241_v52 = vadd.f32 %v7220_v18, %v19209_v58 }
0x127e   :  { %v7225_v27 = vpop.f32.mrb[119].mxu0  ;;  %14249 = vtanh.f32 %v7236_v53 }
0x127f   :  { %14251 = vtanh.f32 %v7235_v11 }
0x1280   :  { %14253 = vtanh.f32 %v7238_v17 }
0x1281   :  { %14255 = vtanh.f32 %v7237_v0 }
0x1282   :  { %14257 = vtanh.f32 %v7240_v57 }
0x1283   :  { %14259 = vtanh.f32 %v7239_v30 }
0x1284   :  { %14261 = vtanh.f32 %v7242_v59 }
0x1285   :  { %14263 = vtanh.f32 %v7241_v52 }
0x1288   :  { %v14250_v41 = vpop.eup %14249 }
0x1289   :  { %v14252_v42 = vpop.eup %14251  ;;  %v7252_v8 = vmul.f32 %v19210_v46, %v14250_v41 }
0x128a   :  { %v14254_v53 = vpop.eup %14253  ;;  %v7251_v11 = vmul.f32 %v19210_v46, %v14252_v42 }
0x128b   :  { %v14256_v17 = vpop.eup %14255  ;;  %7261 = vadd.xlane.f32.xlu1 %v7252_v8  ;;  %v7254_v0 = vmul.f32 %v19210_v46, %v14254_v53 }
0x128c   :  { %7259 = vadd.xlane.f32.xlu0 %v7251_v11  ;;  %v14258_v27 = vpop.eup %14257  ;;  %v7253_v57 = vmul.f32 %v19210_v46, %v14256_v17 }
0x128d   :  { %v14260_v30 = vpop.eup %14259  ;;  %v7256_v18 = vmul.f32 %v19210_v46, %v14258_v27 }
0x128e   :  { %v14262_v59 = vpop.eup %14261  ;;  %v7255_v41 = vmul.f32 %v19210_v46, %v14260_v30 }
0x128f   :  { %7265 = vadd.xlane.f32.xlu1 %v7254_v0  ;;  %v14264_v52 = vpop.eup %14263  ;;  %v7258_v42 = vmul.f32 %v19210_v46, %v14262_v59 }
0x1290   :  { %7263 = vadd.xlane.f32.xlu0 %v7253_v57  ;;  %v7257_v8 = vmul.f32 %v19210_v46, %v14264_v52 }
0x1293   :  { %7269 = vadd.xlane.f32.xlu1 %v7256_v18 }
0x1294   :  { %7267 = vadd.xlane.f32.xlu0 %v7255_v41 }
0x1297   :  { %7273 = vadd.xlane.f32.xlu1 %v7258_v42 }
0x1298   :  { %7271 = vadd.xlane.f32.xlu0 %v7257_v8 }
0x1318   :  { %v7262_v53 = vpop.xlane.xlu1 %7261 }
0x1319   :  { %v7260_v11 = vpop.xlane.xlu0 %7259 }
0x131c   :  { %v7266_v17 = vpop.xlane.xlu1 %7265 }
0x131d   :  { %v7264_v58 = vpop.xlane.xlu0 %7263 }
0x1320   :  { %v7270_v0 = vpop.xlane.xlu1 %7269 }
0x1321   :  { %v7268_v57 = vpop.xlane.xlu0 %7267  ;;  %v7276_v51 = vmax.f32 %v7262_v53, %v7270_v0 }
0x1322   :  { %v7275_v27 = vmax.f32 %v7260_v11, %v7268_v57 }
0x1324   :  { %v7274_v9 = vpop.xlane.xlu1 %7273  ;;  %v7279_v18 = vmax.f32 %v7275_v27, %v7276_v51 }
0x1325   :  { %v7278_v12 = vmax.f32 %v7266_v17, %v7274_v9  ;;  %v7272_v30 = vpop.xlane.xlu0 %7271 }
0x1326   :  { %v7277_v54 = vmax.f32 %v7264_v58, %v7272_v30 }
0x1328   :  { %v7280_v41 = vmax.f32 %v7277_v54, %v7278_v12 }
0x132a   :  { %v7281_v2 = vmax.f32 %v7279_v18, %v7280_v41 }
0x132c   :  { %v7282_v59 = vsub.f32 %v7260_v11, %v7281_v2  ;;  %v7283_v43 = vsub.f32 %v7262_v53, %v7281_v2  ;;  %v7284_v46 = vsub.f32 %v7264_v58, %v7281_v2  ;;  %v7285_v52 = vsub.f32 %v7266_v17, %v7281_v2 }
0x132d   :  { %v7286_v32 = vsub.f32 %v7268_v57, %v7281_v2  ;;  %v7287_v45 = vsub.f32 %v7270_v0, %v7281_v2  ;;  %v7288_v28 = vsub.f32 %v7272_v30, %v7281_v2  ;;  %v7289_v49 = vsub.f32 %v7274_v9, %v7281_v2 }
0x132e   :  { %v7290_v42 = vmul.f32 1.442695, %v7282_v59  ;;  %v7292_v8 = vmul.f32 1.442695, %v7283_v43  ;;  %v7294_v44 = vmul.f32 1.442695, %v7284_v46 }
0x132f   :  { %v7296_v34 = vmul.f32 1.442695, %v7285_v52  ;;  %v7298_v62 = vmul.f32 1.442695, %v7286_v32  ;;  %v7300_v51 = vmul.f32 1.442695, %v7287_v45 }
0x1330   :  { %14265 = vpow2.f32 %v7290_v42  ;;  %v7302_v54 = vmul.f32 1.442695, %v7288_v28  ;;  %v7304_v12 = vmul.f32 1.442695, %v7289_v49  ;;  %v17374_v52 = vld [vmem:[%s18850_s15 + $0x10] sm:$0xff] }
0x1331   :  { %14267 = vpow2.f32 %v7292_v8 }
0x1332   :  { %14269 = vpow2.f32 %v7294_v44 }
0x1333   :  { %14271 = vpow2.f32 %v7296_v34 }
0x1334   :  { %14273 = vpow2.f32 %v7298_v62 }
0x1335   :  { %14275 = vpow2.f32 %v7300_v51 }
0x1336   :  { %14277 = vpow2.f32 %v7302_v54  ;;  %v17380_v54 = vld [vmem:[%s18850_s15 + $0x18] sm:$0xff] }
0x1337   :  { %14279 = vpow2.f32 %v7304_v12 }
0x133a   :  { %v14266_v58 = vpop.eup %14265 }
0x133b   :  { %v14268_v53 = vpop.eup %14267 }
0x133c   :  { %v7306_v43 = vadd.f32 %v14268_v53, %v14266_v58  ;;  %v14270_v11 = vpop.eup %14269 }
0x133d   :  { %v14272_v0 = vpop.eup %14271 }
0x133e   :  { %v7307_v17 = vadd.f32 %v14270_v11, %v7306_v43  ;;  %v14274_v27 = vpop.eup %14273 }
0x133f   :  { %v14276_v44 = vpop.eup %14275 }
0x1340   :  { %v7308_v57 = vadd.f32 %v14272_v0, %v7307_v17  ;;  %v14278_v2 = vpop.eup %14277 }
0x1341   :  { %v14280_v45 = vpop.eup %14279 }
0x1342   :  { %v7309_v30 = vadd.f32 %v14274_v27, %v7308_v57 }
0x1344   :  { %v7310_v32 = vadd.f32 %v14276_v44, %v7309_v30  ;;  %v17389_v30 = vld [vmem:[%s18850_s15 + $0x38] sm:$0xff] }
0x1346   :  { %v7311_v34 = vadd.f32 %v14278_v2, %v7310_v32 }
0x1348   :  { %v7312_v62 = vadd.f32 %v14280_v45, %v7311_v34 }
0x134a   :  { %14281 = vrcp.f32 %v7312_v62  ;;  %v13693_v62 = vld [vmem:[%s18846_s11 + $0x60] ss:$20 sps:$4 sm:$0xff]  }
0x1354   :  { %v14282_v28 = vpop.eup %14281 }
0x1355   :  { %v7314_v49 = vmul.f32 %v14282_v28, %v14266_v58  ;;  %v7315_v9 = vmul.f32 %v14282_v28, %v14268_v53  ;;  %v7316_v18 = vmul.f32 %v14282_v28, %v14270_v11  ;;  %v7317_v41 = vmul.f32 %v14282_v28, %v14272_v0 }
0x1356   :  { %v7318_v42 = vmul.f32 %v14282_v28, %v14274_v27  ;;  %v7319_v12 = vmul.f32 %v14282_v28, %v14276_v44  ;;  %v7320_v53 = vmul.f32 %v14282_v28, %v14278_v2  ;;  %v7321_v11 = vmul.f32 %v14282_v28, %v14280_v45  ;;  %v13700_v45 = vld [vmem:[%s18848_s13 + $0x8] sm:$0xff]   ;;  %v13701_v28 = vld [vmem:[%s18848_s13 + $0x10] sm:$0xff]  }
0x1357   :  { %v7330_v59 = vmul.f32 %v7314_v49, %v16890_v6  ;;  %v7331_v46 = vmul.f32 %v7315_v9, %v16895_v33  ;;  %v7332_v8 = vmul.f32 %v17374_v52, %v7316_v18  ;;  %v7333_v58 = vmul.f32 %v17380_v54, %v7317_v41  ;;  %v13694_v49 = vld [vmem:[%s18846_s11 + $0x88] ss:$20 sps:$4 sm:$0xff]   ;;  %v13695_v18 = vld [vmem:[%s18846_s11 + $0xb0] ss:$20 sps:$4 sm:$0xff]  }
0x1358   :  { %v7334_v33 = vmul.f32 %v7318_v42, %v16904_v50  ;;  %v7335_v17 = vmul.f32 %v7319_v12, %v16910_v56  ;;  %v7336_v57 = vmul.f32 %v7320_v53, %v16916_v47  ;;  %v7337_v44 = vmul.f32 %v17389_v30, %v7321_v11  ;;  %v13691_v50 = vld [vmem:[%s18846_s11 + $0x10] ss:$20 sps:$4 sm:$0xff]   ;;  %v13692_v47 = vld [vmem:[%s18846_s11 + $0x38] ss:$20 sps:$4 sm:$0xff]   ;;  %v13697_v42 = vld [vmem:[%s18846_s11 + $0x100] ss:$20 sps:$4 sm:$0xff]  }
0x1359   :  { %v7338_v51 = vadd.f32 %v7331_v46, %v7330_v59  ;;  %v13699_v56 = vld [vmem:[%s18848_s13] sm:$0xff]   ;;  %v13702_v9 = vld [vmem:[%s18848_s13 + $0x18] sm:$0xff]   ;;  %v13704_v46 = vld [vmem:[%s18848_s13 + $0x28] sm:$0xff]  }
0x135a   :  { %v13703_v41 = vld [vmem:[%s18848_s13 + $0x20] sm:$0xff]   ;;  %v13696_v59 = vld [vmem:[%s18846_s11 + $0xd8] ss:$20 sps:$4 sm:$0xff]  }
0x135b   :  { %v7339_v6 = vadd.f32 %v7338_v51, %v7332_v8  ;;  %v13698_v8 = vld [vmem:[%s18846_s11 + $0x128] ss:$20 sps:$4 sm:$0xff]  }
0x135d   :  { %v7340_v43 = vadd.f32 %v7339_v6, %v7333_v58 }
0x135f   :  { %v7341_v0 = vadd.f32 %v7340_v43, %v7334_v33 }
0x1361   :  { %v7342_v27 = vadd.f32 %v7341_v0, %v7335_v17 }
0x1363   :  { %v7343_v32 = vadd.f32 %v7342_v27, %v7336_v57 }
0x1365   :  { %v7344_v34 = vadd.f32 %v7343_v32, %v7337_v44  ;;  %v19218_v44 = vld [vmem:[#allocation58_spill] sm:$0xff]  ;;  %v19220_v32 = vld [vmem:[#allocation60_spill] sm:$0xff] }
0x1367   :  { %v7345_v2 = vpack.c.bf16 %v7344_v34, %v7344_v34 }
0x1369   :  { %7635 = vmatmul.mubr.bf16.vlgmr.msra.gmra.mrb[112].mxu1 %v7345_v2  ;;  %7676 = vmatmul.mubr.bf16.vlgmr.msra.gmra.mrb[120].mxu0 %v7345_v2 }
0x136a   :  { %12945 = vmatpush3.bf16.msra.mxu1 %v13691_v50  ;;  %12960 = vmatprep.mubr.msk.bf16.mxu1 %vm14578_vm0, %v19064_v5  ;;  %v19223_v50 = vld [vmem:[#allocation62_spill] sm:$0xff] }
0x136b   :  { %12946 = vmatprep.subr.bf16.mxu1 %v19064_v5  ;;  %12965 = vmatpush3.bf16.msra.mxu0 %v13699_v56 }
0x136c   :  { %12966 = vmatprep.subr.bf16.mxu0 %v19064_v5  ;;  %12980 = vmatprep.mubr.msk.bf16.mxu0 %vm14578_vm0, %v19064_v5 }
0x136e   :  { %12947 = vmatpush3.bf16.msra.mxu1 %v13692_v47  ;;  %v19224_v47 = vld [vmem:[#allocation63_spill] sm:$0xff] }
0x136f   :  { %12948 = vmatprep.subr.bf16.mxu1 %v19064_v5  ;;  %12967 = vmatpush3.bf16.msra.mxu0 %v13700_v45 }
0x1370   :  { %12968 = vmatprep.subr.bf16.mxu0 %v19064_v5 }
0x1372   :  { %12949 = vmatpush3.bf16.msra.mxu1 %v13693_v62 }
0x1373   :  { %12950 = vmatprep.subr.bf16.mxu1 %v19064_v5  ;;  %12969 = vmatpush3.bf16.msra.mxu0 %v13701_v28 }
0x1374   :  { %12970 = vmatprep.subr.bf16.mxu0 %v19064_v5 }
0x1376   :  { %12951 = vmatpush3.bf16.msra.mxu1 %v13694_v49  ;;  %v19225_v49 = vld [vmem:[#allocation64_spill] sm:$0xff] }
0x1377   :  { %12952 = vmatprep.subr.bf16.mxu1 %v19064_v5  ;;  %12971 = vmatpush3.bf16.msra.mxu0 %v13702_v9 }
0x1378   :  { %12972 = vmatprep.subr.bf16.mxu0 %v19064_v5 }
0x137a   :  { %12953 = vmatpush3.bf16.msra.mxu1 %v13695_v18 }
0x137b   :  { %12954 = vmatprep.subr.bf16.mxu1 %v19064_v5  ;;  %12973 = vmatpush3.bf16.msra.mxu0 %v13703_v41 }
0x137c   :  { %12974 = vmatprep.subr.bf16.mxu0 %v19064_v5 }
0x137e   :  { %12955 = vmatpush3.bf16.msra.mxu1 %v13696_v59 }
0x137f   :  { %12956 = vmatprep.subr.bf16.mxu1 %v19064_v5  ;;  %12975 = vmatpush3.bf16.msra.mxu0 %v13704_v46 }
0x1380   :  { %12976 = vmatprep.subr.bf16.mxu0 %v19064_v5 }
0x1382   :  { %12957 = vmatpush3.bf16.msra.mxu1 %v13697_v42 }
0x1383   :  { %12958 = vmatprep.subr.bf16.mxu1 %v19064_v5 }
0x1386   :  { %12959 = vmatpush3.bf16.msra.mxu1 %v13698_v8 }
0x1387   :  { %8159 = vmatprep.subr.bf16.mxu1 %v16990_v26  ;;  %v19211_v26 = vld [vmem:[#allocation45_spill] sm:$0xff] }
0x1389   :  { %12961 = vmatmul.mubr.bf16.vlgmr.msra.gmra.mrb[116].mxu1 %v7345_v2 }
0x138a   :  { %8160 = vmatpush1.bf16.msra.mxu1 %v16995_v60  ;;  %8191 = vmatprep.mubr.bf16.mxu1 %v19005_v14  ;;  %v19212_v60 = vld [vmem:[#allocation53_spill] sm:$0xff] }
0x138b   :  { %8161 = vmatprep.subr.bf16.mxu1 %v17008_v4  ;;  %v19213_v4 = vld [vmem:[#allocation54_spill] sm:$0xff] }
0x138e   :  { %8162 = vmatpush1.bf16.msra.mxu1 %v17013_v21  ;;  %v19214_v21 = vld [vmem:[#allocation55_spill] sm:$0xff] }
0x138f   :  { %8163 = vmatprep.subr.bf16.mxu1 %v17020_v20  ;;  %v19215_v20 = vld [vmem:[#allocation56_spill] sm:$0xff] }
0x1392   :  { %8164 = vmatpush1.bf16.msra.mxu1 %v17025_v31  ;;  %v13705_v31 = vld [vmem:[%s18848_s13 + $0x30] sm:$0xff]  }
0x1393   :  { %8165 = vmatprep.subr.bf16.mxu1 %v17032_v48  ;;  %12977 = vmatpush3.bf16.msra.mxu0 %v13705_v31  ;;  %v13706_v48 = vld [vmem:[%s18848_s13 + $0x38] sm:$0xff]   ;;  %v19232_v31 = vld [vmem:[#allocation71_spill] sm:$0xff] }
0x1394   :  { %12978 = vmatprep.subr.bf16.mxu0 %v19064_v5 }
0x1396   :  { %8166 = vmatpush1.bf16.msra.mxu1 %v17037_v63  ;;  %v19216_v63 = vld [vmem:[#allocation17_spill] sm:$0xff] }
0x1397   :  { %8167 = vmatprep.subr.bf16.mxu1 %v17049_v37  ;;  %12979 = vmatpush3.bf16.msra.mxu0 %v13706_v48  ;;  %v19234_v48 = vld [vmem:[#allocation73_spill] sm:$0xff] }
0x1398   :  { %8200 = vmatprep.subr.bf16.mxu0 %v19216_v63 }
0x139a   :  { %8168 = vmatpush1.bf16.msra.mxu1 %v17044_v16 }
0x139b   :  { %8169 = vmatprep.subr.bf16.mxu1 %v17054_v61 }
0x139e   :  { %8170 = vmatpush1.bf16.msra.mxu1 %v17061_v25 }
0x139f   :  { %8171 = vmatprep.subr.bf16.mxu1 %v19211_v26 }
0x13a2   :  { %8172 = vmatpush1.bf16.msra.mxu1 %v19212_v60 }
0x13a3   :  { %8173 = vmatprep.subr.bf16.mxu1 %v19213_v4 }
0x13a6   :  { %8174 = vmatpush1.bf16.msra.mxu1 %v19214_v21  ;;  %v19229_v21 = vld [vmem:[#allocation68_spill] sm:$0xff] }
0x13a7   :  { %8241 = vmatprep.subr.bf16.mxu1 %v19215_v20  ;;  %v19230_v20 = vld [vmem:[#allocation69_spill] sm:$0xff] }
0x143c   :  { %v7636_v16 = vpop.f32.mrb[112].mxu1  ;;  %v7677_v37 = vpop.f32.mrb[120].mxu0 }
0x143d   :  { %v7724_v61 = vadd.f32 %v7636_v16, %v17351_v23  ;;  %v7843_v25 = vadd.f32 %v17347_v1, %v7677_v37  ;;  %v7638_v51 = vpop.f32.mrb[113].mxu1  ;;  %v7679_v12 = vpop.f32.mrb[121].mxu0  ;;  %v19217_v1 = vld [vmem:[#allocation57_spill] sm:$0xff]  ;;  %v19237_v16 = vld [vmem:[#allocation76_spill] sm:$0xff] }
0x143e   :  { %v7842_v58 = vadd.f32 %v17342_v29, %v7638_v51  ;;  %v7844_v6 = vadd.f32 %v17344_v35, %v7679_v12  ;;  %v7640_v53 = vpop.f32.mrb[114].mxu1  ;;  %v7681_v33 = vpop.f32.mrb[122].mxu0  ;;  %v19238_v12 = vld [vmem:[#allocation31_spill] sm:$0xff] }
0x143f   :  { %v7725_v43 = vadd.f32 %v17102_v22, %v7724_v61  ;;  %v12310_v11 = vmul.f32 -1.442695, %v7843_v25  ;;  %v7641_v17 = vpop.f32.mrb[115].mxu1  ;;  %v7682_v0 = vpop.f32.mrb[123].mxu0  ;;  %v19240_v53 = vld [vmem:[#allocation32_spill] sm:$0xff] }
0x1440   :  { %v12309_v57 = vmul.f32 -1.442695, %v7842_v58  ;;  %v19239_v58 = vld [vmem:[#allocation13_spill] sm:$0xff]  ;;  %v19241_v33 = vld [vmem:[#allocation12_spill] sm:$0xff]  ;;  %v19242_v0 = vld [vmem:[#allocation11_spill] sm:$0xff] }
0x1441   :  { %v7726_v27 = vpack.c.bf16 %v7725_v43, %v7725_v43  ;;  %14283 = vpow2.f32 %v12310_v11  ;;  %v3389_v43 = vadd.f32 %v19241_v33, %v19240_v53  ;;  %v17581_v53 = vld [vmem:[%s18846_s11 + $0x8] ss:$20 sps:$4 sm:$0xff]  }
0x1442   :  { %14285 = vpow2.f32 %v12309_v57 }
0x1443   :  { %12981 = vmatmul.mubr.bf16.vlgmr.msra.gmra.mrb[124].mxu0 %v7726_v27  ;;  %14287 = vtanh.f32 %v7844_v6  ;;  %v3388_v6 = vadd.f32 %v19239_v58, %v19238_v12  ;;  %v17570_v12 = vld [vmem:[%s18846_s11] ss:$20 sps:$4 sm:$0xff]  }
0x1444   :  { %8201 = vmatpush1.bf16.msra.mxu0 %v17108_v24  ;;  %8232 = vmatprep.mubr.bf16.mxu0 %v19005_v14  ;;  %v19219_v24 = vld [vmem:[#allocation59_spill] sm:$0xff] }
0x1445   :  { %8202 = vmatprep.subr.bf16.mxu0 %v17113_v13  ;;  %v19221_v13 = vld [vmem:[#allocation52_spill] sm:$0xff] }
0x1448   :  { %8203 = vmatpush1.bf16.msra.mxu0 %v17119_v36  ;;  %v19222_v36 = vld [vmem:[#allocation61_spill] sm:$0xff] }
0x1449   :  { %8204 = vmatprep.subr.bf16.mxu0 %v17126_v55 }
0x144b   :  { %v14284_v29 = vpop.eup %14283 }
0x144c   :  { %v14286_v22 = vpop.eup %14285  ;;  %v7855_v35 = vadd.f32 1.0, %v14284_v29  ;;  %8205 = vmatpush1.bf16.msra.mxu0 %v19217_v1 }
0x144d   :  { %v7849_v23 = vadd.f32 1.0, %v14286_v22  ;;  %8206 = vmatprep.subr.bf16.mxu0 %v19218_v44  ;;  %v14288_v55 = vpop.eup %14287 }
0x144e   :  { %14289 = vrcp.f32 %v7855_v35  ;;  %v19243_v35 = vld [vmem:[#allocation24_spill] sm:$0xff] }
0x144f   :  { %14291 = vrcp.f32 %v7849_v23 }
0x1450   :  { %8207 = vmatpush1.bf16.msra.mxu0 %v19219_v24 }
0x1451   :  { %8208 = vmatprep.subr.bf16.mxu0 %v19220_v32 }
0x1454   :  { %8209 = vmatpush1.bf16.msra.mxu0 %v19221_v13 }
0x1455   :  { %8210 = vmatprep.subr.bf16.mxu0 %v19222_v36 }
0x1458   :  { %v14290_v34 = vpop.eup %14289  ;;  %8211 = vmatpush1.bf16.msra.mxu0 %v19223_v50 }
0x1459   :  { %v14292_v2 = vpop.eup %14291  ;;  %v7865_v56 = vmul.f32 %v14290_v34, %v17189_v40  ;;  %8212 = vmatprep.subr.bf16.mxu0 %v19224_v47  ;;  %v19244_v34 = vld [vmem:[#allocation40_spill] sm:$0xff]  ;;  %v19246_v47 = vld [vmem:[#allocation39_spill] sm:$0xff] }
0x145a   :  { %v7866_v45 = vmul.f32 %v14292_v2, %v14288_v55  ;;  %v19245_v2 = vld [vmem:[#allocation38_spill] sm:$0xff] }
0x145c   :  { %v17496_v62 = vadd.f32 %v7866_v45, %v7865_v56  ;;  %v7718_v28 = vpop.f32.mrb[116].mxu1  ;;  %8213 = vmatpush1.bf16.msra.mxu0 %v19225_v49  ;;  %v19247_v49 = vld [vmem:[#allocation37_spill] sm:$0xff] }
0x145d   :  { %v7845_v9 = vadd.f32 %v17349_v38, %v7718_v28  ;;  %v12962_v18 = vpop.f32.mrb[117].mxu1  ;;  %8214 = vmatprep.subr.bf16.mxu0 %v17187_v10  ;;  %v19226_v10 = vld [vmem:[#allocation65_spill] sm:$0xff]  ;;  %v19228_v38 = vld [vmem:[#allocation67_spill] sm:$0xff] }
0x145e   :  { %v7721_v41 = vpop.f32.mrb[118].mxu1 }
0x145f   :  { %v12311_v59 = vmul.f32 -1.442695, %v7845_v9  ;;  %v12963_v46 = vpop.f32.mrb[119].mxu1  ;;  %v19248_v41 = vld [vmem:[#allocation41_spill] sm:$0xff] }
0x1460   :  { %8215 = vmatpush1.bf16.msra.mxu0 %v17195_v3  ;;  %v19227_v3 = vld [vmem:[#allocation66_spill] sm:$0xff] }
0x1461   :  { %14293 = vpow2.f32 %v12311_v59  ;;  %v19249_v46 = vld [vmem:[#allocation42_spill] sm:$0xff] }
0x1462   :  { %14295 = vtanh.f32 %v17496_v62 }
0x146b   :  { %v14294_v40 = vpop.eup %14293 }
0x146c   :  { %v7862_v42 = vadd.f32 1.0, %v14294_v40  ;;  %v14296_v8 = vpop.eup %14295 }
0x146e   :  { %14297 = vrcp.f32 %v7862_v42  ;;  %v19250_v42 = vld [vmem:[#allocation43_spill] sm:$0xff] }
0x1478   :  { %v14298_v26 = vpop.eup %14297 }
0x1479   :  { %v7869_v60 = vmul.f32 %v14298_v26, %v14296_v8  ;;  %v19251_v26 = vld [vmem:[#allocation44_spill] sm:$0xff] }
0x147b   :  { %v7870_v4 = vpack.c.bf16 %v7869_v60, %v7869_v60 }
0x147d   :  { %8192 = vmatmul.mubr.bf16.vlgmr.msra.gmra.mrb[120].mxu1 %v7870_v4  ;;  %8233 = vmatmul.mubr.bf16.vlgmr.msra.gmra.mrb[128].mxu0 %v7870_v4 }
0x147e   :  { %8242 = vmatpush1.bf16.msra.mxu1 %v17205_v39  ;;  %8273 = vmatprep.mubr.bf16.mxu1 %v19005_v14  ;;  %v19231_v39 = vld [vmem:[#allocation70_spill] sm:$0xff] }
0x147f   :  { %8243 = vmatprep.subr.bf16.mxu1 %v17210_v7  ;;  %8689 = vmatprep.mubr.bf16.mxu0 %v19005_v14  ;;  %v19233_v7 = vld [vmem:[#allocation72_spill] sm:$0xff] }
0x1482   :  { %8244 = vmatpush1.bf16.msra.mxu1 %v17216_v15  ;;  %v19235_v15 = vld [vmem:[#allocation74_spill] sm:$0xff] }
0x1483   :  { %8245 = vmatprep.subr.bf16.mxu1 %v17223_v19  ;;  %v19236_v19 = vld [vmem:[#allocation75_spill] sm:$0xff] }
0x1486   :  { %8246 = vmatpush1.bf16.msra.mxu1 %v19226_v10 }
0x1487   :  { %8247 = vmatprep.subr.bf16.mxu1 %v19227_v3  ;;  %v17552_v3 = vld [vmem:[%s18844_s9] ss:$0 sm:$0xff] }
0x1488   :  { %19252 = vst [vmem:[#allocation77_spill] sm:$0xff] %v17552_v3 }
0x148a   :  { %8248 = vmatpush1.bf16.msra.mxu1 %v19228_v38 }
0x148b   :  { %8249 = vmatprep.subr.bf16.mxu1 %v19229_v21 }
0x148e   :  { %8250 = vmatpush1.bf16.msra.mxu1 %v19230_v20 }
0x148f   :  { %8251 = vmatprep.subr.bf16.mxu1 %v19231_v39 }
0x1492   :  { %8252 = vmatpush1.bf16.msra.mxu1 %v19232_v31 }
0x1493   :  { %8253 = vmatprep.subr.bf16.mxu1 %v19233_v7 }
0x1496   :  { %8254 = vmatpush1.bf16.msra.mxu1 %v19234_v48 }
0x1497   :  { %8255 = vmatprep.subr.bf16.mxu1 %v19235_v15 }
0x149a   :  { %8256 = vmatpush1.bf16.msra.mxu1 %v19236_v19 }
0x149d   :  { %8274 = vmatmul.mubr.bf16.vlgmr.msra.gmra.mrb[124].mxu1 %v7870_v4 }
0x149e   :  { %8730 = vmatprep.mubr.bf16.mxu1 %v19005_v14 }
0x1516   :  { %v7825_v63 = vpop.f32.mrb[124].mxu0 }
0x1517   :  { %v7826_v37 = vadd.f32 %v19237_v16, %v7825_v63  ;;  %v12982_v61 = vpop.f32.mrb[125].mxu0 }
0x1518   :  { %v7828_v25 = vpop.f32.mrb[126].mxu0 }
0x1519   :  { %12308 = vst [vmem:[%s18851_s16 + $0x18] sm:$0xff] %v7826_v37  ;;  %v12983_v51 = vpop.f32.mrb[127].mxu0 }
0x151a   :  { %v17565_v51 = vld [vmem:[%s18846_s11 + $0x4] ss:$20 sps:$4 sm:$0xff]  }
0x151b   :  { %8657 = vmatprep.subr.bf16.mxu0 %v17565_v51 }
0x151c   :  { %8658 = vmatpush1.bf16.msra.mxu0 %v17570_v12 }
0x1550   :  { %v8193_v11 = vpop.f32.mrb[120].mxu1  ;;  %v8234_v17 = vpop.f32.mrb[128].mxu0 }
0x1551   :  { %v17530_v57 = vadd.f32 %v8193_v11, %v19242_v0  ;;  %v17532_v27 = vadd.f32 %v8234_v17, %v3388_v6  ;;  %v8195_v29 = vpop.f32.mrb[121].mxu1  ;;  %v8236_v22 = vpop.f32.mrb[129].mxu0  ;;  %v17575_v6 = vld [vmem:[%s18846_s11 + $0xc] ss:$20 sps:$4 sm:$0xff]   ;;  %v17594_v11 = vld [vmem:[%s18846_s11 + $0x28] ss:$20 sps:$4 sm:$0xff]  }
0x1552   :  { %v17535_v1 = vadd.f32 %v8195_v29, %v19243_v35  ;;  %v17537_v23 = vadd.f32 %v8236_v22, %v3389_v43  ;;  %v8197_v44 = vpop.f32.mrb[122].mxu1  ;;  %v8238_v24 = vpop.f32.mrb[130].mxu0  ;;  %8698 = vmatprep.subr.bf16.mxu1 %v17575_v6  ;;  %v17589_v43 = vld [vmem:[%s18846_s11 + $0x2c] ss:$20 sps:$4 sm:$0xff]   ;;  %v17599_v17 = vld [vmem:[%s18846_s11 + $0x34] ss:$20 sps:$4 sm:$0xff]  }
0x1553   :  { %v8198_v32 = vpop.f32.mrb[123].mxu1  ;;  %v8239_v13 = vpop.f32.mrb[131].mxu0  ;;  %8699 = vmatpush1.bf16.msra.mxu1 %v17581_v53  ;;  %8659 = vmatprep.subr.bf16.mxu0 %v17589_v43  ;;  %v17605_v0 = vld [vmem:[%s18846_s11 + $0x30] ss:$20 sps:$4 sm:$0xff]   ;;  %v17613_v29 = vld [vmem:[%s18846_s11 + $0x54] ss:$20 sps:$4 sm:$0xff]  }
0x1554   :  { %8660 = vmatpush1.bf16.msra.mxu0 %v17594_v11  ;;  %8700 = vmatprep.subr.bf16.mxu1 %v17599_v17  ;;  %v17618_v22 = vld [vmem:[%s18846_s11 + $0x50] ss:$20 sps:$4 sm:$0xff]   ;;  %v17623_v35 = vld [vmem:[%s18846_s11 + $0x58] ss:$20 sps:$4 sm:$0xff]  }
0x1555   :  { %v17628_v44 = vld [vmem:[%s18846_s11 + $0x5c] ss:$20 sps:$4 sm:$0xff]   ;;  %8661 = vmatprep.subr.bf16.mxu0 %v17613_v29  ;;  %v17641_v32 = vld [vmem:[%s18846_s11 + $0x78] ss:$20 sps:$4 sm:$0xff]  }
0x1556   :  { %v17634_v24 = vld [vmem:[%s18846_s11 + $0x7c] ss:$20 sps:$4 sm:$0xff]   ;;  %v17646_v13 = vld [vmem:[%s18846_s11 + $0x84] ss:$20 sps:$4 sm:$0xff]  }
0x1557   :  { %8701 = vmatpush1.bf16.msra.mxu1 %v17605_v0 }
0x1558   :  { %8662 = vmatpush1.bf16.msra.mxu0 %v17618_v22  ;;  %8702 = vmatprep.subr.bf16.mxu1 %v17628_v44 }
0x1559   :  { %8663 = vmatprep.subr.bf16.mxu0 %v17634_v24 }
0x155b   :  { %8703 = vmatpush1.bf16.msra.mxu1 %v17623_v35 }
0x155c   :  { %8704 = vmatprep.subr.bf16.mxu1 %v17646_v13  ;;  %8664 = vmatpush1.bf16.msra.mxu0 %v17641_v32 }
0x1570   :  { %v8275_v36 = vpop.f32.mrb[124].mxu1 }
0x1571   :  { %v17539_v55 = vpop.f32.mrb[125].mxu1  ;;  %v8291_v50 = vadd.f32 %v8275_v36, %v19244_v34  ;;  %v8290_v56 = vadd.f32 %v8275_v36, %v19245_v2  ;;  %v8293_v45 = vadd.f32 %v8275_v36, %v19246_v47  ;;  %v8292_v9 = vadd.f32 %v8275_v36, %v19247_v49 }
0x1572   :  { %v8279_v28 = vpop.f32.mrb[126].mxu1  ;;  %v8295_v59 = vadd.f32 %v8275_v36, %v19248_v41  ;;  %v8294_v40 = vadd.f32 %v8275_v36, %v19249_v46  ;;  %v8297_v8 = vadd.f32 %v8275_v36, %v19250_v42  ;;  %v8296_v60 = vadd.f32 %v8275_v36, %v19251_v26  ;;  %v17653_v36 = vld [vmem:[%s18846_s11 + $0x80] ss:$20 sps:$4 sm:$0xff]  }
0x1573   :  { %v8280_v18 = vpop.f32.mrb[127].mxu1  ;;  %14299 = vtanh.f32 %v8291_v50  ;;  %v17658_v50 = vld [vmem:[%s18846_s11 + $0xa4] ss:$20 sps:$4 sm:$0xff]   ;;  %8705 = vmatpush1.bf16.msra.mxu1 %v17653_v36  ;;  %v17677_v28 = vld [vmem:[%s18846_s11 + $0xa8] ss:$20 sps:$4 sm:$0xff]  }
0x1574   :  { %14301 = vtanh.f32 %v8290_v56  ;;  %v17664_v56 = vld [vmem:[%s18846_s11 + $0xac] ss:$20 sps:$4 sm:$0xff]   ;;  %8665 = vmatprep.subr.bf16.mxu0 %v17658_v50  ;;  %19253 = vst [vmem:[#allocation46_spill] sm:$0xff] %v17677_v28  ;;  %v17688_v18 = vld [vmem:[%s18846_s11 + $0xd4] ss:$20 sps:$4 sm:$0xff]  }
0x1575   :  { %14303 = vtanh.f32 %v8293_v45  ;;  %v17670_v45 = vld [vmem:[%s18846_s11 + $0xa0] ss:$20 sps:$4 sm:$0xff]   ;;  %8706 = vmatprep.subr.bf16.mxu1 %v17664_v56  ;;  %19254 = vst [vmem:[#allocation18_spill] sm:$0xff] %v17688_v18 }
0x1576   :  { %14305 = vtanh.f32 %v8292_v9  ;;  %v17682_v9 = vld [vmem:[%s18846_s11 + $0xcc] ss:$20 sps:$4 sm:$0xff]   ;;  %8666 = vmatpush1.bf16.msra.mxu0 %v17670_v45 }
0x1577   :  { %14307 = vtanh.f32 %v8295_v59  ;;  %v17694_v59 = vld [vmem:[%s18846_s11 + $0xc8] ss:$20 sps:$4 sm:$0xff]   ;;  %8707 = vmatpush1.bf16.msra.mxu1 %v17677_v28  ;;  %8667 = vmatprep.subr.bf16.mxu0 %v17682_v9 }
0x1578   :  { %14309 = vtanh.f32 %v8294_v40  ;;  %v17701_v40 = vld [vmem:[%s18846_s11 + $0xd0] ss:$20 sps:$4 sm:$0xff]   ;;  %8708 = vmatprep.subr.bf16.mxu1 %v17688_v18 }
0x1579   :  { %14311 = vtanh.f32 %v8297_v8  ;;  %19255 = vst [vmem:[#allocation20_spill] sm:$0xff] %v17701_v40  ;;  %v17706_v8 = vld [vmem:[%s18846_s11 + $0xf4] ss:$20 sps:$4 sm:$0xff]  }
0x157a   :  { %14313 = vtanh.f32 %v8296_v60  ;;  %v17712_v60 = vld [vmem:[%s18846_s11 + $0xfc] ss:$20 sps:$4 sm:$0xff]   ;;  %8668 = vmatpush1.bf16.msra.mxu0 %v17694_v59 }
0x157b   :  { %19256 = vst [vmem:[#allocation19_spill] sm:$0xff] %v17712_v60  ;;  %8709 = vmatpush1.bf16.msra.mxu1 %v17701_v40  ;;  %8669 = vmatprep.subr.bf16.mxu0 %v17706_v8 }
0x157c   :  { %8710 = vmatprep.subr.bf16.mxu1 %v17712_v60 }
0x157d   :  { %v14300_v4 = vpop.eup %14299 }
0x157e   :  { %v14302_v10 = vpop.eup %14301  ;;  %v8307_v38 = vmul.f32 %v17552_v3, %v14300_v4  ;;  %v17718_v4 = vld [vmem:[%s18846_s11 + $0xf0] ss:$20 sps:$4 sm:$0xff]  }
0x157f   :  { %v14304_v21 = vpop.eup %14303  ;;  %v8306_v20 = vmul.f32 %v17552_v3, %v14302_v10  ;;  %v17725_v10 = vld [vmem:[%s18846_s11 + $0xf8] ss:$20 sps:$4 sm:$0xff]   ;;  %8670 = vmatpush1.bf16.msra.mxu0 %v17718_v4 }
0x1580   :  { %v14306_v39 = vpop.eup %14305  ;;  %8316 = vadd.xlane.f32.xlu1 %v8307_v38  ;;  %v8309_v31 = vmul.f32 %v17552_v3, %v14304_v21  ;;  %19257 = vst [vmem:[#allocation21_spill] sm:$0xff] %v17725_v10  ;;  %v17730_v38 = vld [vmem:[%s18846_s11 + $0x11c] ss:$20 sps:$4 sm:$0xff]   ;;  %v17736_v21 = vld [vmem:[%s18846_s11 + $0x124] ss:$20 sps:$4 sm:$0xff]   ;;  %8711 = vmatpush1.bf16.msra.mxu1 %v17725_v10 }
0x1581   :  { %8314 = vadd.xlane.f32.xlu0 %v8306_v20  ;;  %v14308_v7 = vpop.eup %14307  ;;  %v8308_v48 = vmul.f32 %v17552_v3, %v14306_v39  ;;  %19258 = vst [vmem:[#allocation48_spill] sm:$0xff] %v17736_v21  ;;  %v17742_v20 = vld [vmem:[%s18846_s11 + $0x118] ss:$20 sps:$4 sm:$0xff]   ;;  %8671 = vmatprep.subr.bf16.mxu0 %v17730_v38  ;;  %v17749_v39 = vld [vmem:[%s18846_s11 + $0x120] ss:$20 sps:$4 sm:$0xff]  }
0x1582   :  { %v14310_v15 = vpop.eup %14309  ;;  %v8311_v19 = vmul.f32 %v17552_v3, %v14308_v7  ;;  %19259 = vst [vmem:[#allocation49_spill] sm:$0xff] %v17749_v39  ;;  %8712 = vmatprep.subr.bf16.mxu1 %v17736_v21 }
0x1583   :  { %v14312_v63 = vpop.eup %14311  ;;  %v8310_v16 = vmul.f32 %v17552_v3, %v14310_v15  ;;  %8672 = vmatpush1.bf16.msra.mxu0 %v17742_v20 }
0x1584   :  { %8320 = vadd.xlane.f32.xlu1 %v8309_v31  ;;  %v14314_v37 = vpop.eup %14313  ;;  %v8313_v61 = vmul.f32 %v17552_v3, %v14312_v63  ;;  %8713 = vmatpush1.bf16.msra.mxu1 %v17749_v39 }
0x1585   :  { %8318 = vadd.xlane.f32.xlu0 %v8308_v48  ;;  %v8312_v25 = vmul.f32 %v17552_v3, %v14314_v37  ;;  %12984 = vmatprep.subr.bf16.mxu0 %v19064_v5 }
0x1586   :  { %13004 = vmatprep.subr.bf16.mxu1 %v19064_v5 }
0x1588   :  { %8324 = vadd.xlane.f32.xlu1 %v8311_v19 }
0x1589   :  { %8322 = vadd.xlane.f32.xlu0 %v8310_v16 }
0x158c   :  { %8328 = vadd.xlane.f32.xlu1 %v8313_v61 }
0x158d   :  { %8326 = vadd.xlane.f32.xlu0 %v8312_v25 }
0x160d   :  { %v8317_v31 = vpop.xlane.xlu1 %8316 }
0x160e   :  { %v8315_v7 = vpop.xlane.xlu0 %8314 }
0x1611   :  { %v8321_v48 = vpop.xlane.xlu1 %8320 }
0x1612   :  { %v8319_v15 = vpop.xlane.xlu0 %8318 }
0x1615   :  { %v8325_v19 = vpop.xlane.xlu1 %8324 }
0x1616   :  { %v8323_v63 = vpop.xlane.xlu0 %8322  ;;  %v8331_v16 = vmax.f32 %v8317_v31, %v8325_v19 }
0x1617   :  { %v8330_v37 = vmax.f32 %v8315_v7, %v8323_v63 }
0x1619   :  { %v8329_v61 = vpop.xlane.xlu1 %8328  ;;  %v8334_v42 = vmax.f32 %v8330_v37, %v8331_v16 }
0x161a   :  { %v8333_v25 = vmax.f32 %v8321_v48, %v8329_v61  ;;  %v8327_v3 = vpop.xlane.xlu0 %8326 }
0x161b   :  { %v8332_v26 = vmax.f32 %v8319_v15, %v8327_v3 }
0x161d   :  { %v8335_v46 = vmax.f32 %v8332_v26, %v8333_v25 }
0x161f   :  { %v8336_v41 = vmax.f32 %v8334_v42, %v8335_v46 }
0x1621   :  { %v8337_v49 = vsub.f32 %v8315_v7, %v8336_v41  ;;  %v8338_v47 = vsub.f32 %v8317_v31, %v8336_v41  ;;  %v8339_v2 = vsub.f32 %v8319_v15, %v8336_v41  ;;  %v8340_v34 = vsub.f32 %v8321_v48, %v8336_v41  ;;  %v17759_v15 = vld [vmem:[%s18850_s15] sm:$0xff] }
0x1622   :  { %v8341_v39 = vsub.f32 %v8323_v63, %v8336_v41  ;;  %v8342_v10 = vsub.f32 %v8325_v19, %v8336_v41  ;;  %v8343_v40 = vsub.f32 %v8327_v3, %v8336_v41  ;;  %v8344_v28 = vsub.f32 %v8329_v61, %v8336_v41  ;;  %v17764_v19 = vld [vmem:[%s18850_s15 + $0x8] sm:$0xff] }
0x1623   :  { %v8345_v33 = vmul.f32 1.442695, %v8337_v49  ;;  %v8347_v58 = vmul.f32 1.442695, %v8338_v47  ;;  %v8349_v21 = vmul.f32 1.442695, %v8339_v2 }
0x1624   :  { %v8351_v60 = vmul.f32 1.442695, %v8340_v34  ;;  %v8353_v18 = vmul.f32 1.442695, %v8341_v39  ;;  %v8355_v16 = vmul.f32 1.442695, %v8342_v10 }
0x1625   :  { %14315 = vpow2.f32 %v8345_v33  ;;  %v8357_v46 = vmul.f32 1.442695, %v8343_v40  ;;  %v8359_v42 = vmul.f32 1.442695, %v8344_v28 }
0x1626   :  { %14317 = vpow2.f32 %v8347_v58 }
0x1627   :  { %14319 = vpow2.f32 %v8349_v21 }
0x1628   :  { %14321 = vpow2.f32 %v8351_v60 }
0x1629   :  { %14323 = vpow2.f32 %v8353_v18 }
0x162a   :  { %14325 = vpow2.f32 %v8355_v16 }
0x162b   :  { %14327 = vpow2.f32 %v8357_v46 }
0x162c   :  { %14329 = vpow2.f32 %v8359_v42 }
0x162f   :  { %v14316_v26 = vpop.eup %14315 }
0x1630   :  { %v14318_v31 = vpop.eup %14317 }
0x1631   :  { %v8361_v47 = vadd.f32 %v14318_v31, %v14316_v26  ;;  %v14320_v49 = vpop.eup %14319 }
0x1632   :  { %v14322_v2 = vpop.eup %14321 }
0x1633   :  { %v8362_v33 = vadd.f32 %v14320_v49, %v8361_v47  ;;  %v14324_v34 = vpop.eup %14323  ;;  %v17773_v47 = vld [vmem:[%s18850_s15 + $0x20] sm:$0xff] }
0x1634   :  { %v14326_v21 = vpop.eup %14325 }
0x1635   :  { %v8363_v58 = vadd.f32 %v14322_v2, %v8362_v33  ;;  %v14328_v41 = vpop.eup %14327 }
0x1636   :  { %v14330_v10 = vpop.eup %14329 }
0x1637   :  { %v8364_v3 = vadd.f32 %v14324_v34, %v8363_v58  ;;  %v17779_v58 = vld [vmem:[%s18850_s15 + $0x28] sm:$0xff] }
0x1639   :  { %v8365_v39 = vadd.f32 %v14326_v21, %v8364_v3 }
0x163b   :  { %v8366_v60 = vadd.f32 %v14328_v41, %v8365_v39 }
0x163d   :  { %v8367_v18 = vadd.f32 %v14330_v10, %v8366_v60 }
0x163f   :  { %14331 = vrcp.f32 %v8367_v18 }
0x1649   :  { %v14332_v40 = vpop.eup %14331 }
0x164a   :  { %v8369_v28 = vmul.f32 %v14332_v40, %v14316_v26  ;;  %v8370_v7 = vmul.f32 %v14332_v40, %v14318_v31  ;;  %v8371_v48 = vmul.f32 %v14332_v40, %v14320_v49  ;;  %v8372_v63 = vmul.f32 %v14332_v40, %v14322_v2 }
0x164b   :  { %v8373_v25 = vmul.f32 %v14332_v40, %v14324_v34  ;;  %v8374_v42 = vmul.f32 %v14332_v40, %v14326_v21  ;;  %v8375_v49 = vmul.f32 %v14332_v40, %v14328_v41 }
0x164c   :  { %v8385_v37 = vmul.f32 %v17759_v15, %v8369_v28  ;;  %v8386_v61 = vmul.f32 %v17764_v19, %v8370_v7  ;;  %v8387_v16 = vmul.f32 %v8371_v48, %v17374_v52  ;;  %v8388_v26 = vmul.f32 %v8372_v63, %v17380_v54  ;;  %v17785_v54 = vld [vmem:[%s18850_s15 + $0x30] sm:$0xff]  ;;  %v13756_v7 = vld [vmem:[%s18846_s11 + $0x38] ss:$20 sps:$4 sm:$0xff]  }
0x164d   :  { %v8389_v33 = vmul.f32 %v17773_v47, %v8373_v25  ;;  %v8376_v52 = vmul.f32 %v14332_v40, %v14330_v10  ;;  %v8390_v34 = vmul.f32 %v17779_v58, %v8374_v42  ;;  %v8391_v21 = vmul.f32 %v17785_v54, %v8375_v49  ;;  %v13755_v28 = vld [vmem:[%s18846_s11 + $0x10] ss:$20 sps:$4 sm:$0xff]   ;;  %v13757_v48 = vld [vmem:[%s18846_s11 + $0x60] ss:$20 sps:$4 sm:$0xff]   ;;  %v13768_v42 = vld [vmem:[%s18848_s13 + $0x28] sm:$0xff]  }
0x164e   :  { %v8393_v46 = vadd.f32 %v8386_v61, %v8385_v37  ;;  %v13763_v40 = vld [vmem:[%s18848_s13] sm:$0xff]   ;;  %v13765_v63 = vld [vmem:[%s18848_s13 + $0x10] sm:$0xff]   ;;  %v13758_v37 = vld [vmem:[%s18846_s11 + $0x88] ss:$20 sps:$4 sm:$0xff]  }
0x164f   :  { %v8392_v41 = vmul.f32 %v8376_v52, %v17389_v30  ;;  %v13764_v30 = vld [vmem:[%s18848_s13 + $0x8] sm:$0xff]   ;;  %v13766_v61 = vld [vmem:[%s18848_s13 + $0x18] sm:$0xff]   ;;  %v13759_v25 = vld [vmem:[%s18846_s11 + $0xb0] ss:$20 sps:$4 sm:$0xff]  }
0x1650   :  { %v8394_v31 = vadd.f32 %v8393_v46, %v8387_v16  ;;  %v13767_v16 = vld [vmem:[%s18848_s13 + $0x20] sm:$0xff]   ;;  %v13760_v46 = vld [vmem:[%s18846_s11 + $0xd8] ss:$20 sps:$4 sm:$0xff]   ;;  %v13769_v49 = vld [vmem:[%s18848_s13 + $0x30] sm:$0xff]  }
0x1651   :  { %v17864_v52 = vld [vmem:[%s18845_s10] ss:$24 sps:$4 sm:$0xff]  }
0x1652   :  { %v8395_v2 = vadd.f32 %v8394_v31, %v8388_v26  ;;  %v13761_v26 = vld [vmem:[%s18846_s11 + $0x100] ss:$20 sps:$4 sm:$0xff]   ;;  %v13762_v31 = vld [vmem:[%s18846_s11 + $0x128] ss:$20 sps:$4 sm:$0xff]  }
0x1654   :  { %v8396_v3 = vadd.f32 %v8395_v2, %v8389_v33  ;;  %v13770_v33 = vld [vmem:[%s18848_s13 + $0x38] sm:$0xff]  }
0x1655   :  { %v17859_v2 = vld [vmem:[%s18845_s10 + $0x4] ss:$24 sps:$4 sm:$0xff]  }
0x1656   :  { %v8397_v39 = vadd.f32 %v8396_v3, %v8390_v34  ;;  %v17869_v34 = vld [vmem:[%s18845_s10 + $0xc] ss:$24 sps:$4 sm:$0xff]  }
0x1657   :  { %19260 = vst [vmem:[#allocation50_spill] sm:$0xff] %v17869_v34  ;;  %v17877_v3 = vld [vmem:[%s18845_s10 + $0x34] ss:$24 sps:$4 sm:$0xff]  }
0x1658   :  { %v8398_v60 = vadd.f32 %v8397_v39, %v8391_v21  ;;  %v17882_v21 = vld [vmem:[%s18845_s10 + $0x30] ss:$24 sps:$4 sm:$0xff]   ;;  %v17889_v39 = vld [vmem:[%s18845_s10 + $0x64] ss:$24 sps:$4 sm:$0xff]  }
0x165a   :  { %v8399_v18 = vadd.f32 %v8398_v60, %v8392_v41  ;;  %v17894_v41 = vld [vmem:[%s18845_s10 + $0x60] ss:$24 sps:$4 sm:$0xff]   ;;  %v17901_v60 = vld [vmem:[%s18845_s10 + $0x94] ss:$24 sps:$4 sm:$0xff]  }
0x165c   :  { %v8400_v10 = vpack.c.bf16 %v8399_v18, %v8399_v18  ;;  %v17906_v18 = vld [vmem:[%s18845_s10 + $0x90] ss:$24 sps:$4 sm:$0xff]  }
0x165e   :  { %8690 = vmatmul.mubr.bf16.vlgmr.msra.gmra.mrb[132].mxu0 %v8400_v10  ;;  %8731 = vmatmul.mubr.bf16.vlgmr.msra.gmra.mrb[128].mxu1 %v8400_v10 }
0x165f   :  { %12985 = vmatpush3.bf16.msra.mxu0 %v13755_v28  ;;  %13000 = vmatprep.mubr.msk.bf16.mxu0 %vm14578_vm0, %v19064_v5  ;;  %v17913_v28 = vld [vmem:[%s18845_s10 + $0xc0] ss:$24 sps:$4 sm:$0xff]  }
0x1660   :  { %12986 = vmatprep.subr.bf16.mxu0 %v19064_v5  ;;  %13005 = vmatpush3.bf16.msra.mxu1 %v13763_v40  ;;  %v17923_v40 = vld [vmem:[%s18845_s10 + $0xf4] ss:$24 sps:$4 sm:$0xff]  }
0x1661   :  { %13006 = vmatprep.subr.bf16.mxu1 %v19064_v5  ;;  %13020 = vmatprep.mubr.msk.bf16.mxu1 %vm14578_vm0, %v19064_v5 }
0x1663   :  { %12987 = vmatpush3.bf16.msra.mxu0 %v13756_v7  ;;  %v17930_v7 = vld [vmem:[%s18845_s10 + $0xf0] ss:$24 sps:$4 sm:$0xff]  }
0x1664   :  { %12988 = vmatprep.subr.bf16.mxu0 %v19064_v5  ;;  %13007 = vmatpush3.bf16.msra.mxu1 %v13764_v30  ;;  %v17936_v30 = vld [vmem:[%s18845_s10 + $0x124] ss:$24 sps:$4 sm:$0xff]  }
0x1665   :  { %13008 = vmatprep.subr.bf16.mxu1 %v19064_v5  ;;  %19261 = vst [vmem:[#allocation51_spill] sm:$0xff] %v17936_v30 }
0x1667   :  { %12989 = vmatpush3.bf16.msra.mxu0 %v13757_v48  ;;  %v17942_v48 = vld [vmem:[%s18845_s10 + $0x120] ss:$24 sps:$4 sm:$0xff]  }
0x1668   :  { %12990 = vmatprep.subr.bf16.mxu0 %v19064_v5  ;;  %13009 = vmatpush3.bf16.msra.mxu1 %v13765_v63  ;;  %19262 = vst [vmem:[#allocation14_spill] sm:$0xff] %v17942_v48  ;;  %v17948_v63 = vld [vmem:[%s18845_s10 + $0x154] ss:$24 sps:$4 sm:$0xff]  }
0x1669   :  { %13010 = vmatprep.subr.bf16.mxu1 %v19064_v5  ;;  %19263 = vst [vmem:[#allocation16_spill] sm:$0xff] %v17948_v63 }
0x166b   :  { %12991 = vmatpush3.bf16.msra.mxu0 %v13758_v37  ;;  %v17954_v37 = vld [vmem:[%s18845_s10 + $0x150] ss:$24 sps:$4 sm:$0xff]  }
0x166c   :  { %12992 = vmatprep.subr.bf16.mxu0 %v19064_v5  ;;  %13011 = vmatpush3.bf16.msra.mxu1 %v13766_v61  ;;  %19264 = vst [vmem:[#allocation15_spill] sm:$0xff] %v17954_v37  ;;  %v17960_v61 = vld [vmem:[%s18845_s10 + $0x14] ss:$24 sps:$4 sm:$0xff]  }
0x166d   :  { %13012 = vmatprep.subr.bf16.mxu1 %v19064_v5  ;;  %19265 = vst [vmem:[#allocation29_spill] sm:$0xff] %v17960_v61 }
0x166f   :  { %12993 = vmatpush3.bf16.msra.mxu0 %v13759_v25 }
0x1670   :  { %12994 = vmatprep.subr.bf16.mxu0 %v19064_v5  ;;  %13013 = vmatpush3.bf16.msra.mxu1 %v13767_v16 }
0x1671   :  { %13014 = vmatprep.subr.bf16.mxu1 %v19064_v5 }
0x1673   :  { %12995 = vmatpush3.bf16.msra.mxu0 %v13760_v46 }
0x1674   :  { %12996 = vmatprep.subr.bf16.mxu0 %v19064_v5  ;;  %13015 = vmatpush3.bf16.msra.mxu1 %v13768_v42 }
0x1675   :  { %13016 = vmatprep.subr.bf16.mxu1 %v19064_v5 }
0x1677   :  { %12997 = vmatpush3.bf16.msra.mxu0 %v13761_v26 }
0x1678   :  { %12998 = vmatprep.subr.bf16.mxu0 %v19064_v5  ;;  %13017 = vmatpush3.bf16.msra.mxu1 %v13769_v49 }
0x1679   :  { %13018 = vmatprep.subr.bf16.mxu1 %v19064_v5 }
0x167b   :  { %12999 = vmatpush3.bf16.msra.mxu0 %v13762_v31 }
0x167c   :  { %13019 = vmatpush3.bf16.msra.mxu1 %v13770_v33  ;;  %9214 = vmatprep.subr.bf16.mxu0 %v17859_v2 }
0x167d   :  { %9255 = vmatprep.subr.bf16.mxu1 %v17869_v34 }
0x167e   :  { %13001 = vmatmul.mubr.bf16.vlgmr.msra.gmra.mrb[136].mxu0 %v8400_v10  ;;  %v17918_v10 = vld [vmem:[%s18845_s10 + $0xc4] ss:$24 sps:$4 sm:$0xff]  }
0x167f   :  { %9246 = vmatprep.mubr.bf16.mxu0 %v19005_v14  ;;  %9215 = vmatpush1.bf16.msra.mxu0 %v17864_v52 }
0x1680   :  { %9216 = vmatprep.subr.bf16.mxu0 %v17877_v3 }
0x1683   :  { %9217 = vmatpush1.bf16.msra.mxu0 %v17882_v21 }
0x1684   :  { %9218 = vmatprep.subr.bf16.mxu0 %v17889_v39 }
0x1687   :  { %9219 = vmatpush1.bf16.msra.mxu0 %v17894_v41 }
0x1688   :  { %9220 = vmatprep.subr.bf16.mxu0 %v17901_v60 }
0x168b   :  { %9221 = vmatpush1.bf16.msra.mxu0 %v17906_v18 }
0x168c   :  { %9222 = vmatprep.subr.bf16.mxu0 %v17918_v10 }
0x168f   :  { %9223 = vmatpush1.bf16.msra.mxu0 %v17913_v28 }
0x1690   :  { %9224 = vmatprep.subr.bf16.mxu0 %v17923_v40 }
0x1693   :  { %9225 = vmatpush1.bf16.msra.mxu0 %v17930_v7 }
0x1694   :  { %9226 = vmatprep.subr.bf16.mxu0 %v17936_v30 }
0x1697   :  { %9227 = vmatpush1.bf16.msra.mxu0 %v17942_v48 }
0x1698   :  { %9228 = vmatprep.subr.bf16.mxu0 %v17948_v63 }
0x169b   :  { %9229 = vmatpush1.bf16.msra.mxu0 %v17954_v37  ;;  %v17971_v37 = vld [vmem:[%s18847_s12] ss:$0 sm:$0xff] }
0x169c   :  { %9296 = vmatprep.subr.bf16.mxu0 %v17960_v61 }
0x1731   :  { %v8691_v25 = vpop.f32.mrb[132].mxu0  ;;  %v8732_v16 = vpop.f32.mrb[128].mxu1 }
0x1732   :  { %v8779_v46 = vadd.f32 %v8691_v25, %v17539_v55  ;;  %v8898_v42 = vadd.f32 %v17535_v1, %v8732_v16  ;;  %v8693_v26 = vpop.f32.mrb[133].mxu0  ;;  %v8734_v31 = vpop.f32.mrb[129].mxu1  ;;  %v17977_v1 = vld [vmem:[%s18845_s10 + $0x8] ss:$24 sps:$4 sm:$0xff]  }
0x1733   :  { %v8897_v49 = vadd.f32 %v17530_v57, %v8693_v26  ;;  %v8899_v33 = vadd.f32 %v17532_v27, %v8734_v31  ;;  %v8695_v34 = vpop.f32.mrb[134].mxu0  ;;  %v8736_v63 = vpop.f32.mrb[130].mxu1  ;;  %v17982_v27 = vld [vmem:[%s18845_s10 + $0x3c] ss:$24 sps:$4 sm:$0xff]   ;;  %v18019_v31 = vld [vmem:[%s18845_s10 + $0xcc] ss:$24 sps:$4 sm:$0xff]  }
0x1734   :  { %v8780_v61 = vadd.f32 %v17971_v37, %v8779_v46  ;;  %v12410_v48 = vmul.f32 -1.442695, %v8898_v42  ;;  %v8696_v30 = vpop.f32.mrb[135].mxu0  ;;  %v8737_v55 = vpop.f32.mrb[131].mxu1  ;;  %v17988_v34 = vld [vmem:[%s18845_s10 + $0x38] ss:$24 sps:$4 sm:$0xff]  }
0x1735   :  { %v12409_v25 = vmul.f32 -1.442695, %v8897_v49  ;;  %v17995_v30 = vld [vmem:[%s18845_s10 + $0x6c] ss:$24 sps:$4 sm:$0xff]   ;;  %v18007_v63 = vld [vmem:[%s18845_s10 + $0x9c] ss:$24 sps:$4 sm:$0xff]  }
0x1736   :  { %v8781_v57 = vpack.c.bf16 %v8780_v61, %v8780_v61  ;;  %14333 = vpow2.f32 %v12410_v48  ;;  %v18001_v48 = vld [vmem:[%s18845_s10 + $0x68] ss:$24 sps:$4 sm:$0xff]   ;;  %19267 = vst [vmem:[#allocation22_spill] sm:$0xff] %v18007_v63  ;;  %v18013_v42 = vld [vmem:[%s18845_s10 + $0x98] ss:$24 sps:$4 sm:$0xff]   ;;  %19269 = vst [vmem:[#allocation47_spill] sm:$0xff] %v18019_v31 }
0x1737   :  { %14335 = vpow2.f32 %v12409_v25  ;;  %19266 = vst [vmem:[#allocation30_spill] sm:$0xff] %v18001_v48  ;;  %19268 = vst [vmem:[#allocation23_spill] sm:$0xff] %v18013_v42  ;;  %v18025_v49 = vld [vmem:[%s18845_s10 + $0xc8] ss:$24 sps:$4 sm:$0xff]   ;;  %v18037_v55 = vld [vmem:[%s18845_s10 + $0xf8] ss:$24 sps:$4 sm:$0xff]  }
0x1738   :  { %13021 = vmatmul.mubr.bf16.vlgmr.msra.gmra.mrb[132].mxu1 %v8781_v57  ;;  %14337 = vtanh.f32 %v8899_v33  ;;  %19270 = vst [vmem:[#allocation45_spill] sm:$0xff] %v18025_v49  ;;  %v18031_v33 = vld [vmem:[%s18845_s10 + $0xfc] ss:$24 sps:$4 sm:$0xff]   ;;  %19272 = vst [vmem:[#allocation54_spill] sm:$0xff] %v18037_v55  ;;  %v18043_v25 = vld [vmem:[%s18845_s10 + $0x12c] ss:$24 sps:$4 sm:$0xff]  }
0x1739   :  { %9256 = vmatpush1.bf16.msra.mxu1 %v17977_v1  ;;  %9287 = vmatprep.mubr.bf16.mxu1 %v19005_v14  ;;  %19271 = vst [vmem:[#allocation53_spill] sm:$0xff] %v18031_v33  ;;  %19273 = vst [vmem:[#allocation55_spill] sm:$0xff] %v18043_v25 }
0x173a   :  { %9257 = vmatprep.subr.bf16.mxu1 %v17982_v27 }
0x173d   :  { %9258 = vmatpush1.bf16.msra.mxu1 %v17988_v34 }
0x173e   :  { %9259 = vmatprep.subr.bf16.mxu1 %v17995_v30 }
0x1740   :  { %v14334_v61 = vpop.eup %14333 }
0x1741   :  { %v14336_v16 = vpop.eup %14335  ;;  %v8910_v46 = vadd.f32 1.0, %v14334_v61  ;;  %9260 = vmatpush1.bf16.msra.mxu1 %v18001_v48 }
0x1742   :  { %v8904_v26 = vadd.f32 1.0, %v14336_v16  ;;  %9261 = vmatprep.subr.bf16.mxu1 %v18007_v63  ;;  %v14338_v57 = vpop.eup %14337  ;;  %v18049_v16 = vld [vmem:[%s18845_s10 + $0x128] ss:$24 sps:$4 sm:$0xff]  }
0x1743   :  { %14339 = vrcp.f32 %v8910_v46  ;;  %19274 = vst [vmem:[#allocation56_spill] sm:$0xff] %v18049_v16 }
0x1744   :  { %14341 = vrcp.f32 %v8904_v26 }
0x1745   :  { %9262 = vmatpush1.bf16.msra.mxu1 %v18013_v42 }
0x1746   :  { %9263 = vmatprep.subr.bf16.mxu1 %v18019_v31 }
0x1749   :  { %9264 = vmatpush1.bf16.msra.mxu1 %v18025_v49 }
0x174a   :  { %9265 = vmatprep.subr.bf16.mxu1 %v18031_v33  ;;  %v18056_v33 = vld [vmem:[%s18845_s10 + $0x15c] ss:$24 sps:$4 sm:$0xff]  }
0x174d   :  { %v14340_v61 = vpop.eup %14339  ;;  %9266 = vmatpush1.bf16.msra.mxu1 %v18037_v55  ;;  %v18064_v55 = vld [vmem:[%s18845_s10 + $0x158] ss:$24 sps:$4 sm:$0xff]  }
0x174e   :  { %v14342_v46 = vpop.eup %14341  ;;  %v8920_v26 = vmul.f32 %v14340_v61, %v17496_v62  ;;  %9267 = vmatprep.subr.bf16.mxu1 %v18043_v25 }
0x174f   :  { %v8921_v49 = vmul.f32 %v14342_v46, %v14338_v57 }
0x1751   :  { %v18058_v31 = vadd.f32 %v8921_v49, %v8920_v26  ;;  %v8773_v42 = vpop.f32.mrb[136].mxu0  ;;  %9268 = vmatpush1.bf16.msra.mxu1 %v18049_v16 }
0x1752   :  { %v8900_v62 = vadd.f32 %v17537_v23, %v8773_v42  ;;  %v13002_v61 = vpop.f32.mrb[137].mxu0  ;;  %9269 = vmatprep.subr.bf16.mxu1 %v18056_v33  ;;  %v18074_v23 = vld [vmem:[%s18845_s10 + $0x10] ss:$24 sps:$4 sm:$0xff]  }
0x1753   :  { %v8776_v25 = vpop.f32.mrb[138].mxu0  ;;  %v19296_v61 = vld [vmem:[#allocation34_spill] sm:$0xff] }
0x1754   :  { %v12411_v63 = vmul.f32 -1.442695, %v8900_v62  ;;  %v13003_v48 = vpop.f32.mrb[139].mxu0  ;;  %v18101_v25 = vld [vmem:[%s18845_s10 + $0x70] ss:$24 sps:$4 sm:$0xff]  }
0x1755   :  { %9270 = vmatpush1.bf16.msra.mxu1 %v18064_v55  ;;  %v18079_v48 = vld [vmem:[%s18845_s10 + $0x44] ss:$24 sps:$4 sm:$0xff]   ;;  %19275 = vst [vmem:[#allocation17_spill] sm:$0xff] %v18101_v25 }
0x1756   :  { %14343 = vpow2.f32 %v12411_v63  ;;  %9712 = vmatprep.subr.bf16.mxu1 %v17565_v51  ;;  %v18085_v51 = vld [vmem:[%s18845_s10 + $0x40] ss:$24 sps:$4 sm:$0xff]   ;;  %v18092_v63 = vld [vmem:[%s18845_s10 + $0x74] ss:$24 sps:$4 sm:$0xff]  }
0x1757   :  { %14345 = vtanh.f32 %v18058_v31 }
0x1760   :  { %v14344_v49 = vpop.eup %14343 }
0x1761   :  { %v8917_v57 = vadd.f32 1.0, %v14344_v49  ;;  %v14346_v46 = vpop.eup %14345  ;;  %v19297_v49 = vld [vmem:[#allocation12_spill] sm:$0xff] }
0x1763   :  { %14347 = vrcp.f32 %v8917_v57  ;;  %v3393_v57 = vadd.f32 %v19297_v49, %v19296_v61  ;;  %v19300_v61 = vld [vmem:[#allocation40_spill] sm:$0xff] }
0x176d   :  { %v14348_v26 = vpop.eup %14347 }
0x176e   :  { %v8924_v16 = vmul.f32 %v14348_v26, %v14346_v46 }
0x1770   :  { %v8925_v42 = vpack.c.bf16 %v8924_v16, %v8924_v16  ;;  %v18107_v16 = vld [vmem:[%s18845_s10 + $0xa4] ss:$24 sps:$4 sm:$0xff]  }
0x1771   :  { %19276 = vst [vmem:[#allocation57_spill] sm:$0xff] %v18107_v16 }
0x1772   :  { %9247 = vmatmul.mubr.bf16.vlgmr.msra.gmra.mrb[140].mxu0 %v8925_v42  ;;  %9288 = vmatmul.mubr.bf16.vlgmr.msra.gmra.mrb[136].mxu1 %v8925_v42 }
0x1773   :  { %9297 = vmatpush1.bf16.msra.mxu0 %v18074_v23  ;;  %9328 = vmatprep.mubr.bf16.mxu0 %v19005_v14 }
0x1774   :  { %9298 = vmatprep.subr.bf16.mxu0 %v18079_v48  ;;  %9713 = vmatpush1.bf16.msra.mxu1 %v17570_v12  ;;  %v18115_v12 = vld [vmem:[%s18845_s10 + $0xa0] ss:$24 sps:$4 sm:$0xff]  }
0x1775   :  { %9714 = vmatprep.subr.bf16.mxu1 %v17589_v43  ;;  %9744 = vmatprep.mubr.bf16.mxu1 %v19005_v14  ;;  %19277 = vst [vmem:[#allocation58_spill] sm:$0xff] %v18115_v12  ;;  %v18121_v43 = vld [vmem:[%s18845_s10 + $0xd4] ss:$24 sps:$4 sm:$0xff]  }
0x1776   :  { %19278 = vst [vmem:[#allocation59_spill] sm:$0xff] %v18121_v43 }
0x1777   :  { %9299 = vmatpush1.bf16.msra.mxu0 %v18085_v51 }
0x1778   :  { %9300 = vmatprep.subr.bf16.mxu0 %v18092_v63  ;;  %9715 = vmatpush1.bf16.msra.mxu1 %v17594_v11  ;;  %v18129_v11 = vld [vmem:[%s18845_s10 + $0xd0] ss:$24 sps:$4 sm:$0xff]  }
0x1779   :  { %9716 = vmatprep.subr.bf16.mxu1 %v17613_v29  ;;  %19279 = vst [vmem:[#allocation60_spill] sm:$0xff] %v18129_v11  ;;  %v18135_v29 = vld [vmem:[%s18845_s10 + $0x104] ss:$24 sps:$4 sm:$0xff]  }
0x177a   :  { %19280 = vst [vmem:[#allocation52_spill] sm:$0xff] %v18135_v29 }
0x177b   :  { %9301 = vmatpush1.bf16.msra.mxu0 %v18101_v25 }
0x177c   :  { %9302 = vmatprep.subr.bf16.mxu0 %v18107_v16  ;;  %9717 = vmatpush1.bf16.msra.mxu1 %v17618_v22  ;;  %v18143_v22 = vld [vmem:[%s18845_s10 + $0x100] ss:$24 sps:$4 sm:$0xff]  }
0x177d   :  { %9718 = vmatprep.subr.bf16.mxu1 %v17634_v24  ;;  %19281 = vst [vmem:[#allocation61_spill] sm:$0xff] %v18143_v22  ;;  %v18149_v24 = vld [vmem:[%s18845_s10 + $0x134] ss:$24 sps:$4 sm:$0xff]  }
0x177e   :  { %19282 = vst [vmem:[#allocation62_spill] sm:$0xff] %v18149_v24 }
0x177f   :  { %9303 = vmatpush1.bf16.msra.mxu0 %v18115_v12 }
0x1780   :  { %9304 = vmatprep.subr.bf16.mxu0 %v18121_v43  ;;  %9719 = vmatpush1.bf16.msra.mxu1 %v17641_v32  ;;  %v18157_v32 = vld [vmem:[%s18845_s10 + $0x130] ss:$24 sps:$4 sm:$0xff]  }
0x1781   :  { %9720 = vmatprep.subr.bf16.mxu1 %v17658_v50  ;;  %19283 = vst [vmem:[#allocation63_spill] sm:$0xff] %v18157_v32  ;;  %v18163_v50 = vld [vmem:[%s18845_s10 + $0x164] ss:$24 sps:$4 sm:$0xff]  }
0x1782   :  { %19284 = vst [vmem:[#allocation64_spill] sm:$0xff] %v18163_v50 }
0x1783   :  { %9305 = vmatpush1.bf16.msra.mxu0 %v18129_v11 }
0x1784   :  { %9306 = vmatprep.subr.bf16.mxu0 %v18135_v29  ;;  %9721 = vmatpush1.bf16.msra.mxu1 %v17670_v45  ;;  %v18171_v45 = vld [vmem:[%s18845_s10 + $0x160] ss:$24 sps:$4 sm:$0xff]  }
0x1785   :  { %9722 = vmatprep.subr.bf16.mxu1 %v17682_v9  ;;  %19285 = vst [vmem:[#allocation65_spill] sm:$0xff] %v18171_v45  ;;  %v19287_v9 = vld [vmem:[#allocation18_spill] sm:$0xff] }
0x1787   :  { %9307 = vmatpush1.bf16.msra.mxu0 %v18143_v22 }
0x1788   :  { %9308 = vmatprep.subr.bf16.mxu0 %v18149_v24  ;;  %9723 = vmatpush1.bf16.msra.mxu1 %v17694_v59  ;;  %v19289_v59 = vld [vmem:[#allocation19_spill] sm:$0xff] }
0x1789   :  { %9724 = vmatprep.subr.bf16.mxu1 %v17706_v8 }
0x178b   :  { %9309 = vmatpush1.bf16.msra.mxu0 %v18157_v32 }
0x178c   :  { %9310 = vmatprep.subr.bf16.mxu0 %v18163_v50  ;;  %9725 = vmatpush1.bf16.msra.mxu1 %v17718_v4 }
0x178d   :  { %9726 = vmatprep.subr.bf16.mxu1 %v17730_v38  ;;  %v19294_v38 = vld [vmem:[#allocation33_spill] sm:$0xff] }
0x178f   :  { %9311 = vmatpush1.bf16.msra.mxu0 %v18171_v45 }
0x1790   :  { %9753 = vmatprep.subr.bf16.mxu0 %v17575_v6  ;;  %9727 = vmatpush1.bf16.msra.mxu1 %v17742_v20  ;;  %v19286_v6 = vld [vmem:[#allocation46_spill] sm:$0xff]  ;;  %v19295_v20 = vld [vmem:[#allocation13_spill] sm:$0xff] }
0x1791   :  { %13024 = vmatprep.subr.bf16.mxu1 %v19064_v5  ;;  %v3392_v62 = vadd.f32 %v19295_v20, %v19294_v38 }
0x1792   :  { %9329 = vmatmul.mubr.bf16.vlgmr.msra.gmra.mrb[144].mxu0 %v8925_v42  ;;  %v19298_v42 = vld [vmem:[#allocation25_spill] sm:$0xff] }
0x1793   :  { %9754 = vmatpush1.bf16.msra.mxu0 %v17581_v53  ;;  %9785 = vmatprep.mubr.bf16.mxu0 %v19005_v14  ;;  %v19288_v53 = vld [vmem:[#allocation20_spill] sm:$0xff] }
0x1794   :  { %9755 = vmatprep.subr.bf16.mxu0 %v17599_v17  ;;  %v19290_v17 = vld [vmem:[#allocation21_spill] sm:$0xff] }
0x1797   :  { %9756 = vmatpush1.bf16.msra.mxu0 %v17605_v0  ;;  %v19291_v0 = vld [vmem:[#allocation48_spill] sm:$0xff] }
0x1798   :  { %9757 = vmatprep.subr.bf16.mxu0 %v17628_v44  ;;  %v19292_v44 = vld [vmem:[#allocation49_spill] sm:$0xff] }
0x179b   :  { %9758 = vmatpush1.bf16.msra.mxu0 %v17623_v35 }
0x179c   :  { %9759 = vmatprep.subr.bf16.mxu0 %v17646_v13  ;;  %v18200_v13 = vld [vmem:[%s18849_s14] ss:$0 sm:$0xff] }
0x179d   :  { %19293 = vst [vmem:[#allocation66_spill] sm:$0xff] %v18200_v13 }
0x179f   :  { %9760 = vmatpush1.bf16.msra.mxu0 %v17653_v36 }
0x17a0   :  { %9761 = vmatprep.subr.bf16.mxu0 %v17664_v56 }
0x17a3   :  { %9762 = vmatpush1.bf16.msra.mxu0 %v19286_v6 }
0x17a4   :  { %9763 = vmatprep.subr.bf16.mxu0 %v19287_v9 }
0x17a7   :  { %9764 = vmatpush1.bf16.msra.mxu0 %v19288_v53 }
0x17a8   :  { %9765 = vmatprep.subr.bf16.mxu0 %v19289_v59 }
0x17ab   :  { %9766 = vmatpush1.bf16.msra.mxu0 %v19290_v17  ;;  %v19299_v17 = vld [vmem:[#allocation26_spill] sm:$0xff] }
0x17ac   :  { %9767 = vmatprep.subr.bf16.mxu0 %v19291_v0 }
0x17af   :  { %9768 = vmatpush1.bf16.msra.mxu0 %v19292_v44 }
0x17b0   :  { %13044 = vmatprep.subr.bf16.mxu0 %v19064_v5 }
0x180b   :  { %v8880_v35 = vpop.f32.mrb[132].mxu1 }
0x180c   :  { %v8881_v36 = vadd.f32 %v18200_v13, %v8880_v35  ;;  %v13022_v56 = vpop.f32.mrb[133].mxu1  ;;  %v19303_v13 = vld [vmem:[#allocation37_spill] sm:$0xff] }
0x180d   :  { %v8883_v8 = vpop.f32.mrb[134].mxu1 }
0x180e   :  { %12408 = vst [vmem:[%s18851_s16 + $0x20] sm:$0xff] %v8881_v36  ;;  %v13023_v4 = vpop.f32.mrb[135].mxu1 }
0x1845   :  { %v9248_v46 = vpop.f32.mrb[140].mxu0  ;;  %v9289_v26 = vpop.f32.mrb[136].mxu1 }
0x1846   :  { %v18211_v6 = vadd.f32 %v9248_v46, %v19298_v42  ;;  %v18213_v9 = vadd.f32 %v9289_v26, %v3392_v62  ;;  %v9250_v53 = vpop.f32.mrb[141].mxu0  ;;  %v9291_v59 = vpop.f32.mrb[137].mxu1  ;;  %v19301_v46 = vld [vmem:[#allocation38_spill] sm:$0xff]  ;;  %v19302_v62 = vld [vmem:[#allocation39_spill] sm:$0xff] }
0x1847   :  { %v18216_v0 = vadd.f32 %v9250_v53, %v19299_v17  ;;  %v18218_v44 = vadd.f32 %v9291_v59, %v3393_v57  ;;  %v9252_v35 = vpop.f32.mrb[142].mxu0  ;;  %v9293_v36 = vpop.f32.mrb[138].mxu1  ;;  %v19304_v57 = vld [vmem:[#allocation41_spill] sm:$0xff]  ;;  %v19305_v17 = vld [vmem:[#allocation42_spill] sm:$0xff] }
0x1848   :  { %v9253_v56 = vpop.f32.mrb[143].mxu0  ;;  %v9294_v8 = vpop.f32.mrb[139].mxu1  ;;  %v19306_v36 = vld [vmem:[#allocation43_spill] sm:$0xff] }
0x1849   :  { %v19307_v8 = vld [vmem:[#allocation44_spill] sm:$0xff] }
0x1865   :  { %v9330_v4 = vpop.f32.mrb[144].mxu0 }
0x1866   :  { %v18220_v38 = vpop.f32.mrb[145].mxu0  ;;  %v9346_v49 = vadd.f32 %v9330_v4, %v19300_v61  ;;  %v9345_v42 = vadd.f32 %v9330_v4, %v19301_v46  ;;  %v9348_v26 = vadd.f32 %v9330_v4, %v19302_v62  ;;  %v9347_v45 = vadd.f32 %v9330_v4, %v19303_v13  ;;  %v19308_v62 = vld [vmem:[#allocation77_spill] sm:$0xff] }
0x1867   :  { %v9334_v20 = vpop.f32.mrb[146].mxu0  ;;  %v9350_v59 = vadd.f32 %v9330_v4, %v19304_v57  ;;  %v9349_v35 = vadd.f32 %v9330_v4, %v19305_v17  ;;  %v9352_v56 = vadd.f32 %v9330_v4, %v19306_v36  ;;  %v9351_v46 = vadd.f32 %v9330_v4, %v19307_v8 }
0x1868   :  { %v9335_v53 = vpop.f32.mrb[147].mxu0  ;;  %14349 = vtanh.f32 %v9346_v49 }
0x1869   :  { %14351 = vtanh.f32 %v9345_v42 }
0x186a   :  { %14353 = vtanh.f32 %v9348_v26 }
0x186b   :  { %14355 = vtanh.f32 %v9347_v45 }
0x186c   :  { %14357 = vtanh.f32 %v9350_v59 }
0x186d   :  { %14359 = vtanh.f32 %v9349_v35 }
0x186e   :  { %14361 = vtanh.f32 %v9352_v56 }
0x186f   :  { %14363 = vtanh.f32 %v9351_v46 }
0x1872   :  { %v14350_v61 = vpop.eup %14349 }
0x1873   :  { %v14352_v20 = vpop.eup %14351  ;;  %v9362_v13 = vmul.f32 %v19308_v62, %v14350_v61 }
0x1874   :  { %v14354_v49 = vpop.eup %14353  ;;  %v9361_v42 = vmul.f32 %v19308_v62, %v14352_v20 }
0x1875   :  { %v14356_v26 = vpop.eup %14355  ;;  %9371 = vadd.xlane.f32.xlu1 %v9362_v13  ;;  %v9364_v45 = vmul.f32 %v19308_v62, %v14354_v49 }
0x1876   :  { %9369 = vadd.xlane.f32.xlu0 %v9361_v42  ;;  %v14358_v53 = vpop.eup %14357  ;;  %v9363_v59 = vmul.f32 %v19308_v62, %v14356_v26 }
0x1877   :  { %v14360_v35 = vpop.eup %14359  ;;  %v9366_v4 = vmul.f32 %v19308_v62, %v14358_v53 }
0x1878   :  { %v14362_v56 = vpop.eup %14361  ;;  %v9365_v61 = vmul.f32 %v19308_v62, %v14360_v35 }
0x1879   :  { %9375 = vadd.xlane.f32.xlu1 %v9364_v45  ;;  %v14364_v46 = vpop.eup %14363  ;;  %v9368_v20 = vmul.f32 %v19308_v62, %v14362_v56 }
0x187a   :  { %9373 = vadd.xlane.f32.xlu0 %v9363_v59  ;;  %v9367_v13 = vmul.f32 %v19308_v62, %v14364_v46 }
0x187d   :  { %9379 = vadd.xlane.f32.xlu1 %v9366_v4 }
0x187e   :  { %9377 = vadd.xlane.f32.xlu0 %v9365_v61 }
0x1881   :  { %9383 = vadd.xlane.f32.xlu1 %v9368_v20 }
0x1882   :  { %9381 = vadd.xlane.f32.xlu0 %v9367_v13 }
0x1902   :  { %v9372_v49 = vpop.xlane.xlu1 %9371 }
0x1903   :  { %v9370_v42 = vpop.xlane.xlu0 %9369 }
0x1906   :  { %v9376_v26 = vpop.xlane.xlu1 %9375 }
0x1907   :  { %v9374_v8 = vpop.xlane.xlu0 %9373 }
0x190a   :  { %v9380_v45 = vpop.xlane.xlu1 %9379 }
0x190b   :  { %v9378_v59 = vpop.xlane.xlu0 %9377  ;;  %v9386_v36 = vmax.f32 %v9372_v49, %v9380_v45 }
0x190c   :  { %v9385_v53 = vmax.f32 %v9370_v42, %v9378_v59 }
0x190e   :  { %v9384_v17 = vpop.xlane.xlu1 %9383  ;;  %v9389_v4 = vmax.f32 %v9385_v53, %v9386_v36 }
0x190f   :  { %v9388_v57 = vmax.f32 %v9376_v26, %v9384_v17  ;;  %v9382_v35 = vpop.xlane.xlu0 %9381 }
0x1910   :  { %v9387_v50 = vmax.f32 %v9374_v8, %v9382_v35 }
0x1912   :  { %v9390_v61 = vmax.f32 %v9387_v50, %v9388_v57 }
0x1914   :  { %v9391_v32 = vmax.f32 %v9389_v4, %v9390_v61 }
0x1916   :  { %v9392_v56 = vsub.f32 %v9370_v42, %v9391_v32  ;;  %v9393_v24 = vsub.f32 %v9372_v49, %v9391_v32  ;;  %v9394_v62 = vsub.f32 %v9374_v8, %v9391_v32  ;;  %v9395_v46 = vsub.f32 %v9376_v26, %v9391_v32 }
0x1917   :  { %v9396_v22 = vsub.f32 %v9378_v59, %v9391_v32  ;;  %v9397_v11 = vsub.f32 %v9380_v45, %v9391_v32  ;;  %v9398_v12 = vsub.f32 %v9382_v35, %v9391_v32  ;;  %v9399_v25 = vsub.f32 %v9384_v17, %v9391_v32 }
0x1918   :  { %v9400_v20 = vmul.f32 1.442695, %v9392_v56  ;;  %v9402_v13 = vmul.f32 1.442695, %v9393_v24  ;;  %v9404_v29 = vmul.f32 1.442695, %v9394_v62 }
0x1919   :  { %v9406_v43 = vmul.f32 1.442695, %v9395_v46  ;;  %v9408_v16 = vmul.f32 1.442695, %v9396_v22  ;;  %v9410_v36 = vmul.f32 1.442695, %v9397_v11 }
0x191a   :  { %14365 = vpow2.f32 %v9400_v20  ;;  %v9412_v50 = vmul.f32 1.442695, %v9398_v12  ;;  %v9414_v57 = vmul.f32 1.442695, %v9399_v25  ;;  %v18243_v46 = vld [vmem:[%s18850_s15 + $0x10] sm:$0xff] }
0x191b   :  { %14367 = vpow2.f32 %v9402_v13 }
0x191c   :  { %14369 = vpow2.f32 %v9404_v29 }
0x191d   :  { %14371 = vpow2.f32 %v9406_v43 }
0x191e   :  { %14373 = vpow2.f32 %v9408_v16 }
0x191f   :  { %14375 = vpow2.f32 %v9410_v36 }
0x1920   :  { %14377 = vpow2.f32 %v9412_v50  ;;  %v18249_v50 = vld [vmem:[%s18850_s15 + $0x18] sm:$0xff] }
0x1921   :  { %14379 = vpow2.f32 %v9414_v57 }
0x1924   :  { %v14366_v8 = vpop.eup %14365 }
0x1925   :  { %v14368_v49 = vpop.eup %14367 }
0x1926   :  { %v9416_v24 = vadd.f32 %v14368_v49, %v14366_v8  ;;  %v14370_v42 = vpop.eup %14369 }
0x1927   :  { %v14372_v45 = vpop.eup %14371 }
0x1928   :  { %v9417_v26 = vadd.f32 %v14370_v42, %v9416_v24  ;;  %v14374_v53 = vpop.eup %14373 }
0x1929   :  { %v14376_v29 = vpop.eup %14375 }
0x192a   :  { %v9418_v59 = vadd.f32 %v14372_v45, %v9417_v26  ;;  %v14378_v32 = vpop.eup %14377 }
0x192b   :  { %v14380_v11 = vpop.eup %14379 }
0x192c   :  { %v9419_v35 = vadd.f32 %v14374_v53, %v9418_v59 }
0x192e   :  { %v9420_v22 = vadd.f32 %v14376_v29, %v9419_v35  ;;  %v18258_v35 = vld [vmem:[%s18850_s15 + $0x38] sm:$0xff] }
0x1930   :  { %v9421_v43 = vadd.f32 %v14378_v32, %v9420_v22 }
0x1932   :  { %v9422_v16 = vadd.f32 %v14380_v11, %v9421_v43 }
0x1934   :  { %14381 = vrcp.f32 %v9422_v16  ;;  %v13845_v16 = vld [vmem:[%s18846_s11 + $0x60] ss:$20 sps:$4 sm:$0xff]  }
0x193e   :  { %v14382_v12 = vpop.eup %14381 }
0x193f   :  { %v9424_v25 = vmul.f32 %v14382_v12, %v14366_v8  ;;  %v9425_v17 = vmul.f32 %v14382_v12, %v14368_v49  ;;  %v9426_v4 = vmul.f32 %v14382_v12, %v14370_v42  ;;  %v9427_v61 = vmul.f32 %v14382_v12, %v14372_v45 }
0x1940   :  { %v9428_v20 = vmul.f32 %v14382_v12, %v14374_v53  ;;  %v9429_v57 = vmul.f32 %v14382_v12, %v14376_v29  ;;  %v9430_v49 = vmul.f32 %v14382_v12, %v14378_v32  ;;  %v9431_v42 = vmul.f32 %v14382_v12, %v14380_v11  ;;  %v13852_v11 = vld [vmem:[%s18848_s13 + $0x8] sm:$0xff]   ;;  %v13853_v12 = vld [vmem:[%s18848_s13 + $0x10] sm:$0xff]  }
0x1941   :  { %v9440_v56 = vmul.f32 %v9424_v25, %v17759_v15  ;;  %v9441_v62 = vmul.f32 %v9425_v17, %v17764_v19  ;;  %v9442_v13 = vmul.f32 %v18243_v46, %v9426_v4  ;;  %v9443_v8 = vmul.f32 %v18249_v50, %v9427_v61  ;;  %v13846_v25 = vld [vmem:[%s18846_s11 + $0x88] ss:$20 sps:$4 sm:$0xff]   ;;  %v13847_v4 = vld [vmem:[%s18846_s11 + $0xb0] ss:$20 sps:$4 sm:$0xff]  }
0x1942   :  { %v9444_v19 = vmul.f32 %v9428_v20, %v17773_v47  ;;  %v9445_v26 = vmul.f32 %v9429_v57, %v17779_v58  ;;  %v9446_v59 = vmul.f32 %v9430_v49, %v17785_v54  ;;  %v9447_v29 = vmul.f32 %v18258_v35, %v9431_v42  ;;  %v13843_v47 = vld [vmem:[%s18846_s11 + $0x10] ss:$20 sps:$4 sm:$0xff]   ;;  %v13844_v54 = vld [vmem:[%s18846_s11 + $0x38] ss:$20 sps:$4 sm:$0xff]   ;;  %v13849_v20 = vld [vmem:[%s18846_s11 + $0x100] ss:$20 sps:$4 sm:$0xff]  }
0x1943   :  { %v9448_v36 = vadd.f32 %v9441_v62, %v9440_v56  ;;  %v13851_v58 = vld [vmem:[%s18848_s13] sm:$0xff]   ;;  %v13854_v17 = vld [vmem:[%s18848_s13 + $0x18] sm:$0xff]   ;;  %v13856_v62 = vld [vmem:[%s18848_s13 + $0x28] sm:$0xff]  }
0x1944   :  { %v13855_v61 = vld [vmem:[%s18848_s13 + $0x20] sm:$0xff]   ;;  %v13848_v56 = vld [vmem:[%s18846_s11 + $0xd8] ss:$20 sps:$4 sm:$0xff]  }
0x1945   :  { %v9449_v15 = vadd.f32 %v9448_v36, %v9442_v13  ;;  %v13850_v13 = vld [vmem:[%s18846_s11 + $0x128] ss:$20 sps:$4 sm:$0xff]  }
0x1947   :  { %v9450_v24 = vadd.f32 %v9449_v15, %v9443_v8 }
0x1949   :  { %v9451_v45 = vadd.f32 %v9450_v24, %v9444_v19 }
0x194b   :  { %v9452_v53 = vadd.f32 %v9451_v45, %v9445_v26 }
0x194d   :  { %v9453_v22 = vadd.f32 %v9452_v53, %v9446_v59 }
0x194f   :  { %v9454_v43 = vadd.f32 %v9453_v22, %v9447_v29  ;;  %v19316_v29 = vld [vmem:[#allocation22_spill] sm:$0xff]  ;;  %v19318_v22 = vld [vmem:[#allocation47_spill] sm:$0xff] }
0x1951   :  { %v9455_v32 = vpack.c.bf16 %v9454_v43, %v9454_v43 }
0x1953   :  { %9745 = vmatmul.mubr.bf16.vlgmr.msra.gmra.mrb[140].mxu1 %v9455_v32  ;;  %9786 = vmatmul.mubr.bf16.vlgmr.msra.gmra.mrb[148].mxu0 %v9455_v32 }
0x1954   :  { %13025 = vmatpush3.bf16.msra.mxu1 %v13843_v47  ;;  %13040 = vmatprep.mubr.msk.bf16.mxu1 %vm14578_vm0, %v19064_v5  ;;  %v19321_v47 = vld [vmem:[#allocation54_spill] sm:$0xff] }
0x1955   :  { %13026 = vmatprep.subr.bf16.mxu1 %v19064_v5  ;;  %13045 = vmatpush3.bf16.msra.mxu0 %v13851_v58 }
0x1956   :  { %13046 = vmatprep.subr.bf16.mxu0 %v19064_v5  ;;  %13060 = vmatprep.mubr.msk.bf16.mxu0 %vm14578_vm0, %v19064_v5 }
0x1958   :  { %13027 = vmatpush3.bf16.msra.mxu1 %v13844_v54  ;;  %v19322_v54 = vld [vmem:[#allocation55_spill] sm:$0xff] }
0x1959   :  { %13028 = vmatprep.subr.bf16.mxu1 %v19064_v5  ;;  %13047 = vmatpush3.bf16.msra.mxu0 %v13852_v11 }
0x195a   :  { %13048 = vmatprep.subr.bf16.mxu0 %v19064_v5 }
0x195c   :  { %13029 = vmatpush3.bf16.msra.mxu1 %v13845_v16 }
0x195d   :  { %13030 = vmatprep.subr.bf16.mxu1 %v19064_v5  ;;  %13049 = vmatpush3.bf16.msra.mxu0 %v13853_v12 }
0x195e   :  { %13050 = vmatprep.subr.bf16.mxu0 %v19064_v5 }
0x1960   :  { %13031 = vmatpush3.bf16.msra.mxu1 %v13846_v25  ;;  %v19323_v25 = vld [vmem:[#allocation56_spill] sm:$0xff] }
0x1961   :  { %13032 = vmatprep.subr.bf16.mxu1 %v19064_v5  ;;  %13051 = vmatpush3.bf16.msra.mxu0 %v13854_v17 }
0x1962   :  { %13052 = vmatprep.subr.bf16.mxu0 %v19064_v5 }
0x1964   :  { %13033 = vmatpush3.bf16.msra.mxu1 %v13847_v4 }
0x1965   :  { %13034 = vmatprep.subr.bf16.mxu1 %v19064_v5  ;;  %13053 = vmatpush3.bf16.msra.mxu0 %v13855_v61 }
0x1966   :  { %13054 = vmatprep.subr.bf16.mxu0 %v19064_v5 }
0x1968   :  { %13035 = vmatpush3.bf16.msra.mxu1 %v13848_v56 }
0x1969   :  { %13036 = vmatprep.subr.bf16.mxu1 %v19064_v5  ;;  %13055 = vmatpush3.bf16.msra.mxu0 %v13856_v62 }
0x196a   :  { %13056 = vmatprep.subr.bf16.mxu0 %v19064_v5 }
0x196c   :  { %13037 = vmatpush3.bf16.msra.mxu1 %v13849_v20 }
0x196d   :  { %13038 = vmatprep.subr.bf16.mxu1 %v19064_v5 }
0x1970   :  { %13039 = vmatpush3.bf16.msra.mxu1 %v13850_v13 }
0x1971   :  { %10269 = vmatprep.subr.bf16.mxu1 %v17859_v2  ;;  %v19309_v2 = vld [vmem:[#allocation51_spill] sm:$0xff] }
0x1973   :  { %13041 = vmatmul.mubr.bf16.vlgmr.msra.gmra.mrb[144].mxu1 %v9455_v32 }
0x1974   :  { %10270 = vmatpush1.bf16.msra.mxu1 %v17864_v52  ;;  %10301 = vmatprep.mubr.bf16.mxu1 %v19005_v14  ;;  %v19310_v52 = vld [vmem:[#allocation14_spill] sm:$0xff] }
0x1975   :  { %10271 = vmatprep.subr.bf16.mxu1 %v17877_v3  ;;  %v19311_v3 = vld [vmem:[#allocation16_spill] sm:$0xff] }
0x1978   :  { %10272 = vmatpush1.bf16.msra.mxu1 %v17882_v21  ;;  %v19312_v21 = vld [vmem:[#allocation15_spill] sm:$0xff] }
0x1979   :  { %10273 = vmatprep.subr.bf16.mxu1 %v17889_v39  ;;  %v19313_v39 = vld [vmem:[#allocation29_spill] sm:$0xff] }
0x197c   :  { %10274 = vmatpush1.bf16.msra.mxu1 %v17894_v41  ;;  %v13857_v41 = vld [vmem:[%s18848_s13 + $0x30] sm:$0xff]  }
0x197d   :  { %10275 = vmatprep.subr.bf16.mxu1 %v17901_v60  ;;  %13057 = vmatpush3.bf16.msra.mxu0 %v13857_v41  ;;  %v13858_v60 = vld [vmem:[%s18848_s13 + $0x38] sm:$0xff]   ;;  %v19330_v41 = vld [vmem:[#allocation61_spill] sm:$0xff] }
0x197e   :  { %13058 = vmatprep.subr.bf16.mxu0 %v19064_v5 }
0x1980   :  { %10276 = vmatpush1.bf16.msra.mxu1 %v17906_v18  ;;  %v19314_v18 = vld [vmem:[#allocation50_spill] sm:$0xff] }
0x1981   :  { %10277 = vmatprep.subr.bf16.mxu1 %v17918_v10  ;;  %13059 = vmatpush3.bf16.msra.mxu0 %v13858_v60  ;;  %v19332_v60 = vld [vmem:[#allocation63_spill] sm:$0xff] }
0x1982   :  { %10310 = vmatprep.subr.bf16.mxu0 %v19314_v18 }
0x1984   :  { %10278 = vmatpush1.bf16.msra.mxu1 %v17913_v28 }
0x1985   :  { %10279 = vmatprep.subr.bf16.mxu1 %v17923_v40 }
0x1988   :  { %10280 = vmatpush1.bf16.msra.mxu1 %v17930_v7 }
0x1989   :  { %10281 = vmatprep.subr.bf16.mxu1 %v19309_v2 }
0x198c   :  { %10282 = vmatpush1.bf16.msra.mxu1 %v19310_v52 }
0x198d   :  { %10283 = vmatprep.subr.bf16.mxu1 %v19311_v3 }
0x1990   :  { %10284 = vmatpush1.bf16.msra.mxu1 %v19312_v21  ;;  %v19327_v21 = vld [vmem:[#allocation59_spill] sm:$0xff] }
0x1991   :  { %10351 = vmatprep.subr.bf16.mxu1 %v19313_v39  ;;  %v19328_v39 = vld [vmem:[#allocation60_spill] sm:$0xff] }
0x1a26   :  { %v9746_v28 = vpop.f32.mrb[140].mxu1  ;;  %v9787_v10 = vpop.f32.mrb[148].mxu0 }
0x1a27   :  { %v9834_v40 = vadd.f32 %v9746_v28, %v18220_v38  ;;  %v9953_v7 = vadd.f32 %v18216_v0, %v9787_v10  ;;  %v9748_v36 = vpop.f32.mrb[141].mxu1  ;;  %v9789_v57 = vpop.f32.mrb[149].mxu0  ;;  %v19315_v0 = vld [vmem:[#allocation30_spill] sm:$0xff] }
0x1a28   :  { %v9952_v8 = vadd.f32 %v18211_v6, %v9748_v36  ;;  %v9954_v15 = vadd.f32 %v18213_v9, %v9789_v57  ;;  %v9750_v49 = vpop.f32.mrb[142].mxu1  ;;  %v9791_v19 = vpop.f32.mrb[150].mxu0  ;;  %v19335_v28 = vld [vmem:[#allocation66_spill] sm:$0xff]  ;;  %v19336_v57 = vld [vmem:[#allocation35_spill] sm:$0xff] }
0x1a29   :  { %v9835_v24 = vadd.f32 %v17971_v37, %v9834_v40  ;;  %v12510_v42 = vmul.f32 -1.442695, %v9953_v7  ;;  %v9751_v26 = vpop.f32.mrb[143].mxu1  ;;  %v9792_v45 = vpop.f32.mrb[151].mxu0  ;;  %v19338_v49 = vld [vmem:[#allocation36_spill] sm:$0xff] }
0x1a2a   :  { %v12509_v59 = vmul.f32 -1.442695, %v9952_v8  ;;  %v19337_v8 = vld [vmem:[#allocation13_spill] sm:$0xff]  ;;  %v19339_v19 = vld [vmem:[#allocation12_spill] sm:$0xff]  ;;  %v19340_v45 = vld [vmem:[#allocation27_spill] sm:$0xff] }
0x1a2b   :  { %v9836_v53 = vpack.c.bf16 %v9835_v24, %v9835_v24  ;;  %14383 = vpow2.f32 %v12510_v42  ;;  %v3397_v24 = vadd.f32 %v19339_v19, %v19338_v49  ;;  %v18452_v49 = vld [vmem:[%s18846_s11 + $0x2c] ss:$20 sps:$4 sm:$0xff]   ;;  %v18457_v19 = vld [vmem:[%s18846_s11 + $0x28] ss:$20 sps:$4 sm:$0xff]  }
0x1a2c   :  { %14385 = vpow2.f32 %v12509_v59 }
0x1a2d   :  { %13061 = vmatmul.mubr.bf16.vlgmr.msra.gmra.mrb[152].mxu0 %v9836_v53  ;;  %14387 = vtanh.f32 %v9954_v15  ;;  %v3396_v15 = vadd.f32 %v19337_v8, %v19336_v57  ;;  %v18439_v57 = vld [vmem:[%s18846_s11] ss:$20 sps:$4 sm:$0xff]  }
0x1a2e   :  { %10311 = vmatpush1.bf16.msra.mxu0 %v17977_v1  ;;  %10342 = vmatprep.mubr.bf16.mxu0 %v19005_v14  ;;  %v19317_v1 = vld [vmem:[#allocation23_spill] sm:$0xff] }
0x1a2f   :  { %10312 = vmatprep.subr.bf16.mxu0 %v17982_v27  ;;  %v19319_v27 = vld [vmem:[#allocation45_spill] sm:$0xff]  ;;  %v13864_v8 = vld [vmem:[%s18846_s11 + $0xc] ss:$20 sps:$4 sm:$0xff]  }
0x1a32   :  { %10313 = vmatpush1.bf16.msra.mxu0 %v17988_v34  ;;  %v19320_v34 = vld [vmem:[#allocation53_spill] sm:$0xff] }
0x1a33   :  { %10314 = vmatprep.subr.bf16.mxu0 %v17995_v30 }
0x1a35   :  { %v14384_v6 = vpop.eup %14383 }
0x1a36   :  { %v14386_v37 = vpop.eup %14385  ;;  %v9965_v9 = vadd.f32 1.0, %v14384_v6  ;;  %10315 = vmatpush1.bf16.msra.mxu0 %v19315_v0 }
0x1a37   :  { %v9959_v38 = vadd.f32 1.0, %v14386_v37  ;;  %10316 = vmatprep.subr.bf16.mxu0 %v19316_v29  ;;  %v14388_v30 = vpop.eup %14387 }
0x1a38   :  { %14389 = vrcp.f32 %v9965_v9  ;;  %v19341_v9 = vld [vmem:[#allocation28_spill] sm:$0xff] }
0x1a39   :  { %14391 = vrcp.f32 %v9959_v38 }
0x1a3a   :  { %10317 = vmatpush1.bf16.msra.mxu0 %v19317_v1 }
0x1a3b   :  { %10318 = vmatprep.subr.bf16.mxu0 %v19318_v22 }
0x1a3e   :  { %10319 = vmatpush1.bf16.msra.mxu0 %v19319_v27 }
0x1a3f   :  { %10320 = vmatprep.subr.bf16.mxu0 %v19320_v34 }
0x1a42   :  { %v14390_v43 = vpop.eup %14389  ;;  %10321 = vmatpush1.bf16.msra.mxu0 %v19321_v47 }
0x1a43   :  { %v14392_v32 = vpop.eup %14391  ;;  %v9975_v58 = vmul.f32 %v14390_v43, %v18058_v31  ;;  %10322 = vmatprep.subr.bf16.mxu0 %v19322_v54  ;;  %v19342_v43 = vld [vmem:[#allocation40_spill] sm:$0xff]  ;;  %v19344_v54 = vld [vmem:[#allocation39_spill] sm:$0xff] }
0x1a44   :  { %v9976_v11 = vmul.f32 %v14392_v32, %v14388_v30  ;;  %v19343_v32 = vld [vmem:[#allocation38_spill] sm:$0xff] }
0x1a46   :  { %v18365_v16 = vadd.f32 %v9976_v11, %v9975_v58  ;;  %v9828_v12 = vpop.f32.mrb[144].mxu1  ;;  %10323 = vmatpush1.bf16.msra.mxu0 %v19323_v25  ;;  %v19345_v25 = vld [vmem:[#allocation37_spill] sm:$0xff] }
0x1a47   :  { %v9955_v17 = vadd.f32 %v18218_v44, %v9828_v12  ;;  %v13042_v4 = vpop.f32.mrb[145].mxu1  ;;  %10324 = vmatprep.subr.bf16.mxu0 %v18056_v33  ;;  %v19324_v33 = vld [vmem:[#allocation17_spill] sm:$0xff]  ;;  %v19326_v44 = vld [vmem:[#allocation58_spill] sm:$0xff] }
0x1a48   :  { %v9831_v61 = vpop.f32.mrb[146].mxu1 }
0x1a49   :  { %v12511_v56 = vmul.f32 -1.442695, %v9955_v17  ;;  %v13043_v62 = vpop.f32.mrb[147].mxu1  ;;  %v19346_v61 = vld [vmem:[#allocation41_spill] sm:$0xff] }
0x1a4a   :  { %10325 = vmatpush1.bf16.msra.mxu0 %v18064_v55  ;;  %v19325_v55 = vld [vmem:[#allocation57_spill] sm:$0xff]  ;;  %v19347_v62 = vld [vmem:[#allocation42_spill] sm:$0xff] }
0x1a4b   :  { %14393 = vpow2.f32 %v12511_v56 }
0x1a4c   :  { %14395 = vtanh.f32 %v18365_v16 }
0x1a55   :  { %v14394_v31 = vpop.eup %14393 }
0x1a56   :  { %v9972_v20 = vadd.f32 1.0, %v14394_v31  ;;  %v14396_v13 = vpop.eup %14395 }
0x1a58   :  { %14397 = vrcp.f32 %v9972_v20  ;;  %v19348_v20 = vld [vmem:[#allocation43_spill] sm:$0xff] }
0x1a62   :  { %v14398_v2 = vpop.eup %14397 }
0x1a63   :  { %v9979_v52 = vmul.f32 %v14398_v2, %v14396_v13  ;;  %v19349_v2 = vld [vmem:[#allocation44_spill] sm:$0xff] }
0x1a65   :  { %v9980_v3 = vpack.c.bf16 %v9979_v52, %v9979_v52 }
0x1a67   :  { %10302 = vmatmul.mubr.bf16.vlgmr.msra.gmra.mrb[148].mxu1 %v9980_v3  ;;  %10343 = vmatmul.mubr.bf16.vlgmr.msra.gmra.mrb[156].mxu0 %v9980_v3 }
0x1a68   :  { %10352 = vmatpush1.bf16.msra.mxu1 %v18074_v23  ;;  %10383 = vmatprep.mubr.bf16.mxu1 %v19005_v14  ;;  %v19329_v23 = vld [vmem:[#allocation52_spill] sm:$0xff] }
0x1a69   :  { %10353 = vmatprep.subr.bf16.mxu1 %v18079_v48  ;;  %10799 = vmatprep.mubr.bf16.mxu0 %v19005_v14  ;;  %v19331_v48 = vld [vmem:[#allocation62_spill] sm:$0xff] }
0x1a6c   :  { %10354 = vmatpush1.bf16.msra.mxu1 %v18085_v51  ;;  %v19333_v51 = vld [vmem:[#allocation64_spill] sm:$0xff] }
0x1a6d   :  { %10355 = vmatprep.subr.bf16.mxu1 %v18092_v63  ;;  %v19334_v63 = vld [vmem:[#allocation65_spill] sm:$0xff] }
0x1a70   :  { %10356 = vmatpush1.bf16.msra.mxu1 %v19324_v33 }
0x1a71   :  { %10357 = vmatprep.subr.bf16.mxu1 %v19325_v55  ;;  %v18421_v55 = vld [vmem:[%s18844_s9] ss:$0 sm:$0xff] }
0x1a74   :  { %10358 = vmatpush1.bf16.msra.mxu1 %v19326_v44 }
0x1a75   :  { %10359 = vmatprep.subr.bf16.mxu1 %v19327_v21 }
0x1a78   :  { %10360 = vmatpush1.bf16.msra.mxu1 %v19328_v39 }
0x1a79   :  { %10361 = vmatprep.subr.bf16.mxu1 %v19329_v23 }
0x1a7c   :  { %10362 = vmatpush1.bf16.msra.mxu1 %v19330_v41 }
0x1a7d   :  { %10363 = vmatprep.subr.bf16.mxu1 %v19331_v48 }
0x1a80   :  { %10364 = vmatpush1.bf16.msra.mxu1 %v19332_v60 }
0x1a81   :  { %10365 = vmatprep.subr.bf16.mxu1 %v19333_v51 }
0x1a84   :  { %10366 = vmatpush1.bf16.msra.mxu1 %v19334_v63 }
0x1a85   :  { %10808 = vmatprep.subr.bf16.mxu1 %v13864_v8 }
0x1a87   :  { %10384 = vmatmul.mubr.bf16.vlgmr.msra.gmra.mrb[152].mxu1 %v9980_v3 }
0x1a88   :  { %10840 = vmatprep.mubr.bf16.mxu1 %v19005_v14 }
0x1b00   :  { %v9935_v18 = vpop.f32.mrb[152].mxu0 }
0x1b01   :  { %v9936_v10 = vadd.f32 %v19335_v28, %v9935_v18  ;;  %v13062_v40 = vpop.f32.mrb[153].mxu0 }
0x1b02   :  { %v9938_v7 = vpop.f32.mrb[154].mxu0 }
0x1b03   :  { %12508 = vst [vmem:[%s18851_s16 + $0x28] sm:$0xff] %v9936_v10  ;;  %v13063_v36 = vpop.f32.mrb[155].mxu0 }
0x1b04   :  { %v18434_v36 = vld [vmem:[%s18846_s11 + $0x4] ss:$20 sps:$4 sm:$0xff]  }
0x1b05   :  { %10767 = vmatprep.subr.bf16.mxu0 %v18434_v36 }
0x1b06   :  { %10768 = vmatpush1.bf16.msra.mxu0 %v18439_v57 }
0x1b07   :  { %10769 = vmatprep.subr.bf16.mxu0 %v18452_v49 }
0x1b0a   :  { %10770 = vmatpush1.bf16.msra.mxu0 %v18457_v19 }
0x1b3a   :  { %v10303_v42 = vpop.f32.mrb[148].mxu1  ;;  %v10344_v26 = vpop.f32.mrb[156].mxu0 }
0x1b3b   :  { %v18399_v59 = vadd.f32 %v10303_v42, %v19340_v45  ;;  %v18401_v53 = vadd.f32 %v10344_v26, %v3396_v15  ;;  %v10305_v6 = vpop.f32.mrb[149].mxu1  ;;  %v10346_v37 = vpop.f32.mrb[157].mxu0  ;;  %v13862_v15 = vld [vmem:[%s18846_s11 + $0x8] ss:$20 sps:$4 sm:$0xff]   ;;  %v13868_v42 = vld [vmem:[%s18846_s11 + $0x30] ss:$20 sps:$4 sm:$0xff]  }
0x1b3c   :  { %v18404_v0 = vadd.f32 %v10305_v6, %v19341_v9  ;;  %v18406_v38 = vadd.f32 %v10346_v37, %v3397_v24  ;;  %v10307_v29 = vpop.f32.mrb[150].mxu1  ;;  %v10348_v1 = vpop.f32.mrb[158].mxu0  ;;  %10809 = vmatpush1.bf16.msra.mxu1 %v13862_v15  ;;  %v13870_v24 = vld [vmem:[%s18846_s11 + $0x34] ss:$20 sps:$4 sm:$0xff]   ;;  %v18475_v45 = vld [vmem:[%s18846_s11 + $0x50] ss:$20 sps:$4 sm:$0xff]  }
0x1b3d   :  { %v10308_v22 = vpop.f32.mrb[151].mxu1  ;;  %v10349_v27 = vpop.f32.mrb[159].mxu0  ;;  %10810 = vmatprep.subr.bf16.mxu1 %v13870_v24  ;;  %v18470_v26 = vld [vmem:[%s18846_s11 + $0x54] ss:$20 sps:$4 sm:$0xff]   ;;  %v13874_v6 = vld [vmem:[%s18846_s11 + $0x58] ss:$20 sps:$4 sm:$0xff]  }
0x1b3e   :  { %v13876_v37 = vld [vmem:[%s18846_s11 + $0x5c] ss:$20 sps:$4 sm:$0xff]   ;;  %10771 = vmatprep.subr.bf16.mxu0 %v18470_v26  ;;  %v18493_v29 = vld [vmem:[%s18846_s11 + $0x78] ss:$20 sps:$4 sm:$0xff]   ;;  %v13880_v22 = vld [vmem:[%s18846_s11 + $0x80] ss:$20 sps:$4 sm:$0xff]  }
0x1b3f   :  { %v18487_v9 = vld [vmem:[%s18846_s11 + $0x7c] ss:$20 sps:$4 sm:$0xff]   ;;  %10772 = vmatpush1.bf16.msra.mxu0 %v18475_v45  ;;  %v13882_v1 = vld [vmem:[%s18846_s11 + $0x84] ss:$20 sps:$4 sm:$0xff]  }
0x1b40   :  { %10811 = vmatpush1.bf16.msra.mxu1 %v13868_v42  ;;  %10773 = vmatprep.subr.bf16.mxu0 %v18487_v9  ;;  %v18505_v27 = vld [vmem:[%s18846_s11 + $0xa4] ss:$20 sps:$4 sm:$0xff]  }
0x1b41   :  { %10812 = vmatprep.subr.bf16.mxu1 %v13876_v37 }
0x1b43   :  { %10774 = vmatpush1.bf16.msra.mxu0 %v18493_v29 }
0x1b44   :  { %10813 = vmatpush1.bf16.msra.mxu1 %v13874_v6  ;;  %10775 = vmatprep.subr.bf16.mxu0 %v18505_v27 }
0x1b45   :  { %10814 = vmatprep.subr.bf16.mxu1 %v13882_v1 }
0x1b48   :  { %10815 = vmatpush1.bf16.msra.mxu1 %v13880_v22 }
0x1b5a   :  { %v10385_v34 = vpop.f32.mrb[152].mxu1 }
0x1b5b   :  { %v18408_v30 = vpop.f32.mrb[153].mxu1  ;;  %v10401_v47 = vadd.f32 %v10385_v34, %v19342_v43  ;;  %v10400_v58 = vadd.f32 %v10385_v34, %v19343_v32  ;;  %v10403_v11 = vadd.f32 %v10385_v34, %v19344_v54  ;;  %v10402_v17 = vadd.f32 %v10385_v34, %v19345_v25 }
0x1b5c   :  { %v10389_v12 = vpop.f32.mrb[154].mxu1  ;;  %v10405_v56 = vadd.f32 %v10385_v34, %v19346_v61  ;;  %v10404_v31 = vadd.f32 %v10385_v34, %v19347_v62  ;;  %v10407_v13 = vadd.f32 %v10385_v34, %v19348_v20  ;;  %v10406_v52 = vadd.f32 %v10385_v34, %v19349_v2  ;;  %v13888_v34 = vld [vmem:[%s18846_s11 + $0xac] ss:$20 sps:$4 sm:$0xff]  }
0x1b5d   :  { %v10390_v4 = vpop.f32.mrb[155].mxu1  ;;  %14399 = vtanh.f32 %v10401_v47  ;;  %v18514_v47 = vld [vmem:[%s18846_s11 + $0xa0] ss:$20 sps:$4 sm:$0xff]   ;;  %10816 = vmatprep.subr.bf16.mxu1 %v13888_v34 }
0x1b5e   :  { %14401 = vtanh.f32 %v10400_v58  ;;  %v13886_v58 = vld [vmem:[%s18846_s11 + $0xa8] ss:$20 sps:$4 sm:$0xff]   ;;  %10776 = vmatpush1.bf16.msra.mxu0 %v18514_v47  ;;  %v13892_v4 = vld [vmem:[%s18846_s11 + $0xd0] ss:$20 sps:$4 sm:$0xff]  }
0x1b5f   :  { %14403 = vtanh.f32 %v10403_v11  ;;  %v18523_v11 = vld [vmem:[%s18846_s11 + $0xcc] ss:$20 sps:$4 sm:$0xff]   ;;  %v13894_v12 = vld [vmem:[%s18846_s11 + $0xd4] ss:$20 sps:$4 sm:$0xff]   ;;  %10817 = vmatpush1.bf16.msra.mxu1 %v13886_v58 }
0x1b60   :  { %14405 = vtanh.f32 %v10402_v17  ;;  %v18532_v17 = vld [vmem:[%s18846_s11 + $0xc8] ss:$20 sps:$4 sm:$0xff]   ;;  %10777 = vmatprep.subr.bf16.mxu0 %v18523_v11  ;;  %10818 = vmatprep.subr.bf16.mxu1 %v13894_v12 }
0x1b61   :  { %14407 = vtanh.f32 %v10405_v56  ;;  %v18541_v56 = vld [vmem:[%s18846_s11 + $0xf4] ss:$20 sps:$4 sm:$0xff]  }
0x1b62   :  { %14409 = vtanh.f32 %v10404_v31  ;;  %v13900_v31 = vld [vmem:[%s18846_s11 + $0xfc] ss:$20 sps:$4 sm:$0xff]   ;;  %10778 = vmatpush1.bf16.msra.mxu0 %v18532_v17 }
0x1b63   :  { %14411 = vtanh.f32 %v10407_v13  ;;  %v18550_v13 = vld [vmem:[%s18846_s11 + $0xf0] ss:$20 sps:$4 sm:$0xff]   ;;  %10819 = vmatpush1.bf16.msra.mxu1 %v13892_v4  ;;  %10779 = vmatprep.subr.bf16.mxu0 %v18541_v56 }
0x1b64   :  { %14413 = vtanh.f32 %v10406_v52  ;;  %v13898_v52 = vld [vmem:[%s18846_s11 + $0xf8] ss:$20 sps:$4 sm:$0xff]   ;;  %10820 = vmatprep.subr.bf16.mxu1 %v13900_v31 }
0x1b66   :  { %10780 = vmatpush1.bf16.msra.mxu0 %v18550_v13 }
0x1b67   :  { %v14400_v3 = vpop.eup %14399  ;;  %10821 = vmatpush1.bf16.msra.mxu1 %v13898_v52 }
0x1b68   :  { %v14402_v33 = vpop.eup %14401  ;;  %v10417_v44 = vmul.f32 %v18421_v55, %v14400_v3  ;;  %v18559_v3 = vld [vmem:[%s18846_s11 + $0x11c] ss:$20 sps:$4 sm:$0xff]  }
0x1b69   :  { %v14404_v21 = vpop.eup %14403  ;;  %v10416_v39 = vmul.f32 %v18421_v55, %v14402_v33  ;;  %v13906_v33 = vld [vmem:[%s18846_s11 + $0x124] ss:$20 sps:$4 sm:$0xff]   ;;  %10781 = vmatprep.subr.bf16.mxu0 %v18559_v3 }
0x1b6a   :  { %v14406_v23 = vpop.eup %14405  ;;  %10426 = vadd.xlane.f32.xlu1 %v10417_v44  ;;  %v10419_v41 = vmul.f32 %v18421_v55, %v14404_v21  ;;  %v18568_v44 = vld [vmem:[%s18846_s11 + $0x118] ss:$20 sps:$4 sm:$0xff]   ;;  %v13904_v21 = vld [vmem:[%s18846_s11 + $0x120] ss:$20 sps:$4 sm:$0xff]   ;;  %10822 = vmatprep.subr.bf16.mxu1 %v13906_v33 }
0x1b6b   :  { %10424 = vadd.xlane.f32.xlu0 %v10416_v39  ;;  %v14408_v48 = vpop.eup %14407  ;;  %v10418_v60 = vmul.f32 %v18421_v55, %v14406_v23  ;;  %10782 = vmatpush1.bf16.msra.mxu0 %v18568_v44 }
0x1b6c   :  { %v14410_v51 = vpop.eup %14409  ;;  %v10421_v63 = vmul.f32 %v18421_v55, %v14408_v48  ;;  %10823 = vmatpush1.bf16.msra.mxu1 %v13904_v21  ;;  %13064 = vmatprep.subr.bf16.mxu0 %v19064_v5 }
0x1b6d   :  { %v14412_v18 = vpop.eup %14411  ;;  %v10420_v28 = vmul.f32 %v18421_v55, %v14410_v51  ;;  %13084 = vmatprep.subr.bf16.mxu1 %v19064_v5 }
0x1b6e   :  { %10430 = vadd.xlane.f32.xlu1 %v10419_v41  ;;  %v14414_v10 = vpop.eup %14413  ;;  %v10423_v40 = vmul.f32 %v18421_v55, %v14412_v18 }
0x1b6f   :  { %10428 = vadd.xlane.f32.xlu0 %v10418_v60  ;;  %v10422_v7 = vmul.f32 %v18421_v55, %v14414_v10 }
0x1b72   :  { %10434 = vadd.xlane.f32.xlu1 %v10421_v63 }
0x1b73   :  { %10432 = vadd.xlane.f32.xlu0 %v10420_v28 }
0x1b76   :  { %10438 = vadd.xlane.f32.xlu1 %v10423_v40 }
0x1b77   :  { %10436 = vadd.xlane.f32.xlu0 %v10422_v7 }
0x1bf7   :  { %v10427_v39 = vpop.xlane.xlu1 %10426 }
0x1bf8   :  { %v10425_v23 = vpop.xlane.xlu0 %10424 }
0x1bfb   :  { %v10431_v41 = vpop.xlane.xlu1 %10430 }
0x1bfc   :  { %v10429_v48 = vpop.xlane.xlu0 %10428 }
0x1bff   :  { %v10435_v60 = vpop.xlane.xlu1 %10434 }
0x1c00   :  { %v10433_v51 = vpop.xlane.xlu0 %10432  ;;  %v10441_v63 = vmax.f32 %v10427_v39, %v10435_v60 }
0x1c01   :  { %v10440_v18 = vmax.f32 %v10425_v23, %v10433_v51 }
0x1c03   :  { %v10439_v28 = vpop.xlane.xlu1 %10438  ;;  %v10444_v8 = vmax.f32 %v10440_v18, %v10441_v63 }
0x1c04   :  { %v10443_v10 = vmax.f32 %v10431_v41, %v10439_v28  ;;  %v10437_v40 = vpop.xlane.xlu0 %10436 }
0x1c05   :  { %v10442_v7 = vmax.f32 %v10429_v48, %v10437_v40 }
0x1c07   :  { %v10445_v15 = vmax.f32 %v10442_v7, %v10443_v10 }
0x1c09   :  { %v10446_v24 = vmax.f32 %v10444_v8, %v10445_v15 }
0x1c0b   :  { %v10447_v42 = vsub.f32 %v10425_v23, %v10446_v24  ;;  %v10448_v6 = vsub.f32 %v10427_v39, %v10446_v24  ;;  %v10449_v37 = vsub.f32 %v10429_v48, %v10446_v24  ;;  %v10450_v1 = vsub.f32 %v10431_v41, %v10446_v24 }
0x1c0c   :  { %v10451_v58 = vsub.f32 %v10433_v51, %v10446_v24  ;;  %v10452_v4 = vsub.f32 %v10435_v60, %v10446_v24  ;;  %v10453_v52 = vsub.f32 %v10437_v40, %v10446_v24  ;;  %v10454_v21 = vsub.f32 %v10439_v28, %v10446_v24 }
0x1c0d   :  { %v10455_v22 = vmul.f32 1.442695, %v10447_v42  ;;  %v10457_v34 = vmul.f32 1.442695, %v10448_v6  ;;  %v10459_v12 = vmul.f32 1.442695, %v10449_v37 }
0x1c0e   :  { %v10461_v31 = vmul.f32 1.442695, %v10450_v1  ;;  %v10463_v33 = vmul.f32 1.442695, %v10451_v58  ;;  %v10465_v63 = vmul.f32 1.442695, %v10452_v4 }
0x1c0f   :  { %14415 = vpow2.f32 %v10455_v22  ;;  %v10467_v18 = vmul.f32 1.442695, %v10453_v52  ;;  %v10469_v39 = vmul.f32 1.442695, %v10454_v21  ;;  %v18585_v4 = vld [vmem:[%s18850_s15 + $0x8] sm:$0xff] }
0x1c10   :  { %14417 = vpow2.f32 %v10457_v34 }
0x1c11   :  { %14419 = vpow2.f32 %v10459_v12  ;;  %v18580_v12 = vld [vmem:[%s18850_s15] sm:$0xff] }
0x1c12   :  { %14421 = vpow2.f32 %v10461_v31 }
0x1c13   :  { %14423 = vpow2.f32 %v10463_v33 }
0x1c14   :  { %14425 = vpow2.f32 %v10465_v63 }
0x1c15   :  { %14427 = vpow2.f32 %v10467_v18 }
0x1c16   :  { %14429 = vpow2.f32 %v10469_v39 }
0x1c19   :  { %v14416_v23 = vpop.eup %14415 }
0x1c1a   :  { %v14418_v41 = vpop.eup %14417 }
0x1c1b   :  { %v10471_v48 = vadd.f32 %v14418_v41, %v14416_v23  ;;  %v14420_v51 = vpop.eup %14419 }
0x1c1c   :  { %v14422_v60 = vpop.eup %14421 }
0x1c1d   :  { %v10472_v10 = vadd.f32 %v14420_v51, %v10471_v48  ;;  %v14424_v8 = vpop.eup %14423  ;;  %v18594_v48 = vld [vmem:[%s18850_s15 + $0x20] sm:$0xff] }
0x1c1e   :  { %v14426_v15 = vpop.eup %14425 }
0x1c1f   :  { %v10473_v7 = vadd.f32 %v14422_v60, %v10472_v10  ;;  %v14428_v28 = vpop.eup %14427 }
0x1c20   :  { %v14430_v6 = vpop.eup %14429 }
0x1c21   :  { %v10474_v40 = vadd.f32 %v14424_v8, %v10473_v7  ;;  %v18600_v7 = vld [vmem:[%s18850_s15 + $0x28] sm:$0xff] }
0x1c23   :  { %v10475_v42 = vadd.f32 %v14426_v15, %v10474_v40 }
0x1c25   :  { %v10476_v24 = vadd.f32 %v14428_v28, %v10475_v42 }
0x1c27   :  { %v10477_v37 = vadd.f32 %v14430_v6, %v10476_v24 }
0x1c29   :  { %14431 = vrcp.f32 %v10477_v37 }
0x1c33   :  { %v14432_v1 = vpop.eup %14431 }
0x1c34   :  { %v10479_v22 = vmul.f32 %v14432_v1, %v14416_v23  ;;  %v10480_v34 = vmul.f32 %v14432_v1, %v14418_v41  ;;  %v10481_v58 = vmul.f32 %v14432_v1, %v14420_v51  ;;  %v10482_v31 = vmul.f32 %v14432_v1, %v14422_v60 }
0x1c35   :  { %v10483_v21 = vmul.f32 %v14432_v1, %v14424_v8  ;;  %v10484_v39 = vmul.f32 %v14432_v1, %v14426_v15  ;;  %v10485_v51 = vmul.f32 %v14432_v1, %v14428_v28 }
0x1c36   :  { %v10495_v52 = vmul.f32 %v18580_v12, %v10479_v22  ;;  %v10496_v33 = vmul.f32 %v18585_v4, %v10480_v34  ;;  %v10497_v63 = vmul.f32 %v10481_v58, %v18243_v46  ;;  %v10498_v23 = vmul.f32 %v10482_v31, %v18249_v50  ;;  %v18606_v50 = vld [vmem:[%s18850_s15 + $0x30] sm:$0xff]  ;;  %v13908_v34 = vld [vmem:[%s18846_s11 + $0x38] ss:$20 sps:$4 sm:$0xff]  }
0x1c37   :  { %v10499_v10 = vmul.f32 %v18594_v48, %v10483_v21  ;;  %v10486_v46 = vmul.f32 %v14432_v1, %v14430_v6  ;;  %v10500_v8 = vmul.f32 %v18600_v7, %v10484_v39  ;;  %v10501_v15 = vmul.f32 %v18606_v50, %v10485_v51  ;;  %v13907_v22 = vld [vmem:[%s18846_s11 + $0x10] ss:$20 sps:$4 sm:$0xff]   ;;  %v13909_v58 = vld [vmem:[%s18846_s11 + $0x60] ss:$20 sps:$4 sm:$0xff]   ;;  %v13920_v39 = vld [vmem:[%s18848_s13 + $0x28] sm:$0xff]  }
0x1c38   :  { %v10503_v18 = vadd.f32 %v10496_v33, %v10495_v52  ;;  %v13915_v1 = vld [vmem:[%s18848_s13] sm:$0xff]   ;;  %v13917_v31 = vld [vmem:[%s18848_s13 + $0x10] sm:$0xff]   ;;  %v13910_v52 = vld [vmem:[%s18846_s11 + $0x88] ss:$20 sps:$4 sm:$0xff]  }
0x1c39   :  { %v10502_v28 = vmul.f32 %v10486_v46, %v18258_v35  ;;  %v13916_v35 = vld [vmem:[%s18848_s13 + $0x8] sm:$0xff]   ;;  %v13918_v33 = vld [vmem:[%s18848_s13 + $0x18] sm:$0xff]   ;;  %v13911_v21 = vld [vmem:[%s18846_s11 + $0xb0] ss:$20 sps:$4 sm:$0xff]  }
0x1c3a   :  { %v10504_v41 = vadd.f32 %v10503_v18, %v10497_v63  ;;  %v13919_v63 = vld [vmem:[%s18848_s13 + $0x20] sm:$0xff]   ;;  %v13912_v18 = vld [vmem:[%s18846_s11 + $0xd8] ss:$20 sps:$4 sm:$0xff]   ;;  %v13921_v51 = vld [vmem:[%s18848_s13 + $0x30] sm:$0xff]  }
0x1c3b   :  { %v13923_v46 = vld [vmem:[%s18845_s10 + $0x10] ss:$24 sps:$4 sm:$0xff]  }
0x1c3c   :  { %v10505_v60 = vadd.f32 %v10504_v41, %v10498_v23  ;;  %v13913_v23 = vld [vmem:[%s18846_s11 + $0x100] ss:$20 sps:$4 sm:$0xff]   ;;  %v13914_v41 = vld [vmem:[%s18846_s11 + $0x128] ss:$20 sps:$4 sm:$0xff]  }
0x1c3e   :  { %v10506_v40 = vadd.f32 %v10505_v60, %v10499_v10  ;;  %v13922_v10 = vld [vmem:[%s18848_s13 + $0x38] sm:$0xff]   ;;  %v13925_v60 = vld [vmem:[%s18845_s10 + $0x14] ss:$24 sps:$4 sm:$0xff]  }
0x1c40   :  { %v10507_v42 = vadd.f32 %v10506_v40, %v10500_v8  ;;  %v13928_v8 = vld [vmem:[%s18845_s10 + $0x44] ss:$24 sps:$4 sm:$0xff]   ;;  %v13926_v40 = vld [vmem:[%s18845_s10 + $0x40] ss:$24 sps:$4 sm:$0xff]  }
0x1c42   :  { %v10508_v24 = vadd.f32 %v10507_v42, %v10501_v15  ;;  %v13929_v15 = vld [vmem:[%s18845_s10 + $0x70] ss:$24 sps:$4 sm:$0xff]   ;;  %v13934_v42 = vld [vmem:[%s18845_s10 + $0xa4] ss:$24 sps:$4 sm:$0xff]  }
0x1c44   :  { %v10509_v37 = vadd.f32 %v10508_v24, %v10502_v28  ;;  %v13932_v28 = vld [vmem:[%s18845_s10 + $0xa0] ss:$24 sps:$4 sm:$0xff]   ;;  %v13937_v24 = vld [vmem:[%s18845_s10 + $0xd4] ss:$24 sps:$4 sm:$0xff]  }
0x1c46   :  { %v10510_v6 = vpack.c.bf16 %v10509_v37, %v10509_v37  ;;  %v13935_v37 = vld [vmem:[%s18845_s10 + $0xd0] ss:$24 sps:$4 sm:$0xff]  }
0x1c48   :  { %10800 = vmatmul.mubr.bf16.vlgmr.msra.gmra.mrb[160].mxu0 %v10510_v6  ;;  %10841 = vmatmul.mubr.bf16.vlgmr.msra.gmra.mrb[156].mxu1 %v10510_v6 }
0x1c49   :  { %13065 = vmatpush3.bf16.msra.mxu0 %v13907_v22  ;;  %13080 = vmatprep.mubr.msk.bf16.mxu0 %vm14578_vm0, %v19064_v5  ;;  %v13940_v22 = vld [vmem:[%s18845_s10 + $0x104] ss:$24 sps:$4 sm:$0xff]  }
0x1c4a   :  { %13066 = vmatprep.subr.bf16.mxu0 %v19064_v5  ;;  %13085 = vmatpush3.bf16.msra.mxu1 %v13915_v1  ;;  %v13943_v1 = vld [vmem:[%s18845_s10 + $0x134] ss:$24 sps:$4 sm:$0xff]  }
0x1c4b   :  { %13086 = vmatprep.subr.bf16.mxu1 %v19064_v5  ;;  %13100 = vmatprep.mubr.msk.bf16.mxu1 %vm14578_vm0, %v19064_v5 }
0x1c4d   :  { %13067 = vmatpush3.bf16.msra.mxu0 %v13908_v34  ;;  %v13941_v34 = vld [vmem:[%s18845_s10 + $0x130] ss:$24 sps:$4 sm:$0xff]  }
0x1c4e   :  { %13068 = vmatprep.subr.bf16.mxu0 %v19064_v5  ;;  %13087 = vmatpush3.bf16.msra.mxu1 %v13916_v35  ;;  %v13946_v35 = vld [vmem:[%s18845_s10 + $0x164] ss:$24 sps:$4 sm:$0xff]  }
0x1c4f   :  { %13088 = vmatprep.subr.bf16.mxu1 %v19064_v5 }
0x1c51   :  { %13069 = vmatpush3.bf16.msra.mxu0 %v13909_v58  ;;  %v13944_v58 = vld [vmem:[%s18845_s10 + $0x160] ss:$24 sps:$4 sm:$0xff]  }
0x1c52   :  { %13070 = vmatprep.subr.bf16.mxu0 %v19064_v5  ;;  %13089 = vmatpush3.bf16.msra.mxu1 %v13917_v31 }
0x1c53   :  { %13090 = vmatprep.subr.bf16.mxu1 %v19064_v5 }
0x1c55   :  { %13071 = vmatpush3.bf16.msra.mxu0 %v13910_v52 }
0x1c56   :  { %13072 = vmatprep.subr.bf16.mxu0 %v19064_v5  ;;  %13091 = vmatpush3.bf16.msra.mxu1 %v13918_v33 }
0x1c57   :  { %13092 = vmatprep.subr.bf16.mxu1 %v19064_v5 }
0x1c59   :  { %13073 = vmatpush3.bf16.msra.mxu0 %v13911_v21 }
0x1c5a   :  { %13074 = vmatprep.subr.bf16.mxu0 %v19064_v5  ;;  %13093 = vmatpush3.bf16.msra.mxu1 %v13919_v63 }
0x1c5b   :  { %13094 = vmatprep.subr.bf16.mxu1 %v19064_v5 }
0x1c5d   :  { %13075 = vmatpush3.bf16.msra.mxu0 %v13912_v18 }
0x1c5e   :  { %13076 = vmatprep.subr.bf16.mxu0 %v19064_v5  ;;  %13095 = vmatpush3.bf16.msra.mxu1 %v13920_v39 }
0x1c5f   :  { %13096 = vmatprep.subr.bf16.mxu1 %v19064_v5 }
0x1c61   :  { %13077 = vmatpush3.bf16.msra.mxu0 %v13913_v23 }
0x1c62   :  { %13078 = vmatprep.subr.bf16.mxu0 %v19064_v5  ;;  %13097 = vmatpush3.bf16.msra.mxu1 %v13921_v51 }
0x1c63   :  { %13098 = vmatprep.subr.bf16.mxu1 %v19064_v5 }
0x1c65   :  { %13079 = vmatpush3.bf16.msra.mxu0 %v13914_v41 }
0x1c66   :  { %13099 = vmatpush3.bf16.msra.mxu1 %v13922_v10  ;;  %11132 = vmatprep.subr.bf16.mxu0 %v13925_v60  ;;  %v18734_v10 = vld [vmem:[%s18847_s12] ss:$0 sm:$0xff] }
0x1c67   :  { %11388 = vmatprep.subr.bf16.mxu1 %v18434_v36  ;;  %v13931_v36 = vld [vmem:[%s18845_s10 + $0x74] ss:$24 sps:$4 sm:$0xff]  }
0x1c68   :  { %13081 = vmatmul.mubr.bf16.vlgmr.msra.gmra.mrb[164].mxu0 %v10510_v6  ;;  %v13938_v6 = vld [vmem:[%s18845_s10 + $0x100] ss:$24 sps:$4 sm:$0xff]  }
0x1c69   :  { %11164 = vmatprep.mubr.bf16.mxu0 %v19005_v14  ;;  %11133 = vmatpush1.bf16.msra.mxu0 %v13923_v46 }
0x1c6a   :  { %11134 = vmatprep.subr.bf16.mxu0 %v13928_v8 }
0x1c6d   :  { %11135 = vmatpush1.bf16.msra.mxu0 %v13926_v40 }
0x1c6e   :  { %11136 = vmatprep.subr.bf16.mxu0 %v13931_v36 }
0x1c71   :  { %11137 = vmatpush1.bf16.msra.mxu0 %v13929_v15 }
0x1c72   :  { %11138 = vmatprep.subr.bf16.mxu0 %v13934_v42 }
0x1c75   :  { %11139 = vmatpush1.bf16.msra.mxu0 %v13932_v28 }
0x1c76   :  { %11140 = vmatprep.subr.bf16.mxu0 %v13937_v24 }
0x1c79   :  { %11141 = vmatpush1.bf16.msra.mxu0 %v13935_v37 }
0x1c7a   :  { %11142 = vmatprep.subr.bf16.mxu0 %v13940_v22 }
0x1c7d   :  { %11143 = vmatpush1.bf16.msra.mxu0 %v13938_v6 }
0x1c7e   :  { %11144 = vmatprep.subr.bf16.mxu0 %v13943_v1 }
0x1c81   :  { %11145 = vmatpush1.bf16.msra.mxu0 %v13941_v34 }
0x1c82   :  { %11146 = vmatprep.subr.bf16.mxu0 %v13946_v35 }
0x1c85   :  { %11147 = vmatpush1.bf16.msra.mxu0 %v13944_v58 }
0x1c86   :  { %13104 = vmatprep.subr.bf16.mxu0 %v19064_v5 }
0x1d1b   :  { %v10801_v31 = vpop.f32.mrb[160].mxu0  ;;  %v10842_v52 = vpop.f32.mrb[156].mxu1 }
0x1d1c   :  { %v10889_v33 = vadd.f32 %v10801_v31, %v18408_v30  ;;  %v11008_v21 = vadd.f32 %v18404_v0, %v10842_v52  ;;  %v10803_v63 = vpop.f32.mrb[161].mxu0  ;;  %v10844_v18 = vpop.f32.mrb[157].mxu1 }
0x1d1d   :  { %v11007_v39 = vadd.f32 %v18399_v59, %v10803_v63  ;;  %v11009_v23 = vadd.f32 %v18401_v53, %v10844_v18  ;;  %v10805_v41 = vpop.f32.mrb[162].mxu0  ;;  %v10846_v51 = vpop.f32.mrb[158].mxu1 }
0x1d1e   :  { %v10890_v60 = vadd.f32 %v18734_v10, %v10889_v33  ;;  %v12610_v46 = vmul.f32 -1.442695, %v11008_v21  ;;  %v10806_v8 = vpop.f32.mrb[163].mxu0  ;;  %v10847_v30 = vpop.f32.mrb[159].mxu1 }
0x1d1f   :  { %v12609_v40 = vmul.f32 -1.442695, %v11007_v39 }
0x1d20   :  { %v10891_v0 = vpack.c.bf16 %v10890_v60, %v10890_v60  ;;  %14433 = vpow2.f32 %v12610_v46 }
0x1d21   :  { %14435 = vpow2.f32 %v12609_v40 }
0x1d22   :  { %13101 = vmatmul.mubr.bf16.vlgmr.msra.gmra.mrb[160].mxu1 %v10891_v0  ;;  %14437 = vtanh.f32 %v11009_v23 }
0x1d23   :  { %11389 = vmatpush1.bf16.msra.mxu1 %v18439_v57  ;;  %11420 = vmatprep.mubr.bf16.mxu1 %v19005_v14 }
0x1d24   :  { %11390 = vmatprep.subr.bf16.mxu1 %v18452_v49 }
0x1d27   :  { %11391 = vmatpush1.bf16.msra.mxu1 %v18457_v19 }
0x1d28   :  { %11392 = vmatprep.subr.bf16.mxu1 %v18470_v26 }
0x1d2a   :  { %v14434_v59 = vpop.eup %14433 }
0x1d2b   :  { %v14436_v53 = vpop.eup %14435  ;;  %v11020_v36 = vadd.f32 1.0, %v14434_v59  ;;  %11393 = vmatpush1.bf16.msra.mxu1 %v18475_v45  ;;  %v13947_v59 = vld [vmem:[%s18848_s13] sm:$0xff]  }
0x1d2c   :  { %v11014_v15 = vadd.f32 1.0, %v14436_v53  ;;  %11394 = vmatprep.subr.bf16.mxu1 %v18487_v9  ;;  %v14438_v14 = vpop.eup %14437  ;;  %v13948_v53 = vld [vmem:[%s18848_s13 + $0x8] sm:$0xff]  }
0x1d2d   :  { %14439 = vrcp.f32 %v11020_v36  ;;  %v13949_v36 = vld [vmem:[%s18848_s13 + $0x10] sm:$0xff]  }
0x1d2e   :  { %14441 = vrcp.f32 %v11014_v15  ;;  %v13951_v15 = vld [vmem:[%s18848_s13 + $0x20] sm:$0xff]  }
0x1d2f   :  { %11395 = vmatpush1.bf16.msra.mxu1 %v18493_v29 }
0x1d30   :  { %11396 = vmatprep.subr.bf16.mxu1 %v18505_v27 }
0x1d33   :  { %11397 = vmatpush1.bf16.msra.mxu1 %v18514_v47 }
0x1d34   :  { %11398 = vmatprep.subr.bf16.mxu1 %v18523_v11 }
0x1d37   :  { %v14440_v57 = vpop.eup %14439  ;;  %11399 = vmatpush1.bf16.msra.mxu1 %v18532_v17 }
0x1d38   :  { %v14442_v49 = vpop.eup %14441  ;;  %v11030_v19 = vmul.f32 %v14440_v57, %v18365_v16  ;;  %11400 = vmatprep.subr.bf16.mxu1 %v18541_v56 }
0x1d39   :  { %v11031_v26 = vmul.f32 %v14442_v49, %v14438_v14  ;;  %v13952_v14 = vld [vmem:[%s18848_s13 + $0x28] sm:$0xff]  }
0x1d3b   :  { %v11032_v45 = vadd.f32 %v11031_v26, %v11030_v19  ;;  %v10883_v9 = vpop.f32.mrb[164].mxu0  ;;  %11401 = vmatpush1.bf16.msra.mxu1 %v18550_v13  ;;  %v18760_v13 = vld [vmem:[%s18849_s14] ss:$0 sm:$0xff] }
0x1d3c   :  { %v11010_v29 = vadd.f32 %v18406_v38, %v10883_v9  ;;  %v13082_v27 = vpop.f32.mrb[165].mxu0  ;;  %11402 = vmatprep.subr.bf16.mxu1 %v18559_v3 }
0x1d3d   :  { %v10886_v47 = vpop.f32.mrb[166].mxu0 }
0x1d3e   :  { %v12611_v11 = vmul.f32 -1.442695, %v11010_v29  ;;  %v13083_v42 = vpop.f32.mrb[167].mxu0 }
0x1d3f   :  { %11403 = vmatpush1.bf16.msra.mxu1 %v18568_v44 }
0x1d40   :  { %14443 = vpow2.f32 %v12611_v11 }
0x1d41   :  { %14445 = vtanh.f32 %v11032_v45 }
0x1d4a   :  { %v14444_v17 = vpop.eup %14443 }
0x1d4b   :  { %v11027_v16 = vadd.f32 1.0, %v14444_v17  ;;  %v14446_v56 = vpop.eup %14445 }
0x1d4d   :  { %14447 = vrcp.f32 %v11027_v16 }
0x1d57   :  { %v14448_v28 = vpop.eup %14447 }
0x1d58   :  { %v11034_v24 = vmul.f32 %v14448_v28, %v14446_v56 }
0x1d5a   :  { %v11035_v37 = vpack.c.bf16 %v11034_v24, %v11034_v24 }
0x1d5c   :  { %11165 = vmatmul.mubr.bf16.vlgmr.msra.gmra.mrb[168].mxu0 %v11035_v37 }
0x1d5d   :  { %13120 = vmatprep.mubr.msk.bf16.mxu0 %vm14578_vm0, %v19064_v5  ;;  %13105 = vmatpush3.bf16.msra.mxu0 %v13947_v59 }
0x1d5e   :  { %13106 = vmatprep.subr.bf16.mxu0 %v19064_v5 }
0x1d61   :  { %13107 = vmatpush3.bf16.msra.mxu0 %v13948_v53 }
0x1d62   :  { %13108 = vmatprep.subr.bf16.mxu0 %v19064_v5 }
0x1d65   :  { %13109 = vmatpush3.bf16.msra.mxu0 %v13949_v36 }
0x1d66   :  { %13110 = vmatprep.subr.bf16.mxu0 %v19064_v5 }
0x1df5   :  { %v10990_v38 = vpop.f32.mrb[160].mxu1 }
0x1df6   :  { %v10991_v3 = vadd.f32 %v18760_v13, %v10990_v38  ;;  %v13102_v44 = vpop.f32.mrb[161].mxu1 }
0x1df7   :  { %v10993_v22 = vpop.f32.mrb[162].mxu1 }
0x1df8   :  { %12608 = vst [vmem:[%s18851_s16 + $0x30] sm:$0xff] %v10991_v3  ;;  %v13103_v6 = vpop.f32.mrb[163].mxu1 }
0x1e2f   :  { %v11166_v1 = vpop.f32.mrb[168].mxu0 }
0x1e30   :  { %v18766_v34 = vpop.f32.mrb[169].mxu0  ;;  %v11182_v35 = vadd.f32 %v11166_v1, %v19342_v43  ;;  %v11181_v58 = vadd.f32 %v11166_v1, %v19343_v32  ;;  %v11184_v31 = vadd.f32 %v11166_v1, %v19344_v54  ;;  %v11183_v33 = vadd.f32 %v11166_v1, %v19345_v25 }
0x1e31   :  { %v11170_v52 = vpop.f32.mrb[170].mxu0  ;;  %v11186_v63 = vadd.f32 %v11166_v1, %v19346_v61  ;;  %v11185_v18 = vadd.f32 %v11166_v1, %v19347_v62  ;;  %v11188_v39 = vadd.f32 %v11166_v1, %v19348_v20  ;;  %v11187_v43 = vadd.f32 %v11166_v1, %v19349_v2 }
0x1e32   :  { %v11171_v21 = vpop.f32.mrb[171].mxu0  ;;  %14449 = vtanh.f32 %v11182_v35 }
0x1e33   :  { %14451 = vtanh.f32 %v11181_v58 }
0x1e34   :  { %14453 = vtanh.f32 %v11184_v31 }
0x1e35   :  { %14455 = vtanh.f32 %v11183_v33 }
0x1e36   :  { %14457 = vtanh.f32 %v11186_v63 }
0x1e37   :  { %14459 = vtanh.f32 %v11185_v18 }
0x1e38   :  { %14461 = vtanh.f32 %v11188_v39 }
0x1e39   :  { %14463 = vtanh.f32 %v11187_v43 }
0x1e3c   :  { %v14450_v32 = vpop.eup %14449 }
0x1e3d   :  { %v14452_v54 = vpop.eup %14451  ;;  %v11198_v25 = vmul.f32 %v18421_v55, %v14450_v32 }
0x1e3e   :  { %v14454_v23 = vpop.eup %14453  ;;  %v11197_v41 = vmul.f32 %v18421_v55, %v14452_v54 }
0x1e3f   :  { %v14456_v51 = vpop.eup %14455  ;;  %11207 = vadd.xlane.f32.xlu1 %v11198_v25  ;;  %v11200_v61 = vmul.f32 %v18421_v55, %v14454_v23 }
0x1e40   :  { %11205 = vadd.xlane.f32.xlu0 %v11197_v41  ;;  %v14458_v62 = vpop.eup %14457  ;;  %v11199_v20 = vmul.f32 %v18421_v55, %v14456_v51 }
0x1e41   :  { %v14460_v60 = vpop.eup %14459  ;;  %v11202_v2 = vmul.f32 %v18421_v55, %v14458_v62 }
0x1e42   :  { %v14462_v46 = vpop.eup %14461  ;;  %v11201_v8 = vmul.f32 %v18421_v55, %v14460_v60 }
0x1e43   :  { %11211 = vadd.xlane.f32.xlu1 %v11200_v61  ;;  %v14464_v30 = vpop.eup %14463  ;;  %v11204_v40 = vmul.f32 %v18421_v55, %v14462_v46 }
0x1e44   :  { %11209 = vadd.xlane.f32.xlu0 %v11199_v20  ;;  %v11203_v0 = vmul.f32 %v18421_v55, %v14464_v30  ;;  %v13950_v55 = vld [vmem:[%s18848_s13 + $0x18] sm:$0xff]  }
0x1e45   :  { %13111 = vmatpush3.bf16.msra.mxu0 %v13950_v55 }
0x1e46   :  { %13112 = vmatprep.subr.bf16.mxu0 %v19064_v5 }
0x1e47   :  { %11215 = vadd.xlane.f32.xlu1 %v11202_v2 }
0x1e48   :  { %11213 = vadd.xlane.f32.xlu0 %v11201_v8 }
0x1e49   :  { %13113 = vmatpush3.bf16.msra.mxu0 %v13951_v15  ;;  %v11270_v15 = vld [vmem:[%s18850_s15 + $0x10] sm:$0xff] }
0x1e4a   :  { %13114 = vmatprep.subr.bf16.mxu0 %v19064_v5 }
0x1e4b   :  { %11219 = vadd.xlane.f32.xlu1 %v11204_v40 }
0x1e4c   :  { %11217 = vadd.xlane.f32.xlu0 %v11203_v0 }
0x1e4d   :  { %13115 = vmatpush3.bf16.msra.mxu0 %v13952_v14 }
0x1e4e   :  { %13116 = vmatprep.subr.bf16.mxu0 %v19064_v5 }
0x1ecc   :  { %v11208_v57 = vpop.xlane.xlu1 %11207 }
0x1ecd   :  { %v11206_v49 = vpop.xlane.xlu0 %11205 }
0x1ed0   :  { %v11212_v19 = vpop.xlane.xlu1 %11211 }
0x1ed1   :  { %v11210_v26 = vpop.xlane.xlu0 %11209 }
0x1ed4   :  { %v11216_v45 = vpop.xlane.xlu1 %11215 }
0x1ed5   :  { %v11214_v9 = vpop.xlane.xlu0 %11213  ;;  %v11222_v29 = vmax.f32 %v11208_v57, %v11216_v45 }
0x1ed6   :  { %v11221_v27 = vmax.f32 %v11206_v49, %v11214_v9 }
0x1ed8   :  { %v11220_v47 = vpop.xlane.xlu1 %11219  ;;  %v11225_v16 = vmax.f32 %v11221_v27, %v11222_v29 }
0x1ed9   :  { %v11224_v11 = vmax.f32 %v11212_v19, %v11220_v47  ;;  %v11218_v42 = vpop.xlane.xlu0 %11217 }
0x1eda   :  { %v11223_v17 = vmax.f32 %v11210_v26, %v11218_v42 }
0x1edc   :  { %v11226_v56 = vmax.f32 %v11223_v17, %v11224_v11 }
0x1ede   :  { %v11227_v28 = vmax.f32 %v11225_v16, %v11226_v56  ;;  %v11275_v16 = vld [vmem:[%s18850_s15 + $0x38] sm:$0xff] }
0x1ee0   :  { %v11228_v24 = vsub.f32 %v11206_v49, %v11227_v28  ;;  %v11229_v37 = vsub.f32 %v11208_v57, %v11227_v28  ;;  %v11230_v38 = vsub.f32 %v11210_v26, %v11227_v28  ;;  %v11231_v3 = vsub.f32 %v11212_v19, %v11227_v28  ;;  %v11271_v19 = vld [vmem:[%s18850_s15 + $0x18] sm:$0xff] }
0x1ee1   :  { %v11232_v6 = vsub.f32 %v11214_v9, %v11227_v28  ;;  %v11233_v35 = vsub.f32 %v11216_v45, %v11227_v28  ;;  %v11234_v31 = vsub.f32 %v11218_v42, %v11227_v28  ;;  %v11235_v33 = vsub.f32 %v11220_v47, %v11227_v28 }
0x1ee2   :  { %v11236_v44 = vmul.f32 1.442695, %v11228_v24  ;;  %v11238_v22 = vmul.f32 1.442695, %v11229_v37  ;;  %v11240_v1 = vmul.f32 1.442695, %v11230_v38 }
0x1ee3   :  { %v11242_v58 = vmul.f32 1.442695, %v11231_v3  ;;  %v11244_v52 = vmul.f32 1.442695, %v11232_v6  ;;  %v11246_v21 = vmul.f32 1.442695, %v11233_v35 }
0x1ee4   :  { %14465 = vpow2.f32 %v11236_v44  ;;  %v11248_v63 = vmul.f32 1.442695, %v11234_v31  ;;  %v11250_v18 = vmul.f32 1.442695, %v11235_v33 }
0x1ee5   :  { %14467 = vpow2.f32 %v11238_v22 }
0x1ee6   :  { %14469 = vpow2.f32 %v11240_v1 }
0x1ee7   :  { %14471 = vpow2.f32 %v11242_v58 }
0x1ee8   :  { %14473 = vpow2.f32 %v11244_v52 }
0x1ee9   :  { %14475 = vpow2.f32 %v11246_v21 }
0x1eea   :  { %14477 = vpow2.f32 %v11248_v63 }
0x1eeb   :  { %14479 = vpow2.f32 %v11250_v18 }
0x1eee   :  { %v14466_v39 = vpop.eup %14465 }
0x1eef   :  { %v14468_v43 = vpop.eup %14467 }
0x1ef0   :  { %v11252_v32 = vadd.f32 %v14468_v43, %v14466_v39  ;;  %v14470_v54 = vpop.eup %14469 }
0x1ef1   :  { %v14472_v23 = vpop.eup %14471 }
0x1ef2   :  { %v11253_v25 = vadd.f32 %v14470_v54, %v11252_v32  ;;  %v14474_v51 = vpop.eup %14473 }
0x1ef3   :  { %v14476_v62 = vpop.eup %14475 }
0x1ef4   :  { %v11254_v41 = vadd.f32 %v14472_v23, %v11253_v25  ;;  %v14478_v60 = vpop.eup %14477 }
0x1ef5   :  { %v14480_v46 = vpop.eup %14479 }
0x1ef6   :  { %v11255_v61 = vadd.f32 %v14474_v51, %v11254_v41 }
0x1ef8   :  { %v11256_v20 = vadd.f32 %v14476_v62, %v11255_v61 }
0x1efa   :  { %v11257_v2 = vadd.f32 %v14478_v60, %v11256_v20 }
0x1efc   :  { %v11258_v8 = vadd.f32 %v14480_v46, %v11257_v2 }
0x1efe   :  { %14481 = vrcp.f32 %v11258_v8 }
0x1f08   :  { %v14482_v30 = vpop.eup %14481 }
0x1f09   :  { %v11260_v40 = vmul.f32 %v14482_v30, %v14466_v39  ;;  %v11261_v0 = vmul.f32 %v14482_v30, %v14468_v43  ;;  %v11262_v59 = vmul.f32 %v14482_v30, %v14470_v54  ;;  %v11263_v53 = vmul.f32 %v14482_v30, %v14472_v23 }
0x1f0a   :  { %v11264_v14 = vmul.f32 %v14482_v30, %v14474_v51  ;;  %v11265_v26 = vmul.f32 %v14482_v30, %v14476_v62  ;;  %v11266_v29 = vmul.f32 %v14482_v30, %v14478_v60  ;;  %v11267_v47 = vmul.f32 %v14482_v30, %v14480_v46 }
0x1f0b   :  { %v11276_v36 = vmul.f32 %v11260_v40, %v18580_v12  ;;  %v11277_v55 = vmul.f32 %v11261_v0, %v18585_v4  ;;  %v11278_v57 = vmul.f32 %v11270_v15, %v11262_v59  ;;  %v11279_v45 = vmul.f32 %v11271_v19, %v11263_v53 }
0x1f0c   :  { %v11280_v27 = vmul.f32 %v11264_v14, %v18594_v48  ;;  %v11281_v4 = vmul.f32 %v11265_v26, %v18600_v7  ;;  %v11282_v42 = vmul.f32 %v11266_v29, %v18606_v50  ;;  %v11283_v56 = vmul.f32 %v11275_v16, %v11267_v47  ;;  %v13953_v48 = vld [vmem:[%s18848_s13 + $0x30] sm:$0xff]   ;;  %v13954_v7 = vld [vmem:[%s18848_s13 + $0x38] sm:$0xff]  }
0x1f0d   :  { %v11284_v49 = vadd.f32 %v11277_v55, %v11276_v36  ;;  %13117 = vmatpush3.bf16.msra.mxu0 %v13953_v48 }
0x1f0e   :  { %13118 = vmatprep.subr.bf16.mxu0 %v19064_v5 }
0x1f0f   :  { %v11285_v9 = vadd.f32 %v11284_v49, %v11278_v57 }
0x1f11   :  { %v11286_v12 = vadd.f32 %v11285_v9, %v11279_v45  ;;  %13119 = vmatpush3.bf16.msra.mxu0 %v13954_v7 }
0x1f13   :  { %v11287_v11 = vadd.f32 %v11286_v12, %v11280_v27 }
0x1f15   :  { %v11288_v17 = vadd.f32 %v11287_v11, %v11281_v4 }
0x1f17   :  { %v11289_v28 = vadd.f32 %v11288_v17, %v11282_v42 }
0x1f19   :  { %v11290_v24 = vadd.f32 %v11289_v28, %v11283_v56 }
0x1f1b   :  { %v11291_v37 = vpack.c.bf16 %v11290_v24, %v11290_v24 }
0x1f1d   :  { %11421 = vmatmul.mubr.bf16.vlgmr.msra.gmra.mrb[164].mxu1 %v11291_v37 }
0x1ff0   :  { %v11422_v50 = vpop.f32.mrb[164].mxu1 }
0x1ff1   :  { %v11428_v38 = vadd.f32 %v11422_v50, %v18766_v34  ;;  %v11424_v3 = vpop.f32.mrb[165].mxu1 }
0x1ff2   :  { %v11425_v44 = vpop.f32.mrb[166].mxu1 }
0x1ff3   :  { %v11429_v22 = vadd.f32 %v18734_v10, %v11428_v38  ;;  %v11426_v6 = vpop.f32.mrb[167].mxu1 }
0x1ff5   :  { %v11430_v1 = vpack.c.bf16 %v11429_v22, %v11429_v22 }
0x1ff7   :  { %13121 = vmatmul.mubr.bf16.vlgmr.msra.gmra.mrb[172].mxu0 %v11430_v1 }
0x20ca   :  { %v11529_v35 = vpop.f32.mrb[172].mxu0 }
0x20cb   :  { %v11530_v58 = vadd.f32 %v18760_v13, %v11529_v35  ;;  %v13122_v31 = vpop.f32.mrb[173].mxu0 }
0x20cc   :  { %v11532_v52 = vpop.f32.mrb[174].mxu0 }
0x20cd   :  { %12652 = vst [vmem:[%s18851_s16 + $0x38] sm:$0xff] %v11530_v58  ;;  %v13123_v5 = vpop.f32.mrb[175].mxu0 }
0x20ce   :  { %11545 = vsyncpa [#allocation6], 1 }
0x20cf   :  { %11546 = vsyncpa [#allocation8], 1 }

</bundles_post_ra>
